<compile_context>
chip_gen: v7x
topology: tpu7x:2x2x1
jax: 0.10.0
libtpu: 0.0.40
codegen_flags: <defaults>
</compile_context>

<pallas_src>
import jax
import jax.numpy as jnp
from jax import lax
from jax.experimental import pallas as pl
from jax.experimental.pallas import tpu as pltpu

MATMUL_DTYPE = jnp.bfloat16   # MXU operand dtype for the big matmuls (fp32 accumulate)
CONV_K = 15                   # depthwise kernel size of input_conv
GATE_L_CHUNK = 512            # L rows per gate-MLP chunk inside the conv/gate kernel


def _vmem_limit_bytes():
    """Generation-aware VMEM budget (v7x has 64 MiB/TC, v5e/v6e have 128 MiB)."""
    try:
        kind = jax.devices()[0].device_kind.lower()
    except Exception:
        kind = ""
    if "v7" in kind or "7x" in kind:
        return 48 * 1024 * 1024
    if any(s in kind for s in ("v4", "v5", "v6")):
        return 96 * 1024 * 1024
    return 32 * 1024 * 1024


def _compiler_params(vmem_limit):
    return pltpu.CompilerParams(
        dimension_semantics=("parallel",),      # batch grid axis
        vmem_limit_bytes=vmem_limit,
    )


def _pick_block_b(B, per_row_bytes, fixed_bytes, vmem_limit):
    """Largest divisor of B whose resident blocks + scratch fit the budget."""
    budget = max(vmem_limit - fixed_bytes, per_row_bytes)
    best = 1
    for cand in range(1, B + 1):
        if B % cand == 0 and cand * per_row_bytes <= budget:
            best = cand
    return best


def _full_spec(arr):
    """Whole-array block (weights shared across all grid steps)."""
    # TODO(synk): pipeline_mode=pl.Buffered(1) would single-buffer these constant
    # blocks (frees VMEM on v7x); left at the default double buffer for safety.
    nd = arr.ndim
    return pl.BlockSpec(arr.shape, lambda *_: (0,) * nd)


def _gelu(x):
    # TODO(synk): PyTorch nn.GELU() defaults to the exact erf form; erf has no
    # guaranteed Mosaic lowering, so the tanh approximation (EUP tanh) is used.
    c = jnp.float32(0.7978845608028654)  # sqrt(2/pi)
    return 0.5 * x * (1.0 + jnp.tanh(c * (x + 0.044715 * x * x * x)))


# ---------------------------------------------------------------------------
# Fused 2-layer bidirectional, length-masked GRU (nn.GRU via pack_padded_sequence
# on right-padded sequences). Padded steps carry the hidden state and write zeros
# to the output (pad_packed semantics). Layer-1 output never leaves VMEM.
# ---------------------------------------------------------------------------
def _bigru2_kernel(x_ref, len_ref,
                   wi1_ref, bi1_ref, whf1_ref, bhf1_ref, whb1_ref, bhb1_ref,
                   wi2_ref, bi2_ref, whf2_ref, bhf2_ref, whb2_ref, bhb2_ref,
                   out_ref, h_ref,
                   gi_scr, mid_scr, mask_scr):
    bb, L, d_in = x_ref.shape
    H = whf1_ref.shape[0]
    unroll = True if L <= 32 else 8   # cap unroll at production sequence lengths

    # Validity mask (bb, L, 1) precomputed ONCE (keeps the compare off the
    # serial, latency-bound recurrence path).
    lens = len_ref[...].reshape(bb, 1, 1)
    t_iota = lax.broadcasted_iota(jnp.int32, (bb, L, 1), 1).astype(jnp.float32)
    mask_scr[...] = (t_iota < lens).astype(jnp.float32)

    def cell(g_row, hh, bh, h_prev):
        r = jax.nn.sigmoid(g_row[:, 0:H] + hh[:, 0:H] + bh[:, 0:H])
        z = jax.nn.sigmoid(g_row[:, H:2 * H] + hh[:, H:2 * H] + bh[:, H:2 * H])
        n = jnp.tanh(g_row[:, 2 * H:3 * H] + r * (hh[:, 2 * H:3 * H] + bh[:, 2 * H:3 * H]))
        return (1.0 - z) * n + z * h_prev

    def run_layer(x2d, wi_ref, bi_ref, whf_ref, bhf_ref, whb_ref, bhb_ref, write_out):
        # Hoisted input projection: ONE MXU matmul for all timesteps, gates and
        # directions, stored to a single (bb, L, 6H) VMEM scratch.
        gi = jnp.dot(x2d.astype(MATMUL_DTYPE), wi_ref[...],
                     preferred_element_type=jnp.float32) + bi_ref[...]
        gi_scr[...] = gi.reshape(bb, L, 6 * H)

        whf = whf_ref[...]    # (H, 3H) = [r | z | n]
        whb = whb_ref[...]
        bhf = bhf_ref[...]    # (1, 3H)
        bhb = bhb_ref[...]

        def step(i, carry):
            h_f, h_b = carry
            tf = i
            tb = L - 1 - i
            # Forward/backward chains interleaved: two independent dependence
            # chains per iteration hide each other's MXU-drain / EUP latency.
            g_f = gi_scr[:, pl.ds(tf, 1), 0:3 * H][:, 0, :]
            g_b = gi_scr[:, pl.ds(tb, 1), 3 * H:6 * H][:, 0, :]
            m_f = mask_scr[:, pl.ds(tf, 1), :][:, 0, :]          # (bb, 1)
            m_b = mask_scr[:, pl.ds(tb, 1), :][:, 0, :]
            # recurrent dots kept fp32 (tiny, latency-bound), ONE matmul per dir
            hh_f = jnp.dot(h_f, whf, preferred_element_type=jnp.float32)
            hh_b = jnp.dot(h_b, whb, preferred_element_type=jnp.float32)
            hf_new = cell(g_f, hh_f, bhf, h_f)
            hb_new = cell(g_b, hh_b, bhb, h_b)
            write_out(tf, hf_new * m_f, tb, hb_new * m_b)        # pads -> 0
            h_f = m_f * hf_new + (1.0 - m_f) * h_f               # carry h through padding
            h_b = m_b * hb_new + (1.0 - m_b) * h_b
            return (h_f, h_b)

        h0 = jnp.zeros((bb, H), jnp.float32)
        return lax.fori_loop(0, L, step, (h0, h0), unroll=unroll)

    # ---- layer 1: output stays in VMEM (mid_scr), never touches HBM ----
    def write_mid(tf, of, tb, ob):
        mid_scr[:, pl.ds(tf, 1), 0:H] = of[:, None, :]
        mid_scr[:, pl.ds(tb, 1), H:2 * H] = ob[:, None, :]

    run_layer(x_ref[...].reshape(bb * L, d_in),
              wi1_ref, bi1_ref, whf1_ref, bhf1_ref, whb1_ref, bhb1_ref, write_mid)

    # ---- layer 2 (inter-layer dropout = identity in eval) ----
    def write_out(tf, of, tb, ob):
        out_ref[:, pl.ds(tf, 1), 0:H] = of[:, None, :]
        out_ref[:, pl.ds(tb, 1), H:2 * H] = ob[:, None, :]

    h_f, h_b = run_layer(mid_scr[...].reshape(bb * L, 2 * H),
                         wi2_ref, bi2_ref, whf2_ref, bhf2_ref, whb2_ref, bhb2_ref,
                         write_out)
    h_ref[:, :, 0:H] = h_f[:, None, :]
    h_ref[:, :, H:2 * H] = h_b[:, None, :]
    # TODO(synk): on v7x the two directions (or batch half-blocks) could be split
    # across the 2 TensorCores via core_map; kept on one core for portability.


def bigru2(x, lens, layers, *, block_b=None):
    assert len(layers) == 2, "InitialGate uses num_layers=2"
    B, L, d_in = x.shape
    H = layers[0]["wh_f"].shape[0]
    D = 2 * H
    weights = []
    for lp in layers:
        weights += [lp["wi"], lp["bi"], lp["wh_f"], lp["bh_f"], lp["wh_b"], lp["bh_b"]]

    vmem_limit = _vmem_limit_bytes()
    if block_b is None:
        # per batch-row: x in (x2), out (x2), h (x2), gi scratch, mid scratch, mask
        per_row = 4 * (2 * L * d_in + 2 * L * D + 2 * D + 3 * L * D + L * D + L)
        fixed = 2 * sum(int(w.size) * w.dtype.itemsize for w in weights) + (4 << 20)
        block_b = _pick_block_b(B, per_row, fixed, vmem_limit)

    grid = (pl.cdiv(B, block_b),)
    out, h = pl.pallas_call(
        _bigru2_kernel,
        grid=grid,
        in_specs=[
            pl.BlockSpec((block_b, L, d_in), lambda b: (b, 0, 0)),
            pl.BlockSpec((block_b, 1, 1), lambda b: (b, 0, 0)),
        ] + [_full_spec(w) for w in weights],
        out_specs=(
            pl.BlockSpec((block_b, L, D), lambda b: (b, 0, 0)),
            pl.BlockSpec((block_b, 1, D), lambda b: (b, 0, 0)),
        ),
        out_shape=(
            jax.ShapeDtypeStruct((B, L, D), jnp.float32),
            jax.ShapeDtypeStruct((B, 1, D), jnp.float32),
        ),
        scratch_shapes=[
            pltpu.VMEM((block_b, L, 3 * D), jnp.float32),   # hoisted gates (6H = 3D)
            pltpu.VMEM((block_b, L, D), jnp.float32),       # layer-1 output (stays in VMEM)
            pltpu.VMEM((block_b, L, 1), jnp.float32),       # validity mask
        ],
        compiler_params=_compiler_params(vmem_limit),
    )(x, lens, *weights)
    return out, h


# ---------------------------------------------------------------------------
# Fused input_conv (depthwise k=15 pad=7 groups=D + pointwise k=1) + gate MLP.
# concat([x, local, global]) is folded into split matmuls; padding lives in VMEM
# scratch (only the halo rows are zeroed); the gate MLP is chunked over L; final
# Linear(D->1) is a VPU multiply + lane reduction with a lane-dense (bb,1,L) output.
# ---------------------------------------------------------------------------
def _conv_gate_kernel(x_ref, g_ref,
                      wdw_ref, bdw_ref, wpwT_ref, bpw_ref,
                      w1x_ref, w1l_ref, w1g_ref, b1_ref,
                      w2_ref, b2_ref, w3_ref, b3_ref,
                      o_ref, xp_ref):
    bb, L, D = x_ref.shape
    K = wdw_ref.shape[0]
    halo = (K - 1) // 2

    # depthwise pad buffer in VMEM: zero ONLY the halo rows (interior overwritten)
    xp_ref[:, 0:halo, :] = jnp.zeros((bb, halo, D), jnp.float32)
    xp_ref[:, halo + L:halo + L + halo, :] = jnp.zeros((bb, halo, D), jnp.float32)
    xp_ref[:, halo:halo + L, :] = x_ref[...]

    wdw = wdw_ref[...]
    bdw = bdw_ref[...]

    # global part of gate layer 1: ONE (bb, D) x (D, 2D) matmul, broadcast over L
    gpart = jnp.dot(g_ref[...].reshape(bb, D).astype(MATMUL_DTYPE), w1g_ref[...],
                    preferred_element_type=jnp.float32)                     # (bb, 2D)

    # chunk over L so the (bb*lc, 2D) fp32 intermediate stays bounded in VMEM/vregs
    lc_full = min(L, GATE_L_CHUNK)
    for l0 in range(0, L, lc_full):
        lc = min(lc_full, L - l0)

        # depthwise Conv1d (cross-correlation), K static taps
        acc = jnp.zeros((bb, lc, D), jnp.float32)
        for k in range(K):
            # TODO(synk): per-tap slices are sublane-misaligned; a pltpu.roll-based
            # shift would move the shift onto the XLU — kept static slices here.
            acc = acc + xp_ref[:, l0 + k:l0 + k + lc, :] * wdw[k, :]
        acc = acc + bdw

        # pointwise Conv1d (k=1): one MXU matmul over the chunk rows
        local = jnp.dot(acc.reshape(bb * lc, D).astype(MATMUL_DTYPE), wpwT_ref[...],
                        preferred_element_type=jnp.float32) + bpw_ref[...]

        # gate layer 1: cat([x, local_feat, global_feat]) @ W1 as split matmuls
        x2d = x_ref[:, l0:l0 + lc, :].reshape(bb * lc, D)
        h1 = (jnp.dot(x2d.astype(MATMUL_DTYPE), w1x_ref[...],
                      preferred_element_type=jnp.float32)
              + jnp.dot(local.astype(MATMUL_DTYPE), w1l_ref[...],
                        preferred_element_type=jnp.float32))
        h1 = _gelu(h1.reshape(bb, lc, 2 * D) + gpart[:, None, :] + b1_ref[...])
        # dropout: identity in eval mode

        # gate layer 2
        h2 = _gelu(jnp.dot(h1.reshape(bb * lc, 2 * D).astype(MATMUL_DTYPE), w2_ref[...],
                           preferred_element_type=jnp.float32) + b2_ref[...])   # (bb*lc, D)

        # final Linear(D -> 1): VPU multiply + lane (XLU) reduce, lane-dense output
        conf = jnp.sum(h2.reshape(bb, lc, D) * w3_ref[...], axis=-1) + b3_ref[...]  # (bb, lc)
        o_ref[:, :, l0:l0 + lc] = conf[:, None, :]


def conv_gate(x, all_emb, cp, gp, *, block_b=None):
    B, L, D = x.shape
    K = cp["wdw"].shape[0]
    weights = [cp["wdw"], cp["bdw"], cp["wpwT"], cp["bpw"],
               gp["w1x"], gp["w1l"], gp["w1g"], gp["b1"],
               gp["w2T"], gp["b2"], gp["w3"], gp["b3"]]

    vmem_limit = _vmem_limit_bytes()
    if block_b is None:
        per_row = 4 * (2 * L * D + 2 * D + 2 * L + (L + K - 1) * D
                       + min(L, GATE_L_CHUNK) * 4 * D)   # chunk intermediates margin
        fixed = 2 * sum(int(w.size) * w.dtype.itemsize for w in weights) + (4 << 20)
        block_b = _pick_block_b(B, per_row, fixed, vmem_limit)

    grid = (pl.cdiv(B, block_b),)
    return pl.pallas_call(
        _conv_gate_kernel,
        grid=grid,
        in_specs=[
            pl.BlockSpec((block_b, L, D), lambda b: (b, 0, 0)),
            pl.BlockSpec((block_b, 1, D), lambda b: (b, 0, 0)),
        ] + [_full_spec(w) for w in weights],
        out_specs=pl.BlockSpec((block_b, 1, L), lambda b: (b, 0, 0)),
        out_shape=jax.ShapeDtypeStruct((B, 1, L), jnp.float32),
        scratch_shapes=[pltpu.VMEM((block_b, L + K - 1, D), jnp.float32)],
        compiler_params=_compiler_params(vmem_limit),
    )(x, all_emb, *weights)


# ---------------------------------------------------------------------------
# Parameters (deterministic, PyTorch-default-style uniform ranges).
# Matmul weights stored pre-transposed (x @ W_T); feed-forward weights in bf16.
# Recurrent weights concatenated as (H, 3H) = [r | z | n] per direction (fp32).
# ---------------------------------------------------------------------------
def init_params(key, hidden):
    H = hidden // 2
    D = hidden
    kit = iter(jax.random.split(key, 64))

    def u(shape, bound, dtype=jnp.float32):
        return jax.random.uniform(next(kit), shape, jnp.float32, -bound, bound).astype(dtype)

    gru_layers = []
    d_in = hidden
    bnd = 1.0 / (H ** 0.5)
    for _ in range(2):                                  # num_layers = 2
        wi_parts = [u((d_in, H), bnd) for _ in range(6)]   # [r_f, z_f, n_f, r_b, z_b, n_b]
        bi_parts = [u((1, H), bnd) for _ in range(6)]
        lp = {
            "wi": jnp.concatenate(wi_parts, axis=1).astype(MATMUL_DTYPE),        # (Din, 6H)
            "bi": jnp.concatenate(bi_parts, axis=1),                             # (1, 6H) fp32
            "wh_f": jnp.concatenate([u((H, H), bnd) for _ in range(3)], axis=1), # (H, 3H)
            "bh_f": u((1, 3 * H), bnd),
            "wh_b": jnp.concatenate([u((H, H), bnd) for _ in range(3)], axis=1),
            "bh_b": u((1, 3 * H), bnd),
        }
        gru_layers.append(lp)
        d_in = 2 * H

    conv = {
        "wdw": u((CONV_K, D), 1.0 / (CONV_K ** 0.5)),            # depthwise (K, C), fp32 (VPU)
        "bdw": u((1, D), 1.0 / (CONV_K ** 0.5)),
        "wpwT": u((D, D), 1.0 / (D ** 0.5), MATMUL_DTYPE),       # pointwise, transposed
        "bpw": u((1, D), 1.0 / (D ** 0.5)),
    }
    b1 = 1.0 / ((3 * D) ** 0.5)
    gate = {
        "w1x": u((D, 2 * D), b1, MATMUL_DTYPE),                  # rows of W1 acting on x
        "w1l": u((D, 2 * D), b1, MATMUL_DTYPE),                  # rows acting on local_feat
        "w1g": u((D, 2 * D), b1, MATMUL_DTYPE),                  # rows acting on global_feat
        "b1": u((1, 2 * D), b1),
        "w2T": u((2 * D, D), 1.0 / ((2 * D) ** 0.5), MATMUL_DTYPE),
        "b2": u((1, D), 1.0 / ((2 * D) ** 0.5)),
        "w3": u((1, D), 1.0 / (D ** 0.5)),                       # final row, fp32 (VPU reduce)
        "b3": u((1, 1), 1.0 / (D ** 0.5)),
    }
    return {"gru_layers": gru_layers, "conv": conv, "gate": gate}


# ---------------------------------------------------------------------------
# InitialGate.forward
# ---------------------------------------------------------------------------
def initial_gate_forward(params, sentence, mask, *, block_b=None):
    B, L, D = sentence.shape
    x = sentence.astype(jnp.float32)
    # DynamicGRU consumes mask.sum(-1) (right-padded sequences): per-row lengths
    lens = mask.astype(jnp.float32).sum(-1).reshape(B, 1, 1)

    # input_rnn: fused 2-layer bidirectional GRU (one pallas_call)
    sent_emb, all_emb = bigru2(x, lens, params["gru_layers"], block_b=block_b)
    # sent_emb: (B, L, D), padded steps zero; all_emb: (B, 1, D) = [h_fwd ; h_bwd]

    # fused input_conv + gate MLP (conv / concat / broadcast / final linear in-kernel).
    # Note: matches PyTorch — Conv1d and the MLP run on the raw (unmasked) sentence.
    conf = conv_gate(x, all_emb, params["conv"], params["gate"], block_b=block_b)  # (B, 1, L)
    return sent_emb, conf[:, 0, :]


if __name__ == "__main__":
    B, L, D = 2, 8, 32                                   # hidden_size = 32
    key = jax.random.PRNGKey(0)
    k_param, k_x = jax.random.split(key)
    params = init_params(k_param, D)

    sentence = jax.random.normal(k_x, (B, L, D), jnp.float32)
    lengths = jnp.array([8, 5], jnp.int32)
    mask = (jnp.arange(L)[None, :] < lengths[:, None]).astype(jnp.int32)

    fwd = jax.jit(lambda s, m: initial_gate_forward(params, s, m))
    sent_emb, conf_logit = fwd(sentence, mask)
    jax.block_until_ready((sent_emb, conf_logit))

    assert sent_emb.shape == (B, L, D)
    assert conf_logit.shape == (B, L)
    assert jnp.all(jnp.isfinite(sent_emb)) and jnp.all(jnp.isfinite(conf_logit))
    print("KERNEL_OK")
</pallas_src>

<mosaic_0001>
module attributes {stable_mosaic.version = 11 : i64} {
  func.func @_conv_gate_kernel(%arg0: i32, %arg1: memref<2x8x32xf32, #tpu.memory_space<vmem>>, %arg2: memref<2x1x32xf32, #tpu.memory_space<vmem>>, %arg3: memref<15x32xf32, #tpu.memory_space<vmem>>, %arg4: memref<1x32xf32, #tpu.memory_space<vmem>>, %arg5: memref<32x32xbf16, #tpu.memory_space<vmem>>, %arg6: memref<1x32xf32, #tpu.memory_space<vmem>>, %arg7: memref<32x64xbf16, #tpu.memory_space<vmem>>, %arg8: memref<32x64xbf16, #tpu.memory_space<vmem>>, %arg9: memref<32x64xbf16, #tpu.memory_space<vmem>>, %arg10: memref<1x64xf32, #tpu.memory_space<vmem>>, %arg11: memref<64x32xbf16, #tpu.memory_space<vmem>>, %arg12: memref<1x32xf32, #tpu.memory_space<vmem>>, %arg13: memref<1x32xf32, #tpu.memory_space<vmem>>, %arg14: memref<1x1xf32, #tpu.memory_space<vmem>>, %arg15: memref<2x1x8xf32, #tpu.memory_space<vmem>>, %arg16: memref<2x22x32xf32, #tpu.memory_space<vmem>>) attributes {dimension_semantics = [#tpu.dimension_semantics<parallel>], iteration_bounds = array<i64: 1>, scalar_prefetch = 0 : i64, scratch_operands = 1 : i64, tpu.core_type = #tpu.core_type<tc>, window_params = [{transform_indices = @transform_0, window_bounds = array<i64: 2, 8, 32>}, {transform_indices = @transform_1, window_bounds = array<i64: 2, 1, 32>}, {pipeline_mode = #tpu.pipeline_mode<synchronous>, transform_indices = @transform_2, window_bounds = array<i64: 15, 32>}, {pipeline_mode = #tpu.pipeline_mode<synchronous>, transform_indices = @transform_3, window_bounds = array<i64: 1, 32>}, {pipeline_mode = #tpu.pipeline_mode<synchronous>, transform_indices = @transform_4, window_bounds = array<i64: 32, 32>}, {pipeline_mode = #tpu.pipeline_mode<synchronous>, transform_indices = @transform_5, window_bounds = array<i64: 1, 32>}, {pipeline_mode = #tpu.pipeline_mode<synchronous>, transform_indices = @transform_6, window_bounds = array<i64: 32, 64>}, {pipeline_mode = #tpu.pipeline_mode<synchronous>, transform_indices = @transform_7, window_bounds = array<i64: 32, 64>}, {pipeline_mode = #tpu.pipeline_mode<synchronous>, transform_indices = @transform_8, window_bounds = array<i64: 32, 64>}, {pipeline_mode = #tpu.pipeline_mode<synchronous>, transform_indices = @transform_9, window_bounds = array<i64: 1, 64>}, {pipeline_mode = #tpu.pipeline_mode<synchronous>, transform_indices = @transform_10, window_bounds = array<i64: 64, 32>}, {pipeline_mode = #tpu.pipeline_mode<synchronous>, transform_indices = @transform_11, window_bounds = array<i64: 1, 32>}, {pipeline_mode = #tpu.pipeline_mode<synchronous>, transform_indices = @transform_12, window_bounds = array<i64: 1, 32>}, {pipeline_mode = #tpu.pipeline_mode<synchronous>, transform_indices = @transform_13, window_bounds = array<i64: 1, 1>}, {transform_indices = @transform_14, window_bounds = array<i64: 2, 1, 8>}]} {
    %cst = arith.constant 0.000000e+00 : f32
    %0 = vector.broadcast %cst : f32 to vector<2x7x32xf32>
    %c0 = arith.constant 0 : index
    %c0_0 = arith.constant 0 : index
    %c0_1 = arith.constant 0 : index
    %1 = vector.load %arg16[%c0, %c0_0, %c0_1] : memref<2x22x32xf32, #tpu.memory_space<vmem>>, vector<2x7x32xf32>
    tpu.vector_store %arg16[%c0, %c0_0, %c0_1], %0 {strides = array<i32>} : memref<2x22x32xf32, #tpu.memory_space<vmem>>, vector<2x7x32xf32>,
    %cst_2 = arith.constant 0.000000e+00 : f32
    %2 = vector.broadcast %cst_2 : f32 to vector<2x7x32xf32>
    %c0_3 = arith.constant 0 : index
    %c15 = arith.constant 15 : index
    %c0_4 = arith.constant 0 : index
    %3 = vector.load %arg16[%c0_3, %c15, %c0_4] : memref<2x22x32xf32, #tpu.memory_space<vmem>>, vector<2x7x32xf32>
    tpu.vector_store %arg16[%c0_3, %c15, %c0_4], %2 {strides = array<i32>} : memref<2x22x32xf32, #tpu.memory_space<vmem>>, vector<2x7x32xf32>,
    %c0_5 = arith.constant 0 : index
    %c0_6 = arith.constant 0 : index
    %c0_7 = arith.constant 0 : index
    %4 = vector.load %arg1[%c0_5, %c0_6, %c0_7] : memref<2x8x32xf32, #tpu.memory_space<vmem>>, vector<2x8x32xf32>
    %c0_8 = arith.constant 0 : index
    %c7 = arith.constant 7 : index
    %c0_9 = arith.constant 0 : index
    %5 = vector.load %arg16[%c0_8, %c7, %c0_9] : memref<2x22x32xf32, #tpu.memory_space<vmem>>, vector<2x8x32xf32>
    tpu.vector_store %arg16[%c0_8, %c7, %c0_9], %4 {strides = array<i32>} : memref<2x22x32xf32, #tpu.memory_space<vmem>>, vector<2x8x32xf32>,
    %c0_10 = arith.constant 0 : index
    %c0_11 = arith.constant 0 : index
    %6 = vector.load %arg3[%c0_10, %c0_11] : memref<15x32xf32, #tpu.memory_space<vmem>>, vector<15x32xf32>
    %c0_12 = arith.constant 0 : index
    %c0_13 = arith.constant 0 : index
    %7 = vector.load %arg4[%c0_12, %c0_13] : memref<1x32xf32, #tpu.memory_space<vmem>>, vector<1x32xf32>
    %c0_14 = arith.constant 0 : index
    %c0_15 = arith.constant 0 : index
    %c0_16 = arith.constant 0 : index
    %8 = vector.load %arg2[%c0_14, %c0_15, %c0_16] : memref<2x1x32xf32, #tpu.memory_space<vmem>>, vector<2x1x32xf32>
    %9 = vector.shape_cast %8 : vector<2x1x32xf32> to vector<2x32xf32>
    %10 = arith.truncf %9 : vector<2x32xf32> to vector<2x32xbf16>
    %c0_17 = arith.constant 0 : index
    %c0_18 = arith.constant 0 : index
    %11 = vector.load %arg9[%c0_17, %c0_18] : memref<32x64xbf16, #tpu.memory_space<vmem>>, vector<32x64xbf16>
    %cst_19 = arith.constant dense<0.000000e+00> : vector<2x64xf32>
    %12 = tpu.matmul %10, %11, %cst_19 {dimension_numbers = #tpu.dot_dimension_numbers<[1], [0], [0], [1], [0, 0, 1, 1], [], []>} : vector<2x32xbf16>, vector<32x64xbf16>, vector<2x64xf32> -> vector<2x64xf32>
    %cst_20 = arith.constant 0.000000e+00 : f32
    %13 = vector.broadcast %cst_20 : f32 to vector<2x8x32xf32>
    %c0_21 = arith.constant 0 : index
    %c0_22 = arith.constant 0 : index
    %c0_23 = arith.constant 0 : index
    %14 = vector.load %arg16[%c0_21, %c0_22, %c0_23] : memref<2x22x32xf32, #tpu.memory_space<vmem>>, vector<2x8x32xf32>
    %15 = vector.extract_strided_slice %6 {offsets = [0, 0], sizes = [1, 32], strides = [1, 1]} : vector<15x32xf32> to vector<1x32xf32>
    %16 = vector.shape_cast %15 : vector<1x32xf32> to vector<32xf32>
    %17 = vector.shape_cast %16 : vector<32xf32> to vector<1x1x32xf32>
    %18 = vector.broadcast %17 : vector<1x1x32xf32> to vector<2x8x32xf32>
    %19 = arith.mulf %14, %18 : vector<2x8x32xf32>
    %20 = arith.addf %13, %19 : vector<2x8x32xf32>
    %c0_24 = arith.constant 0 : index
    %c1 = arith.constant 1 : index
    %c0_25 = arith.constant 0 : index
    %21 = vector.load %arg16[%c0_24, %c1, %c0_25] : memref<2x22x32xf32, #tpu.memory_space<vmem>>, vector<2x8x32xf32>
    %22 = vector.extract_strided_slice %6 {offsets = [1, 0], sizes = [1, 32], strides = [1, 1]} : vector<15x32xf32> to vector<1x32xf32>
    %23 = vector.shape_cast %22 : vector<1x32xf32> to vector<32xf32>
    %24 = vector.shape_cast %23 : vector<32xf32> to vector<1x1x32xf32>
    %25 = vector.broadcast %24 : vector<1x1x32xf32> to vector<2x8x32xf32>
    %26 = arith.mulf %21, %25 : vector<2x8x32xf32>
    %27 = arith.addf %20, %26 : vector<2x8x32xf32>
    %c0_26 = arith.constant 0 : index
    %c2 = arith.constant 2 : index
    %c0_27 = arith.constant 0 : index
    %28 = vector.load %arg16[%c0_26, %c2, %c0_27] : memref<2x22x32xf32, #tpu.memory_space<vmem>>, vector<2x8x32xf32>
    %29 = vector.extract_strided_slice %6 {offsets = [2, 0], sizes = [1, 32], strides = [1, 1]} : vector<15x32xf32> to vector<1x32xf32>
    %30 = vector.shape_cast %29 : vector<1x32xf32> to vector<32xf32>
    %31 = vector.shape_cast %30 : vector<32xf32> to vector<1x1x32xf32>
    %32 = vector.broadcast %31 : vector<1x1x32xf32> to vector<2x8x32xf32>
    %33 = arith.mulf %28, %32 : vector<2x8x32xf32>
    %34 = arith.addf %27, %33 : vector<2x8x32xf32>
    %c0_28 = arith.constant 0 : index
    %c3 = arith.constant 3 : index
    %c0_29 = arith.constant 0 : index
    %35 = vector.load %arg16[%c0_28, %c3, %c0_29] : memref<2x22x32xf32, #tpu.memory_space<vmem>>, vector<2x8x32xf32>
    %36 = vector.extract_strided_slice %6 {offsets = [3, 0], sizes = [1, 32], strides = [1, 1]} : vector<15x32xf32> to vector<1x32xf32>
    %37 = vector.shape_cast %36 : vector<1x32xf32> to vector<32xf32>
    %38 = vector.shape_cast %37 : vector<32xf32> to vector<1x1x32xf32>
    %39 = vector.broadcast %38 : vector<1x1x32xf32> to vector<2x8x32xf32>
    %40 = arith.mulf %35, %39 : vector<2x8x32xf32>
    %41 = arith.addf %34, %40 : vector<2x8x32xf32>
    %c0_30 = arith.constant 0 : index
    %c4 = arith.constant 4 : index
    %c0_31 = arith.constant 0 : index
    %42 = vector.load %arg16[%c0_30, %c4, %c0_31] : memref<2x22x32xf32, #tpu.memory_space<vmem>>, vector<2x8x32xf32>
    %43 = vector.extract_strided_slice %6 {offsets = [4, 0], sizes = [1, 32], strides = [1, 1]} : vector<15x32xf32> to vector<1x32xf32>
    %44 = vector.shape_cast %43 : vector<1x32xf32> to vector<32xf32>
    %45 = vector.shape_cast %44 : vector<32xf32> to vector<1x1x32xf32>
    %46 = vector.broadcast %45 : vector<1x1x32xf32> to vector<2x8x32xf32>
    %47 = arith.mulf %42, %46 : vector<2x8x32xf32>
    %48 = arith.addf %41, %47 : vector<2x8x32xf32>
    %c0_32 = arith.constant 0 : index
    %c5 = arith.constant 5 : index
    %c0_33 = arith.constant 0 : index
    %49 = vector.load %arg16[%c0_32, %c5, %c0_33] : memref<2x22x32xf32, #tpu.memory_space<vmem>>, vector<2x8x32xf32>
    %50 = vector.extract_strided_slice %6 {offsets = [5, 0], sizes = [1, 32], strides = [1, 1]} : vector<15x32xf32> to vector<1x32xf32>
    %51 = vector.shape_cast %50 : vector<1x32xf32> to vector<32xf32>
    %52 = vector.shape_cast %51 : vector<32xf32> to vector<1x1x32xf32>
    %53 = vector.broadcast %52 : vector<1x1x32xf32> to vector<2x8x32xf32>
    %54 = arith.mulf %49, %53 : vector<2x8x32xf32>
    %55 = arith.addf %48, %54 : vector<2x8x32xf32>
    %c0_34 = arith.constant 0 : index
    %c6 = arith.constant 6 : index
    %c0_35 = arith.constant 0 : index
    %56 = vector.load %arg16[%c0_34, %c6, %c0_35] : memref<2x22x32xf32, #tpu.memory_space<vmem>>, vector<2x8x32xf32>
    %57 = vector.extract_strided_slice %6 {offsets = [6, 0], sizes = [1, 32], strides = [1, 1]} : vector<15x32xf32> to vector<1x32xf32>
    %58 = vector.shape_cast %57 : vector<1x32xf32> to vector<32xf32>
    %59 = vector.shape_cast %58 : vector<32xf32> to vector<1x1x32xf32>
    %60 = vector.broadcast %59 : vector<1x1x32xf32> to vector<2x8x32xf32>
    %61 = arith.mulf %56, %60 : vector<2x8x32xf32>
    %62 = arith.addf %55, %61 : vector<2x8x32xf32>
    %c0_36 = arith.constant 0 : index
    %c7_37 = arith.constant 7 : index
    %c0_38 = arith.constant 0 : index
    %63 = vector.load %arg16[%c0_36, %c7_37, %c0_38] : memref<2x22x32xf32, #tpu.memory_space<vmem>>, vector<2x8x32xf32>
    %64 = vector.extract_strided_slice %6 {offsets = [7, 0], sizes = [1, 32], strides = [1, 1]} : vector<15x32xf32> to vector<1x32xf32>
    %65 = vector.shape_cast %64 : vector<1x32xf32> to vector<32xf32>
    %66 = vector.shape_cast %65 : vector<32xf32> to vector<1x1x32xf32>
    %67 = vector.broadcast %66 : vector<1x1x32xf32> to vector<2x8x32xf32>
    %68 = arith.mulf %63, %67 : vector<2x8x32xf32>
    %69 = arith.addf %62, %68 : vector<2x8x32xf32>
    %c0_39 = arith.constant 0 : index
    %c8 = arith.constant 8 : index
    %c0_40 = arith.constant 0 : index
    %70 = vector.load %arg16[%c0_39, %c8, %c0_40] : memref<2x22x32xf32, #tpu.memory_space<vmem>>, vector<2x8x32xf32>
    %71 = vector.extract_strided_slice %6 {offsets = [8, 0], sizes = [1, 32], strides = [1, 1]} : vector<15x32xf32> to vector<1x32xf32>
    %72 = vector.shape_cast %71 : vector<1x32xf32> to vector<32xf32>
    %73 = vector.shape_cast %72 : vector<32xf32> to vector<1x1x32xf32>
    %74 = vector.broadcast %73 : vector<1x1x32xf32> to vector<2x8x32xf32>
    %75 = arith.mulf %70, %74 : vector<2x8x32xf32>
    %76 = arith.addf %69, %75 : vector<2x8x32xf32>
    %c0_41 = arith.constant 0 : index
    %c9 = arith.constant 9 : index
    %c0_42 = arith.constant 0 : index
    %77 = vector.load %arg16[%c0_41, %c9, %c0_42] : memref<2x22x32xf32, #tpu.memory_space<vmem>>, vector<2x8x32xf32>
    %78 = vector.extract_strided_slice %6 {offsets = [9, 0], sizes = [1, 32], strides = [1, 1]} : vector<15x32xf32> to vector<1x32xf32>
    %79 = vector.shape_cast %78 : vector<1x32xf32> to vector<32xf32>
    %80 = vector.shape_cast %79 : vector<32xf32> to vector<1x1x32xf32>
    %81 = vector.broadcast %80 : vector<1x1x32xf32> to vector<2x8x32xf32>
    %82 = arith.mulf %77, %81 : vector<2x8x32xf32>
    %83 = arith.addf %76, %82 : vector<2x8x32xf32>
    %c0_43 = arith.constant 0 : index
    %c10 = arith.constant 10 : index
    %c0_44 = arith.constant 0 : index
    %84 = vector.load %arg16[%c0_43, %c10, %c0_44] : memref<2x22x32xf32, #tpu.memory_space<vmem>>, vector<2x8x32xf32>
    %85 = vector.extract_strided_slice %6 {offsets = [10, 0], sizes = [1, 32], strides = [1, 1]} : vector<15x32xf32> to vector<1x32xf32>
    %86 = vector.shape_cast %85 : vector<1x32xf32> to vector<32xf32>
    %87 = vector.shape_cast %86 : vector<32xf32> to vector<1x1x32xf32>
    %88 = vector.broadcast %87 : vector<1x1x32xf32> to vector<2x8x32xf32>
    %89 = arith.mulf %84, %88 : vector<2x8x32xf32>
    %90 = arith.addf %83, %89 : vector<2x8x32xf32>
    %c0_45 = arith.constant 0 : index
    %c11 = arith.constant 11 : index
    %c0_46 = arith.constant 0 : index
    %91 = vector.load %arg16[%c0_45, %c11, %c0_46] : memref<2x22x32xf32, #tpu.memory_space<vmem>>, vector<2x8x32xf32>
    %92 = vector.extract_strided_slice %6 {offsets = [11, 0], sizes = [1, 32], strides = [1, 1]} : vector<15x32xf32> to vector<1x32xf32>
    %93 = vector.shape_cast %92 : vector<1x32xf32> to vector<32xf32>
    %94 = vector.shape_cast %93 : vector<32xf32> to vector<1x1x32xf32>
    %95 = vector.broadcast %94 : vector<1x1x32xf32> to vector<2x8x32xf32>
    %96 = arith.mulf %91, %95 : vector<2x8x32xf32>
    %97 = arith.addf %90, %96 : vector<2x8x32xf32>
    %c0_47 = arith.constant 0 : index
    %c12 = arith.constant 12 : index
    %c0_48 = arith.constant 0 : index
    %98 = vector.load %arg16[%c0_47, %c12, %c0_48] : memref<2x22x32xf32, #tpu.memory_space<vmem>>, vector<2x8x32xf32>
    %99 = vector.extract_strided_slice %6 {offsets = [12, 0], sizes = [1, 32], strides = [1, 1]} : vector<15x32xf32> to vector<1x32xf32>
    %100 = vector.shape_cast %99 : vector<1x32xf32> to vector<32xf32>
    %101 = vector.shape_cast %100 : vector<32xf32> to vector<1x1x32xf32>
    %102 = vector.broadcast %101 : vector<1x1x32xf32> to vector<2x8x32xf32>
    %103 = arith.mulf %98, %102 : vector<2x8x32xf32>
    %104 = arith.addf %97, %103 : vector<2x8x32xf32>
    %c0_49 = arith.constant 0 : index
    %c13 = arith.constant 13 : index
    %c0_50 = arith.constant 0 : index
    %105 = vector.load %arg16[%c0_49, %c13, %c0_50] : memref<2x22x32xf32, #tpu.memory_space<vmem>>, vector<2x8x32xf32>
    %106 = vector.extract_strided_slice %6 {offsets = [13, 0], sizes = [1, 32], strides = [1, 1]} : vector<15x32xf32> to vector<1x32xf32>
    %107 = vector.shape_cast %106 : vector<1x32xf32> to vector<32xf32>
    %108 = vector.shape_cast %107 : vector<32xf32> to vector<1x1x32xf32>
    %109 = vector.broadcast %108 : vector<1x1x32xf32> to vector<2x8x32xf32>
    %110 = arith.mulf %105, %109 : vector<2x8x32xf32>
    %111 = arith.addf %104, %110 : vector<2x8x32xf32>
    %c0_51 = arith.constant 0 : index
    %c14 = arith.constant 14 : index
    %c0_52 = arith.constant 0 : index
    %112 = vector.load %arg16[%c0_51, %c14, %c0_52] : memref<2x22x32xf32, #tpu.memory_space<vmem>>, vector<2x8x32xf32>
    %113 = vector.extract_strided_slice %6 {offsets = [14, 0], sizes = [1, 32], strides = [1, 1]} : vector<15x32xf32> to vector<1x32xf32>
    %114 = vector.shape_cast %113 : vector<1x32xf32> to vector<32xf32>
    %115 = vector.shape_cast %114 : vector<32xf32> to vector<1x1x32xf32>
    %116 = vector.broadcast %115 : vector<1x1x32xf32> to vector<2x8x32xf32>
    %117 = arith.mulf %112, %116 : vector<2x8x32xf32>
    %118 = arith.addf %111, %117 : vector<2x8x32xf32>
    %119 = vector.shape_cast %7 : vector<1x32xf32> to vector<1x1x32xf32>
    %120 = vector.broadcast %119 : vector<1x1x32xf32> to vector<2x8x32xf32>
    %121 = arith.addf %118, %120 : vector<2x8x32xf32>
    %122 = vector.shape_cast %121 : vector<2x8x32xf32> to vector<16x32xf32>
    %123 = arith.truncf %122 : vector<16x32xf32> to vector<16x32xbf16>
    %c0_53 = arith.constant 0 : index
    %c0_54 = arith.constant 0 : index
    %124 = vector.load %arg5[%c0_53, %c0_54] : memref<32x32xbf16, #tpu.memory_space<vmem>>, vector<32x32xbf16>
    %cst_55 = arith.constant dense<0.000000e+00> : vector<16x32xf32>
    %125 = tpu.matmul %123, %124, %cst_55 {dimension_numbers = #tpu.dot_dimension_numbers<[1], [0], [0], [1], [0, 0, 1, 1], [], []>} : vector<16x32xbf16>, vector<32x32xbf16>, vector<16x32xf32> -> vector<16x32xf32>
    %c0_56 = arith.constant 0 : index
    %c0_57 = arith.constant 0 : index
    %126 = vector.load %arg6[%c0_56, %c0_57] : memref<1x32xf32, #tpu.memory_space<vmem>>, vector<1x32xf32>
    %127 = vector.broadcast %126 : vector<1x32xf32> to vector<16x32xf32>
    %128 = arith.addf %125, %127 : vector<16x32xf32>
    %c0_58 = arith.constant 0 : index
    %c0_59 = arith.constant 0 : index
    %c0_60 = arith.constant 0 : index
    %129 = vector.load %arg1[%c0_58, %c0_59, %c0_60] : memref<2x8x32xf32, #tpu.memory_space<vmem>>, vector<2x8x32xf32>
    %130 = vector.shape_cast %129 : vector<2x8x32xf32> to vector<16x32xf32>
    %131 = arith.truncf %130 : vector<16x32xf32> to vector<16x32xbf16>
    %c0_61 = arith.constant 0 : index
    %c0_62 = arith.constant 0 : index
    %132 = vector.load %arg7[%c0_61, %c0_62] : memref<32x64xbf16, #tpu.memory_space<vmem>>, vector<32x64xbf16>
    %cst_63 = arith.constant dense<0.000000e+00> : vector<16x64xf32>
    %133 = tpu.matmul %131, %132, %cst_63 {dimension_numbers = #tpu.dot_dimension_numbers<[1], [0], [0], [1], [0, 0, 1, 1], [], []>} : vector<16x32xbf16>, vector<32x64xbf16>, vector<16x64xf32> -> vector<16x64xf32>
    %134 = arith.truncf %128 : vector<16x32xf32> to vector<16x32xbf16>
    %c0_64 = arith.constant 0 : index
    %c0_65 = arith.constant 0 : index
    %135 = vector.load %arg8[%c0_64, %c0_65] : memref<32x64xbf16, #tpu.memory_space<vmem>>, vector<32x64xbf16>
    %cst_66 = arith.constant dense<0.000000e+00> : vector<16x64xf32>
    %136 = tpu.matmul %134, %135, %cst_66 {dimension_numbers = #tpu.dot_dimension_numbers<[1], [0], [0], [1], [0, 0, 1, 1], [], []>} : vector<16x32xbf16>, vector<32x64xbf16>, vector<16x64xf32> -> vector<16x64xf32>
    %137 = arith.addf %133, %136 : vector<16x64xf32>
    %138 = vector.shape_cast %137 : vector<16x64xf32> to vector<2x8x64xf32>
    %139 = vector.shape_cast %12 : vector<2x64xf32> to vector<2x1x64xf32>
    %140 = vector.broadcast %139 : vector<2x1x64xf32> to vector<2x8x64xf32>
    %141 = arith.addf %138, %140 : vector<2x8x64xf32>
    %c0_67 = arith.constant 0 : index
    %c0_68 = arith.constant 0 : index
    %142 = vector.load %arg10[%c0_67, %c0_68] : memref<1x64xf32, #tpu.memory_space<vmem>>, vector<1x64xf32>
    %143 = vector.shape_cast %142 : vector<1x64xf32> to vector<1x1x64xf32>
    %144 = vector.broadcast %143 : vector<1x1x64xf32> to vector<2x8x64xf32>
    %145 = arith.addf %141, %144 : vector<2x8x64xf32>
    %cst_69 = arith.constant 5.000000e-01 : f32
    %146 = vector.broadcast %cst_69 : f32 to vector<2x8x64xf32>
    %147 = arith.mulf %146, %145 : vector<2x8x64xf32>
    %cst_70 = arith.constant 4.471500e-02 : f32
    %148 = vector.broadcast %cst_70 : f32 to vector<2x8x64xf32>
    %149 = arith.mulf %148, %145 : vector<2x8x64xf32>
    %150 = arith.mulf %149, %145 : vector<2x8x64xf32>
    %151 = arith.mulf %150, %145 : vector<2x8x64xf32>
    %152 = arith.addf %145, %151 : vector<2x8x64xf32>
    %cst_71 = arith.constant 0.797884583 : f32
    %153 = vector.broadcast %cst_71 : f32 to vector<2x8x64xf32>
    %154 = arith.mulf %153, %152 : vector<2x8x64xf32>
    %155 = math.tanh %154 : vector<2x8x64xf32>
    %cst_72 = arith.constant 1.000000e+00 : f32
    %156 = vector.broadcast %cst_72 : f32 to vector<2x8x64xf32>
    %157 = arith.addf %156, %155 : vector<2x8x64xf32>
    %158 = arith.mulf %147, %157 : vector<2x8x64xf32>
    %159 = vector.shape_cast %158 : vector<2x8x64xf32> to vector<16x64xf32>
    %160 = arith.truncf %159 : vector<16x64xf32> to vector<16x64xbf16>
    %c0_73 = arith.constant 0 : index
    %c0_74 = arith.constant 0 : index
    %161 = vector.load %arg11[%c0_73, %c0_74] : memref<64x32xbf16, #tpu.memory_space<vmem>>, vector<64x32xbf16>
    %cst_75 = arith.constant dense<0.000000e+00> : vector<16x32xf32>
    %162 = tpu.matmul %160, %161, %cst_75 {dimension_numbers = #tpu.dot_dimension_numbers<[1], [0], [0], [1], [0, 0, 1, 1], [], []>} : vector<16x64xbf16>, vector<64x32xbf16>, vector<16x32xf32> -> vector<16x32xf32>
    %c0_76 = arith.constant 0 : index
    %c0_77 = arith.constant 0 : index
    %163 = vector.load %arg12[%c0_76, %c0_77] : memref<1x32xf32, #tpu.memory_space<vmem>>, vector<1x32xf32>
    %164 = vector.broadcast %163 : vector<1x32xf32> to vector<16x32xf32>
    %165 = arith.addf %162, %164 : vector<16x32xf32>
    %cst_78 = arith.constant 5.000000e-01 : f32
    %166 = vector.broadcast %cst_78 : f32 to vector<16x32xf32>
    %167 = arith.mulf %166, %165 : vector<16x32xf32>
    %cst_79 = arith.constant 4.471500e-02 : f32
    %168 = vector.broadcast %cst_79 : f32 to vector<16x32xf32>
    %169 = arith.mulf %168, %165 : vector<16x32xf32>
    %170 = arith.mulf %169, %165 : vector<16x32xf32>
    %171 = arith.mulf %170, %165 : vector<16x32xf32>
    %172 = arith.addf %165, %171 : vector<16x32xf32>
    %cst_80 = arith.constant 0.797884583 : f32
    %173 = vector.broadcast %cst_80 : f32 to vector<16x32xf32>
    %174 = arith.mulf %173, %172 : vector<16x32xf32>
    %175 = math.tanh %174 : vector<16x32xf32>
    %cst_81 = arith.constant 1.000000e+00 : f32
    %176 = vector.broadcast %cst_81 : f32 to vector<16x32xf32>
    %177 = arith.addf %176, %175 : vector<16x32xf32>
    %178 = arith.mulf %167, %177 : vector<16x32xf32>
    %179 = vector.shape_cast %178 : vector<16x32xf32> to vector<2x8x32xf32>
    %c0_82 = arith.constant 0 : index
    %c0_83 = arith.constant 0 : index
    %180 = vector.load %arg13[%c0_82, %c0_83] : memref<1x32xf32, #tpu.memory_space<vmem>>, vector<1x32xf32>
    %181 = vector.shape_cast %180 : vector<1x32xf32> to vector<1x1x32xf32>
    %182 = vector.broadcast %181 : vector<1x1x32xf32> to vector<2x8x32xf32>
    %183 = arith.mulf %179, %182 : vector<2x8x32xf32>
    %cst_84 = arith.constant dense<0.000000e+00> : vector<2x8xf32>
    %184 = vector.multi_reduction <add>, %183, %cst_84 [2] : vector<2x8x32xf32> to vector<2x8xf32>
    %c0_85 = arith.constant 0 : index
    %c0_86 = arith.constant 0 : index
    %185 = vector.load %arg14[%c0_85, %c0_86] : memref<1x1xf32, #tpu.memory_space<vmem>>, vector<1x1xf32>
    %186 = vector.broadcast %185 : vector<1x1xf32> to vector<2x8xf32>
    %187 = arith.addf %184, %186 : vector<2x8xf32>
    %188 = vector.shape_cast %187 : vector<2x8xf32> to vector<2x1x8xf32>
    %c0_87 = arith.constant 0 : index
    %c0_88 = arith.constant 0 : index
    %c0_89 = arith.constant 0 : index
    %189 = vector.load %arg15[%c0_87, %c0_88, %c0_89] : memref<2x1x8xf32, #tpu.memory_space<vmem>>, vector<2x1x8xf32>
    tpu.vector_store %arg15[%c0_87, %c0_88, %c0_89], %188 {strides = array<i32>} : memref<2x1x8xf32, #tpu.memory_space<vmem>>, vector<2x1x8xf32>,
    return
  }
  func.func @transform_0(%arg0: i32) -> (i32, i32, i32) {
    %c0_i32 = arith.constant 0 : i32
    %c0_i32_0 = arith.constant 0 : i32
    %c0_i32_1 = arith.constant 0 : i32
    return %arg0, %c0_i32, %c0_i32_0 : i32, i32, i32
  }
  func.func @transform_1(%arg0: i32) -> (i32, i32, i32) {
    %c0_i32 = arith.constant 0 : i32
    %c0_i32_0 = arith.constant 0 : i32
    %c0_i32_1 = arith.constant 0 : i32
    return %arg0, %c0_i32, %c0_i32_0 : i32, i32, i32
  }
  func.func @transform_2(%arg0: i32) -> (i32, i32) {
    %c0_i32 = arith.constant 0 : i32
    %c0_i32_0 = arith.constant 0 : i32
    %c0_i32_1 = arith.constant 0 : i32
    return %c0_i32, %c0_i32_0 : i32, i32
  }
  func.func @transform_3(%arg0: i32) -> (i32, i32) {
    %c0_i32 = arith.constant 0 : i32
    %c0_i32_0 = arith.constant 0 : i32
    %c0_i32_1 = arith.constant 0 : i32
    return %c0_i32, %c0_i32_0 : i32, i32
  }
  func.func @transform_4(%arg0: i32) -> (i32, i32) {
    %c0_i32 = arith.constant 0 : i32
    %c0_i32_0 = arith.constant 0 : i32
    %c0_i32_1 = arith.constant 0 : i32
    return %c0_i32, %c0_i32_0 : i32, i32
  }
  func.func @transform_5(%arg0: i32) -> (i32, i32) {
    %c0_i32 = arith.constant 0 : i32
    %c0_i32_0 = arith.constant 0 : i32
    %c0_i32_1 = arith.constant 0 : i32
    return %c0_i32, %c0_i32_0 : i32, i32
  }
  func.func @transform_6(%arg0: i32) -> (i32, i32) {
    %c0_i32 = arith.constant 0 : i32
    %c0_i32_0 = arith.constant 0 : i32
    %c0_i32_1 = arith.constant 0 : i32
    return %c0_i32, %c0_i32_0 : i32, i32
  }
  func.func @transform_7(%arg0: i32) -> (i32, i32) {
    %c0_i32 = arith.constant 0 : i32
    %c0_i32_0 = arith.constant 0 : i32
    %c0_i32_1 = arith.constant 0 : i32
    return %c0_i32, %c0_i32_0 : i32, i32
  }
  func.func @transform_8(%arg0: i32) -> (i32, i32) {
    %c0_i32 = arith.constant 0 : i32
    %c0_i32_0 = arith.constant 0 : i32
    %c0_i32_1 = arith.constant 0 : i32
    return %c0_i32, %c0_i32_0 : i32, i32
  }
  func.func @transform_9(%arg0: i32) -> (i32, i32) {
    %c0_i32 = arith.constant 0 : i32
    %c0_i32_0 = arith.constant 0 : i32
    %c0_i32_1 = arith.constant 0 : i32
    return %c0_i32, %c0_i32_0 : i32, i32
  }
  func.func @transform_10(%arg0: i32) -> (i32, i32) {
    %c0_i32 = arith.constant 0 : i32
    %c0_i32_0 = arith.constant 0 : i32
    %c0_i32_1 = arith.constant 0 : i32
    return %c0_i32, %c0_i32_0 : i32, i32
  }
  func.func @transform_11(%arg0: i32) -> (i32, i32) {
    %c0_i32 = arith.constant 0 : i32
    %c0_i32_0 = arith.constant 0 : i32
    %c0_i32_1 = arith.constant 0 : i32
    return %c0_i32, %c0_i32_0 : i32, i32
  }
  func.func @transform_12(%arg0: i32) -> (i32, i32) {
    %c0_i32 = arith.constant 0 : i32
    %c0_i32_0 = arith.constant 0 : i32
    %c0_i32_1 = arith.constant 0 : i32
    return %c0_i32, %c0_i32_0 : i32, i32
  }
  func.func @transform_13(%arg0: i32) -> (i32, i32) {
    %c0_i32 = arith.constant 0 : i32
    %c0_i32_0 = arith.constant 0 : i32
    %c0_i32_1 = arith.constant 0 : i32
    return %c0_i32, %c0_i32_0 : i32, i32
  }
  func.func @transform_14(%arg0: i32) -> (i32, i32, i32) {
    %c0_i32 = arith.constant 0 : i32
    %c0_i32_0 = arith.constant 0 : i32
    %c0_i32_1 = arith.constant 0 : i32
    return %arg0, %c0_i32, %c0_i32_0 : i32, i32, i32
  }
}

module attributes {stable_mosaic.version = 11 : i64} {
  func.func @_bigru2_kernel(%arg0: i32, %arg1: memref<2x8x32xf32, #tpu.memory_space<vmem>>, %arg2: memref<2x1x1xf32, #tpu.memory_space<vmem>>, %arg3: memref<32x96xbf16, #tpu.memory_space<vmem>>, %arg4: memref<1x96xf32, #tpu.memory_space<vmem>>, %arg5: memref<16x48xf32, #tpu.memory_space<vmem>>, %arg6: memref<1x48xf32, #tpu.memory_space<vmem>>, %arg7: memref<16x48xf32, #tpu.memory_space<vmem>>, %arg8: memref<1x48xf32, #tpu.memory_space<vmem>>, %arg9: memref<32x96xbf16, #tpu.memory_space<vmem>>, %arg10: memref<1x96xf32, #tpu.memory_space<vmem>>, %arg11: memref<16x48xf32, #tpu.memory_space<vmem>>, %arg12: memref<1x48xf32, #tpu.memory_space<vmem>>, %arg13: memref<16x48xf32, #tpu.memory_space<vmem>>, %arg14: memref<1x48xf32, #tpu.memory_space<vmem>>, %arg15: memref<2x8x32xf32, #tpu.memory_space<vmem>>, %arg16: memref<2x1x32xf32, #tpu.memory_space<vmem>>, %arg17: memref<2x8x96xf32, #tpu.memory_space<vmem>>, %arg18: memref<2x8x32xf32, #tpu.memory_space<vmem>>, %arg19: memref<2x8x1xf32, #tpu.memory_space<vmem>>) attributes {dimension_semantics = [#tpu.dimension_semantics<parallel>], iteration_bounds = array<i64: 1>, scalar_prefetch = 0 : i64, scratch_operands = 3 : i64, tpu.core_type = #tpu.core_type<tc>, window_params = [{transform_indices = @transform_0, window_bounds = array<i64: 2, 8, 32>}, {transform_indices = @transform_1, window_bounds = array<i64: 2, 1, 1>}, {pipeline_mode = #tpu.pipeline_mode<synchronous>, transform_indices = @transform_2, window_bounds = array<i64: 32, 96>}, {pipeline_mode = #tpu.pipeline_mode<synchronous>, transform_indices = @transform_3, window_bounds = array<i64: 1, 96>}, {pipeline_mode = #tpu.pipeline_mode<synchronous>, transform_indices = @transform_4, window_bounds = array<i64: 16, 48>}, {pipeline_mode = #tpu.pipeline_mode<synchronous>, transform_indices = @transform_5, window_bounds = array<i64: 1, 48>}, {pipeline_mode = #tpu.pipeline_mode<synchronous>, transform_indices = @transform_6, window_bounds = array<i64: 16, 48>}, {pipeline_mode = #tpu.pipeline_mode<synchronous>, transform_indices = @transform_7, window_bounds = array<i64: 1, 48>}, {pipeline_mode = #tpu.pipeline_mode<synchronous>, transform_indices = @transform_8, window_bounds = array<i64: 32, 96>}, {pipeline_mode = #tpu.pipeline_mode<synchronous>, transform_indices = @transform_9, window_bounds = array<i64: 1, 96>}, {pipeline_mode = #tpu.pipeline_mode<synchronous>, transform_indices = @transform_10, window_bounds = array<i64: 16, 48>}, {pipeline_mode = #tpu.pipeline_mode<synchronous>, transform_indices = @transform_11, window_bounds = array<i64: 1, 48>}, {pipeline_mode = #tpu.pipeline_mode<synchronous>, transform_indices = @transform_12, window_bounds = array<i64: 16, 48>}, {pipeline_mode = #tpu.pipeline_mode<synchronous>, transform_indices = @transform_13, window_bounds = array<i64: 1, 48>}, {transform_indices = @transform_14, window_bounds = array<i64: 2, 8, 32>}, {transform_indices = @transform_15, window_bounds = array<i64: 2, 1, 32>}]} {
    %c0 = arith.constant 0 : index
    %c0_0 = arith.constant 0 : index
    %c0_1 = arith.constant 0 : index
    %0 = vector.load %arg2[%c0, %c0_0, %c0_1] : memref<2x1x1xf32, #tpu.memory_space<vmem>>, vector<2x1x1xf32>
    %1 = tpu.iota {dimensions = array<i32: 1>} : vector<2x8x1xi32>
    %2 = arith.sitofp %1 : vector<2x8x1xi32> to vector<2x8x1xf32>
    %3 = vector.broadcast %0 : vector<2x1x1xf32> to vector<2x8x1xf32>
    %4 = arith.cmpf olt, %2, %3 : vector<2x8x1xf32>
    %5 = arith.extui %4 : vector<2x8x1xi1> to vector<2x8x1xi32>
    %6 = arith.sitofp %5 : vector<2x8x1xi32> to vector<2x8x1xf32>
    %c0_2 = arith.constant 0 : index
    %c0_3 = arith.constant 0 : index
    %c0_4 = arith.constant 0 : index
    %7 = vector.load %arg19[%c0_2, %c0_3, %c0_4] : memref<2x8x1xf32, #tpu.memory_space<vmem>>, vector<2x8x1xf32>
    tpu.vector_store %arg19[%c0_2, %c0_3, %c0_4], %6 {strides = array<i32>} : memref<2x8x1xf32, #tpu.memory_space<vmem>>, vector<2x8x1xf32>,
    %c0_5 = arith.constant 0 : index
    %c0_6 = arith.constant 0 : index
    %c0_7 = arith.constant 0 : index
    %8 = vector.load %arg1[%c0_5, %c0_6, %c0_7] : memref<2x8x32xf32, #tpu.memory_space<vmem>>, vector<2x8x32xf32>
    %9 = vector.shape_cast %8 : vector<2x8x32xf32> to vector<16x32xf32>
    %10 = arith.truncf %9 : vector<16x32xf32> to vector<16x32xbf16>
    %c0_8 = arith.constant 0 : index
    %c0_9 = arith.constant 0 : index
    %11 = vector.load %arg3[%c0_8, %c0_9] : memref<32x96xbf16, #tpu.memory_space<vmem>>, vector<32x96xbf16>
    %cst = arith.constant dense<0.000000e+00> : vector<16x96xf32>
    %12 = tpu.matmul %10, %11, %cst {dimension_numbers = #tpu.dot_dimension_numbers<[1], [0], [0], [1], [0, 0, 1, 1], [], []>} : vector<16x32xbf16>, vector<32x96xbf16>, vector<16x96xf32> -> vector<16x96xf32>
    %c0_10 = arith.constant 0 : index
    %c0_11 = arith.constant 0 : index
    %13 = vector.load %arg4[%c0_10, %c0_11] : memref<1x96xf32, #tpu.memory_space<vmem>>, vector<1x96xf32>
    %14 = vector.broadcast %13 : vector<1x96xf32> to vector<16x96xf32>
    %15 = arith.addf %12, %14 : vector<16x96xf32>
    %16 = vector.shape_cast %15 : vector<16x96xf32> to vector<2x8x96xf32>
    %c0_12 = arith.constant 0 : index
    %c0_13 = arith.constant 0 : index
    %c0_14 = arith.constant 0 : index
    %17 = vector.load %arg17[%c0_12, %c0_13, %c0_14] : memref<2x8x96xf32, #tpu.memory_space<vmem>>, vector<2x8x96xf32>
    tpu.vector_store %arg17[%c0_12, %c0_13, %c0_14], %16 {strides = array<i32>} : memref<2x8x96xf32, #tpu.memory_space<vmem>>, vector<2x8x96xf32>,
    %c0_15 = arith.constant 0 : index
    %c0_16 = arith.constant 0 : index
    %18 = vector.load %arg5[%c0_15, %c0_16] : memref<16x48xf32, #tpu.memory_space<vmem>>, vector<16x48xf32>
    %c0_17 = arith.constant 0 : index
    %c0_18 = arith.constant 0 : index
    %19 = vector.load %arg7[%c0_17, %c0_18] : memref<16x48xf32, #tpu.memory_space<vmem>>, vector<16x48xf32>
    %c0_19 = arith.constant 0 : index
    %c0_20 = arith.constant 0 : index
    %20 = vector.load %arg6[%c0_19, %c0_20] : memref<1x48xf32, #tpu.memory_space<vmem>>, vector<1x48xf32>
    %c0_21 = arith.constant 0 : index
    %c0_22 = arith.constant 0 : index
    %21 = vector.load %arg8[%c0_21, %c0_22] : memref<1x48xf32, #tpu.memory_space<vmem>>, vector<1x48xf32>
    %cst_23 = arith.constant 0.000000e+00 : f32
    %22 = vector.broadcast %cst_23 : f32 to vector<2x16xf32>
    %c0_i32 = arith.constant 0 : i32
    %c7_i32 = arith.constant 7 : i32
    %23 = arith.subi %c7_i32, %c0_i32 : i32
    %c0_24 = arith.constant 0 : index
    %24 = arith.index_cast %c0_i32 : i32 to index
    %c0_25 = arith.constant 0 : index
    %25 = vector.load %arg17[%c0_24, %24, %c0_25] : memref<2x8x96xf32, #tpu.memory_space<vmem>>, vector<2x1x48xf32>
    %26 = vector.shape_cast %25 : vector<2x1x48xf32> to vector<2x48xf32>
    %c0_26 = arith.constant 0 : index
    %27 = arith.index_cast %23 : i32 to index
    %c48 = arith.constant 48 : index
    %28 = vector.load %arg17[%c0_26, %27, %c48] : memref<2x8x96xf32, #tpu.memory_space<vmem>>, vector<2x1x48xf32>
    %29 = vector.shape_cast %28 : vector<2x1x48xf32> to vector<2x48xf32>
    %c0_27 = arith.constant 0 : index
    %30 = arith.index_cast %c0_i32 : i32 to index
    %c0_28 = arith.constant 0 : index
    %31 = vector.load %arg19[%c0_27, %30, %c0_28] : memref<2x8x1xf32, #tpu.memory_space<vmem>>, vector<2x1x1xf32>
    %32 = vector.shape_cast %31 : vector<2x1x1xf32> to vector<2x1xf32>
    %c0_29 = arith.constant 0 : index
    %33 = arith.index_cast %23 : i32 to index
    %c0_30 = arith.constant 0 : index
    %34 = vector.load %arg19[%c0_29, %33, %c0_30] : memref<2x8x1xf32, #tpu.memory_space<vmem>>, vector<2x1x1xf32>
    %35 = vector.shape_cast %34 : vector<2x1x1xf32> to vector<2x1xf32>
    %cst_31 = arith.constant dense<0.000000e+00> : vector<2x48xf32>
    %36 = tpu.matmul %22, %18, %cst_31 {dimension_numbers = #tpu.dot_dimension_numbers<[1], [0], [0], [1], [0, 0, 1, 1], [], []>} : vector<2x16xf32>, vector<16x48xf32>, vector<2x48xf32> -> vector<2x48xf32>
    %cst_32 = arith.constant dense<0.000000e+00> : vector<2x48xf32>
    %37 = tpu.matmul %22, %19, %cst_32 {dimension_numbers = #tpu.dot_dimension_numbers<[1], [0], [0], [1], [0, 0, 1, 1], [], []>} : vector<2x16xf32>, vector<16x48xf32>, vector<2x48xf32> -> vector<2x48xf32>
    %38 = vector.extract_strided_slice %26 {offsets = [0, 0], sizes = [2, 16], strides = [1, 1]} : vector<2x48xf32> to vector<2x16xf32>
    %39 = vector.extract_strided_slice %36 {offsets = [0, 0], sizes = [2, 16], strides = [1, 1]} : vector<2x48xf32> to vector<2x16xf32>
    %40 = arith.addf %38, %39 : vector<2x16xf32>
    %41 = vector.extract_strided_slice %20 {offsets = [0, 0], sizes = [1, 16], strides = [1, 1]} : vector<1x48xf32> to vector<1x16xf32>
    %42 = vector.broadcast %41 : vector<1x16xf32> to vector<2x16xf32>
    %43 = arith.addf %40, %42 : vector<2x16xf32>
    %44 = arith.negf %43 : vector<2x16xf32>
    %45 = math.exp %44 : vector<2x16xf32>
    %cst_33 = arith.constant 1.000000e+00 : f32
    %46 = vector.broadcast %cst_33 : f32 to vector<2x16xf32>
    %47 = arith.addf %46, %45 : vector<2x16xf32>
    %48 = arith.divf %46, %47 : vector<2x16xf32>
    %49 = vector.extract_strided_slice %26 {offsets = [0, 16], sizes = [2, 16], strides = [1, 1]} : vector<2x48xf32> to vector<2x16xf32>
    %50 = vector.extract_strided_slice %36 {offsets = [0, 16], sizes = [2, 16], strides = [1, 1]} : vector<2x48xf32> to vector<2x16xf32>
    %51 = arith.addf %49, %50 : vector<2x16xf32>
    %52 = vector.extract_strided_slice %20 {offsets = [0, 16], sizes = [1, 16], strides = [1, 1]} : vector<1x48xf32> to vector<1x16xf32>
    %53 = vector.broadcast %52 : vector<1x16xf32> to vector<2x16xf32>
    %54 = arith.addf %51, %53 : vector<2x16xf32>
    %55 = arith.negf %54 : vector<2x16xf32>
    %56 = math.exp %55 : vector<2x16xf32>
    %cst_34 = arith.constant 1.000000e+00 : f32
    %57 = vector.broadcast %cst_34 : f32 to vector<2x16xf32>
    %58 = arith.addf %57, %56 : vector<2x16xf32>
    %59 = arith.divf %57, %58 : vector<2x16xf32>
    %60 = vector.extract_strided_slice %26 {offsets = [0, 32], sizes = [2, 16], strides = [1, 1]} : vector<2x48xf32> to vector<2x16xf32>
    %61 = vector.extract_strided_slice %36 {offsets = [0, 32], sizes = [2, 16], strides = [1, 1]} : vector<2x48xf32> to vector<2x16xf32>
    %62 = vector.extract_strided_slice %20 {offsets = [0, 32], sizes = [1, 16], strides = [1, 1]} : vector<1x48xf32> to vector<1x16xf32>
    %63 = vector.broadcast %62 : vector<1x16xf32> to vector<2x16xf32>
    %64 = arith.addf %61, %63 : vector<2x16xf32>
    %65 = arith.mulf %48, %64 : vector<2x16xf32>
    %66 = arith.addf %60, %65 : vector<2x16xf32>
    %67 = math.tanh %66 : vector<2x16xf32>
    %cst_35 = arith.constant 1.000000e+00 : f32
    %68 = vector.broadcast %cst_35 : f32 to vector<2x16xf32>
    %69 = arith.subf %68, %59 : vector<2x16xf32>
    %70 = arith.mulf %69, %67 : vector<2x16xf32>
    %71 = arith.mulf %59, %22 : vector<2x16xf32>
    %72 = arith.addf %70, %71 : vector<2x16xf32>
    %73 = vector.extract_strided_slice %29 {offsets = [0, 0], sizes = [2, 16], strides = [1, 1]} : vector<2x48xf32> to vector<2x16xf32>
    %74 = vector.extract_strided_slice %37 {offsets = [0, 0], sizes = [2, 16], strides = [1, 1]} : vector<2x48xf32> to vector<2x16xf32>
    %75 = arith.addf %73, %74 : vector<2x16xf32>
    %76 = vector.extract_strided_slice %21 {offsets = [0, 0], sizes = [1, 16], strides = [1, 1]} : vector<1x48xf32> to vector<1x16xf32>
    %77 = vector.broadcast %76 : vector<1x16xf32> to vector<2x16xf32>
    %78 = arith.addf %75, %77 : vector<2x16xf32>
    %79 = arith.negf %78 : vector<2x16xf32>
    %80 = math.exp %79 : vector<2x16xf32>
    %cst_36 = arith.constant 1.000000e+00 : f32
    %81 = vector.broadcast %cst_36 : f32 to vector<2x16xf32>
    %82 = arith.addf %81, %80 : vector<2x16xf32>
    %83 = arith.divf %81, %82 : vector<2x16xf32>
    %84 = vector.extract_strided_slice %29 {offsets = [0, 16], sizes = [2, 16], strides = [1, 1]} : vector<2x48xf32> to vector<2x16xf32>
    %85 = vector.extract_strided_slice %37 {offsets = [0, 16], sizes = [2, 16], strides = [1, 1]} : vector<2x48xf32> to vector<2x16xf32>
    %86 = arith.addf %84, %85 : vector<2x16xf32>
    %87 = vector.extract_strided_slice %21 {offsets = [0, 16], sizes = [1, 16], strides = [1, 1]} : vector<1x48xf32> to vector<1x16xf32>
    %88 = vector.broadcast %87 : vector<1x16xf32> to vector<2x16xf32>
    %89 = arith.addf %86, %88 : vector<2x16xf32>
    %90 = arith.negf %89 : vector<2x16xf32>
    %91 = math.exp %90 : vector<2x16xf32>
    %cst_37 = arith.constant 1.000000e+00 : f32
    %92 = vector.broadcast %cst_37 : f32 to vector<2x16xf32>
    %93 = arith.addf %92, %91 : vector<2x16xf32>
    %94 = arith.divf %92, %93 : vector<2x16xf32>
    %95 = vector.extract_strided_slice %29 {offsets = [0, 32], sizes = [2, 16], strides = [1, 1]} : vector<2x48xf32> to vector<2x16xf32>
    %96 = vector.extract_strided_slice %37 {offsets = [0, 32], sizes = [2, 16], strides = [1, 1]} : vector<2x48xf32> to vector<2x16xf32>
    %97 = vector.extract_strided_slice %21 {offsets = [0, 32], sizes = [1, 16], strides = [1, 1]} : vector<1x48xf32> to vector<1x16xf32>
    %98 = vector.broadcast %97 : vector<1x16xf32> to vector<2x16xf32>
    %99 = arith.addf %96, %98 : vector<2x16xf32>
    %100 = arith.mulf %83, %99 : vector<2x16xf32>
    %101 = arith.addf %95, %100 : vector<2x16xf32>
    %102 = math.tanh %101 : vector<2x16xf32>
    %cst_38 = arith.constant 1.000000e+00 : f32
    %103 = vector.broadcast %cst_38 : f32 to vector<2x16xf32>
    %104 = arith.subf %103, %94 : vector<2x16xf32>
    %105 = arith.mulf %104, %102 : vector<2x16xf32>
    %106 = arith.mulf %94, %22 : vector<2x16xf32>
    %107 = arith.addf %105, %106 : vector<2x16xf32>
    %108 = vector.broadcast %32 : vector<2x1xf32> to vector<2x16xf32>
    %109 = arith.mulf %72, %108 : vector<2x16xf32>
    %110 = vector.broadcast %35 : vector<2x1xf32> to vector<2x16xf32>
    %111 = arith.mulf %107, %110 : vector<2x16xf32>
    %112 = vector.shape_cast %109 : vector<2x16xf32> to vector<2x1x16xf32>
    %c0_39 = arith.constant 0 : index
    %113 = arith.index_cast %c0_i32 : i32 to index
    %c0_40 = arith.constant 0 : index
    %114 = vector.load %arg18[%c0_39, %113, %c0_40] : memref<2x8x32xf32, #tpu.memory_space<vmem>>, vector<2x1x16xf32>
    tpu.vector_store %arg18[%c0_39, %113, %c0_40], %112 {strides = array<i32>} : memref<2x8x32xf32, #tpu.memory_space<vmem>>, vector<2x1x16xf32>,
    %115 = vector.shape_cast %111 : vector<2x16xf32> to vector<2x1x16xf32>
    %c0_41 = arith.constant 0 : index
    %116 = arith.index_cast %23 : i32 to index
    %c16 = arith.constant 16 : index
    %117 = vector.load %arg18[%c0_41, %116, %c16] : memref<2x8x32xf32, #tpu.memory_space<vmem>>, vector<2x1x16xf32>
    tpu.vector_store %arg18[%c0_41, %116, %c16], %115 {strides = array<i32>} : memref<2x8x32xf32, #tpu.memory_space<vmem>>, vector<2x1x16xf32>,
    %118 = vector.broadcast %32 : vector<2x1xf32> to vector<2x16xf32>
    %119 = arith.mulf %118, %72 : vector<2x16xf32>
    %cst_42 = arith.constant 1.000000e+00 : f32
    %120 = vector.broadcast %cst_42 : f32 to vector<2x1xf32>
    %121 = arith.subf %120, %32 : vector<2x1xf32>
    %122 = vector.broadcast %121 : vector<2x1xf32> to vector<2x16xf32>
    %123 = arith.mulf %122, %22 : vector<2x16xf32>
    %124 = arith.addf %119, %123 : vector<2x16xf32>
    %125 = vector.broadcast %35 : vector<2x1xf32> to vector<2x16xf32>
    %126 = arith.mulf %125, %107 : vector<2x16xf32>
    %cst_43 = arith.constant 1.000000e+00 : f32
    %127 = vector.broadcast %cst_43 : f32 to vector<2x1xf32>
    %128 = arith.subf %127, %35 : vector<2x1xf32>
    %129 = vector.broadcast %128 : vector<2x1xf32> to vector<2x16xf32>
    %130 = arith.mulf %129, %22 : vector<2x16xf32>
    %131 = arith.addf %126, %130 : vector<2x16xf32>
    %c1_i32 = arith.constant 1 : i32
    %c7_i32_44 = arith.constant 7 : i32
    %132 = arith.subi %c7_i32_44, %c1_i32 : i32
    %c0_45 = arith.constant 0 : index
    %133 = arith.index_cast %c1_i32 : i32 to index
    %c0_46 = arith.constant 0 : index
    %134 = vector.load %arg17[%c0_45, %133, %c0_46] : memref<2x8x96xf32, #tpu.memory_space<vmem>>, vector<2x1x48xf32>
    %135 = vector.shape_cast %134 : vector<2x1x48xf32> to vector<2x48xf32>
    %c0_47 = arith.constant 0 : index
    %136 = arith.index_cast %132 : i32 to index
    %c48_48 = arith.constant 48 : index
    %137 = vector.load %arg17[%c0_47, %136, %c48_48] : memref<2x8x96xf32, #tpu.memory_space<vmem>>, vector<2x1x48xf32>
    %138 = vector.shape_cast %137 : vector<2x1x48xf32> to vector<2x48xf32>
    %c0_49 = arith.constant 0 : index
    %139 = arith.index_cast %c1_i32 : i32 to index
    %c0_50 = arith.constant 0 : index
    %140 = vector.load %arg19[%c0_49, %139, %c0_50] : memref<2x8x1xf32, #tpu.memory_space<vmem>>, vector<2x1x1xf32>
    %141 = vector.shape_cast %140 : vector<2x1x1xf32> to vector<2x1xf32>
    %c0_51 = arith.constant 0 : index
    %142 = arith.index_cast %132 : i32 to index
    %c0_52 = arith.constant 0 : index
    %143 = vector.load %arg19[%c0_51, %142, %c0_52] : memref<2x8x1xf32, #tpu.memory_space<vmem>>, vector<2x1x1xf32>
    %144 = vector.shape_cast %143 : vector<2x1x1xf32> to vector<2x1xf32>
    %cst_53 = arith.constant dense<0.000000e+00> : vector<2x48xf32>
    %145 = tpu.matmul %124, %18, %cst_53 {dimension_numbers = #tpu.dot_dimension_numbers<[1], [0], [0], [1], [0, 0, 1, 1], [], []>} : vector<2x16xf32>, vector<16x48xf32>, vector<2x48xf32> -> vector<2x48xf32>
    %cst_54 = arith.constant dense<0.000000e+00> : vector<2x48xf32>
    %146 = tpu.matmul %131, %19, %cst_54 {dimension_numbers = #tpu.dot_dimension_numbers<[1], [0], [0], [1], [0, 0, 1, 1], [], []>} : vector<2x16xf32>, vector<16x48xf32>, vector<2x48xf32> -> vector<2x48xf32>
    %147 = vector.extract_strided_slice %135 {offsets = [0, 0], sizes = [2, 16], strides = [1, 1]} : vector<2x48xf32> to vector<2x16xf32>
    %148 = vector.extract_strided_slice %145 {offsets = [0, 0], sizes = [2, 16], strides = [1, 1]} : vector<2x48xf32> to vector<2x16xf32>
    %149 = arith.addf %147, %148 : vector<2x16xf32>
    %150 = vector.extract_strided_slice %20 {offsets = [0, 0], sizes = [1, 16], strides = [1, 1]} : vector<1x48xf32> to vector<1x16xf32>
    %151 = vector.broadcast %150 : vector<1x16xf32> to vector<2x16xf32>
    %152 = arith.addf %149, %151 : vector<2x16xf32>
    %153 = arith.negf %152 : vector<2x16xf32>
    %154 = math.exp %153 : vector<2x16xf32>
    %cst_55 = arith.constant 1.000000e+00 : f32
    %155 = vector.broadcast %cst_55 : f32 to vector<2x16xf32>
    %156 = arith.addf %155, %154 : vector<2x16xf32>
    %157 = arith.divf %155, %156 : vector<2x16xf32>
    %158 = vector.extract_strided_slice %135 {offsets = [0, 16], sizes = [2, 16], strides = [1, 1]} : vector<2x48xf32> to vector<2x16xf32>
    %159 = vector.extract_strided_slice %145 {offsets = [0, 16], sizes = [2, 16], strides = [1, 1]} : vector<2x48xf32> to vector<2x16xf32>
    %160 = arith.addf %158, %159 : vector<2x16xf32>
    %161 = vector.extract_strided_slice %20 {offsets = [0, 16], sizes = [1, 16], strides = [1, 1]} : vector<1x48xf32> to vector<1x16xf32>
    %162 = vector.broadcast %161 : vector<1x16xf32> to vector<2x16xf32>
    %163 = arith.addf %160, %162 : vector<2x16xf32>
    %164 = arith.negf %163 : vector<2x16xf32>
    %165 = math.exp %164 : vector<2x16xf32>
    %cst_56 = arith.constant 1.000000e+00 : f32
    %166 = vector.broadcast %cst_56 : f32 to vector<2x16xf32>
    %167 = arith.addf %166, %165 : vector<2x16xf32>
    %168 = arith.divf %166, %167 : vector<2x16xf32>
    %169 = vector.extract_strided_slice %135 {offsets = [0, 32], sizes = [2, 16], strides = [1, 1]} : vector<2x48xf32> to vector<2x16xf32>
    %170 = vector.extract_strided_slice %145 {offsets = [0, 32], sizes = [2, 16], strides = [1, 1]} : vector<2x48xf32> to vector<2x16xf32>
    %171 = vector.extract_strided_slice %20 {offsets = [0, 32], sizes = [1, 16], strides = [1, 1]} : vector<1x48xf32> to vector<1x16xf32>
    %172 = vector.broadcast %171 : vector<1x16xf32> to vector<2x16xf32>
    %173 = arith.addf %170, %172 : vector<2x16xf32>
    %174 = arith.mulf %157, %173 : vector<2x16xf32>
    %175 = arith.addf %169, %174 : vector<2x16xf32>
    %176 = math.tanh %175 : vector<2x16xf32>
    %cst_57 = arith.constant 1.000000e+00 : f32
    %177 = vector.broadcast %cst_57 : f32 to vector<2x16xf32>
    %178 = arith.subf %177, %168 : vector<2x16xf32>
    %179 = arith.mulf %178, %176 : vector<2x16xf32>
    %180 = arith.mulf %168, %124 : vector<2x16xf32>
    %181 = arith.addf %179, %180 : vector<2x16xf32>
    %182 = vector.extract_strided_slice %138 {offsets = [0, 0], sizes = [2, 16], strides = [1, 1]} : vector<2x48xf32> to vector<2x16xf32>
    %183 = vector.extract_strided_slice %146 {offsets = [0, 0], sizes = [2, 16], strides = [1, 1]} : vector<2x48xf32> to vector<2x16xf32>
    %184 = arith.addf %182, %183 : vector<2x16xf32>
    %185 = vector.extract_strided_slice %21 {offsets = [0, 0], sizes = [1, 16], strides = [1, 1]} : vector<1x48xf32> to vector<1x16xf32>
    %186 = vector.broadcast %185 : vector<1x16xf32> to vector<2x16xf32>
    %187 = arith.addf %184, %186 : vector<2x16xf32>
    %188 = arith.negf %187 : vector<2x16xf32>
    %189 = math.exp %188 : vector<2x16xf32>
    %cst_58 = arith.constant 1.000000e+00 : f32
    %190 = vector.broadcast %cst_58 : f32 to vector<2x16xf32>
    %191 = arith.addf %190, %189 : vector<2x16xf32>
    %192 = arith.divf %190, %191 : vector<2x16xf32>
    %193 = vector.extract_strided_slice %138 {offsets = [0, 16], sizes = [2, 16], strides = [1, 1]} : vector<2x48xf32> to vector<2x16xf32>
    %194 = vector.extract_strided_slice %146 {offsets = [0, 16], sizes = [2, 16], strides = [1, 1]} : vector<2x48xf32> to vector<2x16xf32>
    %195 = arith.addf %193, %194 : vector<2x16xf32>
    %196 = vector.extract_strided_slice %21 {offsets = [0, 16], sizes = [1, 16], strides = [1, 1]} : vector<1x48xf32> to vector<1x16xf32>
    %197 = vector.broadcast %196 : vector<1x16xf32> to vector<2x16xf32>
    %198 = arith.addf %195, %197 : vector<2x16xf32>
    %199 = arith.negf %198 : vector<2x16xf32>
    %200 = math.exp %199 : vector<2x16xf32>
    %cst_59 = arith.constant 1.000000e+00 : f32
    %201 = vector.broadcast %cst_59 : f32 to vector<2x16xf32>
    %202 = arith.addf %201, %200 : vector<2x16xf32>
    %203 = arith.divf %201, %202 : vector<2x16xf32>
    %204 = vector.extract_strided_slice %138 {offsets = [0, 32], sizes = [2, 16], strides = [1, 1]} : vector<2x48xf32> to vector<2x16xf32>
    %205 = vector.extract_strided_slice %146 {offsets = [0, 32], sizes = [2, 16], strides = [1, 1]} : vector<2x48xf32> to vector<2x16xf32>
    %206 = vector.extract_strided_slice %21 {offsets = [0, 32], sizes = [1, 16], strides = [1, 1]} : vector<1x48xf32> to vector<1x16xf32>
    %207 = vector.broadcast %206 : vector<1x16xf32> to vector<2x16xf32>
    %208 = arith.addf %205, %207 : vector<2x16xf32>
    %209 = arith.mulf %192, %208 : vector<2x16xf32>
    %210 = arith.addf %204, %209 : vector<2x16xf32>
    %211 = math.tanh %210 : vector<2x16xf32>
    %cst_60 = arith.constant 1.000000e+00 : f32
    %212 = vector.broadcast %cst_60 : f32 to vector<2x16xf32>
    %213 = arith.subf %212, %203 : vector<2x16xf32>
    %214 = arith.mulf %213, %211 : vector<2x16xf32>
    %215 = arith.mulf %203, %131 : vector<2x16xf32>
    %216 = arith.addf %214, %215 : vector<2x16xf32>
    %217 = vector.broadcast %141 : vector<2x1xf32> to vector<2x16xf32>
    %218 = arith.mulf %181, %217 : vector<2x16xf32>
    %219 = vector.broadcast %144 : vector<2x1xf32> to vector<2x16xf32>
    %220 = arith.mulf %216, %219 : vector<2x16xf32>
    %221 = vector.shape_cast %218 : vector<2x16xf32> to vector<2x1x16xf32>
    %c0_61 = arith.constant 0 : index
    %222 = arith.index_cast %c1_i32 : i32 to index
    %c0_62 = arith.constant 0 : index
    %223 = vector.load %arg18[%c0_61, %222, %c0_62] : memref<2x8x32xf32, #tpu.memory_space<vmem>>, vector<2x1x16xf32>
    tpu.vector_store %arg18[%c0_61, %222, %c0_62], %221 {strides = array<i32>} : memref<2x8x32xf32, #tpu.memory_space<vmem>>, vector<2x1x16xf32>,
    %224 = vector.shape_cast %220 : vector<2x16xf32> to vector<2x1x16xf32>
    %c0_63 = arith.constant 0 : index
    %225 = arith.index_cast %132 : i32 to index
    %c16_64 = arith.constant 16 : index
    %226 = vector.load %arg18[%c0_63, %225, %c16_64] : memref<2x8x32xf32, #tpu.memory_space<vmem>>, vector<2x1x16xf32>
    tpu.vector_store %arg18[%c0_63, %225, %c16_64], %224 {strides = array<i32>} : memref<2x8x32xf32, #tpu.memory_space<vmem>>, vector<2x1x16xf32>,
    %227 = vector.broadcast %141 : vector<2x1xf32> to vector<2x16xf32>
    %228 = arith.mulf %227, %181 : vector<2x16xf32>
    %cst_65 = arith.constant 1.000000e+00 : f32
    %229 = vector.broadcast %cst_65 : f32 to vector<2x1xf32>
    %230 = arith.subf %229, %141 : vector<2x1xf32>
    %231 = vector.broadcast %230 : vector<2x1xf32> to vector<2x16xf32>
    %232 = arith.mulf %231, %124 : vector<2x16xf32>
    %233 = arith.addf %228, %232 : vector<2x16xf32>
    %234 = vector.broadcast %144 : vector<2x1xf32> to vector<2x16xf32>
    %235 = arith.mulf %234, %216 : vector<2x16xf32>
    %cst_66 = arith.constant 1.000000e+00 : f32
    %236 = vector.broadcast %cst_66 : f32 to vector<2x1xf32>
    %237 = arith.subf %236, %144 : vector<2x1xf32>
    %238 = vector.broadcast %237 : vector<2x1xf32> to vector<2x16xf32>
    %239 = arith.mulf %238, %131 : vector<2x16xf32>
    %240 = arith.addf %235, %239 : vector<2x16xf32>
    %c2_i32 = arith.constant 2 : i32
    %c7_i32_67 = arith.constant 7 : i32
    %241 = arith.subi %c7_i32_67, %c2_i32 : i32
    %c0_68 = arith.constant 0 : index
    %242 = arith.index_cast %c2_i32 : i32 to index
    %c0_69 = arith.constant 0 : index
    %243 = vector.load %arg17[%c0_68, %242, %c0_69] : memref<2x8x96xf32, #tpu.memory_space<vmem>>, vector<2x1x48xf32>
    %244 = vector.shape_cast %243 : vector<2x1x48xf32> to vector<2x48xf32>
    %c0_70 = arith.constant 0 : index
    %245 = arith.index_cast %241 : i32 to index
    %c48_71 = arith.constant 48 : index
    %246 = vector.load %arg17[%c0_70, %245, %c48_71] : memref<2x8x96xf32, #tpu.memory_space<vmem>>, vector<2x1x48xf32>
    %247 = vector.shape_cast %246 : vector<2x1x48xf32> to vector<2x48xf32>
    %c0_72 = arith.constant 0 : index
    %248 = arith.index_cast %c2_i32 : i32 to index
    %c0_73 = arith.constant 0 : index
    %249 = vector.load %arg19[%c0_72, %248, %c0_73] : memref<2x8x1xf32, #tpu.memory_space<vmem>>, vector<2x1x1xf32>
    %250 = vector.shape_cast %249 : vector<2x1x1xf32> to vector<2x1xf32>
    %c0_74 = arith.constant 0 : index
    %251 = arith.index_cast %241 : i32 to index
    %c0_75 = arith.constant 0 : index
    %252 = vector.load %arg19[%c0_74, %251, %c0_75] : memref<2x8x1xf32, #tpu.memory_space<vmem>>, vector<2x1x1xf32>
    %253 = vector.shape_cast %252 : vector<2x1x1xf32> to vector<2x1xf32>
    %cst_76 = arith.constant dense<0.000000e+00> : vector<2x48xf32>
    %254 = tpu.matmul %233, %18, %cst_76 {dimension_numbers = #tpu.dot_dimension_numbers<[1], [0], [0], [1], [0, 0, 1, 1], [], []>} : vector<2x16xf32>, vector<16x48xf32>, vector<2x48xf32> -> vector<2x48xf32>
    %cst_77 = arith.constant dense<0.000000e+00> : vector<2x48xf32>
    %255 = tpu.matmul %240, %19, %cst_77 {dimension_numbers = #tpu.dot_dimension_numbers<[1], [0], [0], [1], [0, 0, 1, 1], [], []>} : vector<2x16xf32>, vector<16x48xf32>, vector<2x48xf32> -> vector<2x48xf32>
    %256 = vector.extract_strided_slice %244 {offsets = [0, 0], sizes = [2, 16], strides = [1, 1]} : vector<2x48xf32> to vector<2x16xf32>
    %257 = vector.extract_strided_slice %254 {offsets = [0, 0], sizes = [2, 16], strides = [1, 1]} : vector<2x48xf32> to vector<2x16xf32>
    %258 = arith.addf %256, %257 : vector<2x16xf32>
    %259 = vector.extract_strided_slice %20 {offsets = [0, 0], sizes = [1, 16], strides = [1, 1]} : vector<1x48xf32> to vector<1x16xf32>
    %260 = vector.broadcast %259 : vector<1x16xf32> to vector<2x16xf32>
    %261 = arith.addf %258, %260 : vector<2x16xf32>
    %262 = arith.negf %261 : vector<2x16xf32>
    %263 = math.exp %262 : vector<2x16xf32>
    %cst_78 = arith.constant 1.000000e+00 : f32
    %264 = vector.broadcast %cst_78 : f32 to vector<2x16xf32>
    %265 = arith.addf %264, %263 : vector<2x16xf32>
    %266 = arith.divf %264, %265 : vector<2x16xf32>
    %267 = vector.extract_strided_slice %244 {offsets = [0, 16], sizes = [2, 16], strides = [1, 1]} : vector<2x48xf32> to vector<2x16xf32>
    %268 = vector.extract_strided_slice %254 {offsets = [0, 16], sizes = [2, 16], strides = [1, 1]} : vector<2x48xf32> to vector<2x16xf32>
    %269 = arith.addf %267, %268 : vector<2x16xf32>
    %270 = vector.extract_strided_slice %20 {offsets = [0, 16], sizes = [1, 16], strides = [1, 1]} : vector<1x48xf32> to vector<1x16xf32>
    %271 = vector.broadcast %270 : vector<1x16xf32> to vector<2x16xf32>
    %272 = arith.addf %269, %271 : vector<2x16xf32>
    %273 = arith.negf %272 : vector<2x16xf32>
    %274 = math.exp %273 : vector<2x16xf32>
    %cst_79 = arith.constant 1.000000e+00 : f32
    %275 = vector.broadcast %cst_79 : f32 to vector<2x16xf32>
    %276 = arith.addf %275, %274 : vector<2x16xf32>
    %277 = arith.divf %275, %276 : vector<2x16xf32>
    %278 = vector.extract_strided_slice %244 {offsets = [0, 32], sizes = [2, 16], strides = [1, 1]} : vector<2x48xf32> to vector<2x16xf32>
    %279 = vector.extract_strided_slice %254 {offsets = [0, 32], sizes = [2, 16], strides = [1, 1]} : vector<2x48xf32> to vector<2x16xf32>
    %280 = vector.extract_strided_slice %20 {offsets = [0, 32], sizes = [1, 16], strides = [1, 1]} : vector<1x48xf32> to vector<1x16xf32>
    %281 = vector.broadcast %280 : vector<1x16xf32> to vector<2x16xf32>
    %282 = arith.addf %279, %281 : vector<2x16xf32>
    %283 = arith.mulf %266, %282 : vector<2x16xf32>
    %284 = arith.addf %278, %283 : vector<2x16xf32>
    %285 = math.tanh %284 : vector<2x16xf32>
    %cst_80 = arith.constant 1.000000e+00 : f32
    %286 = vector.broadcast %cst_80 : f32 to vector<2x16xf32>
    %287 = arith.subf %286, %277 : vector<2x16xf32>
    %288 = arith.mulf %287, %285 : vector<2x16xf32>
    %289 = arith.mulf %277, %233 : vector<2x16xf32>
    %290 = arith.addf %288, %289 : vector<2x16xf32>
    %291 = vector.extract_strided_slice %247 {offsets = [0, 0], sizes = [2, 16], strides = [1, 1]} : vector<2x48xf32> to vector<2x16xf32>
    %292 = vector.extract_strided_slice %255 {offsets = [0, 0], sizes = [2, 16], strides = [1, 1]} : vector<2x48xf32> to vector<2x16xf32>
    %293 = arith.addf %291, %292 : vector<2x16xf32>
    %294 = vector.extract_strided_slice %21 {offsets = [0, 0], sizes = [1, 16], strides = [1, 1]} : vector<1x48xf32> to vector<1x16xf32>
    %295 = vector.broadcast %294 : vector<1x16xf32> to vector<2x16xf32>
    %296 = arith.addf %293, %295 : vector<2x16xf32>
    %297 = arith.negf %296 : vector<2x16xf32>
    %298 = math.exp %297 : vector<2x16xf32>
    %cst_81 = arith.constant 1.000000e+00 : f32
    %299 = vector.broadcast %cst_81 : f32 to vector<2x16xf32>
    %300 = arith.addf %299, %298 : vector<2x16xf32>
    %301 = arith.divf %299, %300 : vector<2x16xf32>
    %302 = vector.extract_strided_slice %247 {offsets = [0, 16], sizes = [2, 16], strides = [1, 1]} : vector<2x48xf32> to vector<2x16xf32>
    %303 = vector.extract_strided_slice %255 {offsets = [0, 16], sizes = [2, 16], strides = [1, 1]} : vector<2x48xf32> to vector<2x16xf32>
    %304 = arith.addf %302, %303 : vector<2x16xf32>
    %305 = vector.extract_strided_slice %21 {offsets = [0, 16], sizes = [1, 16], strides = [1, 1]} : vector<1x48xf32> to vector<1x16xf32>
    %306 = vector.broadcast %305 : vector<1x16xf32> to vector<2x16xf32>
    %307 = arith.addf %304, %306 : vector<2x16xf32>
    %308 = arith.negf %307 : vector<2x16xf32>
    %309 = math.exp %308 : vector<2x16xf32>
    %cst_82 = arith.constant 1.000000e+00 : f32
    %310 = vector.broadcast %cst_82 : f32 to vector<2x16xf32>
    %311 = arith.addf %310, %309 : vector<2x16xf32>
    %312 = arith.divf %310, %311 : vector<2x16xf32>
    %313 = vector.extract_strided_slice %247 {offsets = [0, 32], sizes = [2, 16], strides = [1, 1]} : vector<2x48xf32> to vector<2x16xf32>
    %314 = vector.extract_strided_slice %255 {offsets = [0, 32], sizes = [2, 16], strides = [1, 1]} : vector<2x48xf32> to vector<2x16xf32>
    %315 = vector.extract_strided_slice %21 {offsets = [0, 32], sizes = [1, 16], strides = [1, 1]} : vector<1x48xf32> to vector<1x16xf32>
    %316 = vector.broadcast %315 : vector<1x16xf32> to vector<2x16xf32>
    %317 = arith.addf %314, %316 : vector<2x16xf32>
    %318 = arith.mulf %301, %317 : vector<2x16xf32>
    %319 = arith.addf %313, %318 : vector<2x16xf32>
    %320 = math.tanh %319 : vector<2x16xf32>
    %cst_83 = arith.constant 1.000000e+00 : f32
    %321 = vector.broadcast %cst_83 : f32 to vector<2x16xf32>
    %322 = arith.subf %321, %312 : vector<2x16xf32>
    %323 = arith.mulf %322, %320 : vector<2x16xf32>
    %324 = arith.mulf %312, %240 : vector<2x16xf32>
    %325 = arith.addf %323, %324 : vector<2x16xf32>
    %326 = vector.broadcast %250 : vector<2x1xf32> to vector<2x16xf32>
    %327 = arith.mulf %290, %326 : vector<2x16xf32>
    %328 = vector.broadcast %253 : vector<2x1xf32> to vector<2x16xf32>
    %329 = arith.mulf %325, %328 : vector<2x16xf32>
    %330 = vector.shape_cast %327 : vector<2x16xf32> to vector<2x1x16xf32>
    %c0_84 = arith.constant 0 : index
    %331 = arith.index_cast %c2_i32 : i32 to index
    %c0_85 = arith.constant 0 : index
    %332 = vector.load %arg18[%c0_84, %331, %c0_85] : memref<2x8x32xf32, #tpu.memory_space<vmem>>, vector<2x1x16xf32>
    tpu.vector_store %arg18[%c0_84, %331, %c0_85], %330 {strides = array<i32>} : memref<2x8x32xf32, #tpu.memory_space<vmem>>, vector<2x1x16xf32>,
    %333 = vector.shape_cast %329 : vector<2x16xf32> to vector<2x1x16xf32>
    %c0_86 = arith.constant 0 : index
    %334 = arith.index_cast %241 : i32 to index
    %c16_87 = arith.constant 16 : index
    %335 = vector.load %arg18[%c0_86, %334, %c16_87] : memref<2x8x32xf32, #tpu.memory_space<vmem>>, vector<2x1x16xf32>
    tpu.vector_store %arg18[%c0_86, %334, %c16_87], %333 {strides = array<i32>} : memref<2x8x32xf32, #tpu.memory_space<vmem>>, vector<2x1x16xf32>,
    %336 = vector.broadcast %250 : vector<2x1xf32> to vector<2x16xf32>
    %337 = arith.mulf %336, %290 : vector<2x16xf32>
    %cst_88 = arith.constant 1.000000e+00 : f32
    %338 = vector.broadcast %cst_88 : f32 to vector<2x1xf32>
    %339 = arith.subf %338, %250 : vector<2x1xf32>
    %340 = vector.broadcast %339 : vector<2x1xf32> to vector<2x16xf32>
    %341 = arith.mulf %340, %233 : vector<2x16xf32>
    %342 = arith.addf %337, %341 : vector<2x16xf32>
    %343 = vector.broadcast %253 : vector<2x1xf32> to vector<2x16xf32>
    %344 = arith.mulf %343, %325 : vector<2x16xf32>
    %cst_89 = arith.constant 1.000000e+00 : f32
    %345 = vector.broadcast %cst_89 : f32 to vector<2x1xf32>
    %346 = arith.subf %345, %253 : vector<2x1xf32>
    %347 = vector.broadcast %346 : vector<2x1xf32> to vector<2x16xf32>
    %348 = arith.mulf %347, %240 : vector<2x16xf32>
    %349 = arith.addf %344, %348 : vector<2x16xf32>
    %c3_i32 = arith.constant 3 : i32
    %c7_i32_90 = arith.constant 7 : i32
    %350 = arith.subi %c7_i32_90, %c3_i32 : i32
    %c0_91 = arith.constant 0 : index
    %351 = arith.index_cast %c3_i32 : i32 to index
    %c0_92 = arith.constant 0 : index
    %352 = vector.load %arg17[%c0_91, %351, %c0_92] : memref<2x8x96xf32, #tpu.memory_space<vmem>>, vector<2x1x48xf32>
    %353 = vector.shape_cast %352 : vector<2x1x48xf32> to vector<2x48xf32>
    %c0_93 = arith.constant 0 : index
    %354 = arith.index_cast %350 : i32 to index
    %c48_94 = arith.constant 48 : index
    %355 = vector.load %arg17[%c0_93, %354, %c48_94] : memref<2x8x96xf32, #tpu.memory_space<vmem>>, vector<2x1x48xf32>
    %356 = vector.shape_cast %355 : vector<2x1x48xf32> to vector<2x48xf32>
    %c0_95 = arith.constant 0 : index
    %357 = arith.index_cast %c3_i32 : i32 to index
    %c0_96 = arith.constant 0 : index
    %358 = vector.load %arg19[%c0_95, %357, %c0_96] : memref<2x8x1xf32, #tpu.memory_space<vmem>>, vector<2x1x1xf32>
    %359 = vector.shape_cast %358 : vector<2x1x1xf32> to vector<2x1xf32>
    %c0_97 = arith.constant 0 : index
    %360 = arith.index_cast %350 : i32 to index
    %c0_98 = arith.constant 0 : index
    %361 = vector.load %arg19[%c0_97, %360, %c0_98] : memref<2x8x1xf32, #tpu.memory_space<vmem>>, vector<2x1x1xf32>
    %362 = vector.shape_cast %361 : vector<2x1x1xf32> to vector<2x1xf32>
    %cst_99 = arith.constant dense<0.000000e+00> : vector<2x48xf32>
    %363 = tpu.matmul %342, %18, %cst_99 {dimension_numbers = #tpu.dot_dimension_numbers<[1], [0], [0], [1], [0, 0, 1, 1], [], []>} : vector<2x16xf32>, vector<16x48xf32>, vector<2x48xf32> -> vector<2x48xf32>
    %cst_100 = arith.constant dense<0.000000e+00> : vector<2x48xf32>
    %364 = tpu.matmul %349, %19, %cst_100 {dimension_numbers = #tpu.dot_dimension_numbers<[1], [0], [0], [1], [0, 0, 1, 1], [], []>} : vector<2x16xf32>, vector<16x48xf32>, vector<2x48xf32> -> vector<2x48xf32>
    %365 = vector.extract_strided_slice %353 {offsets = [0, 0], sizes = [2, 16], strides = [1, 1]} : vector<2x48xf32> to vector<2x16xf32>
    %366 = vector.extract_strided_slice %363 {offsets = [0, 0], sizes = [2, 16], strides = [1, 1]} : vector<2x48xf32> to vector<2x16xf32>
    %367 = arith.addf %365, %366 : vector<2x16xf32>
    %368 = vector.extract_strided_slice %20 {offsets = [0, 0], sizes = [1, 16], strides = [1, 1]} : vector<1x48xf32> to vector<1x16xf32>
    %369 = vector.broadcast %368 : vector<1x16xf32> to vector<2x16xf32>
    %370 = arith.addf %367, %369 : vector<2x16xf32>
    %371 = arith.negf %370 : vector<2x16xf32>
    %372 = math.exp %371 : vector<2x16xf32>
    %cst_101 = arith.constant 1.000000e+00 : f32
    %373 = vector.broadcast %cst_101 : f32 to vector<2x16xf32>
    %374 = arith.addf %373, %372 : vector<2x16xf32>
    %375 = arith.divf %373, %374 : vector<2x16xf32>
    %376 = vector.extract_strided_slice %353 {offsets = [0, 16], sizes = [2, 16], strides = [1, 1]} : vector<2x48xf32> to vector<2x16xf32>
    %377 = vector.extract_strided_slice %363 {offsets = [0, 16], sizes = [2, 16], strides = [1, 1]} : vector<2x48xf32> to vector<2x16xf32>
    %378 = arith.addf %376, %377 : vector<2x16xf32>
    %379 = vector.extract_strided_slice %20 {offsets = [0, 16], sizes = [1, 16], strides = [1, 1]} : vector<1x48xf32> to vector<1x16xf32>
    %380 = vector.broadcast %379 : vector<1x16xf32> to vector<2x16xf32>
    %381 = arith.addf %378, %380 : vector<2x16xf32>
    %382 = arith.negf %381 : vector<2x16xf32>
    %383 = math.exp %382 : vector<2x16xf32>
    %cst_102 = arith.constant 1.000000e+00 : f32
    %384 = vector.broadcast %cst_102 : f32 to vector<2x16xf32>
    %385 = arith.addf %384, %383 : vector<2x16xf32>
    %386 = arith.divf %384, %385 : vector<2x16xf32>
    %387 = vector.extract_strided_slice %353 {offsets = [0, 32], sizes = [2, 16], strides = [1, 1]} : vector<2x48xf32> to vector<2x16xf32>
    %388 = vector.extract_strided_slice %363 {offsets = [0, 32], sizes = [2, 16], strides = [1, 1]} : vector<2x48xf32> to vector<2x16xf32>
    %389 = vector.extract_strided_slice %20 {offsets = [0, 32], sizes = [1, 16], strides = [1, 1]} : vector<1x48xf32> to vector<1x16xf32>
    %390 = vector.broadcast %389 : vector<1x16xf32> to vector<2x16xf32>
    %391 = arith.addf %388, %390 : vector<2x16xf32>
    %392 = arith.mulf %375, %391 : vector<2x16xf32>
    %393 = arith.addf %387, %392 : vector<2x16xf32>
    %394 = math.tanh %393 : vector<2x16xf32>
    %cst_103 = arith.constant 1.000000e+00 : f32
    %395 = vector.broadcast %cst_103 : f32 to vector<2x16xf32>
    %396 = arith.subf %395, %386 : vector<2x16xf32>
    %397 = arith.mulf %396, %394 : vector<2x16xf32>
    %398 = arith.mulf %386, %342 : vector<2x16xf32>
    %399 = arith.addf %397, %398 : vector<2x16xf32>
    %400 = vector.extract_strided_slice %356 {offsets = [0, 0], sizes = [2, 16], strides = [1, 1]} : vector<2x48xf32> to vector<2x16xf32>
    %401 = vector.extract_strided_slice %364 {offsets = [0, 0], sizes = [2, 16], strides = [1, 1]} : vector<2x48xf32> to vector<2x16xf32>
    %402 = arith.addf %400, %401 : vector<2x16xf32>
    %403 = vector.extract_strided_slice %21 {offsets = [0, 0], sizes = [1, 16], strides = [1, 1]} : vector<1x48xf32> to vector<1x16xf32>
    %404 = vector.broadcast %403 : vector<1x16xf32> to vector<2x16xf32>
    %405 = arith.addf %402, %404 : vector<2x16xf32>
    %406 = arith.negf %405 : vector<2x16xf32>
    %407 = math.exp %406 : vector<2x16xf32>
    %cst_104 = arith.constant 1.000000e+00 : f32
    %408 = vector.broadcast %cst_104 : f32 to vector<2x16xf32>
    %409 = arith.addf %408, %407 : vector<2x16xf32>
    %410 = arith.divf %408, %409 : vector<2x16xf32>
    %411 = vector.extract_strided_slice %356 {offsets = [0, 16], sizes = [2, 16], strides = [1, 1]} : vector<2x48xf32> to vector<2x16xf32>
    %412 = vector.extract_strided_slice %364 {offsets = [0, 16], sizes = [2, 16], strides = [1, 1]} : vector<2x48xf32> to vector<2x16xf32>
    %413 = arith.addf %411, %412 : vector<2x16xf32>
    %414 = vector.extract_strided_slice %21 {offsets = [0, 16], sizes = [1, 16], strides = [1, 1]} : vector<1x48xf32> to vector<1x16xf32>
    %415 = vector.broadcast %414 : vector<1x16xf32> to vector<2x16xf32>
    %416 = arith.addf %413, %415 : vector<2x16xf32>
    %417 = arith.negf %416 : vector<2x16xf32>
    %418 = math.exp %417 : vector<2x16xf32>
    %cst_105 = arith.constant 1.000000e+00 : f32
    %419 = vector.broadcast %cst_105 : f32 to vector<2x16xf32>
    %420 = arith.addf %419, %418 : vector<2x16xf32>
    %421 = arith.divf %419, %420 : vector<2x16xf32>
    %422 = vector.extract_strided_slice %356 {offsets = [0, 32], sizes = [2, 16], strides = [1, 1]} : vector<2x48xf32> to vector<2x16xf32>
    %423 = vector.extract_strided_slice %364 {offsets = [0, 32], sizes = [2, 16], strides = [1, 1]} : vector<2x48xf32> to vector<2x16xf32>
    %424 = vector.extract_strided_slice %21 {offsets = [0, 32], sizes = [1, 16], strides = [1, 1]} : vector<1x48xf32> to vector<1x16xf32>
    %425 = vector.broadcast %424 : vector<1x16xf32> to vector<2x16xf32>
    %426 = arith.addf %423, %425 : vector<2x16xf32>
    %427 = arith.mulf %410, %426 : vector<2x16xf32>
    %428 = arith.addf %422, %427 : vector<2x16xf32>
    %429 = math.tanh %428 : vector<2x16xf32>
    %cst_106 = arith.constant 1.000000e+00 : f32
    %430 = vector.broadcast %cst_106 : f32 to vector<2x16xf32>
    %431 = arith.subf %430, %421 : vector<2x16xf32>
    %432 = arith.mulf %431, %429 : vector<2x16xf32>
    %433 = arith.mulf %421, %349 : vector<2x16xf32>
    %434 = arith.addf %432, %433 : vector<2x16xf32>
    %435 = vector.broadcast %359 : vector<2x1xf32> to vector<2x16xf32>
    %436 = arith.mulf %399, %435 : vector<2x16xf32>
    %437 = vector.broadcast %362 : vector<2x1xf32> to vector<2x16xf32>
    %438 = arith.mulf %434, %437 : vector<2x16xf32>
    %439 = vector.shape_cast %436 : vector<2x16xf32> to vector<2x1x16xf32>
    %c0_107 = arith.constant 0 : index
    %440 = arith.index_cast %c3_i32 : i32 to index
    %c0_108 = arith.constant 0 : index
    %441 = vector.load %arg18[%c0_107, %440, %c0_108] : memref<2x8x32xf32, #tpu.memory_space<vmem>>, vector<2x1x16xf32>
    tpu.vector_store %arg18[%c0_107, %440, %c0_108], %439 {strides = array<i32>} : memref<2x8x32xf32, #tpu.memory_space<vmem>>, vector<2x1x16xf32>,
    %442 = vector.shape_cast %438 : vector<2x16xf32> to vector<2x1x16xf32>
    %c0_109 = arith.constant 0 : index
    %443 = arith.index_cast %350 : i32 to index
    %c16_110 = arith.constant 16 : index
    %444 = vector.load %arg18[%c0_109, %443, %c16_110] : memref<2x8x32xf32, #tpu.memory_space<vmem>>, vector<2x1x16xf32>
    tpu.vector_store %arg18[%c0_109, %443, %c16_110], %442 {strides = array<i32>} : memref<2x8x32xf32, #tpu.memory_space<vmem>>, vector<2x1x16xf32>,
    %445 = vector.broadcast %359 : vector<2x1xf32> to vector<2x16xf32>
    %446 = arith.mulf %445, %399 : vector<2x16xf32>
    %cst_111 = arith.constant 1.000000e+00 : f32
    %447 = vector.broadcast %cst_111 : f32 to vector<2x1xf32>
    %448 = arith.subf %447, %359 : vector<2x1xf32>
    %449 = vector.broadcast %448 : vector<2x1xf32> to vector<2x16xf32>
    %450 = arith.mulf %449, %342 : vector<2x16xf32>
    %451 = arith.addf %446, %450 : vector<2x16xf32>
    %452 = vector.broadcast %362 : vector<2x1xf32> to vector<2x16xf32>
    %453 = arith.mulf %452, %434 : vector<2x16xf32>
    %cst_112 = arith.constant 1.000000e+00 : f32
    %454 = vector.broadcast %cst_112 : f32 to vector<2x1xf32>
    %455 = arith.subf %454, %362 : vector<2x1xf32>
    %456 = vector.broadcast %455 : vector<2x1xf32> to vector<2x16xf32>
    %457 = arith.mulf %456, %349 : vector<2x16xf32>
    %458 = arith.addf %453, %457 : vector<2x16xf32>
    %c4_i32 = arith.constant 4 : i32
    %c7_i32_113 = arith.constant 7 : i32
    %459 = arith.subi %c7_i32_113, %c4_i32 : i32
    %c0_114 = arith.constant 0 : index
    %460 = arith.index_cast %c4_i32 : i32 to index
    %c0_115 = arith.constant 0 : index
    %461 = vector.load %arg17[%c0_114, %460, %c0_115] : memref<2x8x96xf32, #tpu.memory_space<vmem>>, vector<2x1x48xf32>
    %462 = vector.shape_cast %461 : vector<2x1x48xf32> to vector<2x48xf32>
    %c0_116 = arith.constant 0 : index
    %463 = arith.index_cast %459 : i32 to index
    %c48_117 = arith.constant 48 : index
    %464 = vector.load %arg17[%c0_116, %463, %c48_117] : memref<2x8x96xf32, #tpu.memory_space<vmem>>, vector<2x1x48xf32>
    %465 = vector.shape_cast %464 : vector<2x1x48xf32> to vector<2x48xf32>
    %c0_118 = arith.constant 0 : index
    %466 = arith.index_cast %c4_i32 : i32 to index
    %c0_119 = arith.constant 0 : index
    %467 = vector.load %arg19[%c0_118, %466, %c0_119] : memref<2x8x1xf32, #tpu.memory_space<vmem>>, vector<2x1x1xf32>
    %468 = vector.shape_cast %467 : vector<2x1x1xf32> to vector<2x1xf32>
    %c0_120 = arith.constant 0 : index
    %469 = arith.index_cast %459 : i32 to index
    %c0_121 = arith.constant 0 : index
    %470 = vector.load %arg19[%c0_120, %469, %c0_121] : memref<2x8x1xf32, #tpu.memory_space<vmem>>, vector<2x1x1xf32>
    %471 = vector.shape_cast %470 : vector<2x1x1xf32> to vector<2x1xf32>
    %cst_122 = arith.constant dense<0.000000e+00> : vector<2x48xf32>
    %472 = tpu.matmul %451, %18, %cst_122 {dimension_numbers = #tpu.dot_dimension_numbers<[1], [0], [0], [1], [0, 0, 1, 1], [], []>} : vector<2x16xf32>, vector<16x48xf32>, vector<2x48xf32> -> vector<2x48xf32>
    %cst_123 = arith.constant dense<0.000000e+00> : vector<2x48xf32>
    %473 = tpu.matmul %458, %19, %cst_123 {dimension_numbers = #tpu.dot_dimension_numbers<[1], [0], [0], [1], [0, 0, 1, 1], [], []>} : vector<2x16xf32>, vector<16x48xf32>, vector<2x48xf32> -> vector<2x48xf32>
    %474 = vector.extract_strided_slice %462 {offsets = [0, 0], sizes = [2, 16], strides = [1, 1]} : vector<2x48xf32> to vector<2x16xf32>
    %475 = vector.extract_strided_slice %472 {offsets = [0, 0], sizes = [2, 16], strides = [1, 1]} : vector<2x48xf32> to vector<2x16xf32>
    %476 = arith.addf %474, %475 : vector<2x16xf32>
    %477 = vector.extract_strided_slice %20 {offsets = [0, 0], sizes = [1, 16], strides = [1, 1]} : vector<1x48xf32> to vector<1x16xf32>
    %478 = vector.broadcast %477 : vector<1x16xf32> to vector<2x16xf32>
    %479 = arith.addf %476, %478 : vector<2x16xf32>
    %480 = arith.negf %479 : vector<2x16xf32>
    %481 = math.exp %480 : vector<2x16xf32>
    %cst_124 = arith.constant 1.000000e+00 : f32
    %482 = vector.broadcast %cst_124 : f32 to vector<2x16xf32>
    %483 = arith.addf %482, %481 : vector<2x16xf32>
    %484 = arith.divf %482, %483 : vector<2x16xf32>
    %485 = vector.extract_strided_slice %462 {offsets = [0, 16], sizes = [2, 16], strides = [1, 1]} : vector<2x48xf32> to vector<2x16xf32>
    %486 = vector.extract_strided_slice %472 {offsets = [0, 16], sizes = [2, 16], strides = [1, 1]} : vector<2x48xf32> to vector<2x16xf32>
    %487 = arith.addf %485, %486 : vector<2x16xf32>
    %488 = vector.extract_strided_slice %20 {offsets = [0, 16], sizes = [1, 16], strides = [1, 1]} : vector<1x48xf32> to vector<1x16xf32>
    %489 = vector.broadcast %488 : vector<1x16xf32> to vector<2x16xf32>
    %490 = arith.addf %487, %489 : vector<2x16xf32>
    %491 = arith.negf %490 : vector<2x16xf32>
    %492 = math.exp %491 : vector<2x16xf32>
    %cst_125 = arith.constant 1.000000e+00 : f32
    %493 = vector.broadcast %cst_125 : f32 to vector<2x16xf32>
    %494 = arith.addf %493, %492 : vector<2x16xf32>
    %495 = arith.divf %493, %494 : vector<2x16xf32>
    %496 = vector.extract_strided_slice %462 {offsets = [0, 32], sizes = [2, 16], strides = [1, 1]} : vector<2x48xf32> to vector<2x16xf32>
    %497 = vector.extract_strided_slice %472 {offsets = [0, 32], sizes = [2, 16], strides = [1, 1]} : vector<2x48xf32> to vector<2x16xf32>
    %498 = vector.extract_strided_slice %20 {offsets = [0, 32], sizes = [1, 16], strides = [1, 1]} : vector<1x48xf32> to vector<1x16xf32>
    %499 = vector.broadcast %498 : vector<1x16xf32> to vector<2x16xf32>
    %500 = arith.addf %497, %499 : vector<2x16xf32>
    %501 = arith.mulf %484, %500 : vector<2x16xf32>
    %502 = arith.addf %496, %501 : vector<2x16xf32>
    %503 = math.tanh %502 : vector<2x16xf32>
    %cst_126 = arith.constant 1.000000e+00 : f32
    %504 = vector.broadcast %cst_126 : f32 to vector<2x16xf32>
    %505 = arith.subf %504, %495 : vector<2x16xf32>
    %506 = arith.mulf %505, %503 : vector<2x16xf32>
    %507 = arith.mulf %495, %451 : vector<2x16xf32>
    %508 = arith.addf %506, %507 : vector<2x16xf32>
    %509 = vector.extract_strided_slice %465 {offsets = [0, 0], sizes = [2, 16], strides = [1, 1]} : vector<2x48xf32> to vector<2x16xf32>
    %510 = vector.extract_strided_slice %473 {offsets = [0, 0], sizes = [2, 16], strides = [1, 1]} : vector<2x48xf32> to vector<2x16xf32>
    %511 = arith.addf %509, %510 : vector<2x16xf32>
    %512 = vector.extract_strided_slice %21 {offsets = [0, 0], sizes = [1, 16], strides = [1, 1]} : vector<1x48xf32> to vector<1x16xf32>
    %513 = vector.broadcast %512 : vector<1x16xf32> to vector<2x16xf32>
    %514 = arith.addf %511, %513 : vector<2x16xf32>
    %515 = arith.negf %514 : vector<2x16xf32>
    %516 = math.exp %515 : vector<2x16xf32>
    %cst_127 = arith.constant 1.000000e+00 : f32
    %517 = vector.broadcast %cst_127 : f32 to vector<2x16xf32>
    %518 = arith.addf %517, %516 : vector<2x16xf32>
    %519 = arith.divf %517, %518 : vector<2x16xf32>
    %520 = vector.extract_strided_slice %465 {offsets = [0, 16], sizes = [2, 16], strides = [1, 1]} : vector<2x48xf32> to vector<2x16xf32>
    %521 = vector.extract_strided_slice %473 {offsets = [0, 16], sizes = [2, 16], strides = [1, 1]} : vector<2x48xf32> to vector<2x16xf32>
    %522 = arith.addf %520, %521 : vector<2x16xf32>
    %523 = vector.extract_strided_slice %21 {offsets = [0, 16], sizes = [1, 16], strides = [1, 1]} : vector<1x48xf32> to vector<1x16xf32>
    %524 = vector.broadcast %523 : vector<1x16xf32> to vector<2x16xf32>
    %525 = arith.addf %522, %524 : vector<2x16xf32>
    %526 = arith.negf %525 : vector<2x16xf32>
    %527 = math.exp %526 : vector<2x16xf32>
    %cst_128 = arith.constant 1.000000e+00 : f32
    %528 = vector.broadcast %cst_128 : f32 to vector<2x16xf32>
    %529 = arith.addf %528, %527 : vector<2x16xf32>
    %530 = arith.divf %528, %529 : vector<2x16xf32>
    %531 = vector.extract_strided_slice %465 {offsets = [0, 32], sizes = [2, 16], strides = [1, 1]} : vector<2x48xf32> to vector<2x16xf32>
    %532 = vector.extract_strided_slice %473 {offsets = [0, 32], sizes = [2, 16], strides = [1, 1]} : vector<2x48xf32> to vector<2x16xf32>
    %533 = vector.extract_strided_slice %21 {offsets = [0, 32], sizes = [1, 16], strides = [1, 1]} : vector<1x48xf32> to vector<1x16xf32>
    %534 = vector.broadcast %533 : vector<1x16xf32> to vector<2x16xf32>
    %535 = arith.addf %532, %534 : vector<2x16xf32>
    %536 = arith.mulf %519, %535 : vector<2x16xf32>
    %537 = arith.addf %531, %536 : vector<2x16xf32>
    %538 = math.tanh %537 : vector<2x16xf32>
    %cst_129 = arith.constant 1.000000e+00 : f32
    %539 = vector.broadcast %cst_129 : f32 to vector<2x16xf32>
    %540 = arith.subf %539, %530 : vector<2x16xf32>
    %541 = arith.mulf %540, %538 : vector<2x16xf32>
    %542 = arith.mulf %530, %458 : vector<2x16xf32>
    %543 = arith.addf %541, %542 : vector<2x16xf32>
    %544 = vector.broadcast %468 : vector<2x1xf32> to vector<2x16xf32>
    %545 = arith.mulf %508, %544 : vector<2x16xf32>
    %546 = vector.broadcast %471 : vector<2x1xf32> to vector<2x16xf32>
    %547 = arith.mulf %543, %546 : vector<2x16xf32>
    %548 = vector.shape_cast %545 : vector<2x16xf32> to vector<2x1x16xf32>
    %c0_130 = arith.constant 0 : index
    %549 = arith.index_cast %c4_i32 : i32 to index
    %c0_131 = arith.constant 0 : index
    %550 = vector.load %arg18[%c0_130, %549, %c0_131] : memref<2x8x32xf32, #tpu.memory_space<vmem>>, vector<2x1x16xf32>
    tpu.vector_store %arg18[%c0_130, %549, %c0_131], %548 {strides = array<i32>} : memref<2x8x32xf32, #tpu.memory_space<vmem>>, vector<2x1x16xf32>,
    %551 = vector.shape_cast %547 : vector<2x16xf32> to vector<2x1x16xf32>
    %c0_132 = arith.constant 0 : index
    %552 = arith.index_cast %459 : i32 to index
    %c16_133 = arith.constant 16 : index
    %553 = vector.load %arg18[%c0_132, %552, %c16_133] : memref<2x8x32xf32, #tpu.memory_space<vmem>>, vector<2x1x16xf32>
    tpu.vector_store %arg18[%c0_132, %552, %c16_133], %551 {strides = array<i32>} : memref<2x8x32xf32, #tpu.memory_space<vmem>>, vector<2x1x16xf32>,
    %554 = vector.broadcast %468 : vector<2x1xf32> to vector<2x16xf32>
    %555 = arith.mulf %554, %508 : vector<2x16xf32>
    %cst_134 = arith.constant 1.000000e+00 : f32
    %556 = vector.broadcast %cst_134 : f32 to vector<2x1xf32>
    %557 = arith.subf %556, %468 : vector<2x1xf32>
    %558 = vector.broadcast %557 : vector<2x1xf32> to vector<2x16xf32>
    %559 = arith.mulf %558, %451 : vector<2x16xf32>
    %560 = arith.addf %555, %559 : vector<2x16xf32>
    %561 = vector.broadcast %471 : vector<2x1xf32> to vector<2x16xf32>
    %562 = arith.mulf %561, %543 : vector<2x16xf32>
    %cst_135 = arith.constant 1.000000e+00 : f32
    %563 = vector.broadcast %cst_135 : f32 to vector<2x1xf32>
    %564 = arith.subf %563, %471 : vector<2x1xf32>
    %565 = vector.broadcast %564 : vector<2x1xf32> to vector<2x16xf32>
    %566 = arith.mulf %565, %458 : vector<2x16xf32>
    %567 = arith.addf %562, %566 : vector<2x16xf32>
    %c5_i32 = arith.constant 5 : i32
    %c7_i32_136 = arith.constant 7 : i32
    %568 = arith.subi %c7_i32_136, %c5_i32 : i32
    %c0_137 = arith.constant 0 : index
    %569 = arith.index_cast %c5_i32 : i32 to index
    %c0_138 = arith.constant 0 : index
    %570 = vector.load %arg17[%c0_137, %569, %c0_138] : memref<2x8x96xf32, #tpu.memory_space<vmem>>, vector<2x1x48xf32>
    %571 = vector.shape_cast %570 : vector<2x1x48xf32> to vector<2x48xf32>
    %c0_139 = arith.constant 0 : index
    %572 = arith.index_cast %568 : i32 to index
    %c48_140 = arith.constant 48 : index
    %573 = vector.load %arg17[%c0_139, %572, %c48_140] : memref<2x8x96xf32, #tpu.memory_space<vmem>>, vector<2x1x48xf32>
    %574 = vector.shape_cast %573 : vector<2x1x48xf32> to vector<2x48xf32>
    %c0_141 = arith.constant 0 : index
    %575 = arith.index_cast %c5_i32 : i32 to index
    %c0_142 = arith.constant 0 : index
    %576 = vector.load %arg19[%c0_141, %575, %c0_142] : memref<2x8x1xf32, #tpu.memory_space<vmem>>, vector<2x1x1xf32>
    %577 = vector.shape_cast %576 : vector<2x1x1xf32> to vector<2x1xf32>
    %c0_143 = arith.constant 0 : index
    %578 = arith.index_cast %568 : i32 to index
    %c0_144 = arith.constant 0 : index
    %579 = vector.load %arg19[%c0_143, %578, %c0_144] : memref<2x8x1xf32, #tpu.memory_space<vmem>>, vector<2x1x1xf32>
    %580 = vector.shape_cast %579 : vector<2x1x1xf32> to vector<2x1xf32>
    %cst_145 = arith.constant dense<0.000000e+00> : vector<2x48xf32>
    %581 = tpu.matmul %560, %18, %cst_145 {dimension_numbers = #tpu.dot_dimension_numbers<[1], [0], [0], [1], [0, 0, 1, 1], [], []>} : vector<2x16xf32>, vector<16x48xf32>, vector<2x48xf32> -> vector<2x48xf32>
    %cst_146 = arith.constant dense<0.000000e+00> : vector<2x48xf32>
    %582 = tpu.matmul %567, %19, %cst_146 {dimension_numbers = #tpu.dot_dimension_numbers<[1], [0], [0], [1], [0, 0, 1, 1], [], []>} : vector<2x16xf32>, vector<16x48xf32>, vector<2x48xf32> -> vector<2x48xf32>
    %583 = vector.extract_strided_slice %571 {offsets = [0, 0], sizes = [2, 16], strides = [1, 1]} : vector<2x48xf32> to vector<2x16xf32>
    %584 = vector.extract_strided_slice %581 {offsets = [0, 0], sizes = [2, 16], strides = [1, 1]} : vector<2x48xf32> to vector<2x16xf32>
    %585 = arith.addf %583, %584 : vector<2x16xf32>
    %586 = vector.extract_strided_slice %20 {offsets = [0, 0], sizes = [1, 16], strides = [1, 1]} : vector<1x48xf32> to vector<1x16xf32>
    %587 = vector.broadcast %586 : vector<1x16xf32> to vector<2x16xf32>
    %588 = arith.addf %585, %587 : vector<2x16xf32>
    %589 = arith.negf %588 : vector<2x16xf32>
    %590 = math.exp %589 : vector<2x16xf32>
    %cst_147 = arith.constant 1.000000e+00 : f32
    %591 = vector.broadcast %cst_147 : f32 to vector<2x16xf32>
    %592 = arith.addf %591, %590 : vector<2x16xf32>
    %593 = arith.divf %591, %592 : vector<2x16xf32>
    %594 = vector.extract_strided_slice %571 {offsets = [0, 16], sizes = [2, 16], strides = [1, 1]} : vector<2x48xf32> to vector<2x16xf32>
    %595 = vector.extract_strided_slice %581 {offsets = [0, 16], sizes = [2, 16], strides = [1, 1]} : vector<2x48xf32> to vector<2x16xf32>
    %596 = arith.addf %594, %595 : vector<2x16xf32>
    %597 = vector.extract_strided_slice %20 {offsets = [0, 16], sizes = [1, 16], strides = [1, 1]} : vector<1x48xf32> to vector<1x16xf32>
    %598 = vector.broadcast %597 : vector<1x16xf32> to vector<2x16xf32>
    %599 = arith.addf %596, %598 : vector<2x16xf32>
    %600 = arith.negf %599 : vector<2x16xf32>
    %601 = math.exp %600 : vector<2x16xf32>
    %cst_148 = arith.constant 1.000000e+00 : f32
    %602 = vector.broadcast %cst_148 : f32 to vector<2x16xf32>
    %603 = arith.addf %602, %601 : vector<2x16xf32>
    %604 = arith.divf %602, %603 : vector<2x16xf32>
    %605 = vector.extract_strided_slice %571 {offsets = [0, 32], sizes = [2, 16], strides = [1, 1]} : vector<2x48xf32> to vector<2x16xf32>
    %606 = vector.extract_strided_slice %581 {offsets = [0, 32], sizes = [2, 16], strides = [1, 1]} : vector<2x48xf32> to vector<2x16xf32>
    %607 = vector.extract_strided_slice %20 {offsets = [0, 32], sizes = [1, 16], strides = [1, 1]} : vector<1x48xf32> to vector<1x16xf32>
    %608 = vector.broadcast %607 : vector<1x16xf32> to vector<2x16xf32>
    %609 = arith.addf %606, %608 : vector<2x16xf32>
    %610 = arith.mulf %593, %609 : vector<2x16xf32>
    %611 = arith.addf %605, %610 : vector<2x16xf32>
    %612 = math.tanh %611 : vector<2x16xf32>
    %cst_149 = arith.constant 1.000000e+00 : f32
    %613 = vector.broadcast %cst_149 : f32 to vector<2x16xf32>
    %614 = arith.subf %613, %604 : vector<2x16xf32>
    %615 = arith.mulf %614, %612 : vector<2x16xf32>
    %616 = arith.mulf %604, %560 : vector<2x16xf32>
    %617 = arith.addf %615, %616 : vector<2x16xf32>
    %618 = vector.extract_strided_slice %574 {offsets = [0, 0], sizes = [2, 16], strides = [1, 1]} : vector<2x48xf32> to vector<2x16xf32>
    %619 = vector.extract_strided_slice %582 {offsets = [0, 0], sizes = [2, 16], strides = [1, 1]} : vector<2x48xf32> to vector<2x16xf32>
    %620 = arith.addf %618, %619 : vector<2x16xf32>
    %621 = vector.extract_strided_slice %21 {offsets = [0, 0], sizes = [1, 16], strides = [1, 1]} : vector<1x48xf32> to vector<1x16xf32>
    %622 = vector.broadcast %621 : vector<1x16xf32> to vector<2x16xf32>
    %623 = arith.addf %620, %622 : vector<2x16xf32>
    %624 = arith.negf %623 : vector<2x16xf32>
    %625 = math.exp %624 : vector<2x16xf32>
    %cst_150 = arith.constant 1.000000e+00 : f32
    %626 = vector.broadcast %cst_150 : f32 to vector<2x16xf32>
    %627 = arith.addf %626, %625 : vector<2x16xf32>
    %628 = arith.divf %626, %627 : vector<2x16xf32>
    %629 = vector.extract_strided_slice %574 {offsets = [0, 16], sizes = [2, 16], strides = [1, 1]} : vector<2x48xf32> to vector<2x16xf32>
    %630 = vector.extract_strided_slice %582 {offsets = [0, 16], sizes = [2, 16], strides = [1, 1]} : vector<2x48xf32> to vector<2x16xf32>
    %631 = arith.addf %629, %630 : vector<2x16xf32>
    %632 = vector.extract_strided_slice %21 {offsets = [0, 16], sizes = [1, 16], strides = [1, 1]} : vector<1x48xf32> to vector<1x16xf32>
    %633 = vector.broadcast %632 : vector<1x16xf32> to vector<2x16xf32>
    %634 = arith.addf %631, %633 : vector<2x16xf32>
    %635 = arith.negf %634 : vector<2x16xf32>
    %636 = math.exp %635 : vector<2x16xf32>
    %cst_151 = arith.constant 1.000000e+00 : f32
    %637 = vector.broadcast %cst_151 : f32 to vector<2x16xf32>
    %638 = arith.addf %637, %636 : vector<2x16xf32>
    %639 = arith.divf %637, %638 : vector<2x16xf32>
    %640 = vector.extract_strided_slice %574 {offsets = [0, 32], sizes = [2, 16], strides = [1, 1]} : vector<2x48xf32> to vector<2x16xf32>
    %641 = vector.extract_strided_slice %582 {offsets = [0, 32], sizes = [2, 16], strides = [1, 1]} : vector<2x48xf32> to vector<2x16xf32>
    %642 = vector.extract_strided_slice %21 {offsets = [0, 32], sizes = [1, 16], strides = [1, 1]} : vector<1x48xf32> to vector<1x16xf32>
    %643 = vector.broadcast %642 : vector<1x16xf32> to vector<2x16xf32>
    %644 = arith.addf %641, %643 : vector<2x16xf32>
    %645 = arith.mulf %628, %644 : vector<2x16xf32>
    %646 = arith.addf %640, %645 : vector<2x16xf32>
    %647 = math.tanh %646 : vector<2x16xf32>
    %cst_152 = arith.constant 1.000000e+00 : f32
    %648 = vector.broadcast %cst_152 : f32 to vector<2x16xf32>
    %649 = arith.subf %648, %639 : vector<2x16xf32>
    %650 = arith.mulf %649, %647 : vector<2x16xf32>
    %651 = arith.mulf %639, %567 : vector<2x16xf32>
    %652 = arith.addf %650, %651 : vector<2x16xf32>
    %653 = vector.broadcast %577 : vector<2x1xf32> to vector<2x16xf32>
    %654 = arith.mulf %617, %653 : vector<2x16xf32>
    %655 = vector.broadcast %580 : vector<2x1xf32> to vector<2x16xf32>
    %656 = arith.mulf %652, %655 : vector<2x16xf32>
    %657 = vector.shape_cast %654 : vector<2x16xf32> to vector<2x1x16xf32>
    %c0_153 = arith.constant 0 : index
    %658 = arith.index_cast %c5_i32 : i32 to index
    %c0_154 = arith.constant 0 : index
    %659 = vector.load %arg18[%c0_153, %658, %c0_154] : memref<2x8x32xf32, #tpu.memory_space<vmem>>, vector<2x1x16xf32>
    tpu.vector_store %arg18[%c0_153, %658, %c0_154], %657 {strides = array<i32>} : memref<2x8x32xf32, #tpu.memory_space<vmem>>, vector<2x1x16xf32>,
    %660 = vector.shape_cast %656 : vector<2x16xf32> to vector<2x1x16xf32>
    %c0_155 = arith.constant 0 : index
    %661 = arith.index_cast %568 : i32 to index
    %c16_156 = arith.constant 16 : index
    %662 = vector.load %arg18[%c0_155, %661, %c16_156] : memref<2x8x32xf32, #tpu.memory_space<vmem>>, vector<2x1x16xf32>
    tpu.vector_store %arg18[%c0_155, %661, %c16_156], %660 {strides = array<i32>} : memref<2x8x32xf32, #tpu.memory_space<vmem>>, vector<2x1x16xf32>,
    %663 = vector.broadcast %577 : vector<2x1xf32> to vector<2x16xf32>
    %664 = arith.mulf %663, %617 : vector<2x16xf32>
    %cst_157 = arith.constant 1.000000e+00 : f32
    %665 = vector.broadcast %cst_157 : f32 to vector<2x1xf32>
    %666 = arith.subf %665, %577 : vector<2x1xf32>
    %667 = vector.broadcast %666 : vector<2x1xf32> to vector<2x16xf32>
    %668 = arith.mulf %667, %560 : vector<2x16xf32>
    %669 = arith.addf %664, %668 : vector<2x16xf32>
    %670 = vector.broadcast %580 : vector<2x1xf32> to vector<2x16xf32>
    %671 = arith.mulf %670, %652 : vector<2x16xf32>
    %cst_158 = arith.constant 1.000000e+00 : f32
    %672 = vector.broadcast %cst_158 : f32 to vector<2x1xf32>
    %673 = arith.subf %672, %580 : vector<2x1xf32>
    %674 = vector.broadcast %673 : vector<2x1xf32> to vector<2x16xf32>
    %675 = arith.mulf %674, %567 : vector<2x16xf32>
    %676 = arith.addf %671, %675 : vector<2x16xf32>
    %c6_i32 = arith.constant 6 : i32
    %c7_i32_159 = arith.constant 7 : i32
    %677 = arith.subi %c7_i32_159, %c6_i32 : i32
    %c0_160 = arith.constant 0 : index
    %678 = arith.index_cast %c6_i32 : i32 to index
    %c0_161 = arith.constant 0 : index
    %679 = vector.load %arg17[%c0_160, %678, %c0_161] : memref<2x8x96xf32, #tpu.memory_space<vmem>>, vector<2x1x48xf32>
    %680 = vector.shape_cast %679 : vector<2x1x48xf32> to vector<2x48xf32>
    %c0_162 = arith.constant 0 : index
    %681 = arith.index_cast %677 : i32 to index
    %c48_163 = arith.constant 48 : index
    %682 = vector.load %arg17[%c0_162, %681, %c48_163] : memref<2x8x96xf32, #tpu.memory_space<vmem>>, vector<2x1x48xf32>
    %683 = vector.shape_cast %682 : vector<2x1x48xf32> to vector<2x48xf32>
    %c0_164 = arith.constant 0 : index
    %684 = arith.index_cast %c6_i32 : i32 to index
    %c0_165 = arith.constant 0 : index
    %685 = vector.load %arg19[%c0_164, %684, %c0_165] : memref<2x8x1xf32, #tpu.memory_space<vmem>>, vector<2x1x1xf32>
    %686 = vector.shape_cast %685 : vector<2x1x1xf32> to vector<2x1xf32>
    %c0_166 = arith.constant 0 : index
    %687 = arith.index_cast %677 : i32 to index
    %c0_167 = arith.constant 0 : index
    %688 = vector.load %arg19[%c0_166, %687, %c0_167] : memref<2x8x1xf32, #tpu.memory_space<vmem>>, vector<2x1x1xf32>
    %689 = vector.shape_cast %688 : vector<2x1x1xf32> to vector<2x1xf32>
    %cst_168 = arith.constant dense<0.000000e+00> : vector<2x48xf32>
    %690 = tpu.matmul %669, %18, %cst_168 {dimension_numbers = #tpu.dot_dimension_numbers<[1], [0], [0], [1], [0, 0, 1, 1], [], []>} : vector<2x16xf32>, vector<16x48xf32>, vector<2x48xf32> -> vector<2x48xf32>
    %cst_169 = arith.constant dense<0.000000e+00> : vector<2x48xf32>
    %691 = tpu.matmul %676, %19, %cst_169 {dimension_numbers = #tpu.dot_dimension_numbers<[1], [0], [0], [1], [0, 0, 1, 1], [], []>} : vector<2x16xf32>, vector<16x48xf32>, vector<2x48xf32> -> vector<2x48xf32>
    %692 = vector.extract_strided_slice %680 {offsets = [0, 0], sizes = [2, 16], strides = [1, 1]} : vector<2x48xf32> to vector<2x16xf32>
    %693 = vector.extract_strided_slice %690 {offsets = [0, 0], sizes = [2, 16], strides = [1, 1]} : vector<2x48xf32> to vector<2x16xf32>
    %694 = arith.addf %692, %693 : vector<2x16xf32>
    %695 = vector.extract_strided_slice %20 {offsets = [0, 0], sizes = [1, 16], strides = [1, 1]} : vector<1x48xf32> to vector<1x16xf32>
    %696 = vector.broadcast %695 : vector<1x16xf32> to vector<2x16xf32>
    %697 = arith.addf %694, %696 : vector<2x16xf32>
    %698 = arith.negf %697 : vector<2x16xf32>
    %699 = math.exp %698 : vector<2x16xf32>
    %cst_170 = arith.constant 1.000000e+00 : f32
    %700 = vector.broadcast %cst_170 : f32 to vector<2x16xf32>
    %701 = arith.addf %700, %699 : vector<2x16xf32>
    %702 = arith.divf %700, %701 : vector<2x16xf32>
    %703 = vector.extract_strided_slice %680 {offsets = [0, 16], sizes = [2, 16], strides = [1, 1]} : vector<2x48xf32> to vector<2x16xf32>
    %704 = vector.extract_strided_slice %690 {offsets = [0, 16], sizes = [2, 16], strides = [1, 1]} : vector<2x48xf32> to vector<2x16xf32>
    %705 = arith.addf %703, %704 : vector<2x16xf32>
    %706 = vector.extract_strided_slice %20 {offsets = [0, 16], sizes = [1, 16], strides = [1, 1]} : vector<1x48xf32> to vector<1x16xf32>
    %707 = vector.broadcast %706 : vector<1x16xf32> to vector<2x16xf32>
    %708 = arith.addf %705, %707 : vector<2x16xf32>
    %709 = arith.negf %708 : vector<2x16xf32>
    %710 = math.exp %709 : vector<2x16xf32>
    %cst_171 = arith.constant 1.000000e+00 : f32
    %711 = vector.broadcast %cst_171 : f32 to vector<2x16xf32>
    %712 = arith.addf %711, %710 : vector<2x16xf32>
    %713 = arith.divf %711, %712 : vector<2x16xf32>
    %714 = vector.extract_strided_slice %680 {offsets = [0, 32], sizes = [2, 16], strides = [1, 1]} : vector<2x48xf32> to vector<2x16xf32>
    %715 = vector.extract_strided_slice %690 {offsets = [0, 32], sizes = [2, 16], strides = [1, 1]} : vector<2x48xf32> to vector<2x16xf32>
    %716 = vector.extract_strided_slice %20 {offsets = [0, 32], sizes = [1, 16], strides = [1, 1]} : vector<1x48xf32> to vector<1x16xf32>
    %717 = vector.broadcast %716 : vector<1x16xf32> to vector<2x16xf32>
    %718 = arith.addf %715, %717 : vector<2x16xf32>
    %719 = arith.mulf %702, %718 : vector<2x16xf32>
    %720 = arith.addf %714, %719 : vector<2x16xf32>
    %721 = math.tanh %720 : vector<2x16xf32>
    %cst_172 = arith.constant 1.000000e+00 : f32
    %722 = vector.broadcast %cst_172 : f32 to vector<2x16xf32>
    %723 = arith.subf %722, %713 : vector<2x16xf32>
    %724 = arith.mulf %723, %721 : vector<2x16xf32>
    %725 = arith.mulf %713, %669 : vector<2x16xf32>
    %726 = arith.addf %724, %725 : vector<2x16xf32>
    %727 = vector.extract_strided_slice %683 {offsets = [0, 0], sizes = [2, 16], strides = [1, 1]} : vector<2x48xf32> to vector<2x16xf32>
    %728 = vector.extract_strided_slice %691 {offsets = [0, 0], sizes = [2, 16], strides = [1, 1]} : vector<2x48xf32> to vector<2x16xf32>
    %729 = arith.addf %727, %728 : vector<2x16xf32>
    %730 = vector.extract_strided_slice %21 {offsets = [0, 0], sizes = [1, 16], strides = [1, 1]} : vector<1x48xf32> to vector<1x16xf32>
    %731 = vector.broadcast %730 : vector<1x16xf32> to vector<2x16xf32>
    %732 = arith.addf %729, %731 : vector<2x16xf32>
    %733 = arith.negf %732 : vector<2x16xf32>
    %734 = math.exp %733 : vector<2x16xf32>
    %cst_173 = arith.constant 1.000000e+00 : f32
    %735 = vector.broadcast %cst_173 : f32 to vector<2x16xf32>
    %736 = arith.addf %735, %734 : vector<2x16xf32>
    %737 = arith.divf %735, %736 : vector<2x16xf32>
    %738 = vector.extract_strided_slice %683 {offsets = [0, 16], sizes = [2, 16], strides = [1, 1]} : vector<2x48xf32> to vector<2x16xf32>
    %739 = vector.extract_strided_slice %691 {offsets = [0, 16], sizes = [2, 16], strides = [1, 1]} : vector<2x48xf32> to vector<2x16xf32>
    %740 = arith.addf %738, %739 : vector<2x16xf32>
    %741 = vector.extract_strided_slice %21 {offsets = [0, 16], sizes = [1, 16], strides = [1, 1]} : vector<1x48xf32> to vector<1x16xf32>
    %742 = vector.broadcast %741 : vector<1x16xf32> to vector<2x16xf32>
    %743 = arith.addf %740, %742 : vector<2x16xf32>
    %744 = arith.negf %743 : vector<2x16xf32>
    %745 = math.exp %744 : vector<2x16xf32>
    %cst_174 = arith.constant 1.000000e+00 : f32
    %746 = vector.broadcast %cst_174 : f32 to vector<2x16xf32>
    %747 = arith.addf %746, %745 : vector<2x16xf32>
    %748 = arith.divf %746, %747 : vector<2x16xf32>
    %749 = vector.extract_strided_slice %683 {offsets = [0, 32], sizes = [2, 16], strides = [1, 1]} : vector<2x48xf32> to vector<2x16xf32>
    %750 = vector.extract_strided_slice %691 {offsets = [0, 32], sizes = [2, 16], strides = [1, 1]} : vector<2x48xf32> to vector<2x16xf32>
    %751 = vector.extract_strided_slice %21 {offsets = [0, 32], sizes = [1, 16], strides = [1, 1]} : vector<1x48xf32> to vector<1x16xf32>
    %752 = vector.broadcast %751 : vector<1x16xf32> to vector<2x16xf32>
    %753 = arith.addf %750, %752 : vector<2x16xf32>
    %754 = arith.mulf %737, %753 : vector<2x16xf32>
    %755 = arith.addf %749, %754 : vector<2x16xf32>
    %756 = math.tanh %755 : vector<2x16xf32>
    %cst_175 = arith.constant 1.000000e+00 : f32
    %757 = vector.broadcast %cst_175 : f32 to vector<2x16xf32>
    %758 = arith.subf %757, %748 : vector<2x16xf32>
    %759 = arith.mulf %758, %756 : vector<2x16xf32>
    %760 = arith.mulf %748, %676 : vector<2x16xf32>
    %761 = arith.addf %759, %760 : vector<2x16xf32>
    %762 = vector.broadcast %686 : vector<2x1xf32> to vector<2x16xf32>
    %763 = arith.mulf %726, %762 : vector<2x16xf32>
    %764 = vector.broadcast %689 : vector<2x1xf32> to vector<2x16xf32>
    %765 = arith.mulf %761, %764 : vector<2x16xf32>
    %766 = vector.shape_cast %763 : vector<2x16xf32> to vector<2x1x16xf32>
    %c0_176 = arith.constant 0 : index
    %767 = arith.index_cast %c6_i32 : i32 to index
    %c0_177 = arith.constant 0 : index
    %768 = vector.load %arg18[%c0_176, %767, %c0_177] : memref<2x8x32xf32, #tpu.memory_space<vmem>>, vector<2x1x16xf32>
    tpu.vector_store %arg18[%c0_176, %767, %c0_177], %766 {strides = array<i32>} : memref<2x8x32xf32, #tpu.memory_space<vmem>>, vector<2x1x16xf32>,
    %769 = vector.shape_cast %765 : vector<2x16xf32> to vector<2x1x16xf32>
    %c0_178 = arith.constant 0 : index
    %770 = arith.index_cast %677 : i32 to index
    %c16_179 = arith.constant 16 : index
    %771 = vector.load %arg18[%c0_178, %770, %c16_179] : memref<2x8x32xf32, #tpu.memory_space<vmem>>, vector<2x1x16xf32>
    tpu.vector_store %arg18[%c0_178, %770, %c16_179], %769 {strides = array<i32>} : memref<2x8x32xf32, #tpu.memory_space<vmem>>, vector<2x1x16xf32>,
    %772 = vector.broadcast %686 : vector<2x1xf32> to vector<2x16xf32>
    %773 = arith.mulf %772, %726 : vector<2x16xf32>
    %cst_180 = arith.constant 1.000000e+00 : f32
    %774 = vector.broadcast %cst_180 : f32 to vector<2x1xf32>
    %775 = arith.subf %774, %686 : vector<2x1xf32>
    %776 = vector.broadcast %775 : vector<2x1xf32> to vector<2x16xf32>
    %777 = arith.mulf %776, %669 : vector<2x16xf32>
    %778 = arith.addf %773, %777 : vector<2x16xf32>
    %779 = vector.broadcast %689 : vector<2x1xf32> to vector<2x16xf32>
    %780 = arith.mulf %779, %761 : vector<2x16xf32>
    %cst_181 = arith.constant 1.000000e+00 : f32
    %781 = vector.broadcast %cst_181 : f32 to vector<2x1xf32>
    %782 = arith.subf %781, %689 : vector<2x1xf32>
    %783 = vector.broadcast %782 : vector<2x1xf32> to vector<2x16xf32>
    %784 = arith.mulf %783, %676 : vector<2x16xf32>
    %785 = arith.addf %780, %784 : vector<2x16xf32>
    %c7_i32_182 = arith.constant 7 : i32
    %c7_i32_183 = arith.constant 7 : i32
    %786 = arith.subi %c7_i32_183, %c7_i32_182 : i32
    %c0_184 = arith.constant 0 : index
    %787 = arith.index_cast %c7_i32_182 : i32 to index
    %c0_185 = arith.constant 0 : index
    %788 = vector.load %arg17[%c0_184, %787, %c0_185] : memref<2x8x96xf32, #tpu.memory_space<vmem>>, vector<2x1x48xf32>
    %789 = vector.shape_cast %788 : vector<2x1x48xf32> to vector<2x48xf32>
    %c0_186 = arith.constant 0 : index
    %790 = arith.index_cast %786 : i32 to index
    %c48_187 = arith.constant 48 : index
    %791 = vector.load %arg17[%c0_186, %790, %c48_187] : memref<2x8x96xf32, #tpu.memory_space<vmem>>, vector<2x1x48xf32>
    %792 = vector.shape_cast %791 : vector<2x1x48xf32> to vector<2x48xf32>
    %c0_188 = arith.constant 0 : index
    %793 = arith.index_cast %c7_i32_182 : i32 to index
    %c0_189 = arith.constant 0 : index
    %794 = vector.load %arg19[%c0_188, %793, %c0_189] : memref<2x8x1xf32, #tpu.memory_space<vmem>>, vector<2x1x1xf32>
    %795 = vector.shape_cast %794 : vector<2x1x1xf32> to vector<2x1xf32>
    %c0_190 = arith.constant 0 : index
    %796 = arith.index_cast %786 : i32 to index
    %c0_191 = arith.constant 0 : index
    %797 = vector.load %arg19[%c0_190, %796, %c0_191] : memref<2x8x1xf32, #tpu.memory_space<vmem>>, vector<2x1x1xf32>
    %798 = vector.shape_cast %797 : vector<2x1x1xf32> to vector<2x1xf32>
    %cst_192 = arith.constant dense<0.000000e+00> : vector<2x48xf32>
    %799 = tpu.matmul %778, %18, %cst_192 {dimension_numbers = #tpu.dot_dimension_numbers<[1], [0], [0], [1], [0, 0, 1, 1], [], []>} : vector<2x16xf32>, vector<16x48xf32>, vector<2x48xf32> -> vector<2x48xf32>
    %cst_193 = arith.constant dense<0.000000e+00> : vector<2x48xf32>
    %800 = tpu.matmul %785, %19, %cst_193 {dimension_numbers = #tpu.dot_dimension_numbers<[1], [0], [0], [1], [0, 0, 1, 1], [], []>} : vector<2x16xf32>, vector<16x48xf32>, vector<2x48xf32> -> vector<2x48xf32>
    %801 = vector.extract_strided_slice %789 {offsets = [0, 0], sizes = [2, 16], strides = [1, 1]} : vector<2x48xf32> to vector<2x16xf32>
    %802 = vector.extract_strided_slice %799 {offsets = [0, 0], sizes = [2, 16], strides = [1, 1]} : vector<2x48xf32> to vector<2x16xf32>
    %803 = arith.addf %801, %802 : vector<2x16xf32>
    %804 = vector.extract_strided_slice %20 {offsets = [0, 0], sizes = [1, 16], strides = [1, 1]} : vector<1x48xf32> to vector<1x16xf32>
    %805 = vector.broadcast %804 : vector<1x16xf32> to vector<2x16xf32>
    %806 = arith.addf %803, %805 : vector<2x16xf32>
    %807 = arith.negf %806 : vector<2x16xf32>
    %808 = math.exp %807 : vector<2x16xf32>
    %cst_194 = arith.constant 1.000000e+00 : f32
    %809 = vector.broadcast %cst_194 : f32 to vector<2x16xf32>
    %810 = arith.addf %809, %808 : vector<2x16xf32>
    %811 = arith.divf %809, %810 : vector<2x16xf32>
    %812 = vector.extract_strided_slice %789 {offsets = [0, 16], sizes = [2, 16], strides = [1, 1]} : vector<2x48xf32> to vector<2x16xf32>
    %813 = vector.extract_strided_slice %799 {offsets = [0, 16], sizes = [2, 16], strides = [1, 1]} : vector<2x48xf32> to vector<2x16xf32>
    %814 = arith.addf %812, %813 : vector<2x16xf32>
    %815 = vector.extract_strided_slice %20 {offsets = [0, 16], sizes = [1, 16], strides = [1, 1]} : vector<1x48xf32> to vector<1x16xf32>
    %816 = vector.broadcast %815 : vector<1x16xf32> to vector<2x16xf32>
    %817 = arith.addf %814, %816 : vector<2x16xf32>
    %818 = arith.negf %817 : vector<2x16xf32>
    %819 = math.exp %818 : vector<2x16xf32>
    %cst_195 = arith.constant 1.000000e+00 : f32
    %820 = vector.broadcast %cst_195 : f32 to vector<2x16xf32>
    %821 = arith.addf %820, %819 : vector<2x16xf32>
    %822 = arith.divf %820, %821 : vector<2x16xf32>
    %823 = vector.extract_strided_slice %789 {offsets = [0, 32], sizes = [2, 16], strides = [1, 1]} : vector<2x48xf32> to vector<2x16xf32>
    %824 = vector.extract_strided_slice %799 {offsets = [0, 32], sizes = [2, 16], strides = [1, 1]} : vector<2x48xf32> to vector<2x16xf32>
    %825 = vector.extract_strided_slice %20 {offsets = [0, 32], sizes = [1, 16], strides = [1, 1]} : vector<1x48xf32> to vector<1x16xf32>
    %826 = vector.broadcast %825 : vector<1x16xf32> to vector<2x16xf32>
    %827 = arith.addf %824, %826 : vector<2x16xf32>
    %828 = arith.mulf %811, %827 : vector<2x16xf32>
    %829 = arith.addf %823, %828 : vector<2x16xf32>
    %830 = math.tanh %829 : vector<2x16xf32>
    %cst_196 = arith.constant 1.000000e+00 : f32
    %831 = vector.broadcast %cst_196 : f32 to vector<2x16xf32>
    %832 = arith.subf %831, %822 : vector<2x16xf32>
    %833 = arith.mulf %832, %830 : vector<2x16xf32>
    %834 = arith.mulf %822, %778 : vector<2x16xf32>
    %835 = arith.addf %833, %834 : vector<2x16xf32>
    %836 = vector.extract_strided_slice %792 {offsets = [0, 0], sizes = [2, 16], strides = [1, 1]} : vector<2x48xf32> to vector<2x16xf32>
    %837 = vector.extract_strided_slice %800 {offsets = [0, 0], sizes = [2, 16], strides = [1, 1]} : vector<2x48xf32> to vector<2x16xf32>
    %838 = arith.addf %836, %837 : vector<2x16xf32>
    %839 = vector.extract_strided_slice %21 {offsets = [0, 0], sizes = [1, 16], strides = [1, 1]} : vector<1x48xf32> to vector<1x16xf32>
    %840 = vector.broadcast %839 : vector<1x16xf32> to vector<2x16xf32>
    %841 = arith.addf %838, %840 : vector<2x16xf32>
    %842 = arith.negf %841 : vector<2x16xf32>
    %843 = math.exp %842 : vector<2x16xf32>
    %cst_197 = arith.constant 1.000000e+00 : f32
    %844 = vector.broadcast %cst_197 : f32 to vector<2x16xf32>
    %845 = arith.addf %844, %843 : vector<2x16xf32>
    %846 = arith.divf %844, %845 : vector<2x16xf32>
    %847 = vector.extract_strided_slice %792 {offsets = [0, 16], sizes = [2, 16], strides = [1, 1]} : vector<2x48xf32> to vector<2x16xf32>
    %848 = vector.extract_strided_slice %800 {offsets = [0, 16], sizes = [2, 16], strides = [1, 1]} : vector<2x48xf32> to vector<2x16xf32>
    %849 = arith.addf %847, %848 : vector<2x16xf32>
    %850 = vector.extract_strided_slice %21 {offsets = [0, 16], sizes = [1, 16], strides = [1, 1]} : vector<1x48xf32> to vector<1x16xf32>
    %851 = vector.broadcast %850 : vector<1x16xf32> to vector<2x16xf32>
    %852 = arith.addf %849, %851 : vector<2x16xf32>
    %853 = arith.negf %852 : vector<2x16xf32>
    %854 = math.exp %853 : vector<2x16xf32>
    %cst_198 = arith.constant 1.000000e+00 : f32
    %855 = vector.broadcast %cst_198 : f32 to vector<2x16xf32>
    %856 = arith.addf %855, %854 : vector<2x16xf32>
    %857 = arith.divf %855, %856 : vector<2x16xf32>
    %858 = vector.extract_strided_slice %792 {offsets = [0, 32], sizes = [2, 16], strides = [1, 1]} : vector<2x48xf32> to vector<2x16xf32>
    %859 = vector.extract_strided_slice %800 {offsets = [0, 32], sizes = [2, 16], strides = [1, 1]} : vector<2x48xf32> to vector<2x16xf32>
    %860 = vector.extract_strided_slice %21 {offsets = [0, 32], sizes = [1, 16], strides = [1, 1]} : vector<1x48xf32> to vector<1x16xf32>
    %861 = vector.broadcast %860 : vector<1x16xf32> to vector<2x16xf32>
    %862 = arith.addf %859, %861 : vector<2x16xf32>
    %863 = arith.mulf %846, %862 : vector<2x16xf32>
    %864 = arith.addf %858, %863 : vector<2x16xf32>
    %865 = math.tanh %864 : vector<2x16xf32>
    %cst_199 = arith.constant 1.000000e+00 : f32
    %866 = vector.broadcast %cst_199 : f32 to vector<2x16xf32>
    %867 = arith.subf %866, %857 : vector<2x16xf32>
    %868 = arith.mulf %867, %865 : vector<2x16xf32>
    %869 = arith.mulf %857, %785 : vector<2x16xf32>
    %870 = arith.addf %868, %869 : vector<2x16xf32>
    %871 = vector.broadcast %795 : vector<2x1xf32> to vector<2x16xf32>
    %872 = arith.mulf %835, %871 : vector<2x16xf32>
    %873 = vector.broadcast %798 : vector<2x1xf32> to vector<2x16xf32>
    %874 = arith.mulf %870, %873 : vector<2x16xf32>
    %875 = vector.shape_cast %872 : vector<2x16xf32> to vector<2x1x16xf32>
    %c0_200 = arith.constant 0 : index
    %876 = arith.index_cast %c7_i32_182 : i32 to index
    %c0_201 = arith.constant 0 : index
    %877 = vector.load %arg18[%c0_200, %876, %c0_201] : memref<2x8x32xf32, #tpu.memory_space<vmem>>, vector<2x1x16xf32>
    tpu.vector_store %arg18[%c0_200, %876, %c0_201], %875 {strides = array<i32>} : memref<2x8x32xf32, #tpu.memory_space<vmem>>, vector<2x1x16xf32>,
    %878 = vector.shape_cast %874 : vector<2x16xf32> to vector<2x1x16xf32>
    %c0_202 = arith.constant 0 : index
    %879 = arith.index_cast %786 : i32 to index
    %c16_203 = arith.constant 16 : index
    %880 = vector.load %arg18[%c0_202, %879, %c16_203] : memref<2x8x32xf32, #tpu.memory_space<vmem>>, vector<2x1x16xf32>
    tpu.vector_store %arg18[%c0_202, %879, %c16_203], %878 {strides = array<i32>} : memref<2x8x32xf32, #tpu.memory_space<vmem>>, vector<2x1x16xf32>,
    %881 = vector.broadcast %795 : vector<2x1xf32> to vector<2x16xf32>
    %882 = arith.mulf %881, %835 : vector<2x16xf32>
    %cst_204 = arith.constant 1.000000e+00 : f32
    %883 = vector.broadcast %cst_204 : f32 to vector<2x1xf32>
    %884 = arith.subf %883, %795 : vector<2x1xf32>
    %885 = vector.broadcast %884 : vector<2x1xf32> to vector<2x16xf32>
    %886 = arith.mulf %885, %778 : vector<2x16xf32>
    %887 = arith.addf %882, %886 : vector<2x16xf32>
    %888 = vector.broadcast %798 : vector<2x1xf32> to vector<2x16xf32>
    %889 = arith.mulf %888, %870 : vector<2x16xf32>
    %cst_205 = arith.constant 1.000000e+00 : f32
    %890 = vector.broadcast %cst_205 : f32 to vector<2x1xf32>
    %891 = arith.subf %890, %798 : vector<2x1xf32>
    %892 = vector.broadcast %891 : vector<2x1xf32> to vector<2x16xf32>
    %893 = arith.mulf %892, %785 : vector<2x16xf32>
    %894 = arith.addf %889, %893 : vector<2x16xf32>
    %c8_i32 = arith.constant 8 : i32
    %c0_206 = arith.constant 0 : index
    %c0_207 = arith.constant 0 : index
    %c0_208 = arith.constant 0 : index
    %895 = vector.load %arg18[%c0_206, %c0_207, %c0_208] : memref<2x8x32xf32, #tpu.memory_space<vmem>>, vector<2x8x32xf32>
    %896 = vector.shape_cast %895 : vector<2x8x32xf32> to vector<16x32xf32>
    %897 = arith.truncf %896 : vector<16x32xf32> to vector<16x32xbf16>
    %c0_209 = arith.constant 0 : index
    %c0_210 = arith.constant 0 : index
    %898 = vector.load %arg9[%c0_209, %c0_210] : memref<32x96xbf16, #tpu.memory_space<vmem>>, vector<32x96xbf16>
    %cst_211 = arith.constant dense<0.000000e+00> : vector<16x96xf32>
    %899 = tpu.matmul %897, %898, %cst_211 {dimension_numbers = #tpu.dot_dimension_numbers<[1], [0], [0], [1], [0, 0, 1, 1], [], []>} : vector<16x32xbf16>, vector<32x96xbf16>, vector<16x96xf32> -> vector<16x96xf32>
    %c0_212 = arith.constant 0 : index
    %c0_213 = arith.constant 0 : index
    %900 = vector.load %arg10[%c0_212, %c0_213] : memref<1x96xf32, #tpu.memory_space<vmem>>, vector<1x96xf32>
    %901 = vector.broadcast %900 : vector<1x96xf32> to vector<16x96xf32>
    %902 = arith.addf %899, %901 : vector<16x96xf32>
    %903 = vector.shape_cast %902 : vector<16x96xf32> to vector<2x8x96xf32>
    %c0_214 = arith.constant 0 : index
    %c0_215 = arith.constant 0 : index
    %c0_216 = arith.constant 0 : index
    %904 = vector.load %arg17[%c0_214, %c0_215, %c0_216] : memref<2x8x96xf32, #tpu.memory_space<vmem>>, vector<2x8x96xf32>
    tpu.vector_store %arg17[%c0_214, %c0_215, %c0_216], %903 {strides = array<i32>} : memref<2x8x96xf32, #tpu.memory_space<vmem>>, vector<2x8x96xf32>,
    %c0_217 = arith.constant 0 : index
    %c0_218 = arith.constant 0 : index
    %905 = vector.load %arg11[%c0_217, %c0_218] : memref<16x48xf32, #tpu.memory_space<vmem>>, vector<16x48xf32>
    %c0_219 = arith.constant 0 : index
    %c0_220 = arith.constant 0 : index
    %906 = vector.load %arg13[%c0_219, %c0_220] : memref<16x48xf32, #tpu.memory_space<vmem>>, vector<16x48xf32>
    %c0_221 = arith.constant 0 : index
    %c0_222 = arith.constant 0 : index
    %907 = vector.load %arg12[%c0_221, %c0_222] : memref<1x48xf32, #tpu.memory_space<vmem>>, vector<1x48xf32>
    %c0_223 = arith.constant 0 : index
    %c0_224 = arith.constant 0 : index
    %908 = vector.load %arg14[%c0_223, %c0_224] : memref<1x48xf32, #tpu.memory_space<vmem>>, vector<1x48xf32>
    %cst_225 = arith.constant 0.000000e+00 : f32
    %909 = vector.broadcast %cst_225 : f32 to vector<2x16xf32>
    %c0_i32_226 = arith.constant 0 : i32
    %c7_i32_227 = arith.constant 7 : i32
    %910 = arith.subi %c7_i32_227, %c0_i32_226 : i32
    %c0_228 = arith.constant 0 : index
    %911 = arith.index_cast %c0_i32_226 : i32 to index
    %c0_229 = arith.constant 0 : index
    %912 = vector.load %arg17[%c0_228, %911, %c0_229] : memref<2x8x96xf32, #tpu.memory_space<vmem>>, vector<2x1x48xf32>
    %913 = vector.shape_cast %912 : vector<2x1x48xf32> to vector<2x48xf32>
    %c0_230 = arith.constant 0 : index
    %914 = arith.index_cast %910 : i32 to index
    %c48_231 = arith.constant 48 : index
    %915 = vector.load %arg17[%c0_230, %914, %c48_231] : memref<2x8x96xf32, #tpu.memory_space<vmem>>, vector<2x1x48xf32>
    %916 = vector.shape_cast %915 : vector<2x1x48xf32> to vector<2x48xf32>
    %c0_232 = arith.constant 0 : index
    %917 = arith.index_cast %c0_i32_226 : i32 to index
    %c0_233 = arith.constant 0 : index
    %918 = vector.load %arg19[%c0_232, %917, %c0_233] : memref<2x8x1xf32, #tpu.memory_space<vmem>>, vector<2x1x1xf32>
    %919 = vector.shape_cast %918 : vector<2x1x1xf32> to vector<2x1xf32>
    %c0_234 = arith.constant 0 : index
    %920 = arith.index_cast %910 : i32 to index
    %c0_235 = arith.constant 0 : index
    %921 = vector.load %arg19[%c0_234, %920, %c0_235] : memref<2x8x1xf32, #tpu.memory_space<vmem>>, vector<2x1x1xf32>
    %922 = vector.shape_cast %921 : vector<2x1x1xf32> to vector<2x1xf32>
    %cst_236 = arith.constant dense<0.000000e+00> : vector<2x48xf32>
    %923 = tpu.matmul %909, %905, %cst_236 {dimension_numbers = #tpu.dot_dimension_numbers<[1], [0], [0], [1], [0, 0, 1, 1], [], []>} : vector<2x16xf32>, vector<16x48xf32>, vector<2x48xf32> -> vector<2x48xf32>
    %cst_237 = arith.constant dense<0.000000e+00> : vector<2x48xf32>
    %924 = tpu.matmul %909, %906, %cst_237 {dimension_numbers = #tpu.dot_dimension_numbers<[1], [0], [0], [1], [0, 0, 1, 1], [], []>} : vector<2x16xf32>, vector<16x48xf32>, vector<2x48xf32> -> vector<2x48xf32>
    %925 = vector.extract_strided_slice %913 {offsets = [0, 0], sizes = [2, 16], strides = [1, 1]} : vector<2x48xf32> to vector<2x16xf32>
    %926 = vector.extract_strided_slice %923 {offsets = [0, 0], sizes = [2, 16], strides = [1, 1]} : vector<2x48xf32> to vector<2x16xf32>
    %927 = arith.addf %925, %926 : vector<2x16xf32>
    %928 = vector.extract_strided_slice %907 {offsets = [0, 0], sizes = [1, 16], strides = [1, 1]} : vector<1x48xf32> to vector<1x16xf32>
    %929 = vector.broadcast %928 : vector<1x16xf32> to vector<2x16xf32>
    %930 = arith.addf %927, %929 : vector<2x16xf32>
    %931 = arith.negf %930 : vector<2x16xf32>
    %932 = math.exp %931 : vector<2x16xf32>
    %cst_238 = arith.constant 1.000000e+00 : f32
    %933 = vector.broadcast %cst_238 : f32 to vector<2x16xf32>
    %934 = arith.addf %933, %932 : vector<2x16xf32>
    %935 = arith.divf %933, %934 : vector<2x16xf32>
    %936 = vector.extract_strided_slice %913 {offsets = [0, 16], sizes = [2, 16], strides = [1, 1]} : vector<2x48xf32> to vector<2x16xf32>
    %937 = vector.extract_strided_slice %923 {offsets = [0, 16], sizes = [2, 16], strides = [1, 1]} : vector<2x48xf32> to vector<2x16xf32>
    %938 = arith.addf %936, %937 : vector<2x16xf32>
    %939 = vector.extract_strided_slice %907 {offsets = [0, 16], sizes = [1, 16], strides = [1, 1]} : vector<1x48xf32> to vector<1x16xf32>
    %940 = vector.broadcast %939 : vector<1x16xf32> to vector<2x16xf32>
    %941 = arith.addf %938, %940 : vector<2x16xf32>
    %942 = arith.negf %941 : vector<2x16xf32>
    %943 = math.exp %942 : vector<2x16xf32>
    %cst_239 = arith.constant 1.000000e+00 : f32
    %944 = vector.broadcast %cst_239 : f32 to vector<2x16xf32>
    %945 = arith.addf %944, %943 : vector<2x16xf32>
    %946 = arith.divf %944, %945 : vector<2x16xf32>
    %947 = vector.extract_strided_slice %913 {offsets = [0, 32], sizes = [2, 16], strides = [1, 1]} : vector<2x48xf32> to vector<2x16xf32>
    %948 = vector.extract_strided_slice %923 {offsets = [0, 32], sizes = [2, 16], strides = [1, 1]} : vector<2x48xf32> to vector<2x16xf32>
    %949 = vector.extract_strided_slice %907 {offsets = [0, 32], sizes = [1, 16], strides = [1, 1]} : vector<1x48xf32> to vector<1x16xf32>
    %950 = vector.broadcast %949 : vector<1x16xf32> to vector<2x16xf32>
    %951 = arith.addf %948, %950 : vector<2x16xf32>
    %952 = arith.mulf %935, %951 : vector<2x16xf32>
    %953 = arith.addf %947, %952 : vector<2x16xf32>
    %954 = math.tanh %953 : vector<2x16xf32>
    %cst_240 = arith.constant 1.000000e+00 : f32
    %955 = vector.broadcast %cst_240 : f32 to vector<2x16xf32>
    %956 = arith.subf %955, %946 : vector<2x16xf32>
    %957 = arith.mulf %956, %954 : vector<2x16xf32>
    %958 = arith.mulf %946, %909 : vector<2x16xf32>
    %959 = arith.addf %957, %958 : vector<2x16xf32>
    %960 = vector.extract_strided_slice %916 {offsets = [0, 0], sizes = [2, 16], strides = [1, 1]} : vector<2x48xf32> to vector<2x16xf32>
    %961 = vector.extract_strided_slice %924 {offsets = [0, 0], sizes = [2, 16], strides = [1, 1]} : vector<2x48xf32> to vector<2x16xf32>
    %962 = arith.addf %960, %961 : vector<2x16xf32>
    %963 = vector.extract_strided_slice %908 {offsets = [0, 0], sizes = [1, 16], strides = [1, 1]} : vector<1x48xf32> to vector<1x16xf32>
    %964 = vector.broadcast %963 : vector<1x16xf32> to vector<2x16xf32>
    %965 = arith.addf %962, %964 : vector<2x16xf32>
    %966 = arith.negf %965 : vector<2x16xf32>
    %967 = math.exp %966 : vector<2x16xf32>
    %cst_241 = arith.constant 1.000000e+00 : f32
    %968 = vector.broadcast %cst_241 : f32 to vector<2x16xf32>
    %969 = arith.addf %968, %967 : vector<2x16xf32>
    %970 = arith.divf %968, %969 : vector<2x16xf32>
    %971 = vector.extract_strided_slice %916 {offsets = [0, 16], sizes = [2, 16], strides = [1, 1]} : vector<2x48xf32> to vector<2x16xf32>
    %972 = vector.extract_strided_slice %924 {offsets = [0, 16], sizes = [2, 16], strides = [1, 1]} : vector<2x48xf32> to vector<2x16xf32>
    %973 = arith.addf %971, %972 : vector<2x16xf32>
    %974 = vector.extract_strided_slice %908 {offsets = [0, 16], sizes = [1, 16], strides = [1, 1]} : vector<1x48xf32> to vector<1x16xf32>
    %975 = vector.broadcast %974 : vector<1x16xf32> to vector<2x16xf32>
    %976 = arith.addf %973, %975 : vector<2x16xf32>
    %977 = arith.negf %976 : vector<2x16xf32>
    %978 = math.exp %977 : vector<2x16xf32>
    %cst_242 = arith.constant 1.000000e+00 : f32
    %979 = vector.broadcast %cst_242 : f32 to vector<2x16xf32>
    %980 = arith.addf %979, %978 : vector<2x16xf32>
    %981 = arith.divf %979, %980 : vector<2x16xf32>
    %982 = vector.extract_strided_slice %916 {offsets = [0, 32], sizes = [2, 16], strides = [1, 1]} : vector<2x48xf32> to vector<2x16xf32>
    %983 = vector.extract_strided_slice %924 {offsets = [0, 32], sizes = [2, 16], strides = [1, 1]} : vector<2x48xf32> to vector<2x16xf32>
    %984 = vector.extract_strided_slice %908 {offsets = [0, 32], sizes = [1, 16], strides = [1, 1]} : vector<1x48xf32> to vector<1x16xf32>
    %985 = vector.broadcast %984 : vector<1x16xf32> to vector<2x16xf32>
    %986 = arith.addf %983, %985 : vector<2x16xf32>
    %987 = arith.mulf %970, %986 : vector<2x16xf32>
    %988 = arith.addf %982, %987 : vector<2x16xf32>
    %989 = math.tanh %988 : vector<2x16xf32>
    %cst_243 = arith.constant 1.000000e+00 : f32
    %990 = vector.broadcast %cst_243 : f32 to vector<2x16xf32>
    %991 = arith.subf %990, %981 : vector<2x16xf32>
    %992 = arith.mulf %991, %989 : vector<2x16xf32>
    %993 = arith.mulf %981, %909 : vector<2x16xf32>
    %994 = arith.addf %992, %993 : vector<2x16xf32>
    %995 = vector.broadcast %919 : vector<2x1xf32> to vector<2x16xf32>
    %996 = arith.mulf %959, %995 : vector<2x16xf32>
    %997 = vector.broadcast %922 : vector<2x1xf32> to vector<2x16xf32>
    %998 = arith.mulf %994, %997 : vector<2x16xf32>
    %999 = vector.shape_cast %996 : vector<2x16xf32> to vector<2x1x16xf32>
    %c0_244 = arith.constant 0 : index
    %1000 = arith.index_cast %c0_i32_226 : i32 to index
    %c0_245 = arith.constant 0 : index
    %1001 = vector.load %arg15[%c0_244, %1000, %c0_245] : memref<2x8x32xf32, #tpu.memory_space<vmem>>, vector<2x1x16xf32>
    tpu.vector_store %arg15[%c0_244, %1000, %c0_245], %999 {strides = array<i32>} : memref<2x8x32xf32, #tpu.memory_space<vmem>>, vector<2x1x16xf32>,
    %1002 = vector.shape_cast %998 : vector<2x16xf32> to vector<2x1x16xf32>
    %c0_246 = arith.constant 0 : index
    %1003 = arith.index_cast %910 : i32 to index
    %c16_247 = arith.constant 16 : index
    %1004 = vector.load %arg15[%c0_246, %1003, %c16_247] : memref<2x8x32xf32, #tpu.memory_space<vmem>>, vector<2x1x16xf32>
    tpu.vector_store %arg15[%c0_246, %1003, %c16_247], %1002 {strides = array<i32>} : memref<2x8x32xf32, #tpu.memory_space<vmem>>, vector<2x1x16xf32>,
    %1005 = vector.broadcast %919 : vector<2x1xf32> to vector<2x16xf32>
    %1006 = arith.mulf %1005, %959 : vector<2x16xf32>
    %cst_248 = arith.constant 1.000000e+00 : f32
    %1007 = vector.broadcast %cst_248 : f32 to vector<2x1xf32>
    %1008 = arith.subf %1007, %919 : vector<2x1xf32>
    %1009 = vector.broadcast %1008 : vector<2x1xf32> to vector<2x16xf32>
    %1010 = arith.mulf %1009, %909 : vector<2x16xf32>
    %1011 = arith.addf %1006, %1010 : vector<2x16xf32>
    %1012 = vector.broadcast %922 : vector<2x1xf32> to vector<2x16xf32>
    %1013 = arith.mulf %1012, %994 : vector<2x16xf32>
    %cst_249 = arith.constant 1.000000e+00 : f32
    %1014 = vector.broadcast %cst_249 : f32 to vector<2x1xf32>
    %1015 = arith.subf %1014, %922 : vector<2x1xf32>
    %1016 = vector.broadcast %1015 : vector<2x1xf32> to vector<2x16xf32>
    %1017 = arith.mulf %1016, %909 : vector<2x16xf32>
    %1018 = arith.addf %1013, %1017 : vector<2x16xf32>
    %c1_i32_250 = arith.constant 1 : i32
    %c7_i32_251 = arith.constant 7 : i32
    %1019 = arith.subi %c7_i32_251, %c1_i32_250 : i32
    %c0_252 = arith.constant 0 : index
    %1020 = arith.index_cast %c1_i32_250 : i32 to index
    %c0_253 = arith.constant 0 : index
    %1021 = vector.load %arg17[%c0_252, %1020, %c0_253] : memref<2x8x96xf32, #tpu.memory_space<vmem>>, vector<2x1x48xf32>
    %1022 = vector.shape_cast %1021 : vector<2x1x48xf32> to vector<2x48xf32>
    %c0_254 = arith.constant 0 : index
    %1023 = arith.index_cast %1019 : i32 to index
    %c48_255 = arith.constant 48 : index
    %1024 = vector.load %arg17[%c0_254, %1023, %c48_255] : memref<2x8x96xf32, #tpu.memory_space<vmem>>, vector<2x1x48xf32>
    %1025 = vector.shape_cast %1024 : vector<2x1x48xf32> to vector<2x48xf32>
    %c0_256 = arith.constant 0 : index
    %1026 = arith.index_cast %c1_i32_250 : i32 to index
    %c0_257 = arith.constant 0 : index
    %1027 = vector.load %arg19[%c0_256, %1026, %c0_257] : memref<2x8x1xf32, #tpu.memory_space<vmem>>, vector<2x1x1xf32>
    %1028 = vector.shape_cast %1027 : vector<2x1x1xf32> to vector<2x1xf32>
    %c0_258 = arith.constant 0 : index
    %1029 = arith.index_cast %1019 : i32 to index
    %c0_259 = arith.constant 0 : index
    %1030 = vector.load %arg19[%c0_258, %1029, %c0_259] : memref<2x8x1xf32, #tpu.memory_space<vmem>>, vector<2x1x1xf32>
    %1031 = vector.shape_cast %1030 : vector<2x1x1xf32> to vector<2x1xf32>
    %cst_260 = arith.constant dense<0.000000e+00> : vector<2x48xf32>
    %1032 = tpu.matmul %1011, %905, %cst_260 {dimension_numbers = #tpu.dot_dimension_numbers<[1], [0], [0], [1], [0, 0, 1, 1], [], []>} : vector<2x16xf32>, vector<16x48xf32>, vector<2x48xf32> -> vector<2x48xf32>
    %cst_261 = arith.constant dense<0.000000e+00> : vector<2x48xf32>
    %1033 = tpu.matmul %1018, %906, %cst_261 {dimension_numbers = #tpu.dot_dimension_numbers<[1], [0], [0], [1], [0, 0, 1, 1], [], []>} : vector<2x16xf32>, vector<16x48xf32>, vector<2x48xf32> -> vector<2x48xf32>
    %1034 = vector.extract_strided_slice %1022 {offsets = [0, 0], sizes = [2, 16], strides = [1, 1]} : vector<2x48xf32> to vector<2x16xf32>
    %1035 = vector.extract_strided_slice %1032 {offsets = [0, 0], sizes = [2, 16], strides = [1, 1]} : vector<2x48xf32> to vector<2x16xf32>
    %1036 = arith.addf %1034, %1035 : vector<2x16xf32>
    %1037 = vector.extract_strided_slice %907 {offsets = [0, 0], sizes = [1, 16], strides = [1, 1]} : vector<1x48xf32> to vector<1x16xf32>
    %1038 = vector.broadcast %1037 : vector<1x16xf32> to vector<2x16xf32>
    %1039 = arith.addf %1036, %1038 : vector<2x16xf32>
    %1040 = arith.negf %1039 : vector<2x16xf32>
    %1041 = math.exp %1040 : vector<2x16xf32>
    %cst_262 = arith.constant 1.000000e+00 : f32
    %1042 = vector.broadcast %cst_262 : f32 to vector<2x16xf32>
    %1043 = arith.addf %1042, %1041 : vector<2x16xf32>
    %1044 = arith.divf %1042, %1043 : vector<2x16xf32>
    %1045 = vector.extract_strided_slice %1022 {offsets = [0, 16], sizes = [2, 16], strides = [1, 1]} : vector<2x48xf32> to vector<2x16xf32>
    %1046 = vector.extract_strided_slice %1032 {offsets = [0, 16], sizes = [2, 16], strides = [1, 1]} : vector<2x48xf32> to vector<2x16xf32>
    %1047 = arith.addf %1045, %1046 : vector<2x16xf32>
    %1048 = vector.extract_strided_slice %907 {offsets = [0, 16], sizes = [1, 16], strides = [1, 1]} : vector<1x48xf32> to vector<1x16xf32>
    %1049 = vector.broadcast %1048 : vector<1x16xf32> to vector<2x16xf32>
    %1050 = arith.addf %1047, %1049 : vector<2x16xf32>
    %1051 = arith.negf %1050 : vector<2x16xf32>
    %1052 = math.exp %1051 : vector<2x16xf32>
    %cst_263 = arith.constant 1.000000e+00 : f32
    %1053 = vector.broadcast %cst_263 : f32 to vector<2x16xf32>
    %1054 = arith.addf %1053, %1052 : vector<2x16xf32>
    %1055 = arith.divf %1053, %1054 : vector<2x16xf32>
    %1056 = vector.extract_strided_slice %1022 {offsets = [0, 32], sizes = [2, 16], strides = [1, 1]} : vector<2x48xf32> to vector<2x16xf32>
    %1057 = vector.extract_strided_slice %1032 {offsets = [0, 32], sizes = [2, 16], strides = [1, 1]} : vector<2x48xf32> to vector<2x16xf32>
    %1058 = vector.extract_strided_slice %907 {offsets = [0, 32], sizes = [1, 16], strides = [1, 1]} : vector<1x48xf32> to vector<1x16xf32>
    %1059 = vector.broadcast %1058 : vector<1x16xf32> to vector<2x16xf32>
    %1060 = arith.addf %1057, %1059 : vector<2x16xf32>
    %1061 = arith.mulf %1044, %1060 : vector<2x16xf32>
    %1062 = arith.addf %1056, %1061 : vector<2x16xf32>
    %1063 = math.tanh %1062 : vector<2x16xf32>
    %cst_264 = arith.constant 1.000000e+00 : f32
    %1064 = vector.broadcast %cst_264 : f32 to vector<2x16xf32>
    %1065 = arith.subf %1064, %1055 : vector<2x16xf32>
    %1066 = arith.mulf %1065, %1063 : vector<2x16xf32>
    %1067 = arith.mulf %1055, %1011 : vector<2x16xf32>
    %1068 = arith.addf %1066, %1067 : vector<2x16xf32>
    %1069 = vector.extract_strided_slice %1025 {offsets = [0, 0], sizes = [2, 16], strides = [1, 1]} : vector<2x48xf32> to vector<2x16xf32>
    %1070 = vector.extract_strided_slice %1033 {offsets = [0, 0], sizes = [2, 16], strides = [1, 1]} : vector<2x48xf32> to vector<2x16xf32>
    %1071 = arith.addf %1069, %1070 : vector<2x16xf32>
    %1072 = vector.extract_strided_slice %908 {offsets = [0, 0], sizes = [1, 16], strides = [1, 1]} : vector<1x48xf32> to vector<1x16xf32>
    %1073 = vector.broadcast %1072 : vector<1x16xf32> to vector<2x16xf32>
    %1074 = arith.addf %1071, %1073 : vector<2x16xf32>
    %1075 = arith.negf %1074 : vector<2x16xf32>
    %1076 = math.exp %1075 : vector<2x16xf32>
    %cst_265 = arith.constant 1.000000e+00 : f32
    %1077 = vector.broadcast %cst_265 : f32 to vector<2x16xf32>
    %1078 = arith.addf %1077, %1076 : vector<2x16xf32>
    %1079 = arith.divf %1077, %1078 : vector<2x16xf32>
    %1080 = vector.extract_strided_slice %1025 {offsets = [0, 16], sizes = [2, 16], strides = [1, 1]} : vector<2x48xf32> to vector<2x16xf32>
    %1081 = vector.extract_strided_slice %1033 {offsets = [0, 16], sizes = [2, 16], strides = [1, 1]} : vector<2x48xf32> to vector<2x16xf32>
    %1082 = arith.addf %1080, %1081 : vector<2x16xf32>
    %1083 = vector.extract_strided_slice %908 {offsets = [0, 16], sizes = [1, 16], strides = [1, 1]} : vector<1x48xf32> to vector<1x16xf32>
    %1084 = vector.broadcast %1083 : vector<1x16xf32> to vector<2x16xf32>
    %1085 = arith.addf %1082, %1084 : vector<2x16xf32>
    %1086 = arith.negf %1085 : vector<2x16xf32>
    %1087 = math.exp %1086 : vector<2x16xf32>
    %cst_266 = arith.constant 1.000000e+00 : f32
    %1088 = vector.broadcast %cst_266 : f32 to vector<2x16xf32>
    %1089 = arith.addf %1088, %1087 : vector<2x16xf32>
    %1090 = arith.divf %1088, %1089 : vector<2x16xf32>
    %1091 = vector.extract_strided_slice %1025 {offsets = [0, 32], sizes = [2, 16], strides = [1, 1]} : vector<2x48xf32> to vector<2x16xf32>
    %1092 = vector.extract_strided_slice %1033 {offsets = [0, 32], sizes = [2, 16], strides = [1, 1]} : vector<2x48xf32> to vector<2x16xf32>
    %1093 = vector.extract_strided_slice %908 {offsets = [0, 32], sizes = [1, 16], strides = [1, 1]} : vector<1x48xf32> to vector<1x16xf32>
    %1094 = vector.broadcast %1093 : vector<1x16xf32> to vector<2x16xf32>
    %1095 = arith.addf %1092, %1094 : vector<2x16xf32>
    %1096 = arith.mulf %1079, %1095 : vector<2x16xf32>
    %1097 = arith.addf %1091, %1096 : vector<2x16xf32>
    %1098 = math.tanh %1097 : vector<2x16xf32>
    %cst_267 = arith.constant 1.000000e+00 : f32
    %1099 = vector.broadcast %cst_267 : f32 to vector<2x16xf32>
    %1100 = arith.subf %1099, %1090 : vector<2x16xf32>
    %1101 = arith.mulf %1100, %1098 : vector<2x16xf32>
    %1102 = arith.mulf %1090, %1018 : vector<2x16xf32>
    %1103 = arith.addf %1101, %1102 : vector<2x16xf32>
    %1104 = vector.broadcast %1028 : vector<2x1xf32> to vector<2x16xf32>
    %1105 = arith.mulf %1068, %1104 : vector<2x16xf32>
    %1106 = vector.broadcast %1031 : vector<2x1xf32> to vector<2x16xf32>
    %1107 = arith.mulf %1103, %1106 : vector<2x16xf32>
    %1108 = vector.shape_cast %1105 : vector<2x16xf32> to vector<2x1x16xf32>
    %c0_268 = arith.constant 0 : index
    %1109 = arith.index_cast %c1_i32_250 : i32 to index
    %c0_269 = arith.constant 0 : index
    %1110 = vector.load %arg15[%c0_268, %1109, %c0_269] : memref<2x8x32xf32, #tpu.memory_space<vmem>>, vector<2x1x16xf32>
    tpu.vector_store %arg15[%c0_268, %1109, %c0_269], %1108 {strides = array<i32>} : memref<2x8x32xf32, #tpu.memory_space<vmem>>, vector<2x1x16xf32>,
    %1111 = vector.shape_cast %1107 : vector<2x16xf32> to vector<2x1x16xf32>
    %c0_270 = arith.constant 0 : index
    %1112 = arith.index_cast %1019 : i32 to index
    %c16_271 = arith.constant 16 : index
    %1113 = vector.load %arg15[%c0_270, %1112, %c16_271] : memref<2x8x32xf32, #tpu.memory_space<vmem>>, vector<2x1x16xf32>
    tpu.vector_store %arg15[%c0_270, %1112, %c16_271], %1111 {strides = array<i32>} : memref<2x8x32xf32, #tpu.memory_space<vmem>>, vector<2x1x16xf32>,
    %1114 = vector.broadcast %1028 : vector<2x1xf32> to vector<2x16xf32>
    %1115 = arith.mulf %1114, %1068 : vector<2x16xf32>
    %cst_272 = arith.constant 1.000000e+00 : f32
    %1116 = vector.broadcast %cst_272 : f32 to vector<2x1xf32>
    %1117 = arith.subf %1116, %1028 : vector<2x1xf32>
    %1118 = vector.broadcast %1117 : vector<2x1xf32> to vector<2x16xf32>
    %1119 = arith.mulf %1118, %1011 : vector<2x16xf32>
    %1120 = arith.addf %1115, %1119 : vector<2x16xf32>
    %1121 = vector.broadcast %1031 : vector<2x1xf32> to vector<2x16xf32>
    %1122 = arith.mulf %1121, %1103 : vector<2x16xf32>
    %cst_273 = arith.constant 1.000000e+00 : f32
    %1123 = vector.broadcast %cst_273 : f32 to vector<2x1xf32>
    %1124 = arith.subf %1123, %1031 : vector<2x1xf32>
    %1125 = vector.broadcast %1124 : vector<2x1xf32> to vector<2x16xf32>
    %1126 = arith.mulf %1125, %1018 : vector<2x16xf32>
    %1127 = arith.addf %1122, %1126 : vector<2x16xf32>
    %c2_i32_274 = arith.constant 2 : i32
    %c7_i32_275 = arith.constant 7 : i32
    %1128 = arith.subi %c7_i32_275, %c2_i32_274 : i32
    %c0_276 = arith.constant 0 : index
    %1129 = arith.index_cast %c2_i32_274 : i32 to index
    %c0_277 = arith.constant 0 : index
    %1130 = vector.load %arg17[%c0_276, %1129, %c0_277] : memref<2x8x96xf32, #tpu.memory_space<vmem>>, vector<2x1x48xf32>
    %1131 = vector.shape_cast %1130 : vector<2x1x48xf32> to vector<2x48xf32>
    %c0_278 = arith.constant 0 : index
    %1132 = arith.index_cast %1128 : i32 to index
    %c48_279 = arith.constant 48 : index
    %1133 = vector.load %arg17[%c0_278, %1132, %c48_279] : memref<2x8x96xf32, #tpu.memory_space<vmem>>, vector<2x1x48xf32>
    %1134 = vector.shape_cast %1133 : vector<2x1x48xf32> to vector<2x48xf32>
    %c0_280 = arith.constant 0 : index
    %1135 = arith.index_cast %c2_i32_274 : i32 to index
    %c0_281 = arith.constant 0 : index
    %1136 = vector.load %arg19[%c0_280, %1135, %c0_281] : memref<2x8x1xf32, #tpu.memory_space<vmem>>, vector<2x1x1xf32>
    %1137 = vector.shape_cast %1136 : vector<2x1x1xf32> to vector<2x1xf32>
    %c0_282 = arith.constant 0 : index
    %1138 = arith.index_cast %1128 : i32 to index
    %c0_283 = arith.constant 0 : index
    %1139 = vector.load %arg19[%c0_282, %1138, %c0_283] : memref<2x8x1xf32, #tpu.memory_space<vmem>>, vector<2x1x1xf32>
    %1140 = vector.shape_cast %1139 : vector<2x1x1xf32> to vector<2x1xf32>
    %cst_284 = arith.constant dense<0.000000e+00> : vector<2x48xf32>
    %1141 = tpu.matmul %1120, %905, %cst_284 {dimension_numbers = #tpu.dot_dimension_numbers<[1], [0], [0], [1], [0, 0, 1, 1], [], []>} : vector<2x16xf32>, vector<16x48xf32>, vector<2x48xf32> -> vector<2x48xf32>
    %cst_285 = arith.constant dense<0.000000e+00> : vector<2x48xf32>
    %1142 = tpu.matmul %1127, %906, %cst_285 {dimension_numbers = #tpu.dot_dimension_numbers<[1], [0], [0], [1], [0, 0, 1, 1], [], []>} : vector<2x16xf32>, vector<16x48xf32>, vector<2x48xf32> -> vector<2x48xf32>
    %1143 = vector.extract_strided_slice %1131 {offsets = [0, 0], sizes = [2, 16], strides = [1, 1]} : vector<2x48xf32> to vector<2x16xf32>
    %1144 = vector.extract_strided_slice %1141 {offsets = [0, 0], sizes = [2, 16], strides = [1, 1]} : vector<2x48xf32> to vector<2x16xf32>
    %1145 = arith.addf %1143, %1144 : vector<2x16xf32>
    %1146 = vector.extract_strided_slice %907 {offsets = [0, 0], sizes = [1, 16], strides = [1, 1]} : vector<1x48xf32> to vector<1x16xf32>
    %1147 = vector.broadcast %1146 : vector<1x16xf32> to vector<2x16xf32>
    %1148 = arith.addf %1145, %1147 : vector<2x16xf32>
    %1149 = arith.negf %1148 : vector<2x16xf32>
    %1150 = math.exp %1149 : vector<2x16xf32>
    %cst_286 = arith.constant 1.000000e+00 : f32
    %1151 = vector.broadcast %cst_286 : f32 to vector<2x16xf32>
    %1152 = arith.addf %1151, %1150 : vector<2x16xf32>
    %1153 = arith.divf %1151, %1152 : vector<2x16xf32>
    %1154 = vector.extract_strided_slice %1131 {offsets = [0, 16], sizes = [2, 16], strides = [1, 1]} : vector<2x48xf32> to vector<2x16xf32>
    %1155 = vector.extract_strided_slice %1141 {offsets = [0, 16], sizes = [2, 16], strides = [1, 1]} : vector<2x48xf32> to vector<2x16xf32>
    %1156 = arith.addf %1154, %1155 : vector<2x16xf32>
    %1157 = vector.extract_strided_slice %907 {offsets = [0, 16], sizes = [1, 16], strides = [1, 1]} : vector<1x48xf32> to vector<1x16xf32>
    %1158 = vector.broadcast %1157 : vector<1x16xf32> to vector<2x16xf32>
    %1159 = arith.addf %1156, %1158 : vector<2x16xf32>
    %1160 = arith.negf %1159 : vector<2x16xf32>
    %1161 = math.exp %1160 : vector<2x16xf32>
    %cst_287 = arith.constant 1.000000e+00 : f32
    %1162 = vector.broadcast %cst_287 : f32 to vector<2x16xf32>
    %1163 = arith.addf %1162, %1161 : vector<2x16xf32>
    %1164 = arith.divf %1162, %1163 : vector<2x16xf32>
    %1165 = vector.extract_strided_slice %1131 {offsets = [0, 32], sizes = [2, 16], strides = [1, 1]} : vector<2x48xf32> to vector<2x16xf32>
    %1166 = vector.extract_strided_slice %1141 {offsets = [0, 32], sizes = [2, 16], strides = [1, 1]} : vector<2x48xf32> to vector<2x16xf32>
    %1167 = vector.extract_strided_slice %907 {offsets = [0, 32], sizes = [1, 16], strides = [1, 1]} : vector<1x48xf32> to vector<1x16xf32>
    %1168 = vector.broadcast %1167 : vector<1x16xf32> to vector<2x16xf32>
    %1169 = arith.addf %1166, %1168 : vector<2x16xf32>
    %1170 = arith.mulf %1153, %1169 : vector<2x16xf32>
    %1171 = arith.addf %1165, %1170 : vector<2x16xf32>
    %1172 = math.tanh %1171 : vector<2x16xf32>
    %cst_288 = arith.constant 1.000000e+00 : f32
    %1173 = vector.broadcast %cst_288 : f32 to vector<2x16xf32>
    %1174 = arith.subf %1173, %1164 : vector<2x16xf32>
    %1175 = arith.mulf %1174, %1172 : vector<2x16xf32>
    %1176 = arith.mulf %1164, %1120 : vector<2x16xf32>
    %1177 = arith.addf %1175, %1176 : vector<2x16xf32>
    %1178 = vector.extract_strided_slice %1134 {offsets = [0, 0], sizes = [2, 16], strides = [1, 1]} : vector<2x48xf32> to vector<2x16xf32>
    %1179 = vector.extract_strided_slice %1142 {offsets = [0, 0], sizes = [2, 16], strides = [1, 1]} : vector<2x48xf32> to vector<2x16xf32>
    %1180 = arith.addf %1178, %1179 : vector<2x16xf32>
    %1181 = vector.extract_strided_slice %908 {offsets = [0, 0], sizes = [1, 16], strides = [1, 1]} : vector<1x48xf32> to vector<1x16xf32>
    %1182 = vector.broadcast %1181 : vector<1x16xf32> to vector<2x16xf32>
    %1183 = arith.addf %1180, %1182 : vector<2x16xf32>
    %1184 = arith.negf %1183 : vector<2x16xf32>
    %1185 = math.exp %1184 : vector<2x16xf32>
    %cst_289 = arith.constant 1.000000e+00 : f32
    %1186 = vector.broadcast %cst_289 : f32 to vector<2x16xf32>
    %1187 = arith.addf %1186, %1185 : vector<2x16xf32>
    %1188 = arith.divf %1186, %1187 : vector<2x16xf32>
    %1189 = vector.extract_strided_slice %1134 {offsets = [0, 16], sizes = [2, 16], strides = [1, 1]} : vector<2x48xf32> to vector<2x16xf32>
    %1190 = vector.extract_strided_slice %1142 {offsets = [0, 16], sizes = [2, 16], strides = [1, 1]} : vector<2x48xf32> to vector<2x16xf32>
    %1191 = arith.addf %1189, %1190 : vector<2x16xf32>
    %1192 = vector.extract_strided_slice %908 {offsets = [0, 16], sizes = [1, 16], strides = [1, 1]} : vector<1x48xf32> to vector<1x16xf32>
    %1193 = vector.broadcast %1192 : vector<1x16xf32> to vector<2x16xf32>
    %1194 = arith.addf %1191, %1193 : vector<2x16xf32>
    %1195 = arith.negf %1194 : vector<2x16xf32>
    %1196 = math.exp %1195 : vector<2x16xf32>
    %cst_290 = arith.constant 1.000000e+00 : f32
    %1197 = vector.broadcast %cst_290 : f32 to vector<2x16xf32>
    %1198 = arith.addf %1197, %1196 : vector<2x16xf32>
    %1199 = arith.divf %1197, %1198 : vector<2x16xf32>
    %1200 = vector.extract_strided_slice %1134 {offsets = [0, 32], sizes = [2, 16], strides = [1, 1]} : vector<2x48xf32> to vector<2x16xf32>
    %1201 = vector.extract_strided_slice %1142 {offsets = [0, 32], sizes = [2, 16], strides = [1, 1]} : vector<2x48xf32> to vector<2x16xf32>
    %1202 = vector.extract_strided_slice %908 {offsets = [0, 32], sizes = [1, 16], strides = [1, 1]} : vector<1x48xf32> to vector<1x16xf32>
    %1203 = vector.broadcast %1202 : vector<1x16xf32> to vector<2x16xf32>
    %1204 = arith.addf %1201, %1203 : vector<2x16xf32>
    %1205 = arith.mulf %1188, %1204 : vector<2x16xf32>
    %1206 = arith.addf %1200, %1205 : vector<2x16xf32>
    %1207 = math.tanh %1206 : vector<2x16xf32>
    %cst_291 = arith.constant 1.000000e+00 : f32
    %1208 = vector.broadcast %cst_291 : f32 to vector<2x16xf32>
    %1209 = arith.subf %1208, %1199 : vector<2x16xf32>
    %1210 = arith.mulf %1209, %1207 : vector<2x16xf32>
    %1211 = arith.mulf %1199, %1127 : vector<2x16xf32>
    %1212 = arith.addf %1210, %1211 : vector<2x16xf32>
    %1213 = vector.broadcast %1137 : vector<2x1xf32> to vector<2x16xf32>
    %1214 = arith.mulf %1177, %1213 : vector<2x16xf32>
    %1215 = vector.broadcast %1140 : vector<2x1xf32> to vector<2x16xf32>
    %1216 = arith.mulf %1212, %1215 : vector<2x16xf32>
    %1217 = vector.shape_cast %1214 : vector<2x16xf32> to vector<2x1x16xf32>
    %c0_292 = arith.constant 0 : index
    %1218 = arith.index_cast %c2_i32_274 : i32 to index
    %c0_293 = arith.constant 0 : index
    %1219 = vector.load %arg15[%c0_292, %1218, %c0_293] : memref<2x8x32xf32, #tpu.memory_space<vmem>>, vector<2x1x16xf32>
    tpu.vector_store %arg15[%c0_292, %1218, %c0_293], %1217 {strides = array<i32>} : memref<2x8x32xf32, #tpu.memory_space<vmem>>, vector<2x1x16xf32>,
    %1220 = vector.shape_cast %1216 : vector<2x16xf32> to vector<2x1x16xf32>
    %c0_294 = arith.constant 0 : index
    %1221 = arith.index_cast %1128 : i32 to index
    %c16_295 = arith.constant 16 : index
    %1222 = vector.load %arg15[%c0_294, %1221, %c16_295] : memref<2x8x32xf32, #tpu.memory_space<vmem>>, vector<2x1x16xf32>
    tpu.vector_store %arg15[%c0_294, %1221, %c16_295], %1220 {strides = array<i32>} : memref<2x8x32xf32, #tpu.memory_space<vmem>>, vector<2x1x16xf32>,
    %1223 = vector.broadcast %1137 : vector<2x1xf32> to vector<2x16xf32>
    %1224 = arith.mulf %1223, %1177 : vector<2x16xf32>
    %cst_296 = arith.constant 1.000000e+00 : f32
    %1225 = vector.broadcast %cst_296 : f32 to vector<2x1xf32>
    %1226 = arith.subf %1225, %1137 : vector<2x1xf32>
    %1227 = vector.broadcast %1226 : vector<2x1xf32> to vector<2x16xf32>
    %1228 = arith.mulf %1227, %1120 : vector<2x16xf32>
    %1229 = arith.addf %1224, %1228 : vector<2x16xf32>
    %1230 = vector.broadcast %1140 : vector<2x1xf32> to vector<2x16xf32>
    %1231 = arith.mulf %1230, %1212 : vector<2x16xf32>
    %cst_297 = arith.constant 1.000000e+00 : f32
    %1232 = vector.broadcast %cst_297 : f32 to vector<2x1xf32>
    %1233 = arith.subf %1232, %1140 : vector<2x1xf32>
    %1234 = vector.broadcast %1233 : vector<2x1xf32> to vector<2x16xf32>
    %1235 = arith.mulf %1234, %1127 : vector<2x16xf32>
    %1236 = arith.addf %1231, %1235 : vector<2x16xf32>
    %c3_i32_298 = arith.constant 3 : i32
    %c7_i32_299 = arith.constant 7 : i32
    %1237 = arith.subi %c7_i32_299, %c3_i32_298 : i32
    %c0_300 = arith.constant 0 : index
    %1238 = arith.index_cast %c3_i32_298 : i32 to index
    %c0_301 = arith.constant 0 : index
    %1239 = vector.load %arg17[%c0_300, %1238, %c0_301] : memref<2x8x96xf32, #tpu.memory_space<vmem>>, vector<2x1x48xf32>
    %1240 = vector.shape_cast %1239 : vector<2x1x48xf32> to vector<2x48xf32>
    %c0_302 = arith.constant 0 : index
    %1241 = arith.index_cast %1237 : i32 to index
    %c48_303 = arith.constant 48 : index
    %1242 = vector.load %arg17[%c0_302, %1241, %c48_303] : memref<2x8x96xf32, #tpu.memory_space<vmem>>, vector<2x1x48xf32>
    %1243 = vector.shape_cast %1242 : vector<2x1x48xf32> to vector<2x48xf32>
    %c0_304 = arith.constant 0 : index
    %1244 = arith.index_cast %c3_i32_298 : i32 to index
    %c0_305 = arith.constant 0 : index
    %1245 = vector.load %arg19[%c0_304, %1244, %c0_305] : memref<2x8x1xf32, #tpu.memory_space<vmem>>, vector<2x1x1xf32>
    %1246 = vector.shape_cast %1245 : vector<2x1x1xf32> to vector<2x1xf32>
    %c0_306 = arith.constant 0 : index
    %1247 = arith.index_cast %1237 : i32 to index
    %c0_307 = arith.constant 0 : index
    %1248 = vector.load %arg19[%c0_306, %1247, %c0_307] : memref<2x8x1xf32, #tpu.memory_space<vmem>>, vector<2x1x1xf32>
    %1249 = vector.shape_cast %1248 : vector<2x1x1xf32> to vector<2x1xf32>
    %cst_308 = arith.constant dense<0.000000e+00> : vector<2x48xf32>
    %1250 = tpu.matmul %1229, %905, %cst_308 {dimension_numbers = #tpu.dot_dimension_numbers<[1], [0], [0], [1], [0, 0, 1, 1], [], []>} : vector<2x16xf32>, vector<16x48xf32>, vector<2x48xf32> -> vector<2x48xf32>
    %cst_309 = arith.constant dense<0.000000e+00> : vector<2x48xf32>
    %1251 = tpu.matmul %1236, %906, %cst_309 {dimension_numbers = #tpu.dot_dimension_numbers<[1], [0], [0], [1], [0, 0, 1, 1], [], []>} : vector<2x16xf32>, vector<16x48xf32>, vector<2x48xf32> -> vector<2x48xf32>
    %1252 = vector.extract_strided_slice %1240 {offsets = [0, 0], sizes = [2, 16], strides = [1, 1]} : vector<2x48xf32> to vector<2x16xf32>
    %1253 = vector.extract_strided_slice %1250 {offsets = [0, 0], sizes = [2, 16], strides = [1, 1]} : vector<2x48xf32> to vector<2x16xf32>
    %1254 = arith.addf %1252, %1253 : vector<2x16xf32>
    %1255 = vector.extract_strided_slice %907 {offsets = [0, 0], sizes = [1, 16], strides = [1, 1]} : vector<1x48xf32> to vector<1x16xf32>
    %1256 = vector.broadcast %1255 : vector<1x16xf32> to vector<2x16xf32>
    %1257 = arith.addf %1254, %1256 : vector<2x16xf32>
    %1258 = arith.negf %1257 : vector<2x16xf32>
    %1259 = math.exp %1258 : vector<2x16xf32>
    %cst_310 = arith.constant 1.000000e+00 : f32
    %1260 = vector.broadcast %cst_310 : f32 to vector<2x16xf32>
    %1261 = arith.addf %1260, %1259 : vector<2x16xf32>
    %1262 = arith.divf %1260, %1261 : vector<2x16xf32>
    %1263 = vector.extract_strided_slice %1240 {offsets = [0, 16], sizes = [2, 16], strides = [1, 1]} : vector<2x48xf32> to vector<2x16xf32>
    %1264 = vector.extract_strided_slice %1250 {offsets = [0, 16], sizes = [2, 16], strides = [1, 1]} : vector<2x48xf32> to vector<2x16xf32>
    %1265 = arith.addf %1263, %1264 : vector<2x16xf32>
    %1266 = vector.extract_strided_slice %907 {offsets = [0, 16], sizes = [1, 16], strides = [1, 1]} : vector<1x48xf32> to vector<1x16xf32>
    %1267 = vector.broadcast %1266 : vector<1x16xf32> to vector<2x16xf32>
    %1268 = arith.addf %1265, %1267 : vector<2x16xf32>
    %1269 = arith.negf %1268 : vector<2x16xf32>
    %1270 = math.exp %1269 : vector<2x16xf32>
    %cst_311 = arith.constant 1.000000e+00 : f32
    %1271 = vector.broadcast %cst_311 : f32 to vector<2x16xf32>
    %1272 = arith.addf %1271, %1270 : vector<2x16xf32>
    %1273 = arith.divf %1271, %1272 : vector<2x16xf32>
    %1274 = vector.extract_strided_slice %1240 {offsets = [0, 32], sizes = [2, 16], strides = [1, 1]} : vector<2x48xf32> to vector<2x16xf32>
    %1275 = vector.extract_strided_slice %1250 {offsets = [0, 32], sizes = [2, 16], strides = [1, 1]} : vector<2x48xf32> to vector<2x16xf32>
    %1276 = vector.extract_strided_slice %907 {offsets = [0, 32], sizes = [1, 16], strides = [1, 1]} : vector<1x48xf32> to vector<1x16xf32>
    %1277 = vector.broadcast %1276 : vector<1x16xf32> to vector<2x16xf32>
    %1278 = arith.addf %1275, %1277 : vector<2x16xf32>
    %1279 = arith.mulf %1262, %1278 : vector<2x16xf32>
    %1280 = arith.addf %1274, %1279 : vector<2x16xf32>
    %1281 = math.tanh %1280 : vector<2x16xf32>
    %cst_312 = arith.constant 1.000000e+00 : f32
    %1282 = vector.broadcast %cst_312 : f32 to vector<2x16xf32>
    %1283 = arith.subf %1282, %1273 : vector<2x16xf32>
    %1284 = arith.mulf %1283, %1281 : vector<2x16xf32>
    %1285 = arith.mulf %1273, %1229 : vector<2x16xf32>
    %1286 = arith.addf %1284, %1285 : vector<2x16xf32>
    %1287 = vector.extract_strided_slice %1243 {offsets = [0, 0], sizes = [2, 16], strides = [1, 1]} : vector<2x48xf32> to vector<2x16xf32>
    %1288 = vector.extract_strided_slice %1251 {offsets = [0, 0], sizes = [2, 16], strides = [1, 1]} : vector<2x48xf32> to vector<2x16xf32>
    %1289 = arith.addf %1287, %1288 : vector<2x16xf32>
    %1290 = vector.extract_strided_slice %908 {offsets = [0, 0], sizes = [1, 16], strides = [1, 1]} : vector<1x48xf32> to vector<1x16xf32>
    %1291 = vector.broadcast %1290 : vector<1x16xf32> to vector<2x16xf32>
    %1292 = arith.addf %1289, %1291 : vector<2x16xf32>
    %1293 = arith.negf %1292 : vector<2x16xf32>
    %1294 = math.exp %1293 : vector<2x16xf32>
    %cst_313 = arith.constant 1.000000e+00 : f32
    %1295 = vector.broadcast %cst_313 : f32 to vector<2x16xf32>
    %1296 = arith.addf %1295, %1294 : vector<2x16xf32>
    %1297 = arith.divf %1295, %1296 : vector<2x16xf32>
    %1298 = vector.extract_strided_slice %1243 {offsets = [0, 16], sizes = [2, 16], strides = [1, 1]} : vector<2x48xf32> to vector<2x16xf32>
    %1299 = vector.extract_strided_slice %1251 {offsets = [0, 16], sizes = [2, 16], strides = [1, 1]} : vector<2x48xf32> to vector<2x16xf32>
    %1300 = arith.addf %1298, %1299 : vector<2x16xf32>
    %1301 = vector.extract_strided_slice %908 {offsets = [0, 16], sizes = [1, 16], strides = [1, 1]} : vector<1x48xf32> to vector<1x16xf32>
    %1302 = vector.broadcast %1301 : vector<1x16xf32> to vector<2x16xf32>
    %1303 = arith.addf %1300, %1302 : vector<2x16xf32>
    %1304 = arith.negf %1303 : vector<2x16xf32>
    %1305 = math.exp %1304 : vector<2x16xf32>
    %cst_314 = arith.constant 1.000000e+00 : f32
    %1306 = vector.broadcast %cst_314 : f32 to vector<2x16xf32>
    %1307 = arith.addf %1306, %1305 : vector<2x16xf32>
    %1308 = arith.divf %1306, %1307 : vector<2x16xf32>
    %1309 = vector.extract_strided_slice %1243 {offsets = [0, 32], sizes = [2, 16], strides = [1, 1]} : vector<2x48xf32> to vector<2x16xf32>
    %1310 = vector.extract_strided_slice %1251 {offsets = [0, 32], sizes = [2, 16], strides = [1, 1]} : vector<2x48xf32> to vector<2x16xf32>
    %1311 = vector.extract_strided_slice %908 {offsets = [0, 32], sizes = [1, 16], strides = [1, 1]} : vector<1x48xf32> to vector<1x16xf32>
    %1312 = vector.broadcast %1311 : vector<1x16xf32> to vector<2x16xf32>
    %1313 = arith.addf %1310, %1312 : vector<2x16xf32>
    %1314 = arith.mulf %1297, %1313 : vector<2x16xf32>
    %1315 = arith.addf %1309, %1314 : vector<2x16xf32>
    %1316 = math.tanh %1315 : vector<2x16xf32>
    %cst_315 = arith.constant 1.000000e+00 : f32
    %1317 = vector.broadcast %cst_315 : f32 to vector<2x16xf32>
    %1318 = arith.subf %1317, %1308 : vector<2x16xf32>
    %1319 = arith.mulf %1318, %1316 : vector<2x16xf32>
    %1320 = arith.mulf %1308, %1236 : vector<2x16xf32>
    %1321 = arith.addf %1319, %1320 : vector<2x16xf32>
    %1322 = vector.broadcast %1246 : vector<2x1xf32> to vector<2x16xf32>
    %1323 = arith.mulf %1286, %1322 : vector<2x16xf32>
    %1324 = vector.broadcast %1249 : vector<2x1xf32> to vector<2x16xf32>
    %1325 = arith.mulf %1321, %1324 : vector<2x16xf32>
    %1326 = vector.shape_cast %1323 : vector<2x16xf32> to vector<2x1x16xf32>
    %c0_316 = arith.constant 0 : index
    %1327 = arith.index_cast %c3_i32_298 : i32 to index
    %c0_317 = arith.constant 0 : index
    %1328 = vector.load %arg15[%c0_316, %1327, %c0_317] : memref<2x8x32xf32, #tpu.memory_space<vmem>>, vector<2x1x16xf32>
    tpu.vector_store %arg15[%c0_316, %1327, %c0_317], %1326 {strides = array<i32>} : memref<2x8x32xf32, #tpu.memory_space<vmem>>, vector<2x1x16xf32>,
    %1329 = vector.shape_cast %1325 : vector<2x16xf32> to vector<2x1x16xf32>
    %c0_318 = arith.constant 0 : index
    %1330 = arith.index_cast %1237 : i32 to index
    %c16_319 = arith.constant 16 : index
    %1331 = vector.load %arg15[%c0_318, %1330, %c16_319] : memref<2x8x32xf32, #tpu.memory_space<vmem>>, vector<2x1x16xf32>
    tpu.vector_store %arg15[%c0_318, %1330, %c16_319], %1329 {strides = array<i32>} : memref<2x8x32xf32, #tpu.memory_space<vmem>>, vector<2x1x16xf32>,
    %1332 = vector.broadcast %1246 : vector<2x1xf32> to vector<2x16xf32>
    %1333 = arith.mulf %1332, %1286 : vector<2x16xf32>
    %cst_320 = arith.constant 1.000000e+00 : f32
    %1334 = vector.broadcast %cst_320 : f32 to vector<2x1xf32>
    %1335 = arith.subf %1334, %1246 : vector<2x1xf32>
    %1336 = vector.broadcast %1335 : vector<2x1xf32> to vector<2x16xf32>
    %1337 = arith.mulf %1336, %1229 : vector<2x16xf32>
    %1338 = arith.addf %1333, %1337 : vector<2x16xf32>
    %1339 = vector.broadcast %1249 : vector<2x1xf32> to vector<2x16xf32>
    %1340 = arith.mulf %1339, %1321 : vector<2x16xf32>
    %cst_321 = arith.constant 1.000000e+00 : f32
    %1341 = vector.broadcast %cst_321 : f32 to vector<2x1xf32>
    %1342 = arith.subf %1341, %1249 : vector<2x1xf32>
    %1343 = vector.broadcast %1342 : vector<2x1xf32> to vector<2x16xf32>
    %1344 = arith.mulf %1343, %1236 : vector<2x16xf32>
    %1345 = arith.addf %1340, %1344 : vector<2x16xf32>
    %c4_i32_322 = arith.constant 4 : i32
    %c7_i32_323 = arith.constant 7 : i32
    %1346 = arith.subi %c7_i32_323, %c4_i32_322 : i32
    %c0_324 = arith.constant 0 : index
    %1347 = arith.index_cast %c4_i32_322 : i32 to index
    %c0_325 = arith.constant 0 : index
    %1348 = vector.load %arg17[%c0_324, %1347, %c0_325] : memref<2x8x96xf32, #tpu.memory_space<vmem>>, vector<2x1x48xf32>
    %1349 = vector.shape_cast %1348 : vector<2x1x48xf32> to vector<2x48xf32>
    %c0_326 = arith.constant 0 : index
    %1350 = arith.index_cast %1346 : i32 to index
    %c48_327 = arith.constant 48 : index
    %1351 = vector.load %arg17[%c0_326, %1350, %c48_327] : memref<2x8x96xf32, #tpu.memory_space<vmem>>, vector<2x1x48xf32>
    %1352 = vector.shape_cast %1351 : vector<2x1x48xf32> to vector<2x48xf32>
    %c0_328 = arith.constant 0 : index
    %1353 = arith.index_cast %c4_i32_322 : i32 to index
    %c0_329 = arith.constant 0 : index
    %1354 = vector.load %arg19[%c0_328, %1353, %c0_329] : memref<2x8x1xf32, #tpu.memory_space<vmem>>, vector<2x1x1xf32>
    %1355 = vector.shape_cast %1354 : vector<2x1x1xf32> to vector<2x1xf32>
    %c0_330 = arith.constant 0 : index
    %1356 = arith.index_cast %1346 : i32 to index
    %c0_331 = arith.constant 0 : index
    %1357 = vector.load %arg19[%c0_330, %1356, %c0_331] : memref<2x8x1xf32, #tpu.memory_space<vmem>>, vector<2x1x1xf32>
    %1358 = vector.shape_cast %1357 : vector<2x1x1xf32> to vector<2x1xf32>
    %cst_332 = arith.constant dense<0.000000e+00> : vector<2x48xf32>
    %1359 = tpu.matmul %1338, %905, %cst_332 {dimension_numbers = #tpu.dot_dimension_numbers<[1], [0], [0], [1], [0, 0, 1, 1], [], []>} : vector<2x16xf32>, vector<16x48xf32>, vector<2x48xf32> -> vector<2x48xf32>
    %cst_333 = arith.constant dense<0.000000e+00> : vector<2x48xf32>
    %1360 = tpu.matmul %1345, %906, %cst_333 {dimension_numbers = #tpu.dot_dimension_numbers<[1], [0], [0], [1], [0, 0, 1, 1], [], []>} : vector<2x16xf32>, vector<16x48xf32>, vector<2x48xf32> -> vector<2x48xf32>
    %1361 = vector.extract_strided_slice %1349 {offsets = [0, 0], sizes = [2, 16], strides = [1, 1]} : vector<2x48xf32> to vector<2x16xf32>
    %1362 = vector.extract_strided_slice %1359 {offsets = [0, 0], sizes = [2, 16], strides = [1, 1]} : vector<2x48xf32> to vector<2x16xf32>
    %1363 = arith.addf %1361, %1362 : vector<2x16xf32>
    %1364 = vector.extract_strided_slice %907 {offsets = [0, 0], sizes = [1, 16], strides = [1, 1]} : vector<1x48xf32> to vector<1x16xf32>
    %1365 = vector.broadcast %1364 : vector<1x16xf32> to vector<2x16xf32>
    %1366 = arith.addf %1363, %1365 : vector<2x16xf32>
    %1367 = arith.negf %1366 : vector<2x16xf32>
    %1368 = math.exp %1367 : vector<2x16xf32>
    %cst_334 = arith.constant 1.000000e+00 : f32
    %1369 = vector.broadcast %cst_334 : f32 to vector<2x16xf32>
    %1370 = arith.addf %1369, %1368 : vector<2x16xf32>
    %1371 = arith.divf %1369, %1370 : vector<2x16xf32>
    %1372 = vector.extract_strided_slice %1349 {offsets = [0, 16], sizes = [2, 16], strides = [1, 1]} : vector<2x48xf32> to vector<2x16xf32>
    %1373 = vector.extract_strided_slice %1359 {offsets = [0, 16], sizes = [2, 16], strides = [1, 1]} : vector<2x48xf32> to vector<2x16xf32>
    %1374 = arith.addf %1372, %1373 : vector<2x16xf32>
    %1375 = vector.extract_strided_slice %907 {offsets = [0, 16], sizes = [1, 16], strides = [1, 1]} : vector<1x48xf32> to vector<1x16xf32>
    %1376 = vector.broadcast %1375 : vector<1x16xf32> to vector<2x16xf32>
    %1377 = arith.addf %1374, %1376 : vector<2x16xf32>
    %1378 = arith.negf %1377 : vector<2x16xf32>
    %1379 = math.exp %1378 : vector<2x16xf32>
    %cst_335 = arith.constant 1.000000e+00 : f32
    %1380 = vector.broadcast %cst_335 : f32 to vector<2x16xf32>
    %1381 = arith.addf %1380, %1379 : vector<2x16xf32>
    %1382 = arith.divf %1380, %1381 : vector<2x16xf32>
    %1383 = vector.extract_strided_slice %1349 {offsets = [0, 32], sizes = [2, 16], strides = [1, 1]} : vector<2x48xf32> to vector<2x16xf32>
    %1384 = vector.extract_strided_slice %1359 {offsets = [0, 32], sizes = [2, 16], strides = [1, 1]} : vector<2x48xf32> to vector<2x16xf32>
    %1385 = vector.extract_strided_slice %907 {offsets = [0, 32], sizes = [1, 16], strides = [1, 1]} : vector<1x48xf32> to vector<1x16xf32>
    %1386 = vector.broadcast %1385 : vector<1x16xf32> to vector<2x16xf32>
    %1387 = arith.addf %1384, %1386 : vector<2x16xf32>
    %1388 = arith.mulf %1371, %1387 : vector<2x16xf32>
    %1389 = arith.addf %1383, %1388 : vector<2x16xf32>
    %1390 = math.tanh %1389 : vector<2x16xf32>
    %cst_336 = arith.constant 1.000000e+00 : f32
    %1391 = vector.broadcast %cst_336 : f32 to vector<2x16xf32>
    %1392 = arith.subf %1391, %1382 : vector<2x16xf32>
    %1393 = arith.mulf %1392, %1390 : vector<2x16xf32>
    %1394 = arith.mulf %1382, %1338 : vector<2x16xf32>
    %1395 = arith.addf %1393, %1394 : vector<2x16xf32>
    %1396 = vector.extract_strided_slice %1352 {offsets = [0, 0], sizes = [2, 16], strides = [1, 1]} : vector<2x48xf32> to vector<2x16xf32>
    %1397 = vector.extract_strided_slice %1360 {offsets = [0, 0], sizes = [2, 16], strides = [1, 1]} : vector<2x48xf32> to vector<2x16xf32>
    %1398 = arith.addf %1396, %1397 : vector<2x16xf32>
    %1399 = vector.extract_strided_slice %908 {offsets = [0, 0], sizes = [1, 16], strides = [1, 1]} : vector<1x48xf32> to vector<1x16xf32>
    %1400 = vector.broadcast %1399 : vector<1x16xf32> to vector<2x16xf32>
    %1401 = arith.addf %1398, %1400 : vector<2x16xf32>
    %1402 = arith.negf %1401 : vector<2x16xf32>
    %1403 = math.exp %1402 : vector<2x16xf32>
    %cst_337 = arith.constant 1.000000e+00 : f32
    %1404 = vector.broadcast %cst_337 : f32 to vector<2x16xf32>
    %1405 = arith.addf %1404, %1403 : vector<2x16xf32>
    %1406 = arith.divf %1404, %1405 : vector<2x16xf32>
    %1407 = vector.extract_strided_slice %1352 {offsets = [0, 16], sizes = [2, 16], strides = [1, 1]} : vector<2x48xf32> to vector<2x16xf32>
    %1408 = vector.extract_strided_slice %1360 {offsets = [0, 16], sizes = [2, 16], strides = [1, 1]} : vector<2x48xf32> to vector<2x16xf32>
    %1409 = arith.addf %1407, %1408 : vector<2x16xf32>
    %1410 = vector.extract_strided_slice %908 {offsets = [0, 16], sizes = [1, 16], strides = [1, 1]} : vector<1x48xf32> to vector<1x16xf32>
    %1411 = vector.broadcast %1410 : vector<1x16xf32> to vector<2x16xf32>
    %1412 = arith.addf %1409, %1411 : vector<2x16xf32>
    %1413 = arith.negf %1412 : vector<2x16xf32>
    %1414 = math.exp %1413 : vector<2x16xf32>
    %cst_338 = arith.constant 1.000000e+00 : f32
    %1415 = vector.broadcast %cst_338 : f32 to vector<2x16xf32>
    %1416 = arith.addf %1415, %1414 : vector<2x16xf32>
    %1417 = arith.divf %1415, %1416 : vector<2x16xf32>
    %1418 = vector.extract_strided_slice %1352 {offsets = [0, 32], sizes = [2, 16], strides = [1, 1]} : vector<2x48xf32> to vector<2x16xf32>
    %1419 = vector.extract_strided_slice %1360 {offsets = [0, 32], sizes = [2, 16], strides = [1, 1]} : vector<2x48xf32> to vector<2x16xf32>
    %1420 = vector.extract_strided_slice %908 {offsets = [0, 32], sizes = [1, 16], strides = [1, 1]} : vector<1x48xf32> to vector<1x16xf32>
    %1421 = vector.broadcast %1420 : vector<1x16xf32> to vector<2x16xf32>
    %1422 = arith.addf %1419, %1421 : vector<2x16xf32>
    %1423 = arith.mulf %1406, %1422 : vector<2x16xf32>
    %1424 = arith.addf %1418, %1423 : vector<2x16xf32>
    %1425 = math.tanh %1424 : vector<2x16xf32>
    %cst_339 = arith.constant 1.000000e+00 : f32
    %1426 = vector.broadcast %cst_339 : f32 to vector<2x16xf32>
    %1427 = arith.subf %1426, %1417 : vector<2x16xf32>
    %1428 = arith.mulf %1427, %1425 : vector<2x16xf32>
    %1429 = arith.mulf %1417, %1345 : vector<2x16xf32>
    %1430 = arith.addf %1428, %1429 : vector<2x16xf32>
    %1431 = vector.broadcast %1355 : vector<2x1xf32> to vector<2x16xf32>
    %1432 = arith.mulf %1395, %1431 : vector<2x16xf32>
    %1433 = vector.broadcast %1358 : vector<2x1xf32> to vector<2x16xf32>
    %1434 = arith.mulf %1430, %1433 : vector<2x16xf32>
    %1435 = vector.shape_cast %1432 : vector<2x16xf32> to vector<2x1x16xf32>
    %c0_340 = arith.constant 0 : index
    %1436 = arith.index_cast %c4_i32_322 : i32 to index
    %c0_341 = arith.constant 0 : index
    %1437 = vector.load %arg15[%c0_340, %1436, %c0_341] : memref<2x8x32xf32, #tpu.memory_space<vmem>>, vector<2x1x16xf32>
    tpu.vector_store %arg15[%c0_340, %1436, %c0_341], %1435 {strides = array<i32>} : memref<2x8x32xf32, #tpu.memory_space<vmem>>, vector<2x1x16xf32>,
    %1438 = vector.shape_cast %1434 : vector<2x16xf32> to vector<2x1x16xf32>
    %c0_342 = arith.constant 0 : index
    %1439 = arith.index_cast %1346 : i32 to index
    %c16_343 = arith.constant 16 : index
    %1440 = vector.load %arg15[%c0_342, %1439, %c16_343] : memref<2x8x32xf32, #tpu.memory_space<vmem>>, vector<2x1x16xf32>
    tpu.vector_store %arg15[%c0_342, %1439, %c16_343], %1438 {strides = array<i32>} : memref<2x8x32xf32, #tpu.memory_space<vmem>>, vector<2x1x16xf32>,
    %1441 = vector.broadcast %1355 : vector<2x1xf32> to vector<2x16xf32>
    %1442 = arith.mulf %1441, %1395 : vector<2x16xf32>
    %cst_344 = arith.constant 1.000000e+00 : f32
    %1443 = vector.broadcast %cst_344 : f32 to vector<2x1xf32>
    %1444 = arith.subf %1443, %1355 : vector<2x1xf32>
    %1445 = vector.broadcast %1444 : vector<2x1xf32> to vector<2x16xf32>
    %1446 = arith.mulf %1445, %1338 : vector<2x16xf32>
    %1447 = arith.addf %1442, %1446 : vector<2x16xf32>
    %1448 = vector.broadcast %1358 : vector<2x1xf32> to vector<2x16xf32>
    %1449 = arith.mulf %1448, %1430 : vector<2x16xf32>
    %cst_345 = arith.constant 1.000000e+00 : f32
    %1450 = vector.broadcast %cst_345 : f32 to vector<2x1xf32>
    %1451 = arith.subf %1450, %1358 : vector<2x1xf32>
    %1452 = vector.broadcast %1451 : vector<2x1xf32> to vector<2x16xf32>
    %1453 = arith.mulf %1452, %1345 : vector<2x16xf32>
    %1454 = arith.addf %1449, %1453 : vector<2x16xf32>
    %c5_i32_346 = arith.constant 5 : i32
    %c7_i32_347 = arith.constant 7 : i32
    %1455 = arith.subi %c7_i32_347, %c5_i32_346 : i32
    %c0_348 = arith.constant 0 : index
    %1456 = arith.index_cast %c5_i32_346 : i32 to index
    %c0_349 = arith.constant 0 : index
    %1457 = vector.load %arg17[%c0_348, %1456, %c0_349] : memref<2x8x96xf32, #tpu.memory_space<vmem>>, vector<2x1x48xf32>
    %1458 = vector.shape_cast %1457 : vector<2x1x48xf32> to vector<2x48xf32>
    %c0_350 = arith.constant 0 : index
    %1459 = arith.index_cast %1455 : i32 to index
    %c48_351 = arith.constant 48 : index
    %1460 = vector.load %arg17[%c0_350, %1459, %c48_351] : memref<2x8x96xf32, #tpu.memory_space<vmem>>, vector<2x1x48xf32>
    %1461 = vector.shape_cast %1460 : vector<2x1x48xf32> to vector<2x48xf32>
    %c0_352 = arith.constant 0 : index
    %1462 = arith.index_cast %c5_i32_346 : i32 to index
    %c0_353 = arith.constant 0 : index
    %1463 = vector.load %arg19[%c0_352, %1462, %c0_353] : memref<2x8x1xf32, #tpu.memory_space<vmem>>, vector<2x1x1xf32>
    %1464 = vector.shape_cast %1463 : vector<2x1x1xf32> to vector<2x1xf32>
    %c0_354 = arith.constant 0 : index
    %1465 = arith.index_cast %1455 : i32 to index
    %c0_355 = arith.constant 0 : index
    %1466 = vector.load %arg19[%c0_354, %1465, %c0_355] : memref<2x8x1xf32, #tpu.memory_space<vmem>>, vector<2x1x1xf32>
    %1467 = vector.shape_cast %1466 : vector<2x1x1xf32> to vector<2x1xf32>
    %cst_356 = arith.constant dense<0.000000e+00> : vector<2x48xf32>
    %1468 = tpu.matmul %1447, %905, %cst_356 {dimension_numbers = #tpu.dot_dimension_numbers<[1], [0], [0], [1], [0, 0, 1, 1], [], []>} : vector<2x16xf32>, vector<16x48xf32>, vector<2x48xf32> -> vector<2x48xf32>
    %cst_357 = arith.constant dense<0.000000e+00> : vector<2x48xf32>
    %1469 = tpu.matmul %1454, %906, %cst_357 {dimension_numbers = #tpu.dot_dimension_numbers<[1], [0], [0], [1], [0, 0, 1, 1], [], []>} : vector<2x16xf32>, vector<16x48xf32>, vector<2x48xf32> -> vector<2x48xf32>
    %1470 = vector.extract_strided_slice %1458 {offsets = [0, 0], sizes = [2, 16], strides = [1, 1]} : vector<2x48xf32> to vector<2x16xf32>
    %1471 = vector.extract_strided_slice %1468 {offsets = [0, 0], sizes = [2, 16], strides = [1, 1]} : vector<2x48xf32> to vector<2x16xf32>
    %1472 = arith.addf %1470, %1471 : vector<2x16xf32>
    %1473 = vector.extract_strided_slice %907 {offsets = [0, 0], sizes = [1, 16], strides = [1, 1]} : vector<1x48xf32> to vector<1x16xf32>
    %1474 = vector.broadcast %1473 : vector<1x16xf32> to vector<2x16xf32>
    %1475 = arith.addf %1472, %1474 : vector<2x16xf32>
    %1476 = arith.negf %1475 : vector<2x16xf32>
    %1477 = math.exp %1476 : vector<2x16xf32>
    %cst_358 = arith.constant 1.000000e+00 : f32
    %1478 = vector.broadcast %cst_358 : f32 to vector<2x16xf32>
    %1479 = arith.addf %1478, %1477 : vector<2x16xf32>
    %1480 = arith.divf %1478, %1479 : vector<2x16xf32>
    %1481 = vector.extract_strided_slice %1458 {offsets = [0, 16], sizes = [2, 16], strides = [1, 1]} : vector<2x48xf32> to vector<2x16xf32>
    %1482 = vector.extract_strided_slice %1468 {offsets = [0, 16], sizes = [2, 16], strides = [1, 1]} : vector<2x48xf32> to vector<2x16xf32>
    %1483 = arith.addf %1481, %1482 : vector<2x16xf32>
    %1484 = vector.extract_strided_slice %907 {offsets = [0, 16], sizes = [1, 16], strides = [1, 1]} : vector<1x48xf32> to vector<1x16xf32>
    %1485 = vector.broadcast %1484 : vector<1x16xf32> to vector<2x16xf32>
    %1486 = arith.addf %1483, %1485 : vector<2x16xf32>
    %1487 = arith.negf %1486 : vector<2x16xf32>
    %1488 = math.exp %1487 : vector<2x16xf32>
    %cst_359 = arith.constant 1.000000e+00 : f32
    %1489 = vector.broadcast %cst_359 : f32 to vector<2x16xf32>
    %1490 = arith.addf %1489, %1488 : vector<2x16xf32>
    %1491 = arith.divf %1489, %1490 : vector<2x16xf32>
    %1492 = vector.extract_strided_slice %1458 {offsets = [0, 32], sizes = [2, 16], strides = [1, 1]} : vector<2x48xf32> to vector<2x16xf32>
    %1493 = vector.extract_strided_slice %1468 {offsets = [0, 32], sizes = [2, 16], strides = [1, 1]} : vector<2x48xf32> to vector<2x16xf32>
    %1494 = vector.extract_strided_slice %907 {offsets = [0, 32], sizes = [1, 16], strides = [1, 1]} : vector<1x48xf32> to vector<1x16xf32>
    %1495 = vector.broadcast %1494 : vector<1x16xf32> to vector<2x16xf32>
    %1496 = arith.addf %1493, %1495 : vector<2x16xf32>
    %1497 = arith.mulf %1480, %1496 : vector<2x16xf32>
    %1498 = arith.addf %1492, %1497 : vector<2x16xf32>
    %1499 = math.tanh %1498 : vector<2x16xf32>
    %cst_360 = arith.constant 1.000000e+00 : f32
    %1500 = vector.broadcast %cst_360 : f32 to vector<2x16xf32>
    %1501 = arith.subf %1500, %1491 : vector<2x16xf32>
    %1502 = arith.mulf %1501, %1499 : vector<2x16xf32>
    %1503 = arith.mulf %1491, %1447 : vector<2x16xf32>
    %1504 = arith.addf %1502, %1503 : vector<2x16xf32>
    %1505 = vector.extract_strided_slice %1461 {offsets = [0, 0], sizes = [2, 16], strides = [1, 1]} : vector<2x48xf32> to vector<2x16xf32>
    %1506 = vector.extract_strided_slice %1469 {offsets = [0, 0], sizes = [2, 16], strides = [1, 1]} : vector<2x48xf32> to vector<2x16xf32>
    %1507 = arith.addf %1505, %1506 : vector<2x16xf32>
    %1508 = vector.extract_strided_slice %908 {offsets = [0, 0], sizes = [1, 16], strides = [1, 1]} : vector<1x48xf32> to vector<1x16xf32>
    %1509 = vector.broadcast %1508 : vector<1x16xf32> to vector<2x16xf32>
    %1510 = arith.addf %1507, %1509 : vector<2x16xf32>
    %1511 = arith.negf %1510 : vector<2x16xf32>
    %1512 = math.exp %1511 : vector<2x16xf32>
    %cst_361 = arith.constant 1.000000e+00 : f32
    %1513 = vector.broadcast %cst_361 : f32 to vector<2x16xf32>
    %1514 = arith.addf %1513, %1512 : vector<2x16xf32>
    %1515 = arith.divf %1513, %1514 : vector<2x16xf32>
    %1516 = vector.extract_strided_slice %1461 {offsets = [0, 16], sizes = [2, 16], strides = [1, 1]} : vector<2x48xf32> to vector<2x16xf32>
    %1517 = vector.extract_strided_slice %1469 {offsets = [0, 16], sizes = [2, 16], strides = [1, 1]} : vector<2x48xf32> to vector<2x16xf32>
    %1518 = arith.addf %1516, %1517 : vector<2x16xf32>
    %1519 = vector.extract_strided_slice %908 {offsets = [0, 16], sizes = [1, 16], strides = [1, 1]} : vector<1x48xf32> to vector<1x16xf32>
    %1520 = vector.broadcast %1519 : vector<1x16xf32> to vector<2x16xf32>
    %1521 = arith.addf %1518, %1520 : vector<2x16xf32>
    %1522 = arith.negf %1521 : vector<2x16xf32>
    %1523 = math.exp %1522 : vector<2x16xf32>
    %cst_362 = arith.constant 1.000000e+00 : f32
    %1524 = vector.broadcast %cst_362 : f32 to vector<2x16xf32>
    %1525 = arith.addf %1524, %1523 : vector<2x16xf32>
    %1526 = arith.divf %1524, %1525 : vector<2x16xf32>
    %1527 = vector.extract_strided_slice %1461 {offsets = [0, 32], sizes = [2, 16], strides = [1, 1]} : vector<2x48xf32> to vector<2x16xf32>
    %1528 = vector.extract_strided_slice %1469 {offsets = [0, 32], sizes = [2, 16], strides = [1, 1]} : vector<2x48xf32> to vector<2x16xf32>
    %1529 = vector.extract_strided_slice %908 {offsets = [0, 32], sizes = [1, 16], strides = [1, 1]} : vector<1x48xf32> to vector<1x16xf32>
    %1530 = vector.broadcast %1529 : vector<1x16xf32> to vector<2x16xf32>
    %1531 = arith.addf %1528, %1530 : vector<2x16xf32>
    %1532 = arith.mulf %1515, %1531 : vector<2x16xf32>
    %1533 = arith.addf %1527, %1532 : vector<2x16xf32>
    %1534 = math.tanh %1533 : vector<2x16xf32>
    %cst_363 = arith.constant 1.000000e+00 : f32
    %1535 = vector.broadcast %cst_363 : f32 to vector<2x16xf32>
    %1536 = arith.subf %1535, %1526 : vector<2x16xf32>
    %1537 = arith.mulf %1536, %1534 : vector<2x16xf32>
    %1538 = arith.mulf %1526, %1454 : vector<2x16xf32>
    %1539 = arith.addf %1537, %1538 : vector<2x16xf32>
    %1540 = vector.broadcast %1464 : vector<2x1xf32> to vector<2x16xf32>
    %1541 = arith.mulf %1504, %1540 : vector<2x16xf32>
    %1542 = vector.broadcast %1467 : vector<2x1xf32> to vector<2x16xf32>
    %1543 = arith.mulf %1539, %1542 : vector<2x16xf32>
    %1544 = vector.shape_cast %1541 : vector<2x16xf32> to vector<2x1x16xf32>
    %c0_364 = arith.constant 0 : index
    %1545 = arith.index_cast %c5_i32_346 : i32 to index
    %c0_365 = arith.constant 0 : index
    %1546 = vector.load %arg15[%c0_364, %1545, %c0_365] : memref<2x8x32xf32, #tpu.memory_space<vmem>>, vector<2x1x16xf32>
    tpu.vector_store %arg15[%c0_364, %1545, %c0_365], %1544 {strides = array<i32>} : memref<2x8x32xf32, #tpu.memory_space<vmem>>, vector<2x1x16xf32>,
    %1547 = vector.shape_cast %1543 : vector<2x16xf32> to vector<2x1x16xf32>
    %c0_366 = arith.constant 0 : index
    %1548 = arith.index_cast %1455 : i32 to index
    %c16_367 = arith.constant 16 : index
    %1549 = vector.load %arg15[%c0_366, %1548, %c16_367] : memref<2x8x32xf32, #tpu.memory_space<vmem>>, vector<2x1x16xf32>
    tpu.vector_store %arg15[%c0_366, %1548, %c16_367], %1547 {strides = array<i32>} : memref<2x8x32xf32, #tpu.memory_space<vmem>>, vector<2x1x16xf32>,
    %1550 = vector.broadcast %1464 : vector<2x1xf32> to vector<2x16xf32>
    %1551 = arith.mulf %1550, %1504 : vector<2x16xf32>
    %cst_368 = arith.constant 1.000000e+00 : f32
    %1552 = vector.broadcast %cst_368 : f32 to vector<2x1xf32>
    %1553 = arith.subf %1552, %1464 : vector<2x1xf32>
    %1554 = vector.broadcast %1553 : vector<2x1xf32> to vector<2x16xf32>
    %1555 = arith.mulf %1554, %1447 : vector<2x16xf32>
    %1556 = arith.addf %1551, %1555 : vector<2x16xf32>
    %1557 = vector.broadcast %1467 : vector<2x1xf32> to vector<2x16xf32>
    %1558 = arith.mulf %1557, %1539 : vector<2x16xf32>
    %cst_369 = arith.constant 1.000000e+00 : f32
    %1559 = vector.broadcast %cst_369 : f32 to vector<2x1xf32>
    %1560 = arith.subf %1559, %1467 : vector<2x1xf32>
    %1561 = vector.broadcast %1560 : vector<2x1xf32> to vector<2x16xf32>
    %1562 = arith.mulf %1561, %1454 : vector<2x16xf32>
    %1563 = arith.addf %1558, %1562 : vector<2x16xf32>
    %c6_i32_370 = arith.constant 6 : i32
    %c7_i32_371 = arith.constant 7 : i32
    %1564 = arith.subi %c7_i32_371, %c6_i32_370 : i32
    %c0_372 = arith.constant 0 : index
    %1565 = arith.index_cast %c6_i32_370 : i32 to index
    %c0_373 = arith.constant 0 : index
    %1566 = vector.load %arg17[%c0_372, %1565, %c0_373] : memref<2x8x96xf32, #tpu.memory_space<vmem>>, vector<2x1x48xf32>
    %1567 = vector.shape_cast %1566 : vector<2x1x48xf32> to vector<2x48xf32>
    %c0_374 = arith.constant 0 : index
    %1568 = arith.index_cast %1564 : i32 to index
    %c48_375 = arith.constant 48 : index
    %1569 = vector.load %arg17[%c0_374, %1568, %c48_375] : memref<2x8x96xf32, #tpu.memory_space<vmem>>, vector<2x1x48xf32>
    %1570 = vector.shape_cast %1569 : vector<2x1x48xf32> to vector<2x48xf32>
    %c0_376 = arith.constant 0 : index
    %1571 = arith.index_cast %c6_i32_370 : i32 to index
    %c0_377 = arith.constant 0 : index
    %1572 = vector.load %arg19[%c0_376, %1571, %c0_377] : memref<2x8x1xf32, #tpu.memory_space<vmem>>, vector<2x1x1xf32>
    %1573 = vector.shape_cast %1572 : vector<2x1x1xf32> to vector<2x1xf32>
    %c0_378 = arith.constant 0 : index
    %1574 = arith.index_cast %1564 : i32 to index
    %c0_379 = arith.constant 0 : index
    %1575 = vector.load %arg19[%c0_378, %1574, %c0_379] : memref<2x8x1xf32, #tpu.memory_space<vmem>>, vector<2x1x1xf32>
    %1576 = vector.shape_cast %1575 : vector<2x1x1xf32> to vector<2x1xf32>
    %cst_380 = arith.constant dense<0.000000e+00> : vector<2x48xf32>
    %1577 = tpu.matmul %1556, %905, %cst_380 {dimension_numbers = #tpu.dot_dimension_numbers<[1], [0], [0], [1], [0, 0, 1, 1], [], []>} : vector<2x16xf32>, vector<16x48xf32>, vector<2x48xf32> -> vector<2x48xf32>
    %cst_381 = arith.constant dense<0.000000e+00> : vector<2x48xf32>
    %1578 = tpu.matmul %1563, %906, %cst_381 {dimension_numbers = #tpu.dot_dimension_numbers<[1], [0], [0], [1], [0, 0, 1, 1], [], []>} : vector<2x16xf32>, vector<16x48xf32>, vector<2x48xf32> -> vector<2x48xf32>
    %1579 = vector.extract_strided_slice %1567 {offsets = [0, 0], sizes = [2, 16], strides = [1, 1]} : vector<2x48xf32> to vector<2x16xf32>
    %1580 = vector.extract_strided_slice %1577 {offsets = [0, 0], sizes = [2, 16], strides = [1, 1]} : vector<2x48xf32> to vector<2x16xf32>
    %1581 = arith.addf %1579, %1580 : vector<2x16xf32>
    %1582 = vector.extract_strided_slice %907 {offsets = [0, 0], sizes = [1, 16], strides = [1, 1]} : vector<1x48xf32> to vector<1x16xf32>
    %1583 = vector.broadcast %1582 : vector<1x16xf32> to vector<2x16xf32>
    %1584 = arith.addf %1581, %1583 : vector<2x16xf32>
    %1585 = arith.negf %1584 : vector<2x16xf32>
    %1586 = math.exp %1585 : vector<2x16xf32>
    %cst_382 = arith.constant 1.000000e+00 : f32
    %1587 = vector.broadcast %cst_382 : f32 to vector<2x16xf32>
    %1588 = arith.addf %1587, %1586 : vector<2x16xf32>
    %1589 = arith.divf %1587, %1588 : vector<2x16xf32>
    %1590 = vector.extract_strided_slice %1567 {offsets = [0, 16], sizes = [2, 16], strides = [1, 1]} : vector<2x48xf32> to vector<2x16xf32>
    %1591 = vector.extract_strided_slice %1577 {offsets = [0, 16], sizes = [2, 16], strides = [1, 1]} : vector<2x48xf32> to vector<2x16xf32>
    %1592 = arith.addf %1590, %1591 : vector<2x16xf32>
    %1593 = vector.extract_strided_slice %907 {offsets = [0, 16], sizes = [1, 16], strides = [1, 1]} : vector<1x48xf32> to vector<1x16xf32>
    %1594 = vector.broadcast %1593 : vector<1x16xf32> to vector<2x16xf32>
    %1595 = arith.addf %1592, %1594 : vector<2x16xf32>
    %1596 = arith.negf %1595 : vector<2x16xf32>
    %1597 = math.exp %1596 : vector<2x16xf32>
    %cst_383 = arith.constant 1.000000e+00 : f32
    %1598 = vector.broadcast %cst_383 : f32 to vector<2x16xf32>
    %1599 = arith.addf %1598, %1597 : vector<2x16xf32>
    %1600 = arith.divf %1598, %1599 : vector<2x16xf32>
    %1601 = vector.extract_strided_slice %1567 {offsets = [0, 32], sizes = [2, 16], strides = [1, 1]} : vector<2x48xf32> to vector<2x16xf32>
    %1602 = vector.extract_strided_slice %1577 {offsets = [0, 32], sizes = [2, 16], strides = [1, 1]} : vector<2x48xf32> to vector<2x16xf32>
    %1603 = vector.extract_strided_slice %907 {offsets = [0, 32], sizes = [1, 16], strides = [1, 1]} : vector<1x48xf32> to vector<1x16xf32>
    %1604 = vector.broadcast %1603 : vector<1x16xf32> to vector<2x16xf32>
    %1605 = arith.addf %1602, %1604 : vector<2x16xf32>
    %1606 = arith.mulf %1589, %1605 : vector<2x16xf32>
    %1607 = arith.addf %1601, %1606 : vector<2x16xf32>
    %1608 = math.tanh %1607 : vector<2x16xf32>
    %cst_384 = arith.constant 1.000000e+00 : f32
    %1609 = vector.broadcast %cst_384 : f32 to vector<2x16xf32>
    %1610 = arith.subf %1609, %1600 : vector<2x16xf32>
    %1611 = arith.mulf %1610, %1608 : vector<2x16xf32>
    %1612 = arith.mulf %1600, %1556 : vector<2x16xf32>
    %1613 = arith.addf %1611, %1612 : vector<2x16xf32>
    %1614 = vector.extract_strided_slice %1570 {offsets = [0, 0], sizes = [2, 16], strides = [1, 1]} : vector<2x48xf32> to vector<2x16xf32>
    %1615 = vector.extract_strided_slice %1578 {offsets = [0, 0], sizes = [2, 16], strides = [1, 1]} : vector<2x48xf32> to vector<2x16xf32>
    %1616 = arith.addf %1614, %1615 : vector<2x16xf32>
    %1617 = vector.extract_strided_slice %908 {offsets = [0, 0], sizes = [1, 16], strides = [1, 1]} : vector<1x48xf32> to vector<1x16xf32>
    %1618 = vector.broadcast %1617 : vector<1x16xf32> to vector<2x16xf32>
    %1619 = arith.addf %1616, %1618 : vector<2x16xf32>
    %1620 = arith.negf %1619 : vector<2x16xf32>
    %1621 = math.exp %1620 : vector<2x16xf32>
    %cst_385 = arith.constant 1.000000e+00 : f32
    %1622 = vector.broadcast %cst_385 : f32 to vector<2x16xf32>
    %1623 = arith.addf %1622, %1621 : vector<2x16xf32>
    %1624 = arith.divf %1622, %1623 : vector<2x16xf32>
    %1625 = vector.extract_strided_slice %1570 {offsets = [0, 16], sizes = [2, 16], strides = [1, 1]} : vector<2x48xf32> to vector<2x16xf32>
    %1626 = vector.extract_strided_slice %1578 {offsets = [0, 16], sizes = [2, 16], strides = [1, 1]} : vector<2x48xf32> to vector<2x16xf32>
    %1627 = arith.addf %1625, %1626 : vector<2x16xf32>
    %1628 = vector.extract_strided_slice %908 {offsets = [0, 16], sizes = [1, 16], strides = [1, 1]} : vector<1x48xf32> to vector<1x16xf32>
    %1629 = vector.broadcast %1628 : vector<1x16xf32> to vector<2x16xf32>
    %1630 = arith.addf %1627, %1629 : vector<2x16xf32>
    %1631 = arith.negf %1630 : vector<2x16xf32>
    %1632 = math.exp %1631 : vector<2x16xf32>
    %cst_386 = arith.constant 1.000000e+00 : f32
    %1633 = vector.broadcast %cst_386 : f32 to vector<2x16xf32>
    %1634 = arith.addf %1633, %1632 : vector<2x16xf32>
    %1635 = arith.divf %1633, %1634 : vector<2x16xf32>
    %1636 = vector.extract_strided_slice %1570 {offsets = [0, 32], sizes = [2, 16], strides = [1, 1]} : vector<2x48xf32> to vector<2x16xf32>
    %1637 = vector.extract_strided_slice %1578 {offsets = [0, 32], sizes = [2, 16], strides = [1, 1]} : vector<2x48xf32> to vector<2x16xf32>
    %1638 = vector.extract_strided_slice %908 {offsets = [0, 32], sizes = [1, 16], strides = [1, 1]} : vector<1x48xf32> to vector<1x16xf32>
    %1639 = vector.broadcast %1638 : vector<1x16xf32> to vector<2x16xf32>
    %1640 = arith.addf %1637, %1639 : vector<2x16xf32>
    %1641 = arith.mulf %1624, %1640 : vector<2x16xf32>
    %1642 = arith.addf %1636, %1641 : vector<2x16xf32>
    %1643 = math.tanh %1642 : vector<2x16xf32>
    %cst_387 = arith.constant 1.000000e+00 : f32
    %1644 = vector.broadcast %cst_387 : f32 to vector<2x16xf32>
    %1645 = arith.subf %1644, %1635 : vector<2x16xf32>
    %1646 = arith.mulf %1645, %1643 : vector<2x16xf32>
    %1647 = arith.mulf %1635, %1563 : vector<2x16xf32>
    %1648 = arith.addf %1646, %1647 : vector<2x16xf32>
    %1649 = vector.broadcast %1573 : vector<2x1xf32> to vector<2x16xf32>
    %1650 = arith.mulf %1613, %1649 : vector<2x16xf32>
    %1651 = vector.broadcast %1576 : vector<2x1xf32> to vector<2x16xf32>
    %1652 = arith.mulf %1648, %1651 : vector<2x16xf32>
    %1653 = vector.shape_cast %1650 : vector<2x16xf32> to vector<2x1x16xf32>
    %c0_388 = arith.constant 0 : index
    %1654 = arith.index_cast %c6_i32_370 : i32 to index
    %c0_389 = arith.constant 0 : index
    %1655 = vector.load %arg15[%c0_388, %1654, %c0_389] : memref<2x8x32xf32, #tpu.memory_space<vmem>>, vector<2x1x16xf32>
    tpu.vector_store %arg15[%c0_388, %1654, %c0_389], %1653 {strides = array<i32>} : memref<2x8x32xf32, #tpu.memory_space<vmem>>, vector<2x1x16xf32>,
    %1656 = vector.shape_cast %1652 : vector<2x16xf32> to vector<2x1x16xf32>
    %c0_390 = arith.constant 0 : index
    %1657 = arith.index_cast %1564 : i32 to index
    %c16_391 = arith.constant 16 : index
    %1658 = vector.load %arg15[%c0_390, %1657, %c16_391] : memref<2x8x32xf32, #tpu.memory_space<vmem>>, vector<2x1x16xf32>
    tpu.vector_store %arg15[%c0_390, %1657, %c16_391], %1656 {strides = array<i32>} : memref<2x8x32xf32, #tpu.memory_space<vmem>>, vector<2x1x16xf32>,
    %1659 = vector.broadcast %1573 : vector<2x1xf32> to vector<2x16xf32>
    %1660 = arith.mulf %1659, %1613 : vector<2x16xf32>
    %cst_392 = arith.constant 1.000000e+00 : f32
    %1661 = vector.broadcast %cst_392 : f32 to vector<2x1xf32>
    %1662 = arith.subf %1661, %1573 : vector<2x1xf32>
    %1663 = vector.broadcast %1662 : vector<2x1xf32> to vector<2x16xf32>
    %1664 = arith.mulf %1663, %1556 : vector<2x16xf32>
    %1665 = arith.addf %1660, %1664 : vector<2x16xf32>
    %1666 = vector.broadcast %1576 : vector<2x1xf32> to vector<2x16xf32>
    %1667 = arith.mulf %1666, %1648 : vector<2x16xf32>
    %cst_393 = arith.constant 1.000000e+00 : f32
    %1668 = vector.broadcast %cst_393 : f32 to vector<2x1xf32>
    %1669 = arith.subf %1668, %1576 : vector<2x1xf32>
    %1670 = vector.broadcast %1669 : vector<2x1xf32> to vector<2x16xf32>
    %1671 = arith.mulf %1670, %1563 : vector<2x16xf32>
    %1672 = arith.addf %1667, %1671 : vector<2x16xf32>
    %c7_i32_394 = arith.constant 7 : i32
    %c7_i32_395 = arith.constant 7 : i32
    %1673 = arith.subi %c7_i32_395, %c7_i32_394 : i32
    %c0_396 = arith.constant 0 : index
    %1674 = arith.index_cast %c7_i32_394 : i32 to index
    %c0_397 = arith.constant 0 : index
    %1675 = vector.load %arg17[%c0_396, %1674, %c0_397] : memref<2x8x96xf32, #tpu.memory_space<vmem>>, vector<2x1x48xf32>
    %1676 = vector.shape_cast %1675 : vector<2x1x48xf32> to vector<2x48xf32>
    %c0_398 = arith.constant 0 : index
    %1677 = arith.index_cast %1673 : i32 to index
    %c48_399 = arith.constant 48 : index
    %1678 = vector.load %arg17[%c0_398, %1677, %c48_399] : memref<2x8x96xf32, #tpu.memory_space<vmem>>, vector<2x1x48xf32>
    %1679 = vector.shape_cast %1678 : vector<2x1x48xf32> to vector<2x48xf32>
    %c0_400 = arith.constant 0 : index
    %1680 = arith.index_cast %c7_i32_394 : i32 to index
    %c0_401 = arith.constant 0 : index
    %1681 = vector.load %arg19[%c0_400, %1680, %c0_401] : memref<2x8x1xf32, #tpu.memory_space<vmem>>, vector<2x1x1xf32>
    %1682 = vector.shape_cast %1681 : vector<2x1x1xf32> to vector<2x1xf32>
    %c0_402 = arith.constant 0 : index
    %1683 = arith.index_cast %1673 : i32 to index
    %c0_403 = arith.constant 0 : index
    %1684 = vector.load %arg19[%c0_402, %1683, %c0_403] : memref<2x8x1xf32, #tpu.memory_space<vmem>>, vector<2x1x1xf32>
    %1685 = vector.shape_cast %1684 : vector<2x1x1xf32> to vector<2x1xf32>
    %cst_404 = arith.constant dense<0.000000e+00> : vector<2x48xf32>
    %1686 = tpu.matmul %1665, %905, %cst_404 {dimension_numbers = #tpu.dot_dimension_numbers<[1], [0], [0], [1], [0, 0, 1, 1], [], []>} : vector<2x16xf32>, vector<16x48xf32>, vector<2x48xf32> -> vector<2x48xf32>
    %cst_405 = arith.constant dense<0.000000e+00> : vector<2x48xf32>
    %1687 = tpu.matmul %1672, %906, %cst_405 {dimension_numbers = #tpu.dot_dimension_numbers<[1], [0], [0], [1], [0, 0, 1, 1], [], []>} : vector<2x16xf32>, vector<16x48xf32>, vector<2x48xf32> -> vector<2x48xf32>
    %1688 = vector.extract_strided_slice %1676 {offsets = [0, 0], sizes = [2, 16], strides = [1, 1]} : vector<2x48xf32> to vector<2x16xf32>
    %1689 = vector.extract_strided_slice %1686 {offsets = [0, 0], sizes = [2, 16], strides = [1, 1]} : vector<2x48xf32> to vector<2x16xf32>
    %1690 = arith.addf %1688, %1689 : vector<2x16xf32>
    %1691 = vector.extract_strided_slice %907 {offsets = [0, 0], sizes = [1, 16], strides = [1, 1]} : vector<1x48xf32> to vector<1x16xf32>
    %1692 = vector.broadcast %1691 : vector<1x16xf32> to vector<2x16xf32>
    %1693 = arith.addf %1690, %1692 : vector<2x16xf32>
    %1694 = arith.negf %1693 : vector<2x16xf32>
    %1695 = math.exp %1694 : vector<2x16xf32>
    %cst_406 = arith.constant 1.000000e+00 : f32
    %1696 = vector.broadcast %cst_406 : f32 to vector<2x16xf32>
    %1697 = arith.addf %1696, %1695 : vector<2x16xf32>
    %1698 = arith.divf %1696, %1697 : vector<2x16xf32>
    %1699 = vector.extract_strided_slice %1676 {offsets = [0, 16], sizes = [2, 16], strides = [1, 1]} : vector<2x48xf32> to vector<2x16xf32>
    %1700 = vector.extract_strided_slice %1686 {offsets = [0, 16], sizes = [2, 16], strides = [1, 1]} : vector<2x48xf32> to vector<2x16xf32>
    %1701 = arith.addf %1699, %1700 : vector<2x16xf32>
    %1702 = vector.extract_strided_slice %907 {offsets = [0, 16], sizes = [1, 16], strides = [1, 1]} : vector<1x48xf32> to vector<1x16xf32>
    %1703 = vector.broadcast %1702 : vector<1x16xf32> to vector<2x16xf32>
    %1704 = arith.addf %1701, %1703 : vector<2x16xf32>
    %1705 = arith.negf %1704 : vector<2x16xf32>
    %1706 = math.exp %1705 : vector<2x16xf32>
    %cst_407 = arith.constant 1.000000e+00 : f32
    %1707 = vector.broadcast %cst_407 : f32 to vector<2x16xf32>
    %1708 = arith.addf %1707, %1706 : vector<2x16xf32>
    %1709 = arith.divf %1707, %1708 : vector<2x16xf32>
    %1710 = vector.extract_strided_slice %1676 {offsets = [0, 32], sizes = [2, 16], strides = [1, 1]} : vector<2x48xf32> to vector<2x16xf32>
    %1711 = vector.extract_strided_slice %1686 {offsets = [0, 32], sizes = [2, 16], strides = [1, 1]} : vector<2x48xf32> to vector<2x16xf32>
    %1712 = vector.extract_strided_slice %907 {offsets = [0, 32], sizes = [1, 16], strides = [1, 1]} : vector<1x48xf32> to vector<1x16xf32>
    %1713 = vector.broadcast %1712 : vector<1x16xf32> to vector<2x16xf32>
    %1714 = arith.addf %1711, %1713 : vector<2x16xf32>
    %1715 = arith.mulf %1698, %1714 : vector<2x16xf32>
    %1716 = arith.addf %1710, %1715 : vector<2x16xf32>
    %1717 = math.tanh %1716 : vector<2x16xf32>
    %cst_408 = arith.constant 1.000000e+00 : f32
    %1718 = vector.broadcast %cst_408 : f32 to vector<2x16xf32>
    %1719 = arith.subf %1718, %1709 : vector<2x16xf32>
    %1720 = arith.mulf %1719, %1717 : vector<2x16xf32>
    %1721 = arith.mulf %1709, %1665 : vector<2x16xf32>
    %1722 = arith.addf %1720, %1721 : vector<2x16xf32>
    %1723 = vector.extract_strided_slice %1679 {offsets = [0, 0], sizes = [2, 16], strides = [1, 1]} : vector<2x48xf32> to vector<2x16xf32>
    %1724 = vector.extract_strided_slice %1687 {offsets = [0, 0], sizes = [2, 16], strides = [1, 1]} : vector<2x48xf32> to vector<2x16xf32>
    %1725 = arith.addf %1723, %1724 : vector<2x16xf32>
    %1726 = vector.extract_strided_slice %908 {offsets = [0, 0], sizes = [1, 16], strides = [1, 1]} : vector<1x48xf32> to vector<1x16xf32>
    %1727 = vector.broadcast %1726 : vector<1x16xf32> to vector<2x16xf32>
    %1728 = arith.addf %1725, %1727 : vector<2x16xf32>
    %1729 = arith.negf %1728 : vector<2x16xf32>
    %1730 = math.exp %1729 : vector<2x16xf32>
    %cst_409 = arith.constant 1.000000e+00 : f32
    %1731 = vector.broadcast %cst_409 : f32 to vector<2x16xf32>
    %1732 = arith.addf %1731, %1730 : vector<2x16xf32>
    %1733 = arith.divf %1731, %1732 : vector<2x16xf32>
    %1734 = vector.extract_strided_slice %1679 {offsets = [0, 16], sizes = [2, 16], strides = [1, 1]} : vector<2x48xf32> to vector<2x16xf32>
    %1735 = vector.extract_strided_slice %1687 {offsets = [0, 16], sizes = [2, 16], strides = [1, 1]} : vector<2x48xf32> to vector<2x16xf32>
    %1736 = arith.addf %1734, %1735 : vector<2x16xf32>
    %1737 = vector.extract_strided_slice %908 {offsets = [0, 16], sizes = [1, 16], strides = [1, 1]} : vector<1x48xf32> to vector<1x16xf32>
    %1738 = vector.broadcast %1737 : vector<1x16xf32> to vector<2x16xf32>
    %1739 = arith.addf %1736, %1738 : vector<2x16xf32>
    %1740 = arith.negf %1739 : vector<2x16xf32>
    %1741 = math.exp %1740 : vector<2x16xf32>
    %cst_410 = arith.constant 1.000000e+00 : f32
    %1742 = vector.broadcast %cst_410 : f32 to vector<2x16xf32>
    %1743 = arith.addf %1742, %1741 : vector<2x16xf32>
    %1744 = arith.divf %1742, %1743 : vector<2x16xf32>
    %1745 = vector.extract_strided_slice %1679 {offsets = [0, 32], sizes = [2, 16], strides = [1, 1]} : vector<2x48xf32> to vector<2x16xf32>
    %1746 = vector.extract_strided_slice %1687 {offsets = [0, 32], sizes = [2, 16], strides = [1, 1]} : vector<2x48xf32> to vector<2x16xf32>
    %1747 = vector.extract_strided_slice %908 {offsets = [0, 32], sizes = [1, 16], strides = [1, 1]} : vector<1x48xf32> to vector<1x16xf32>
    %1748 = vector.broadcast %1747 : vector<1x16xf32> to vector<2x16xf32>
    %1749 = arith.addf %1746, %1748 : vector<2x16xf32>
    %1750 = arith.mulf %1733, %1749 : vector<2x16xf32>
    %1751 = arith.addf %1745, %1750 : vector<2x16xf32>
    %1752 = math.tanh %1751 : vector<2x16xf32>
    %cst_411 = arith.constant 1.000000e+00 : f32
    %1753 = vector.broadcast %cst_411 : f32 to vector<2x16xf32>
    %1754 = arith.subf %1753, %1744 : vector<2x16xf32>
    %1755 = arith.mulf %1754, %1752 : vector<2x16xf32>
    %1756 = arith.mulf %1744, %1672 : vector<2x16xf32>
    %1757 = arith.addf %1755, %1756 : vector<2x16xf32>
    %1758 = vector.broadcast %1682 : vector<2x1xf32> to vector<2x16xf32>
    %1759 = arith.mulf %1722, %1758 : vector<2x16xf32>
    %1760 = vector.broadcast %1685 : vector<2x1xf32> to vector<2x16xf32>
    %1761 = arith.mulf %1757, %1760 : vector<2x16xf32>
    %1762 = vector.shape_cast %1759 : vector<2x16xf32> to vector<2x1x16xf32>
    %c0_412 = arith.constant 0 : index
    %1763 = arith.index_cast %c7_i32_394 : i32 to index
    %c0_413 = arith.constant 0 : index
    %1764 = vector.load %arg15[%c0_412, %1763, %c0_413] : memref<2x8x32xf32, #tpu.memory_space<vmem>>, vector<2x1x16xf32>
    tpu.vector_store %arg15[%c0_412, %1763, %c0_413], %1762 {strides = array<i32>} : memref<2x8x32xf32, #tpu.memory_space<vmem>>, vector<2x1x16xf32>,
    %1765 = vector.shape_cast %1761 : vector<2x16xf32> to vector<2x1x16xf32>
    %c0_414 = arith.constant 0 : index
    %1766 = arith.index_cast %1673 : i32 to index
    %c16_415 = arith.constant 16 : index
    %1767 = vector.load %arg15[%c0_414, %1766, %c16_415] : memref<2x8x32xf32, #tpu.memory_space<vmem>>, vector<2x1x16xf32>
    tpu.vector_store %arg15[%c0_414, %1766, %c16_415], %1765 {strides = array<i32>} : memref<2x8x32xf32, #tpu.memory_space<vmem>>, vector<2x1x16xf32>,
    %1768 = vector.broadcast %1682 : vector<2x1xf32> to vector<2x16xf32>
    %1769 = arith.mulf %1768, %1722 : vector<2x16xf32>
    %cst_416 = arith.constant 1.000000e+00 : f32
    %1770 = vector.broadcast %cst_416 : f32 to vector<2x1xf32>
    %1771 = arith.subf %1770, %1682 : vector<2x1xf32>
    %1772 = vector.broadcast %1771 : vector<2x1xf32> to vector<2x16xf32>
    %1773 = arith.mulf %1772, %1665 : vector<2x16xf32>
    %1774 = arith.addf %1769, %1773 : vector<2x16xf32>
    %1775 = vector.broadcast %1685 : vector<2x1xf32> to vector<2x16xf32>
    %1776 = arith.mulf %1775, %1757 : vector<2x16xf32>
    %cst_417 = arith.constant 1.000000e+00 : f32
    %1777 = vector.broadcast %cst_417 : f32 to vector<2x1xf32>
    %1778 = arith.subf %1777, %1685 : vector<2x1xf32>
    %1779 = vector.broadcast %1778 : vector<2x1xf32> to vector<2x16xf32>
    %1780 = arith.mulf %1779, %1672 : vector<2x16xf32>
    %1781 = arith.addf %1776, %1780 : vector<2x16xf32>
    %c8_i32_418 = arith.constant 8 : i32
    %1782 = vector.shape_cast %1774 : vector<2x16xf32> to vector<2x1x16xf32>
    %c0_419 = arith.constant 0 : index
    %c0_420 = arith.constant 0 : index
    %c0_421 = arith.constant 0 : index
    %1783 = vector.load %arg16[%c0_419, %c0_420, %c0_421] : memref<2x1x32xf32, #tpu.memory_space<vmem>>, vector<2x1x16xf32>
    tpu.vector_store %arg16[%c0_419, %c0_420, %c0_421], %1782 {strides = array<i32>} : memref<2x1x32xf32, #tpu.memory_space<vmem>>, vector<2x1x16xf32>,
    %1784 = vector.shape_cast %1781 : vector<2x16xf32> to vector<2x1x16xf32>
    %c0_422 = arith.constant 0 : index
    %c0_423 = arith.constant 0 : index
    %c16_424 = arith.constant 16 : index
    %1785 = vector.load %arg16[%c0_422, %c0_423, %c16_424] : memref<2x1x32xf32, #tpu.memory_space<vmem>>, vector<2x1x16xf32>
    tpu.vector_store %arg16[%c0_422, %c0_423, %c16_424], %1784 {strides = array<i32>} : memref<2x1x32xf32, #tpu.memory_space<vmem>>, vector<2x1x16xf32>,
    return
  }
  func.func @transform_0(%arg0: i32) -> (i32, i32, i32) {
    %c0_i32 = arith.constant 0 : i32
    %c0_i32_0 = arith.constant 0 : i32
    %c0_i32_1 = arith.constant 0 : i32
    return %arg0, %c0_i32, %c0_i32_0 : i32, i32, i32
  }
  func.func @transform_1(%arg0: i32) -> (i32, i32, i32) {
    %c0_i32 = arith.constant 0 : i32
    %c0_i32_0 = arith.constant 0 : i32
    %c0_i32_1 = arith.constant 0 : i32
    return %arg0, %c0_i32, %c0_i32_0 : i32, i32, i32
  }
  func.func @transform_2(%arg0: i32) -> (i32, i32) {
    %c0_i32 = arith.constant 0 : i32
    %c0_i32_0 = arith.constant 0 : i32
    %c0_i32_1 = arith.constant 0 : i32
    return %c0_i32, %c0_i32_0 : i32, i32
  }
  func.func @transform_3(%arg0: i32) -> (i32, i32) {
    %c0_i32 = arith.constant 0 : i32
    %c0_i32_0 = arith.constant 0 : i32
    %c0_i32_1 = arith.constant 0 : i32
    return %c0_i32, %c0_i32_0 : i32, i32
  }
  func.func @transform_4(%arg0: i32) -> (i32, i32) {
    %c0_i32 = arith.constant 0 : i32
    %c0_i32_0 = arith.constant 0 : i32
    %c0_i32_1 = arith.constant 0 : i32
    return %c0_i32, %c0_i32_0 : i32, i32
  }
  func.func @transform_5(%arg0: i32) -> (i32, i32) {
    %c0_i32 = arith.constant 0 : i32
    %c0_i32_0 = arith.constant 0 : i32
    %c0_i32_1 = arith.constant 0 : i32
    return %c0_i32, %c0_i32_0 : i32, i32
  }
  func.func @transform_6(%arg0: i32) -> (i32, i32) {
    %c0_i32 = arith.constant 0 : i32
    %c0_i32_0 = arith.constant 0 : i32
    %c0_i32_1 = arith.constant 0 : i32
    return %c0_i32, %c0_i32_0 : i32, i32
  }
  func.func @transform_7(%arg0: i32) -> (i32, i32) {
    %c0_i32 = arith.constant 0 : i32
    %c0_i32_0 = arith.constant 0 : i32
    %c0_i32_1 = arith.constant 0 : i32
    return %c0_i32, %c0_i32_0 : i32, i32
  }
  func.func @transform_8(%arg0: i32) -> (i32, i32) {
    %c0_i32 = arith.constant 0 : i32
    %c0_i32_0 = arith.constant 0 : i32
    %c0_i32_1 = arith.constant 0 : i32
    return %c0_i32, %c0_i32_0 : i32, i32
  }
  func.func @transform_9(%arg0: i32) -> (i32, i32) {
    %c0_i32 = arith.constant 0 : i32
    %c0_i32_0 = arith.constant 0 : i32
    %c0_i32_1 = arith.constant 0 : i32
    return %c0_i32, %c0_i32_0 : i32, i32
  }
  func.func @transform_10(%arg0: i32) -> (i32, i32) {
    %c0_i32 = arith.constant 0 : i32
    %c0_i32_0 = arith.constant 0 : i32
    %c0_i32_1 = arith.constant 0 : i32
    return %c0_i32, %c0_i32_0 : i32, i32
  }
  func.func @transform_11(%arg0: i32) -> (i32, i32) {
    %c0_i32 = arith.constant 0 : i32
    %c0_i32_0 = arith.constant 0 : i32
    %c0_i32_1 = arith.constant 0 : i32
    return %c0_i32, %c0_i32_0 : i32, i32
  }
  func.func @transform_12(%arg0: i32) -> (i32, i32) {
    %c0_i32 = arith.constant 0 : i32
    %c0_i32_0 = arith.constant 0 : i32
    %c0_i32_1 = arith.constant 0 : i32
    return %c0_i32, %c0_i32_0 : i32, i32
  }
  func.func @transform_13(%arg0: i32) -> (i32, i32) {
    %c0_i32 = arith.constant 0 : i32
    %c0_i32_0 = arith.constant 0 : i32
    %c0_i32_1 = arith.constant 0 : i32
    return %c0_i32, %c0_i32_0 : i32, i32
  }
  func.func @transform_14(%arg0: i32) -> (i32, i32, i32) {
    %c0_i32 = arith.constant 0 : i32
    %c0_i32_0 = arith.constant 0 : i32
    %c0_i32_1 = arith.constant 0 : i32
    return %arg0, %c0_i32, %c0_i32_0 : i32, i32, i32
  }
  func.func @transform_15(%arg0: i32) -> (i32, i32, i32) {
    %c0_i32 = arith.constant 0 : i32
    %c0_i32_0 = arith.constant 0 : i32
    %c0_i32_1 = arith.constant 0 : i32
    return %arg0, %c0_i32, %c0_i32_0 : i32, i32, i32
  }
}

</mosaic_0001>

<bundles_post_ra>
// kernel: _lambda_.3
= control target key start
LH: loop header
LB: loop body
LE: loop exit
PB: predicated region body
PF: predicated region fallthrough
CT: control target
= control target key end

     0   :  { %s1099_s0 = inlined_call_operand.vmem [shape: f32[2,8,32], index: 0, kind: input, shape index: {}]   ;;  %s1100_s1 = inlined_call_operand.vmem [shape: f32[2,1,32], index: 1, kind: input, shape index: {}]   ;;  %s1101_s2 = inlined_call_operand.vmem [shape: f32[15,32], index: 2, kind: input, shape index: {}]   ;;  %s1102_s3 = inlined_call_operand.vmem [shape: f32[1,32], index: 3, kind: input, shape index: {}]   ;;  %s1103_s4 = inlined_call_operand.vmem [shape: bf16[32,32], index: 4, kind: input, shape index: {}]   ;;  %s1104_s5 = inlined_call_operand.vmem [shape: f32[1,32], index: 5, kind: input, shape index: {}]   ;;  %s1105_s6 = inlined_call_operand.vmem [shape: bf16[32,64], index: 6, kind: input, shape index: {}]   ;;  %s1106_s7 = inlined_call_operand.vmem [shape: bf16[32,64], index: 7, kind: input, shape index: {}]   ;;  %s1107_s8 = inlined_call_operand.vmem [shape: bf16[32,64], index: 8, kind: input, shape index: {}]   ;;  %s1108_s9 = inlined_call_operand.vmem [shape: f32[1,64], index: 9, kind: input, shape index: {}]   ;;  %s1109_s10 = inlined_call_operand.vmem [shape: bf16[64,32], index: 10, kind: input, shape index: {}]   ;;  %s1110_s11 = inlined_call_operand.vmem [shape: f32[1,32], index: 11, kind: input, shape index: {}]   ;;  %s1111_s12 = inlined_call_operand.vmem [shape: f32[1,32], index: 12, kind: input, shape index: {}]   ;;  %s1112_s13 = inlined_call_operand.<no memory space> [shape: f32[1,1], index: 13, kind: input, shape index: {}]   ;;  %s1113_s14 = inlined_call_operand.hbm [shape: f32[2,1,8], index: 14, kind: output, shape index: {}]  }
   0x1   :  { %v19_v0 = vstv %s1112_s13 }
   0x2   :  { %20 = vst [vmem:[#allocation3] sm:$0x1] %v19_v0 }
   0x3   :  { %v803_v1 = vld [vmem:[%s1107_s8] sm:$0xff]   ;;  %v847_v2 = vmov 0.0   ;;  %v804_v3 = vld [vmem:[%s1107_s8 + $0x8] sm:$0xff]   ;;  %v137_v4 = vlaneseq  ;;  %vm848_vm0 = vmmov 0   ;;  %vm58_vm1 = vcmask 261120  }
   0x4   :  { %750 = vmatprep.subr.bf16.mxu1 %v847_v2  ;;  %766 = vmatprep.subr.bf16.mxu0 %v847_v2  ;;  %v945_v5 = vld [vmem:[%s1099_s0] sm:$0xff]  ;;  %v950_v6 = vld [vmem:[%s1099_s0 + $0x8] sm:$0xff]  ;;  %vm51_vm2 = vcmask 260096   ;;  %vm77_vm3 = vcmask 1041409  }
   0x5   :  { %751 = vmatpush3.bf16.msra.mxu1 %v803_v1  ;;  %754 = vmatprep.mubr.msk.bf16.mxu1 %vm848_vm0, %v847_v2  ;;  %v64_v7 = vld [vmem:[%s1100_s1] sm:$0x1]  ;;  %59 = vst.msk [vmem:[#allocation2 + $0x7] sm:$0xff] %vm58_vm1, %v945_v5  ;;  %60 = vst.msk [vmem:[#allocation2 + $0x1f] sm:$0xff] %vm58_vm1, %v950_v6  ;;  %v65_v8 = vld [vmem:[%s1100_s1 + $0x1] sm:$0x1] }
   0x6   :  { %752 = vmatprep.subr.bf16.mxu1 %v847_v2  ;;  %v66_v9 = vpack.c.bf16 %v64_v7, %v64_v7  ;;  %770 = vmatprep.mubr.msk.bf16.mxu0 %vm848_vm0, %v847_v2  ;;  %v67_v10 = vpack.c.bf16 %v65_v8, %v65_v8  ;;  %52 = vst.msk [vmem:[#allocation2] sm:$0x7f] %vm51_vm2, %v847_v2  ;;  %53 = vst.msk [vmem:[#allocation2 + $0x18] sm:$0x7f] %vm51_vm2, %v847_v2  ;;  %v970_v11 = vshrl.u32 %v137_v4, 7  ;;  %v61_v14 = vld [vmem:[%s1101_s2] sm:$0xff] }
   0x7   :  { %54 = vst.msk [vmem:[#allocation2 + $0xf] sm:$0x7f] %vm51_vm2, %v847_v2  ;;  %55 = vst.msk [vmem:[#allocation2 + $0x27] sm:$0x7f] %vm51_vm2, %v847_v2  ;;  %v805_v24 = vld [vmem:[%s1103_s4] sm:$0xff]   ;;  %v806_v29 = vld [vmem:[%s1103_s4 + $0x8] sm:$0xff]  }
   0x8   :  { %v74_v12 = vunpack.c.l.b16 %v66_v9  ;;  %v75_v13 = vunpack.c.l.b16 %v67_v10  ;;  %v977_v15 = vsub.s32 0, %v970_v11  ;;  %v149_v16 = vsub.s32 1, %v970_v11  ;;  %v62_v59 = vld [vmem:[%s1101_s2 + $0x8] sm:$0x7f] }
   0x9   :  { %753 = vmatpush3.bf16.msra.mxu1 %v804_v3  ;;  %v159_v17 = vsub.s32 2, %v970_v11  ;;  %v169_v18 = vsub.s32 3, %v970_v11  ;;  %v179_v20 = vsub.s32 4, %v970_v11  ;;  %v189_v28 = vsub.s32 5, %v970_v11 }
   0xa   :  { %758 = vmatprep.subr.bf16.mxu1 %v847_v2  ;;  %v76_v19 = vrot.slane %v75_v13, 7  ;;  %v140_v21 = vrot.slane %v61_v14, %v977_v15  ;;  %v150_v22 = vrot.slane %v61_v14, %v149_v16  ;;  %v199_v33 = vsub.s32 6, %v970_v11 }
   0xb   :  { %v160_v25 = vrot.slane %v61_v14, %v159_v17  ;;  %v170_v27 = vrot.slane %v61_v14, %v169_v18  ;;  %v180_v40 = vrot.slane %v61_v14, %v179_v20  ;;  %v190_v50 = vrot.slane %v61_v14, %v189_v28 }
   0xc   :  { %v78_v23 = vsel %vm77_vm3, %v76_v19, %v74_v12  ;;  %v209_v51 = vsub.s32 7, %v970_v11  ;;  %v200_v58 = vrot.slane %v61_v14, %v199_v33  ;;  %v205_v9 = vld [vmem:[#allocation2 + $0x7] sm:$0xff]  ;;  %v206_v10 = vld [vmem:[#allocation2 + $0x1f] sm:$0xff] }
   0xd   :  { %v79_v26 = vpack.c.b16 %v78_v23, %v78_v23  ;;  %v135_v30 = vld [vmem:[#allocation2] sm:$0xff]  ;;  %v136_v31 = vld [vmem:[#allocation2 + $0x18] sm:$0xff] }
   0xe   :  { %v145_v32 = vld [vmem:[#allocation2 + $0x1] sm:$0xff]  ;;  %v141_v34 = vmul.f32 %v140_v21, %v135_v30  ;;  %v142_v35 = vmul.f32 %v140_v21, %v136_v31  ;;  %v146_v36 = vld [vmem:[#allocation2 + $0x19] sm:$0xff]  ;;  %v210_v3 = vrot.slane %v61_v14, %v209_v51  ;;  %v220_v21 = vrot.slane %v62_v59, %v977_v15 }
   0xf   :  { %755 = vmatmul.mubr.msk.bf16.vlgmr.msra.gmra.mrb[0].mxu1 %vm58_vm1, %v79_v26  ;;  %v151_v37 = vmul.f32 %v150_v22, %v145_v32  ;;  %v155_v38 = vld [vmem:[#allocation2 + $0x2] sm:$0xff]  ;;  %v156_v39 = vld [vmem:[#allocation2 + $0x1a] sm:$0xff]  ;;  %v152_v41 = vmul.f32 %v150_v22, %v146_v36 }
  0x10   :  { %759 = vmatpush3.bf16.msra.mxu1 %v805_v24  ;;  %762 = vmatprep.mubr.msk.bf16.mxu1 %vm848_vm0, %v847_v2  ;;  %v161_v42 = vmul.f32 %v160_v25, %v155_v38  ;;  %v162_v43 = vmul.f32 %v160_v25, %v156_v39  ;;  %v165_v44 = vld [vmem:[#allocation2 + $0x3] sm:$0xff]  ;;  %v166_v45 = vld [vmem:[#allocation2 + $0x1b] sm:$0xff]  ;;  %v211_v25 = vmul.f32 %v210_v3, %v205_v9 }
  0x11   :  { %v175_v46 = vld [vmem:[#allocation2 + $0x4] sm:$0xff]  ;;  %760 = vmatprep.subr.bf16.mxu1 %v847_v2  ;;  %v153_v47 = vadd.f32 %v151_v37, %v141_v34  ;;  %v171_v48 = vmul.f32 %v170_v27, %v165_v44  ;;  %v176_v49 = vld [vmem:[#allocation2 + $0x1c] sm:$0xff]  ;;  %v154_v52 = vadd.f32 %v152_v41, %v142_v35  ;;  %v172_v53 = vmul.f32 %v170_v27, %v166_v45 }
  0x12   :  { %v185_v54 = vld [vmem:[#allocation2 + $0x5] sm:$0xff]  ;;  %v181_v56 = vmul.f32 %v180_v40, %v175_v46  ;;  %v186_v57 = vld [vmem:[#allocation2 + $0x1d] sm:$0xff]  ;;  %v182_v61 = vmul.f32 %v180_v40, %v176_v49  ;;  %v230_v27 = vrot.slane %v62_v59, %v149_v16 }
  0x13   :  { %v163_v55 = vadd.f32 %v161_v42, %v153_v47  ;;  %v164_v60 = vadd.f32 %v162_v43, %v154_v52  ;;  %v195_v62 = vld [vmem:[#allocation2 + $0x6] sm:$0xff]  ;;  %v191_v0 = vmul.f32 %v190_v50, %v185_v54  ;;  %v196_v1 = vld [vmem:[#allocation2 + $0x1e] sm:$0xff]  ;;  %v192_v8 = vmul.f32 %v190_v50, %v186_v57 }
  0x14   :  { %761 = vmatpush3.bf16.msra.mxu1 %v806_v29  ;;  %v201_v13 = vmul.f32 %v200_v58, %v195_v62  ;;  %v215_v19 = vld [vmem:[#allocation2 + $0x8] sm:$0xff]  ;;  %v202_v23 = vmul.f32 %v200_v58, %v196_v1  ;;  %v216_v26 = vld [vmem:[#allocation2 + $0x20] sm:$0xff] }
  0x15   :  { %v173_v63 = vadd.f32 %v171_v48, %v163_v55  ;;  %774 = vmatprep.subr.bf16.mxu1 %v847_v2  ;;  %v174_v7 = vadd.f32 %v172_v53, %v164_v60 }
  0x17   :  { %v183_v12 = vadd.f32 %v181_v56, %v173_v63  ;;  %v184_v22 = vadd.f32 %v182_v61, %v174_v7 }
  0x19   :  { %v193_v24 = vadd.f32 %v191_v0, %v183_v12 }
  0x1a   :  { %21 = vsyncpa [#allocation5], 0  ;;  %v194_v14 = vadd.f32 %v192_v8, %v184_v22  ;;  %v212_v29 = vmul.f32 %v210_v3, %v206_v10  ;;  %v225_v30 = vld [vmem:[#allocation2 + $0x9] sm:$0xff]  ;;  %v221_v32 = vmul.f32 %v220_v21, %v215_v19  ;;  %v226_v34 = vld [vmem:[#allocation2 + $0x21] sm:$0xff]  ;;  %v240_v35 = vrot.slane %v62_v59, %v159_v17 }
  0x1b   :  { %v203_v31 = vadd.f32 %v201_v13, %v193_v24  ;;  %v222_v37 = vmul.f32 %v220_v21, %v216_v26  ;;  %v235_v38 = vld [vmem:[#allocation2 + $0xa] sm:$0xff]  ;;  %v231_v40 = vmul.f32 %v230_v27, %v225_v30  ;;  %v236_v41 = vld [vmem:[#allocation2 + $0x22] sm:$0xff]  ;;  %v250_v42 = vrot.slane %v62_v59, %v169_v18  ;;  %v713_v19 = vld [vmem:[%s1102_s3] ss:$0 sm:$0xff] }
  0x1c   :  { %v204_v36 = vadd.f32 %v202_v23, %v194_v14  ;;  %v232_v43 = vmul.f32 %v230_v27, %v226_v34  ;;  %v245_v44 = vld [vmem:[#allocation2 + $0xb] sm:$0xff]  ;;  %v241_v46 = vmul.f32 %v240_v35, %v235_v38  ;;  %v246_v47 = vld [vmem:[#allocation2 + $0x23] sm:$0xff]  ;;  %v260_v48 = vrot.slane %v62_v59, %v179_v20 }
  0x1d   :  { %v213_v39 = vadd.f32 %v211_v25, %v203_v31  ;;  %v242_v17 = vmul.f32 %v240_v35, %v236_v41  ;;  %v255_v50 = vld [vmem:[#allocation2 + $0xc] sm:$0xff]  ;;  %v251_v52 = vmul.f32 %v250_v42, %v245_v44  ;;  %v256_v53 = vld [vmem:[#allocation2 + $0x24] sm:$0xff]  ;;  %v270_v54 = vrot.slane %v62_v59, %v189_v28  ;;  %v714_v35 = vld [vmem:[%s1104_s5] ss:$0 sm:$0xff] }
  0x1e   :  { %v214_v16 = vadd.f32 %v212_v29, %v204_v36  ;;  %v252_v18 = vmul.f32 %v250_v42, %v246_v47  ;;  %v265_v56 = vld [vmem:[#allocation2 + $0xd] sm:$0xff]  ;;  %v261_v58 = vmul.f32 %v260_v48, %v255_v50  ;;  %v266_v60 = vld [vmem:[#allocation2 + $0x25] sm:$0xff]  ;;  %v280_v61 = vrot.slane %v62_v59, %v199_v33  ;;  %v814_v47 = vld [vmem:[%s1109_s10 + $0x18] sm:$0xff]  }
  0x1f   :  { %v223_v45 = vadd.f32 %v221_v32, %v213_v39  ;;  %v262_v20 = vmul.f32 %v260_v48, %v256_v53  ;;  %v275_v63 = vld [vmem:[#allocation2 + $0xe] sm:$0xff]  ;;  %v271_v1 = vmul.f32 %v270_v54, %v265_v56  ;;  %v276_v3 = vld [vmem:[#allocation2 + $0x26] sm:$0xff]  ;;  %v272_v8 = vmul.f32 %v270_v54, %v266_v60 }
  0x20   :  { %v224_v49 = vadd.f32 %v222_v37, %v214_v16  ;;  %v281_v10 = vmul.f32 %v280_v61, %v275_v63  ;;  %v282_v12 = vmul.f32 %v280_v61, %v276_v3  ;;  %v807_v25 = vld [vmem:[%s1105_s6] sm:$0xff]   ;;  %v809_v27 = vld [vmem:[%s1105_s6 + $0x8] sm:$0xff]   ;;  %v363_v29 = vpack.c.bf16 %v950_v6, %v945_v5 }
  0x21   :  { %v233_v51 = vadd.f32 %v231_v40, %v223_v45  ;;  %v808_v26 = vld [vmem:[%s1106_s7] sm:$0xff]   ;;  %v810_v14 = vld [vmem:[%s1106_s7 + $0x8] sm:$0xff]   ;;  %v849_v48 = vmov 1966171168   ;;  %vm587_vm4 = vcmask 523264   ;;  %vm691_vm5 = vcmask 57344  }
  0x22   :  { %v234_v55 = vadd.f32 %v232_v43, %v224_v49  ;;  %767 = vmatpush3.bf16.msra.mxu0 %v808_v26  ;;  %v811_v44 = vld [vmem:[%s1109_s10] sm:$0xff]   ;;  %v812_v45 = vld [vmem:[%s1109_s10 + $0x8] sm:$0xff]   ;;  %v487_v49 = vunpack.c.l.s4 %v849_v48 }
  0x23   :  { %v243_v57 = vadd.f32 %v241_v46, %v233_v51  ;;  %768 = vmatprep.subr.bf16.mxu0 %v847_v2  ;;  %v813_v46 = vld [vmem:[%s1109_s10 + $0x10] sm:$0xff]  }
  0x24   :  { %v244_v62 = vadd.f32 %v242_v17, %v234_v55  ;;  %v488_v17 = vunpack.c.0.s8 %v487_v49  ;;  %v731_v49 = vld [vmem:[%s1111_s12] ss:$0 sm:$0xff]  ;;  %s851_s12 = smov [#allocation4]  }
  0x25   :  { %v253_v0 = vadd.f32 %v251_v52, %v243_v57  ;;  %s699_s28 = sshll.u32 %s851_s12, 4  ;;  %s700_s28 = int_to_ptr.vmem [resolvable:$true] %s699_s28 }
  0x26   :  { %v254_v7 = vadd.f32 %v252_v18, %v244_v62  ;;  %769 = vmatpush3.bf16.msra.mxu0 %v810_v14  ;;  %v491_v50 = vsub.s32 %v488_v17, %v970_v11  ;;  %v732_v14 = vld [vmem:[#allocation3] ss:$0 sm:$0xff]  ;;  %s823_s4 = scalar_lea.vmem %s700_s28, 32  ;;  %p828_p1 = scmp.lt.s32.totalorder %s700_s28, %s700_s28 }
  0x27   :  { %v263_v9 = vadd.f32 %v261_v58, %v253_v0  ;;  %782 = vmatprep.subr.bf16.mxu0 %v847_v2  ;;  %v724_v58 = vld [vmem:[%s1108_s9] ss:$0 sm:$0xff]  ;;  %p824_p0 = scmp.ne.s32.totalorder %s700_s28, %s823_s4  ;;  %p829_p2 = scmp.lt.s32.totalorder %s823_s4, %s823_s4 }
  0x28   :  { %v264_v28 = vadd.f32 %v262_v20, %v254_v7 }
  0x29   :  { %v273_v13 = vadd.f32 %v271_v1, %v263_v9  ;;  %p830_p3 = por %p829_p2, %p828_p1 }
  0x2a   :  { %v274_v21 = vadd.f32 %v272_v8, %v264_v28 }
  0x2b   :  { %v283_v22 = vadd.f32 %v281_v10, %v273_v13  ;;  %p831_p4 = pnand %p830_p3, %p824_p0 }
  0x2c   :  { %v284_v33 = vadd.f32 %v282_v12, %v274_v21 }
  0x2d   :  { %v291_v59 = vadd.f32 %v713_v19, %v283_v22 }
  0x2e   :  { %v292_v23 = vadd.f32 %v713_v19, %v284_v33 }
  0x30   :  { %v293_v24 = vpack.c.bf16 %v292_v23, %v291_v59 }
  0x32   :  { %763 = vmatmul.mubr.msk.bf16.vlgmr.msra.gmra.mrb[4].mxu1 %vm58_vm1, %v293_v24 }
  0x33   :  { %778 = vmatprep.mubr.msk.bf16.mxu1 %vm848_vm0, %v847_v2  ;;  %775 = vmatpush3.bf16.msra.mxu1 %v807_v25 }
  0x34   :  { %776 = vmatprep.subr.bf16.mxu1 %v847_v2 }
  0x37   :  { %777 = vmatpush3.bf16.msra.mxu1 %v809_v27 }
  0x3a   :  { %779 = vmatmul.mubr.msk.bf16.vlgmr.msra.gmra.mrb[8].mxu1 %vm58_vm1, %v363_v29  ;;  %v850_v29 = vmov 0  }
  0x3b   :  { %801 = vset.pattern.permute.xlu1 %v850_v29  ;;  %802 = vset.pattern.permute.xlu0 %v850_v29 }
  0x3c   :  { %672 = vperm.xlu1 %801, %v732_v14  }
  0xe2   :  { %v129_v30 = vpop.f32.mrb[0].mxu1 }
  0xe3   :  { %v756_v31 = vpop.f32.mrb[1].mxu1  ;;  %v492_v51 = vrot.slane %v129_v30, %v491_v50  ;;  %v725_v30 = vld [vmem:[%s1110_s11] ss:$0 sm:$0xff] }
  0xe4   :  { %v132_v32 = vpop.f32.mrb[2].mxu1 }
  0xe5   :  { %v757_v34 = vpop.f32.mrb[3].mxu1  ;;  %v493_v52 = vcombine.high %v492_v51, %v492_v51  ;;  %v500_v53 = vrot.slane %v492_v51, %v491_v50 }
  0xe7   :  { %v507_v54 = vrot.slane %v493_v52, %v491_v50  ;;  %v511_v56 = vrot.slane %v500_v53, %v977_v15 }
  0xe9   :  { %v515_v62 = vrot.slane %v507_v54, %v977_v15 }
 0x105   :  { %v354_v36 = vpop.f32.mrb[4].mxu1 }
 0x106   :  { %v764_v37 = vpop.f32.mrb[5].mxu1  ;;  %v355_v39 = vadd.f32 %v714_v35, %v354_v36 }
 0x107   :  { %v357_v38 = vpop.f32.mrb[6].mxu1 }
 0x108   :  { %v358_v40 = vadd.f32 %v714_v35, %v357_v38  ;;  %v765_v41 = vpop.f32.mrb[7].mxu1 }
 0x10a   :  { %v368_v5 = vpack.c.bf16 %v358_v40, %v355_v39 }
 0x10c   :  { %771 = vmatmul.mubr.msk.bf16.vlgmr.msra.gmra.mrb[0].mxu0 %vm58_vm1, %v368_v5 }
 0x10d   :  { %790 = vmatprep.mubr.msk.bf16.mxu0 %vm848_vm0, %v847_v2  ;;  %v478_v6 = vpop.f32.mrb[8].mxu1  ;;  %783 = vmatpush3.bf16.msra.mxu0 %v811_v44 }
 0x10e   :  { %v780_v42 = vpop.f32.mrb[9].mxu1  ;;  %784 = vmatprep.subr.bf16.mxu0 %v847_v2 }
 0x10f   :  { %v481_v16 = vpop.f32.mrb[10].mxu1 }
 0x110   :  { %v781_v43 = vpop.f32.mrb[11].mxu1 }
 0x111   :  { %785 = vmatpush3.bf16.msra.mxu0 %v812_v45 }
 0x112   :  { %786 = vmatprep.subr.bf16.mxu0 %v847_v2 }
 0x115   :  { %787 = vmatpush3.bf16.msra.mxu0 %v813_v46 }
 0x116   :  { %788 = vmatprep.subr.bf16.mxu0 %v847_v2 }
 0x119   :  { %789 = vmatpush3.bf16.msra.mxu0 %v814_v47 }
 0x1df   :  { %v422_v55 = vpop.f32.mrb[0].mxu0 }
 0x1e0   :  { %v479_v18 = vadd.f32 %v478_v6, %v422_v55  ;;  %v772_v57 = vpop.f32.mrb[1].mxu0 }
 0x1e1   :  { %v425_v2 = vpop.f32.mrb[2].mxu0  ;;  %v673_v57 = vpop.permute.xlu1 %672 }
 0x1e2   :  { %v518_v60 = vadd.f32 %v511_v56, %v479_v18  ;;  %v482_v61 = vadd.f32 %v481_v16, %v425_v2  ;;  %v773_v20 = vpop.f32.mrb[3].mxu0  ;;  %v680_v56 = vand.u32 127, %v137_v4 }
 0x1e4   :  { %v527_v63 = vadd.f32 %v724_v58, %v518_v60  ;;  %v519_v0 = vadd.f32 %v515_v62, %v482_v61 }
 0x1e6   :  { %v531_v1 = vmul.f32 0.044715, %v527_v63  ;;  %v528_v3 = vadd.f32 %v724_v58, %v519_v0  ;;  %v529_v15 = vmul.f32 0.5, %v527_v63  ;;  %v683_v58 = vsub.s32 %v680_v56, %v970_v11 }
 0x1e8   :  { %v533_v7 = vmul.f32 %v531_v1, %v527_v63  ;;  %v532_v8 = vmul.f32 0.044715, %v528_v3  ;;  %v530_v23 = vmul.f32 0.5, %v528_v3 }
 0x1ea   :  { %v535_v9 = vmul.f32 %v533_v7, %v527_v63  ;;  %v534_v10 = vmul.f32 %v532_v8, %v528_v3 }
 0x1ec   :  { %v537_v28 = vadd.f32 %v535_v9, %v527_v63  ;;  %v536_v12 = vmul.f32 %v534_v10, %v528_v3 }
 0x1ee   :  { %v539_v13 = vmul.f32 0.7978846, %v537_v28  ;;  %v538_v19 = vadd.f32 %v536_v12, %v528_v3 }
 0x1f0   :  { %815 = vtanh.f32 %v539_v13  ;;  %v540_v21 = vmul.f32 0.7978846, %v538_v19 }
 0x1f2   :  { %817 = vtanh.f32 %v540_v21 }
 0x1fa   :  { %v816_v22 = vpop.eup %815 }
 0x1fb   :  { %v543_v33 = vadd.f32 1.0, %v816_v22 }
 0x1fc   :  { %v818_v59 = vpop.eup %817 }
 0x1fd   :  { %v544_v24 = vadd.f32 1.0, %v818_v59  ;;  %v545_v25 = vmul.f32 %v543_v33, %v529_v15 }
 0x1ff   :  { %v546_v26 = vmul.f32 %v544_v24, %v530_v23 }
 0x201   :  { %v547_v27 = vpack.c.bf16 %v546_v26, %v545_v25 }
 0x203   :  { %791 = vmatmul.mubr.msk.bf16.vlgmr.msra.gmra.mrb[4].mxu0 %vm587_vm4, %v547_v27 }
 0x2d6   :  { %v625_v31 = vpop.f32.mrb[4].mxu0 }
 0x2d7   :  { %v626_v32 = vadd.f32 %v725_v30, %v625_v31  ;;  %v792_v34 = vpop.f32.mrb[5].mxu0 }
 0x2d8   :  { %v628_v35 = vpop.f32.mrb[6].mxu0 }
 0x2d9   :  { %v634_v36 = vmul.f32 0.044715, %v626_v32  ;;  %v629_v37 = vadd.f32 %v725_v30, %v628_v35  ;;  %v793_v38 = vpop.f32.mrb[7].mxu0  ;;  %v632_v46 = vmul.f32 0.5, %v626_v32 }
 0x2db   :  { %v636_v39 = vmul.f32 %v634_v36, %v626_v32  ;;  %v635_v40 = vmul.f32 0.044715, %v629_v37  ;;  %v633_v50 = vmul.f32 0.5, %v629_v37 }
 0x2dd   :  { %v637_v41 = vmul.f32 %v635_v40, %v629_v37  ;;  %v638_v5 = vmul.f32 %v636_v39, %v626_v32 }
 0x2df   :  { %v640_v6 = vadd.f32 %v638_v5, %v626_v32  ;;  %v639_v42 = vmul.f32 %v637_v41, %v629_v37 }
 0x2e1   :  { %v642_v16 = vmul.f32 0.7978846, %v640_v6  ;;  %v641_v43 = vadd.f32 %v639_v42, %v629_v37 }
 0x2e3   :  { %819 = vtanh.f32 %v642_v16  ;;  %v643_v44 = vmul.f32 0.7978846, %v641_v43 }
 0x2e5   :  { %821 = vtanh.f32 %v643_v44 }
 0x2ed   :  { %v820_v45 = vpop.eup %819 }
 0x2ee   :  { %v646_v47 = vadd.f32 1.0, %v820_v45 }
 0x2ef   :  { %v822_v48 = vpop.eup %821 }
 0x2f0   :  { %v648_v17 = vmul.f32 %v646_v47, %v632_v46  ;;  %v647_v51 = vadd.f32 1.0, %v822_v48 }
 0x2f2   :  { %v657_v52 = vmul.f32 %v731_v49, %v648_v17  ;;  %v649_v53 = vmul.f32 %v647_v51, %v633_v50 }
 0x2f4   :  { %v659_v54 = vsel %vm58_vm1, %v657_v52, 0.0  ;;  %v658_v55 = vmul.f32 %v731_v49, %v649_v53 }
 0x2f5   :  { %660 = vadd.xlane.f32.xlu0 %v659_v54 }
 0x2f6   :  { %v662_v18 = vsel %vm58_vm1, %v658_v55, 0.0 }
 0x2f9   :  { %663 = vadd.xlane.f32.xlu0 %v662_v18 }
 0x382   :  { %v661_v2 = vpop.xlane.xlu0 %660 }
 0x383   :  { %v675_v60 = vadd.f32 %v673_v57, %v661_v2 }
 0x385   :  { %v684_v61 = vrot.slane %v675_v60, %v683_v58 }
 0x386   :  { %v664_v62 = vpop.xlane.xlu0 %663 }
 0x387   :  { %692 = vst.msk [vmem:[#allocation4] sm:$0x1] %vm691_vm5, %v684_v61  ;;  %v676_v20 = vadd.f32 %v673_v57, %v664_v62 }
 0x389   :  { %v688_v63 = vrot.slane %v676_v20, %v683_v58 }
 0x38b   :  { %693 = vst.msk [vmem:[#allocation4 + $0x1] sm:$0x1] %vm691_vm5, %v688_v63 }
 0x38c   :  { %834 = shalt.err (!%p831_p4)
}
 0x38d   :  { %s835_s30 = scalar_lea.hbm %s1113_s14, 32 }
 0x38e   :  { %p836_p5 = scmp.ne.s32.totalorder %s1113_s14, %s835_s30  ;;  %p839_p6 = scmp.lt.u32.totalorder %s835_s30, %s1113_s14 }
 0x390   :  { %p841_p7 = pnand %p839_p6, %p836_p5 }
 0x392   :  { %844 = shalt.err (!%p841_p7)
}
 0x393   :  { %s852_s18 = smov 16   ;;  %s853_s13 = smov 1  }
 0x394   :  { %705 = dma.vmem_to_hbm [thread:$0]  %s700_s28, 32, %s1113_s14, [#allocation5], %s852_s18, %s852_s18, %s853_s13  }
 0x395   :  { %845 = dma.done.wait [#allocation5], 32  }
 0x396   :  { %846 = vsyncadd [#allocation5], 4294967264 }
 0x397   :  { %709 = vsyncpa [#allocation5], 1 }

// kernel: _lambda_.2
= control target key start
LH: loop header
LB: loop body
LE: loop exit
PB: predicated region body
PF: predicated region fallthrough
CT: control target
= control target key end

     0   :  { %s8841_s0 = inlined_call_operand.vmem [shape: f32[2,8,32], index: 0, kind: input, shape index: {}]   ;;  %s8842_s1 = inlined_call_operand.vmem [shape: f32[2,1,1], index: 1, kind: input, shape index: {}]   ;;  %s8843_s2 = inlined_call_operand.vmem [shape: bf16[32,96], index: 2, kind: input, shape index: {}]   ;;  %s8844_s3 = inlined_call_operand.hbm [shape: f32[1,96], index: 3, kind: input, shape index: {}]   ;;  %s8845_s4 = inlined_call_operand.hbm [shape: f32[16,48], index: 4, kind: input, shape index: {}]   ;;  %s8846_s5 = inlined_call_operand.hbm [shape: f32[1,48], index: 5, kind: input, shape index: {}]   ;;  %s8847_s6 = inlined_call_operand.hbm [shape: f32[16,48], index: 6, kind: input, shape index: {}]   ;;  %s8848_s7 = inlined_call_operand.vmem [shape: f32[1,48], index: 7, kind: input, shape index: {}]   ;;  %s8849_s8 = inlined_call_operand.vmem [shape: bf16[32,96], index: 8, kind: input, shape index: {}]   ;;  %s8850_s9 = inlined_call_operand.vmem [shape: f32[1,96], index: 9, kind: input, shape index: {}]   ;;  %s8851_s10 = inlined_call_operand.vmem [shape: f32[16,48], index: 10, kind: input, shape index: {}]   ;;  %s8852_s11 = inlined_call_operand.vmem [shape: f32[1,48], index: 11, kind: input, shape index: {}]   ;;  %s8853_s12 = inlined_call_operand.vmem [shape: f32[16,48], index: 12, kind: input, shape index: {}]   ;;  %s8854_s13 = inlined_call_operand.vmem [shape: f32[1,48], index: 13, kind: input, shape index: {}]   ;;  %s8855_s14 = inlined_call_operand.hbm [shape: f32[2,8,32], index: 14, kind: output, shape index: {0}]   ;;  %s8856_s15 = inlined_call_operand.vmem [shape: f32[2,1,32], index: 15, kind: output, shape index: {1}]  }
   0x1   :  { %8858 = sst [smem:[#allocation18_spill]] %s8855_s14 }
   0x2   :  { %21 = vsyncpa [#allocation6], 0 }
   0x3   :  { %22 = vsyncpa [#allocation9], 0 }
   0x4   :  { %23 = vsyncpa [#allocation12], 0 }
   0x5   :  { %24 = vsyncpa [#allocation7], 0  ;;  %s7170_s18 = smov [#allocation8]   ;;  %s7052_s22 = scalar_lea.hbm %s8845_s4, 256 }
   0x6   :  { %s46_s19 = sshll.u32 %s7170_s18, 4  ;;  %p7053_p0 = scmp.ne.s32.totalorder %s8845_s4, %s7052_s22  ;;  %s47_s19 = int_to_ptr.vmem [resolvable:$true] %s46_s19 }
   0x7   :  { %p7056_p1 = scmp.lt.u32.totalorder %s7052_s22, %s8845_s4 }
   0x9   :  { %p7058_p2 = pnand %p7056_p1, %p7053_p0 }
   0xb   :  { %7061 = shalt.err (!%p7058_p2)
}
   0xc   :  { %s7062_s27 = scalar_lea.vmem %s47_s19, 256  ;;  %p7067_p4 = scmp.lt.s32.totalorder %s47_s19, %s47_s19 }
   0xd   :  { %p7063_p3 = scmp.ne.s32.totalorder %s47_s19, %s7062_s27  ;;  %p7068_p5 = scmp.lt.s32.totalorder %s7062_s27, %s7062_s27 }
   0xf   :  { %p7069_p6 = por %p7068_p5, %p7067_p4 }
  0x11   :  { %p7070_p7 = pnand %p7069_p6, %p7063_p3 }
  0x13   :  { %7073 = shalt.err (!%p7070_p7)
}
  0x14   :  { %s7171_s28 = smov 128   ;;  %s7172_s29 = smov 8  }
  0x15   :  { %52 = dma.hbm_to_vmem [thread:$0]  %s8845_s4, 256, %s47_s19, [#allocation9], %s7171_s28, %s7171_s28, %s7172_s29  }
  0x16   :  { %s7173_s17 = smov [#allocation5]   ;;  %s7174_s20 = smov [#allocation10]  }
  0x17   :  { %s37_s18 = sshll.u32 %s7173_s17, 4  ;;  %s59_s21 = sshll.u32 %s7174_s20, 4  ;;  %s38_s18 = int_to_ptr.vmem [resolvable:$true] %s37_s18  ;;  %s60_s21 = int_to_ptr.vmem [resolvable:$true] %s59_s21 }
  0x18   :  { %s7074_s24 = scalar_lea.hbm %s8844_s3, 16 }
  0x19   :  { %p7075_p8 = scmp.ne.s32.totalorder %s8844_s3, %s7074_s24  ;;  %p7078_p9 = scmp.lt.u32.totalorder %s7074_s24, %s8844_s3 }
  0x1b   :  { %p7080_p10 = pnand %p7078_p9, %p7075_p8 }
  0x1d   :  { %7083 = shalt.err (!%p7080_p10)
}
  0x1e   :  { %s7084_s4 = scalar_lea.vmem %s38_s18, 16  ;;  %s7088_s19 = scalar_lea.vmem %s38_s18, 32 }
  0x1f   :  { %p7085_p11 = scmp.ne.s32.totalorder %s38_s18, %s7084_s4  ;;  %p7089_p12 = scmp.lt.s32.totalorder %s38_s18, %s38_s18 }
  0x20   :  { %p7090_p13 = scmp.lt.s32.totalorder %s7088_s19, %s7084_s4 }
  0x22   :  { %p7091_p0 = por %p7090_p13, %p7089_p12 }
  0x24   :  { %p7092_p1 = pnand %p7091_p0, %p7085_p11 }
  0x26   :  { %7095 = shalt.err (!%p7092_p1)
}
  0x27   :  { %40 = dma.hbm_to_vmem [thread:$0]  %s8844_s3, 16, %s38_s18, [#allocation6]  }
  0x28   :  { %s7096_s14 = scalar_lea.hbm %s8846_s5, 16 }
  0x29   :  { %p7097_p2 = scmp.ne.s32.totalorder %s8846_s5, %s7096_s14  ;;  %p7100_p3 = scmp.lt.u32.totalorder %s7096_s14, %s8846_s5 }
  0x2b   :  { %p7102_p4 = pnand %p7100_p3, %p7097_p2 }
  0x2d   :  { %7105 = shalt.err (!%p7102_p4)
}
  0x2e   :  { %s7106_s26 = scalar_lea.vmem %s60_s21, 16  ;;  %s7110_s27 = scalar_lea.vmem %s60_s21, 32 }
  0x2f   :  { %p7107_p5 = scmp.ne.s32.totalorder %s60_s21, %s7106_s26  ;;  %p7111_p6 = scmp.lt.s32.totalorder %s60_s21, %s60_s21 }
  0x30   :  { %p7112_p7 = scmp.lt.s32.totalorder %s7110_s27, %s7106_s26 }
  0x32   :  { %p7113_p8 = por %p7112_p7, %p7111_p6 }
  0x34   :  { %p7114_p9 = pnand %p7113_p8, %p7107_p5 }
  0x36   :  { %7117 = shalt.err (!%p7114_p9)
}
  0x37   :  { %62 = dma.hbm_to_vmem [thread:$0]  %s8846_s5, 16, %s60_s21, [#allocation9]  }
  0x38   :  { %s7175_s4 = smov [#allocation11]   ;;  %s7118_s17 = scalar_lea.hbm %s8847_s6, 256 }
  0x39   :  { %s68_s19 = sshll.u32 %s7175_s4, 4  ;;  %p7119_p10 = scmp.ne.s32.totalorder %s8847_s6, %s7118_s17  ;;  %s69_s19 = int_to_ptr.vmem [resolvable:$true] %s68_s19 }
  0x3a   :  { %p7122_p11 = scmp.lt.u32.totalorder %s7118_s17, %s8847_s6 }
  0x3c   :  { %p7124_p12 = pnand %p7122_p11, %p7119_p10 }
  0x3e   :  { %7127 = shalt.err (!%p7124_p12)
}
  0x3f   :  { %s7128_s24 = scalar_lea.vmem %s69_s19, 256  ;;  %p7133_p0 = scmp.lt.s32.totalorder %s69_s19, %s69_s19 }
  0x40   :  { %p7129_p13 = scmp.ne.s32.totalorder %s69_s19, %s7128_s24  ;;  %p7134_p1 = scmp.lt.s32.totalorder %s7128_s24, %s7128_s24 }
  0x42   :  { %p7135_p2 = por %p7134_p1, %p7133_p0 }
  0x44   :  { %p7136_p3 = pnand %p7135_p2, %p7129_p13 }
  0x46   :  { %7139 = shalt.err (!%p7136_p3)
}
  0x47   :  { %74 = dma.hbm_to_vmem [thread:$0]  %s8847_s6, 256, %s69_s19, [#allocation12], %s7171_s28, %s7171_s28, %s7172_s29  }
  0x48   :  { %7162 = dma.done.wait [#allocation6], 16  }
  0x49   :  { %7163 = vsyncadd [#allocation6], 4294967280 }
  0x4a   :  { %7164 = dma.done.wait [#allocation9], 272  }
  0x4b   :  { %7165 = vsyncadd [#allocation9], 4294967024 }
  0x4c   :  { %7166 = dma.done.wait [#allocation12], 256  }
  0x4d   :  { %7167 = vsyncadd [#allocation12], 4294967040  ;;  %v7176_v0 = vmov 0.0   ;;  %v7177_v1 = vmov 0.0|0.0   ;;  %vm7178_vm0 = vmmov 0   ;;  %v6660_v2 = vld [vmem:[%s8843_s2] sm:$0xff]   ;;  %v104_v28 = vlaneseq }
  0x4e   :  { %6304 = vmatprep.subr.bf16.mxu0 %v7176_v0  ;;  %6544 = vmatprep.subr.bf16.mxu1 %v7177_v1  ;;  %v202_v3 = vld [vmem:[#allocation8] sm:$0xff]  ;;  %v203_v4 = vld [vmem:[#allocation8 + $0x8] sm:$0xff]  ;;  %v6661_v6 = vld [vmem:[%s8843_s2 + $0x8] sm:$0xff]   ;;  %vm154_vm1 = vcmask 261120   ;;  %s7179_s30 = smov 48   ;;  %vm199_vm2 = vcmask 785408  }
  0x4f   :  { %6316 = vmatprep.mubr.msk.f32.mxu1 %vm7178_vm0, %v7176_v0  ;;  %6308 = vmatprep.mubr.msk.bf16.mxu0 %vm7178_vm0, %v7176_v0  ;;  %v7331_v5 = vpack.c.bf16 %v203_v4, %v202_v3  ;;  %v204_v7 = vld [vmem:[#allocation11] sm:$0xff]  ;;  %v205_v8 = vld [vmem:[#allocation11 + $0x8] sm:$0xff]  ;;  %v7366_v13 = vld [vmem:[%s8848_s7] ss:$0 sm:$0xff]  ;;  %s7180_s16 = smov 16   ;;  %v7181_v29 = vmov 0  }
  0x50   :  { %6305 = vmatpush3.bf16.msra.mxu0 %v6660_v2  ;;  %v128_v9 = vld [vmem:[%s8841_s0] sm:$0xff]  ;;  %v129_v10 = vld [vmem:[%s8841_s0 + $0x8] sm:$0xff]  ;;  %v7344_v11 = vpack.c.bf16 %v205_v8, %v204_v7  ;;  %440 = vrot.lane.b32.xlu1 %v7366_v13, %s7179_s30  ;;  %v6098_v15 = vld [vmem:[#allocation5] ss:$0 sm:$0xff]  ;;  %v105_v30 = vshrl.u32 %v104_v28, 7  ;;  %vm125_vm3 = vcmask 7168  }
  0x51   :  { %6306 = vmatprep.subr.bf16.mxu0 %v7176_v0  ;;  %6546 = vmatpush3.bf16.msra.mxu1 %v7331_v5  ;;  %v130_v12 = vpack.c.bf16 %v129_v10, %v128_v9  ;;  %v6095_v31 = vld [vmem:[%s8842_s1 + $0x1] ss:$0 sm:$0xff]  ;;  %v6094_v32 = vld [vmem:[%s8842_s1] ss:$0 sm:$0xff]  ;;  %s7182_s1 = smov 32   ;;  %s7183_s23 = smov 112  }
  0x52   :  { %6547 = vmatprep.subr.bf16.mxu1 %v7177_v1  ;;  %6658 = vset.pattern.permute.xlu1 %v7181_v29  ;;  %v106_v33 = vcvt.s32.f32 %v105_v30  ;;  %v7396_v3 = vld [vmem:[#allocation10] ss:$0 sm:$0xff]  ;;  %s7184_s24 = smov 96   ;;  %vm586_vm6 = vcmask 1041409   ;;  %s7185_s5 = smov 64   ;;  %vm216_vm7 = vcmask 130048  }
  0x53   :  { %6659 = vset.pattern.permute.xlu0 %v7181_v29  ;;  %vm529_vm8 = vcmask 122880   ;;  %vm540_vm9 = vcmask 254080  }
  0x54   :  { %6307 = vmatpush3.bf16.msra.mxu0 %v6661_v6  ;;  %6317 = vmatmul.mubr.f32.vlgmr.msra.gmra.mrb[0].mxu1 %v7176_v0  ;;  %vm120_vm4 = vcmp.lt.f32.partialorder %v106_v33, %v6095_v31  ;;  %vm119_vm5 = vcmp.lt.f32.partialorder %v106_v33, %v6094_v32 }
  0x55   :  { %6553 = vmatprep.subr.bf16.mxu0 %v7177_v1  ;;  %6549 = vmatpush3.bf16.msra.mxu1 %v7344_v11  ;;  %v6097_v34 = vsel %vm120_vm4, 1.0, %v7176_v0  ;;  %v6096_v35 = vsel %vm119_vm5, 1.0, %v7176_v0 }
  0x56   :  { %6323 = vmatprep.mubr.msk.f32.mxu1 %vm7178_vm0, %v7176_v0  ;;  %6550 = vmatprep.subr.bf16.mxu1 %v7177_v1  ;;  %127 = vst.msk [vmem:[#allocation4 + $0x8] sm:$0xff] %vm125_vm3, %v6097_v34  ;;  %126 = vst.msk [vmem:[#allocation4] sm:$0xff] %vm125_vm3, %v6096_v35 }
  0x57   :  { %6309 = vmatmul.mubr.msk.bf16.vlgmr.msra.gmra.mrb[0].mxu0 %vm154_vm1, %v130_v12 }
  0x58   :  { %6555 = vmatpush3.bf16.msra.mxu0 %v7344_v11  ;;  %6337 = vmatprep.mubr.msk.f32.mxu0 %vm7178_vm0, %v7176_v0 }
  0x59   :  { %6324 = vmatmul.mubr.f32.vlgmr.msra.gmra.mrb[2].mxu1 %v7176_v0  ;;  %6559 = vmatprep.subr.bf16.mxu0 %v7177_v1 }
  0x5a   :  { %6552 = vmatpush3.bf16.msra.mxu1 %v7331_v5  ;;  %6330 = vmatprep.mubr.msk.f32.mxu1 %vm7178_vm0, %v7176_v0 }
  0x5b   :  { %6556 = vmatprep.subr.bf16.mxu1 %v7177_v1 }
  0x5d   :  { %v215_v56 = vld [vmem:[#allocation4 + $0xf] sm:$0x1]  ;;  %v214_v59 = vld [vmem:[#allocation4 + $0x7] sm:$0x1] }
  0x5e   :  { %v560_v58 = vsub.f32 1.0, %v215_v56  ;;  %v559_v60 = vsub.f32 1.0, %v214_v59 }
  0xc2   :  { %v7387_v39 = vpop.permute.xlu1 %440 }
 0x127   :  { %v7370_v14 = vpop.f32.mrb[0].mxu1 }
 0x128   :  { %v6318_v16 = vpop.f32.mrb[1].mxu1  ;;  %v386_v4 = vadd.f32 %v7396_v3, %v7370_v14  ;;  %v361_v10 = vrot.slane %v7370_v14, 1 }
 0x12a   :  { %v192_v17 = vpop.f32.mrb[0].mxu0  ;;  %v388_v7 = vrot.slane %v386_v4, 1 }
 0x12b   :  { %v193_v18 = vadd.f32 %v6098_v15, %v192_v17  ;;  %v6310_v19 = vpop.f32.mrb[1].mxu0 }
 0x12c   :  { %v356_v20 = vpop.f32.mrb[2].mxu1  ;;  %v195_v21 = vpop.f32.mrb[2].mxu0 }
 0x12d   :  { %200 = vst.msk [vmem:[#allocation2] sm:$0xff] %vm199_vm2, %v193_v18  ;;  %v458_v22 = vadd.f32 %v7366_v13, %v356_v20  ;;  %v6325_v23 = vpop.f32.mrb[3].mxu1  ;;  %v196_v24 = vadd.f32 %v6098_v15, %v195_v21  ;;  %v426_v25 = vrot.slane %v356_v20, 1  ;;  %v6311_v26 = vpop.f32.mrb[3].mxu0 }
 0x12f   :  { %201 = vst.msk [vmem:[#allocation2 + $0x8] sm:$0xff] %vm199_vm2, %v196_v24  ;;  %429 = vrot.lane.b32.xlu0 %v426_v25, %s7179_s30  ;;  %v460_v27 = vrot.slane %v458_v22, 1 }
 0x131   :  { %463 = vrot.lane.b32.xlu1 %v460_v27, %s7180_s16 }
 0x133   :  { %427 = vrot.lane.b32.xlu0 %v356_v20, %s7179_s30 }
 0x134   :  { %v210_v42 = vld [vmem:[#allocation2 + $0x7] sm:$0x1]  ;;  %v7406_v16 = vld [vmem:[#allocation2] sm:$0x1] }
 0x135   :  { %v364_v18 = vadd.f32 %v7370_v14, %v7406_v16 }
 0x136   :  { %v211_v36 = vld [vmem:[#allocation2 + $0xf] sm:$0x1]  ;;  %v209_v9 = vld [vmem:[#allocation2 + $0x8] sm:$0x1] }
 0x137   :  { %461 = vrot.lane.b32.xlu0 %v458_v22, %s7180_s16  ;;  %v365_v12 = vadd.f32 %v361_v10, %v209_v9  ;;  %v372_v19 = vadd.f32 %v7396_v3, %v364_v18 }
 0x139   :  { %v373_v15 = vadd.f32 %v7396_v3, %v365_v12  ;;  %v6103_v20 = vmul.f32 -1.442695, %v372_v19 }
 0x13b   :  { %v6104_v17 = vmul.f32 -1.442695, %v373_v15 }
 0x1a1   :  { %v430_v37 = vpop.permute.xlu0 %429 }
 0x1a2   :  { %v434_v38 = vadd.f32 %v430_v37, %v211_v36 }
 0x1a3   :  { %v464_v52 = vpop.permute.xlu1 %463 }
 0x1a4   :  { %v444_v40 = vadd.f32 %v7387_v39, %v434_v38 }
 0x1a5   :  { %v428_v41 = vpop.permute.xlu0 %427 }
 0x1a6   :  { %v6107_v43 = vmul.f32 -1.442695, %v444_v40  ;;  %v433_v44 = vadd.f32 %v428_v41, %v210_v42 }
 0x1a8   :  { %6664 = vpow2.f32 %v6107_v43  ;;  %v443_v45 = vadd.f32 %v7387_v39, %v433_v44 }
 0x1a9   :  { %v462_v55 = vpop.permute.xlu0 %461 }
 0x1aa   :  { %v6106_v46 = vmul.f32 -1.442695, %v443_v45  ;;  %v213_v45 = vld [vmem:[#allocation4 + $0x8] sm:$0x1] }
 0x1ac   :  { %6666 = vpow2.f32 %v6106_v46 }
 0x1b2   :  { %v6665_v47 = vpop.eup %6664 }
 0x1b3   :  { %v452_v48 = vadd.f32 1.0, %v6665_v47 }
 0x1b5   :  { %6668 = vrcp.f32 %v452_v48 }
 0x1b6   :  { %v6667_v49 = vpop.eup %6666 }
 0x1b7   :  { %v451_v50 = vadd.f32 1.0, %v6667_v49 }
 0x1b9   :  { %6670 = vrcp.f32 %v451_v50  ;;  %v212_v50 = vld [vmem:[#allocation4] sm:$0x1] }
 0x1bf   :  { %v6669_v51 = vpop.eup %6668 }
 0x1c0   :  { %v468_v53 = vmul.f32 %v6669_v51, %v464_v52  ;;  %v482_v27 = vsub.f32 1.0, %v6669_v51  ;;  %v494_v31 = vmul.f32 0.0, %v6669_v51 }
 0x1c2   :  { %473 = vrot.lane.b32.xlu1 %v468_v53, %s7182_s1 }
 0x1c3   :  { %v7392_v54 = vpop.eup %6670 }
 0x1c4   :  { %v467_v57 = vmul.f32 %v7392_v54, %v462_v55  ;;  %v481_v14 = vsub.f32 1.0, %v7392_v54  ;;  %v544_v55 = vsub.f32 1.0, %v213_v45 }
 0x1c6   :  { %471 = vrot.lane.b32.xlu0 %v467_v57, %s7182_s1  ;;  %516 = vperm.xlu1 %6658, %v215_v56   ;;  %v543_v56 = vsub.f32 1.0, %v212_v50 }
 0x1ca   :  { %511 = vperm.xlu1 %6658, %v214_v59   ;;  %568 = vperm.xlu0 %6659, %v560_v58  }
 0x1ce   :  { %563 = vperm.xlu1 %6658, %v559_v60  }
 0x234   :  { %v474_v61 = vpop.permute.xlu1 %473 }
 0x235   :  { %v478_v62 = vadd.f32 %v474_v61, %v211_v36  ;;  %v493_v36 = vmul.f32 0.0, %v7392_v54 }
 0x237   :  { %6672 = vtanh.f32 %v478_v62 }
 0x238   :  { %v472_v63 = vpop.permute.xlu0 %471 }
 0x239   :  { %v477_v2 = vadd.f32 %v472_v63, %v210_v42 }
 0x23b   :  { %6674 = vtanh.f32 %v477_v2 }
 0x23c   :  { %6676 = vpow2.f32 %v6104_v17 }
 0x23d   :  { %6678 = vpow2.f32 %v6103_v20 }
 0x241   :  { %v6673_v6 = vpop.eup %6672 }
 0x242   :  { %487 = vrot.lane.b32.xlu0 %v6673_v6, %s7183_s23 }
 0x245   :  { %v6675_v8 = vpop.eup %6674  ;;  %v517_v22 = vpop.permute.xlu1 %516 }
 0x246   :  { %391 = vrot.lane.b32.xlu0 %v388_v7, %s7184_s24  ;;  %485 = vrot.lane.b32.xlu1 %v6675_v8, %s7183_s23  ;;  %v6677_v21 = vpop.eup %6676 }
 0x247   :  { %v381_v23 = vadd.f32 1.0, %v6677_v21  ;;  %v6679_v26 = vpop.eup %6678 }
 0x248   :  { %v380_v30 = vadd.f32 1.0, %v6679_v26 }
 0x249   :  { %v512_v24 = vpop.permute.xlu1 %511  ;;  %v569_v25 = vpop.permute.xlu0 %568  ;;  %6680 = vrcp.f32 %v381_v23 }
 0x24a   :  { %389 = vrot.lane.b32.xlu1 %v386_v4, %s7184_s24  ;;  %6682 = vrcp.f32 %v380_v30  ;;  %v572_v38 = vmul.f32 0.0, %v569_v25 }
 0x24d   :  { %v564_v28 = vpop.permute.xlu1 %563 }
 0x24e   :  { %v571_v46 = vmul.f32 0.0, %v564_v28 }
 0x253   :  { %v6681_v34 = vpop.eup %6680 }
 0x254   :  { %v6683_v53 = vpop.eup %6682  ;;  %v410_v6 = vsub.f32 1.0, %v6681_v34  ;;  %v422_v10 = vmul.f32 0.0, %v6681_v34 }
 0x255   :  { %v409_v18 = vsub.f32 1.0, %v6683_v53  ;;  %v421_v20 = vmul.f32 0.0, %v6683_v53 }
 0x2b4   :  { %v488_v29 = vpop.permute.xlu0 %487 }
 0x2b5   :  { %v492_v32 = vmul.f32 %v488_v29, %v482_v27 }
 0x2b7   :  { %v496_v33 = vadd.f32 %v494_v31, %v492_v32 }
 0x2b8   :  { %v392_v35 = vpop.permute.xlu0 %391  ;;  %v486_v37 = vpop.permute.xlu1 %485 }
 0x2b9   :  { %v7413_v40 = vmul.f32 %v517_v22, %v496_v33  ;;  %v396_v41 = vmul.f32 %v6681_v34, %v392_v35  ;;  %v491_v42 = vmul.f32 %v486_v37, %v481_v14  ;;  %v577_v34 = vld [vmem:[#allocation2 + $0x6] sm:$0x1]  ;;  %v578_v37 = vld [vmem:[#allocation2 + $0xe] sm:$0x1] }
 0x2bb   :  { %v7416_v43 = vadd.f32 %v572_v38, %v7413_v40  ;;  %v495_v44 = vadd.f32 %v493_v36, %v491_v42  ;;  %401 = vrot.lane.b32.xlu1 %v396_v41, %s7182_s1 }
 0x2bc   :  { %v390_v51 = vpop.permute.xlu1 %389 }
 0x2bd   :  { %v7419_v47 = vmul.f32 %v512_v24, %v495_v44  ;;  %v664_v49 = vrot.slane %v7416_v43, 7  ;;  %v395_v54 = vmul.f32 %v6683_v53, %v390_v51 }
 0x2bf   :  { %504 = vperm.xlu1 %6658, %v213_v45   ;;  %v7422_v48 = vadd.f32 %v571_v46, %v7419_v47 }
 0x2c1   :  { %v665_v52 = vsel %vm586_vm6, %v664_v49, %v7422_v48 }
 0x2c2   :  { %666 = vrot.lane.b32.xlu0 %v665_v52, %s7185_s5 }
 0x2c3   :  { %499 = vperm.xlu1 %6658, %v212_v50  }
 0x2c6   :  { %399 = vrot.lane.b32.xlu0 %v395_v54, %s7182_s1 }
 0x2ca   :  { %552 = vperm.xlu0 %6659, %v544_v55   ;;  %v582_v55 = vld [vmem:[#allocation4 + $0xe] sm:$0x1] }
 0x2ce   :  { %547 = vperm.xlu0 %6659, %v543_v56  }
 0x32d   :  { %v402_v57 = vpop.permute.xlu1 %401 }
 0x32e   :  { %v406_v58 = vadd.f32 %v402_v57, %v209_v9 }
 0x330   :  { %6684 = vtanh.f32 %v406_v58 }
 0x334   :  { %v667_v59 = vpop.permute.xlu0 %666 }
 0x335   :  { %6338 = vmatmul.mubr.msk.f32.vlgmr.msra.gmra.mrb[4].mxu0 %vm216_vm7, %v667_v59 }
 0x336   :  { %6561 = vmatpush3.bf16.msra.mxu0 %v7344_v11  ;;  %6351 = vmatprep.mubr.msk.f32.mxu0 %vm7178_vm0, %v7176_v0 }
 0x337   :  { %6565 = vmatprep.subr.bf16.mxu0 %v7177_v1 }
 0x338   :  { %v400_v60 = vpop.permute.xlu0 %399 }
 0x339   :  { %v405_v61 = vadd.f32 %v400_v60, %v7406_v16  ;;  %v923_v60 = vsub.f32 1.0, %v582_v55 }
 0x33a   :  { %v6685_v62 = vpop.eup %6684 }
 0x33b   :  { %6686 = vtanh.f32 %v405_v61  ;;  %415 = vrot.lane.b32.xlu1 %v6685_v62, %s7183_s23  ;;  %v581_v61 = vld [vmem:[#allocation4 + $0x6] sm:$0x1] }
 0x33c   :  { %v922_v62 = vsub.f32 1.0, %v581_v61 }
 0x33e   :  { %v505_v2 = vpop.permute.xlu1 %504 }
 0x342   :  { %v500_v4 = vpop.permute.xlu1 %499 }
 0x345   :  { %v6687_v63 = vpop.eup %6686 }
 0x346   :  { %413 = vrot.lane.b32.xlu0 %v6687_v63, %s7183_s23 }
 0x349   :  { %v553_v8 = vpop.permute.xlu0 %552 }
 0x34a   :  { %v556_v19 = vmul.f32 0.0, %v553_v8 }
 0x34d   :  { %v548_v15 = vpop.permute.xlu0 %547 }
 0x34e   :  { %v555_v24 = vmul.f32 0.0, %v548_v15 }
 0x3ad   :  { %v416_v7 = vpop.permute.xlu1 %415 }
 0x3ae   :  { %v420_v9 = vmul.f32 %v416_v7, %v410_v6 }
 0x3b0   :  { %v424_v12 = vadd.f32 %v422_v10, %v420_v9 }
 0x3b2   :  { %v7437_v17 = vmul.f32 %v505_v2, %v424_v12 }
 0x3b4   :  { %v7440_v22 = vadd.f32 %v556_v19, %v7437_v17 }
 0x3b6   :  { %v585_v27 = vrot.slane %v7440_v22, 7 }
 0x3b8   :  { %v414_v16 = vpop.permute.xlu0 %413 }
 0x3b9   :  { %v419_v21 = vmul.f32 %v414_v16, %v409_v18  ;;  %v576_v16 = vld [vmem:[#allocation2 + $0x9] sm:$0x1] }
 0x3bb   :  { %v423_v23 = vadd.f32 %v421_v20, %v419_v21  ;;  %v575_v21 = vld [vmem:[#allocation2 + $0x1] sm:$0x1] }
 0x3bd   :  { %v7442_v25 = vmul.f32 %v500_v4, %v423_v23 }
 0x3bf   :  { %v7445_v26 = vadd.f32 %v555_v24, %v7442_v25 }
 0x3c1   :  { %v587_v28 = vsel %vm586_vm6, %v585_v27, %v7445_v26 }
 0x3c2   :  { %588 = vrot.lane.b32.xlu1 %v587_v28, %s7183_s23 }
 0x408   :  { %v736_v29 = vpop.f32.mrb[4].mxu0 }
 0x409   :  { %v800_v30 = vrot.slane %v736_v29, 1  ;;  %v823_v31 = vadd.f32 %v7366_v13, %v736_v29  ;;  %v6339_v32 = vpop.f32.mrb[5].mxu0  ;;  %801 = vrot.lane.b32.xlu1 %v736_v29, %s7179_s30 }
 0x40b   :  { %803 = vrot.lane.b32.xlu0 %v800_v30, %s7179_s30  ;;  %v825_v33 = vrot.slane %v823_v31, 1 }
 0x40d   :  { %826 = vrot.lane.b32.xlu1 %v823_v31, %s7180_s16 }
 0x40f   :  { %828 = vrot.lane.b32.xlu0 %v825_v33, %s7180_s16 }
 0x434   :  { %v589_v14 = vpop.permute.xlu1 %588 }
 0x435   :  { %6331 = vmatmul.mubr.msk.f32.vlgmr.msra.gmra.mrb[4].mxu1 %vm216_vm7, %v589_v14 }
 0x436   :  { %6558 = vmatpush3.bf16.msra.mxu1 %v7331_v5  ;;  %6344 = vmatprep.mubr.msk.f32.mxu1 %vm7178_vm0, %v7176_v0 }
 0x437   :  { %6562 = vmatprep.subr.bf16.mxu1 %v7177_v1 }
 0x47b   :  { %v802_v35 = vpop.permute.xlu1 %801 }
 0x47c   :  { %v807_v36 = vadd.f32 %v802_v35, %v577_v34 }
 0x47d   :  { %v804_v38 = vpop.permute.xlu0 %803 }
 0x47e   :  { %v809_v41 = vadd.f32 %v807_v36, %v7387_v39  ;;  %v808_v42 = vadd.f32 %v804_v38, %v578_v37 }
 0x47f   :  { %v827_v54 = vpop.permute.xlu1 %826 }
 0x480   :  { %v6112_v44 = vmul.f32 -1.442695, %v809_v41  ;;  %v810_v45 = vadd.f32 %v808_v42, %v7387_v39 }
 0x481   :  { %v829_v58 = vpop.permute.xlu0 %828 }
 0x482   :  { %6688 = vpow2.f32 %v6112_v44  ;;  %v6113_v46 = vmul.f32 -1.442695, %v810_v45 }
 0x484   :  { %6690 = vpow2.f32 %v6113_v46 }
 0x48c   :  { %v6689_v49 = vpop.eup %6688 }
 0x48d   :  { %v817_v50 = vadd.f32 1.0, %v6689_v49 }
 0x48e   :  { %v6691_v51 = vpop.eup %6690 }
 0x48f   :  { %6692 = vrcp.f32 %v817_v50  ;;  %v818_v52 = vadd.f32 1.0, %v6691_v51 }
 0x491   :  { %6694 = vrcp.f32 %v818_v52 }
 0x499   :  { %v6693_v53 = vpop.eup %6692 }
 0x49a   :  { %v832_v56 = vmul.f32 %v6693_v53, %v827_v54  ;;  %v846_v35 = vsub.f32 1.0, %v6693_v53  ;;  %v858_v41 = vmul.f32 %v6693_v53, %v7422_v48 }
 0x49b   :  { %v6695_v57 = vpop.eup %6694 }
 0x49c   :  { %v833_v59 = vmul.f32 %v6695_v57, %v829_v58  ;;  %836 = vrot.lane.b32.xlu1 %v832_v56, %s7182_s1  ;;  %v847_v38 = vsub.f32 1.0, %v6695_v57  ;;  %v859_v45 = vmul.f32 %v6695_v57, %v7416_v43  ;;  %v580_v57 = vld [vmem:[#allocation4 + $0x9] sm:$0x1] }
 0x49e   :  { %838 = vrot.lane.b32.xlu0 %v833_v59, %s7182_s1 }
 0x4a0   :  { %931 = vperm.xlu1 %6658, %v923_v60  }
 0x4a2   :  { %881 = vperm.xlu0 %6659, %v582_v55  }
 0x4a4   :  { %926 = vperm.xlu1 %6658, %v922_v62  }
 0x4a6   :  { %876 = vperm.xlu0 %6659, %v581_v61  }
 0x508   :  { %v658_v63 = vpop.f32.mrb[4].mxu1 }
 0x509   :  { %v6332_v2 = vpop.f32.mrb[5].mxu1  ;;  %v760_v10 = vadd.f32 %v7396_v3, %v658_v63  ;;  %v741_v18 = vrot.slane %v658_v63, 1  ;;  %v744_v24 = vadd.f32 %v658_v63, %v575_v21  ;;  %v579_v63 = vld [vmem:[#allocation4 + $0x1] sm:$0x1] }
 0x50b   :  { %v762_v15 = vrot.slane %v760_v10, 1  ;;  %v745_v19 = vadd.f32 %v741_v18, %v576_v16  ;;  %v746_v27 = vadd.f32 %v7396_v3, %v744_v24 }
 0x50d   :  { %v747_v20 = vadd.f32 %v7396_v3, %v745_v19  ;;  %v6110_v28 = vmul.f32 -1.442695, %v746_v27 }
 0x50e   :  { %v837_v4 = vpop.permute.xlu1 %836 }
 0x50f   :  { %v842_v6 = vadd.f32 %v837_v4, %v577_v34  ;;  %v6111_v23 = vmul.f32 -1.442695, %v747_v20  ;;  %v907_v4 = vsub.f32 1.0, %v580_v57 }
 0x510   :  { %v839_v7 = vpop.permute.xlu0 %838 }
 0x511   :  { %v843_v8 = vadd.f32 %v839_v7, %v578_v37  ;;  %6696 = vtanh.f32 %v842_v6  ;;  %v906_v6 = vsub.f32 1.0, %v579_v63 }
 0x513   :  { %6698 = vtanh.f32 %v843_v8 }
 0x514   :  { %6700 = vpow2.f32 %v6111_v23 }
 0x515   :  { %6702 = vpow2.f32 %v6110_v28 }
 0x51b   :  { %v6697_v9 = vpop.eup %6696 }
 0x51c   :  { %850 = vrot.lane.b32.xlu1 %v6697_v9, %s7183_s23 }
 0x51d   :  { %v6699_v12 = vpop.eup %6698 }
 0x51e   :  { %852 = vrot.lane.b32.xlu0 %v6699_v12, %s7183_s23  ;;  %v6701_v29 = vpop.eup %6700 }
 0x51f   :  { %v932_v30 = vpop.permute.xlu1 %931  ;;  %v755_v31 = vadd.f32 1.0, %v6701_v29  ;;  %v6703_v14 = vpop.eup %6702 }
 0x520   :  { %763 = vrot.lane.b32.xlu1 %v760_v10, %s7184_s24  ;;  %v754_v36 = vadd.f32 1.0, %v6703_v14  ;;  %v935_v54 = vmul.f32 %v932_v30, %v7416_v43 }
 0x521   :  { %v882_v32 = vpop.permute.xlu0 %881  ;;  %6704 = vrcp.f32 %v755_v31 }
 0x522   :  { %765 = vrot.lane.b32.xlu0 %v762_v15, %s7184_s24  ;;  %6706 = vrcp.f32 %v754_v36 }
 0x523   :  { %v927_v33 = vpop.permute.xlu1 %926 }
 0x524   :  { %v934_v59 = vmul.f32 %v927_v33, %v7422_v48 }
 0x525   :  { %v877_v34 = vpop.permute.xlu0 %876 }
 0x52b   :  { %v6705_v51 = vpop.eup %6704 }
 0x52c   :  { %v6707_v48 = vpop.eup %6706  ;;  %v784_v23 = vsub.f32 1.0, %v6705_v51  ;;  %v796_v28 = vmul.f32 %v6705_v51, %v7440_v22 }
 0x52d   :  { %v795_v14 = vmul.f32 %v6707_v48, %v7445_v26 }
 0x58e   :  { %v851_v37 = vpop.permute.xlu1 %850 }
 0x58f   :  { %v856_v42 = vmul.f32 %v851_v37, %v846_v35 }
 0x590   :  { %v853_v44 = vpop.permute.xlu0 %852 }
 0x591   :  { %v857_v46 = vmul.f32 %v853_v44, %v847_v38  ;;  %v860_v49 = vadd.f32 %v858_v41, %v856_v42 }
 0x592   :  { %v764_v62 = vpop.permute.xlu1 %763 }
 0x593   :  { %v861_v50 = vadd.f32 %v859_v45, %v857_v46  ;;  %v7475_v55 = vmul.f32 %v877_v34, %v860_v49  ;;  %v769_v2 = vmul.f32 %v6707_v48, %v764_v62 }
 0x594   :  { %v766_v52 = vpop.permute.xlu0 %765 }
 0x595   :  { %v7477_v56 = vmul.f32 %v882_v32, %v861_v50  ;;  %v770_v58 = vmul.f32 %v6705_v51, %v766_v52  ;;  %v7485_v60 = vadd.f32 %v934_v59, %v7475_v55  ;;  %v940_v51 = vld [vmem:[#allocation2 + $0x5] sm:$0x1] }
 0x597   :  { %v7481_v53 = vadd.f32 %v935_v54, %v7477_v56  ;;  %775 = vrot.lane.b32.xlu1 %v770_v58, %s7182_s1  ;;  %v941_v58 = vld [vmem:[#allocation2 + $0xd] sm:$0x1] }
 0x599   :  { %v1026_v61 = vrot.slane %v7481_v53, 7 }
 0x59b   :  { %869 = vperm.xlu1 %6658, %v580_v57   ;;  %v1027_v43 = vsel %vm586_vm6, %v1026_v61, %v7485_v60 }
 0x59c   :  { %1028 = vrot.lane.b32.xlu0 %v1027_v43, %s7185_s5 }
 0x59f   :  { %864 = vperm.xlu1 %6658, %v579_v63  }
 0x5a0   :  { %773 = vrot.lane.b32.xlu0 %v769_v2, %s7182_s1 }
 0x5a4   :  { %915 = vperm.xlu0 %6659, %v907_v4  }
 0x5a8   :  { %910 = vperm.xlu0 %6659, %v906_v6  }
 0x609   :  { %v776_v7 = vpop.permute.xlu1 %775 }
 0x60a   :  { %v780_v8 = vadd.f32 %v776_v7, %v576_v16 }
 0x60c   :  { %6708 = vtanh.f32 %v780_v8 }
 0x60e   :  { %v1029_v9 = vpop.permute.xlu0 %1028 }
 0x60f   :  { %6352 = vmatmul.mubr.msk.f32.vlgmr.msra.gmra.mrb[6].mxu0 %vm216_vm7, %v1029_v9  ;;  %v945_v9 = vld [vmem:[#allocation4 + $0xd] sm:$0x1] }
 0x610   :  { %6567 = vmatpush3.bf16.msra.mxu0 %v7344_v11  ;;  %6365 = vmatprep.mubr.msk.f32.mxu0 %vm7178_vm0, %v7176_v0 }
 0x611   :  { %6571 = vmatprep.subr.bf16.mxu0 %v7177_v1 }
 0x612   :  { %v774_v10 = vpop.permute.xlu0 %773 }
 0x613   :  { %v779_v12 = vadd.f32 %v774_v10, %v575_v21  ;;  %v783_v21 = vsub.f32 1.0, %v6707_v48 }
 0x615   :  { %6710 = vtanh.f32 %v779_v12 }
 0x616   :  { %v6709_v15 = vpop.eup %6708 }
 0x617   :  { %789 = vrot.lane.b32.xlu1 %v6709_v15, %s7183_s23 }
 0x61a   :  { %v870_v16 = vpop.permute.xlu1 %869 }
 0x61e   :  { %v865_v19 = vpop.permute.xlu1 %864 }
 0x61f   :  { %v6711_v18 = vpop.eup %6710 }
 0x620   :  { %787 = vrot.lane.b32.xlu0 %v6711_v18, %s7183_s23 }
 0x623   :  { %v916_v20 = vpop.permute.xlu0 %915 }
 0x624   :  { %v919_v33 = vmul.f32 %v916_v20, %v7440_v22 }
 0x627   :  { %v911_v30 = vpop.permute.xlu0 %910 }
 0x628   :  { %v918_v37 = vmul.f32 %v911_v30, %v7445_v26 }
 0x689   :  { %v790_v24 = vpop.permute.xlu1 %789 }
 0x68a   :  { %v794_v27 = vmul.f32 %v790_v24, %v784_v23 }
 0x68c   :  { %v798_v29 = vadd.f32 %v796_v28, %v794_v27 }
 0x68e   :  { %v7500_v31 = vmul.f32 %v870_v16, %v798_v29  ;;  %v1285_v16 = vsub.f32 1.0, %v945_v9 }
 0x690   :  { %v7505_v35 = vadd.f32 %v919_v33, %v7500_v31 }
 0x692   :  { %v788_v32 = vpop.permute.xlu0 %787  ;;  %v948_v42 = vrot.slane %v7505_v35, 7 }
 0x693   :  { %v793_v34 = vmul.f32 %v788_v32, %v783_v21 }
 0x695   :  { %v797_v36 = vadd.f32 %v795_v14, %v793_v34 }
 0x697   :  { %v7508_v38 = vmul.f32 %v865_v19, %v797_v36  ;;  %v944_v19 = vld [vmem:[#allocation4 + $0x5] sm:$0x1]  ;;  %v939_v36 = vld [vmem:[#allocation2 + $0xa] sm:$0x1] }
 0x698   :  { %v1284_v20 = vsub.f32 1.0, %v944_v19 }
 0x699   :  { %v7511_v41 = vadd.f32 %v918_v37, %v7508_v38 }
 0x69b   :  { %v949_v44 = vsel %vm586_vm6, %v948_v42, %v7511_v41  ;;  %v938_v42 = vld [vmem:[#allocation2 + $0x2] sm:$0x1] }
 0x69c   :  { %950 = vrot.lane.b32.xlu1 %v949_v44, %s7183_s23 }
 0x6e2   :  { %v1098_v22 = vpop.f32.mrb[6].mxu0 }
 0x6e3   :  { %v1162_v45 = vrot.slane %v1098_v22, 1  ;;  %v1185_v46 = vadd.f32 %v7366_v13, %v1098_v22  ;;  %v6353_v49 = vpop.f32.mrb[7].mxu0  ;;  %1163 = vrot.lane.b32.xlu1 %v1098_v22, %s7179_s30 }
 0x6e5   :  { %1165 = vrot.lane.b32.xlu0 %v1162_v45, %s7179_s30  ;;  %v1187_v26 = vrot.slane %v1185_v46, 1 }
 0x6e7   :  { %1188 = vrot.lane.b32.xlu1 %v1185_v46, %s7180_s16 }
 0x6e9   :  { %1190 = vrot.lane.b32.xlu0 %v1187_v26, %s7180_s16 }
 0x70e   :  { %v951_v50 = vpop.permute.xlu1 %950 }
 0x70f   :  { %6345 = vmatmul.mubr.msk.f32.vlgmr.msra.gmra.mrb[6].mxu1 %vm216_vm7, %v951_v50 }
 0x710   :  { %6564 = vmatpush3.bf16.msra.mxu1 %v7331_v5  ;;  %6358 = vmatprep.mubr.msk.f32.mxu1 %vm7178_vm0, %v7176_v0 }
 0x711   :  { %6568 = vmatprep.subr.bf16.mxu1 %v7177_v1 }
 0x755   :  { %v1164_v52 = vpop.permute.xlu1 %1163 }
 0x756   :  { %v1169_v54 = vadd.f32 %v1164_v52, %v940_v51 }
 0x757   :  { %v1166_v59 = vpop.permute.xlu0 %1165 }
 0x758   :  { %v1171_v57 = vadd.f32 %v1169_v54, %v7387_v39  ;;  %v1170_v61 = vadd.f32 %v1166_v59, %v941_v58 }
 0x759   :  { %v1189_v8 = vpop.permute.xlu1 %1188 }
 0x75a   :  { %v6118_v62 = vmul.f32 -1.442695, %v1171_v57  ;;  %v1172_v43 = vadd.f32 %v1170_v61, %v7387_v39 }
 0x75b   :  { %v1191_v15 = vpop.permute.xlu0 %1190 }
 0x75c   :  { %6712 = vpow2.f32 %v6118_v62  ;;  %v6119_v63 = vmul.f32 -1.442695, %v1172_v43 }
 0x75e   :  { %6714 = vpow2.f32 %v6119_v63 }
 0x766   :  { %v6713_v48 = vpop.eup %6712 }
 0x767   :  { %v1179_v2 = vadd.f32 1.0, %v6713_v48 }
 0x768   :  { %v6715_v4 = vpop.eup %6714 }
 0x769   :  { %6716 = vrcp.f32 %v1179_v2  ;;  %v1180_v6 = vadd.f32 1.0, %v6715_v4 }
 0x76b   :  { %6718 = vrcp.f32 %v1180_v6 }
 0x773   :  { %v6717_v7 = vpop.eup %6716 }
 0x774   :  { %v1194_v10 = vmul.f32 %v6717_v7, %v1189_v8  ;;  %v1208_v61 = vsub.f32 1.0, %v6717_v7  ;;  %v1220_v63 = vmul.f32 %v6717_v7, %v7485_v60 }
 0x775   :  { %v6719_v12 = vpop.eup %6718 }
 0x776   :  { %v1195_v18 = vmul.f32 %v6719_v12, %v1191_v15  ;;  %1198 = vrot.lane.b32.xlu1 %v1194_v10, %s7182_s1  ;;  %v1209_v43 = vsub.f32 1.0, %v6719_v12  ;;  %v1221_v4 = vmul.f32 %v6719_v12, %v7481_v53 }
 0x778   :  { %1200 = vrot.lane.b32.xlu0 %v1195_v18, %s7182_s1 }
 0x77a   :  { %1293 = vperm.xlu1 %6658, %v1285_v16  }
 0x77c   :  { %1243 = vperm.xlu0 %6659, %v945_v9  }
 0x77e   :  { %1288 = vperm.xlu1 %6658, %v1284_v20  }
 0x780   :  { %1238 = vperm.xlu0 %6659, %v944_v19  }
 0x7e2   :  { %v1020_v23 = vpop.f32.mrb[6].mxu1 }
 0x7e3   :  { %v6346_v24 = vpop.f32.mrb[7].mxu1  ;;  %v1122_v32 = vadd.f32 %v7396_v3, %v1020_v23  ;;  %v1103_v34 = vrot.slane %v1020_v23, 1  ;;  %v1106_v44 = vadd.f32 %v1020_v23, %v938_v42 }
 0x7e5   :  { %v1124_v14 = vrot.slane %v1122_v32, 1  ;;  %v1107_v37 = vadd.f32 %v1103_v34, %v939_v36  ;;  %v1108_v45 = vadd.f32 %v7396_v3, %v1106_v44 }
 0x7e7   :  { %v1109_v22 = vadd.f32 %v7396_v3, %v1107_v37  ;;  %v6116_v49 = vmul.f32 -1.442695, %v1108_v45 }
 0x7e8   :  { %v1199_v27 = vpop.permute.xlu1 %1198 }
 0x7e9   :  { %v1204_v28 = vadd.f32 %v1199_v27, %v940_v51  ;;  %v6117_v46 = vmul.f32 -1.442695, %v1109_v22  ;;  %v943_v27 = vld [vmem:[#allocation4 + $0xa] sm:$0x1] }
 0x7ea   :  { %v1201_v29 = vpop.permute.xlu0 %1200 }
 0x7eb   :  { %v1205_v30 = vadd.f32 %v1201_v29, %v941_v58  ;;  %6720 = vtanh.f32 %v1204_v28 }
 0x7ed   :  { %6722 = vtanh.f32 %v1205_v30 }
 0x7ee   :  { %6724 = vpow2.f32 %v6117_v46 }
 0x7ef   :  { %6726 = vpow2.f32 %v6116_v49 }
 0x7f5   :  { %v6721_v21 = vpop.eup %6720 }
 0x7f6   :  { %1212 = vrot.lane.b32.xlu1 %v6721_v21, %s7183_s23  ;;  %v1269_v21 = vsub.f32 1.0, %v943_v27 }
 0x7f7   :  { %v6723_v33 = vpop.eup %6722 }
 0x7f8   :  { %1214 = vrot.lane.b32.xlu0 %v6723_v33, %s7183_s23  ;;  %v6725_v26 = vpop.eup %6724 }
 0x7f9   :  { %v1294_v50 = vpop.permute.xlu1 %1293  ;;  %v1117_v51 = vadd.f32 1.0, %v6725_v26  ;;  %v6727_v54 = vpop.eup %6726 }
 0x7fa   :  { %1125 = vrot.lane.b32.xlu1 %v1122_v32, %s7184_s24  ;;  %v1116_v58 = vadd.f32 1.0, %v6727_v54  ;;  %v1297_v18 = vmul.f32 %v1294_v50, %v7481_v53 }
 0x7fb   :  { %v1244_v52 = vpop.permute.xlu0 %1243  ;;  %6728 = vrcp.f32 %v1117_v51 }
 0x7fc   :  { %1127 = vrot.lane.b32.xlu0 %v1124_v14, %s7184_s24  ;;  %6730 = vrcp.f32 %v1116_v58 }
 0x7fd   :  { %v1289_v59 = vpop.permute.xlu1 %1288 }
 0x7fe   :  { %v1296_v24 = vmul.f32 %v1289_v59, %v7485_v60  ;;  %v942_v60 = vld [vmem:[#allocation4 + $0x2] sm:$0x1] }
 0x7ff   :  { %v1239_v57 = vpop.permute.xlu0 %1238  ;;  %v1268_v32 = vsub.f32 1.0, %v942_v60 }
 0x805   :  { %v6729_v10 = vpop.eup %6728 }
 0x806   :  { %v6731_v12 = vpop.eup %6730  ;;  %v1146_v49 = vsub.f32 1.0, %v6729_v10  ;;  %v1158_v51 = vmul.f32 %v6729_v10, %v7505_v35 }
 0x807   :  { %v1145_v58 = vsub.f32 1.0, %v6731_v12 }
 0x868   :  { %v1213_v62 = vpop.permute.xlu1 %1212 }
 0x869   :  { %v1218_v48 = vmul.f32 %v1213_v62, %v1208_v61  ;;  %v1157_v62 = vmul.f32 %v6731_v12, %v7511_v41 }
 0x86a   :  { %v1215_v2 = vpop.permute.xlu0 %1214 }
 0x86b   :  { %v1219_v6 = vmul.f32 %v1215_v2, %v1209_v43  ;;  %v1222_v8 = vadd.f32 %v1220_v63, %v1218_v48 }
 0x86c   :  { %v1126_v23 = vpop.permute.xlu1 %1125 }
 0x86d   :  { %v1223_v9 = vadd.f32 %v1221_v4, %v1219_v6  ;;  %v7541_v16 = vmul.f32 %v1239_v57, %v1222_v8  ;;  %v1131_v28 = vmul.f32 %v6731_v12, %v1126_v23  ;;  %v1303_v12 = vld [vmem:[#allocation2 + $0xc] sm:$0x1] }
 0x86e   :  { %v1128_v15 = vpop.permute.xlu0 %1127 }
 0x86f   :  { %v7543_v19 = vmul.f32 %v1244_v52, %v1223_v9  ;;  %v1132_v20 = vmul.f32 %v6729_v10, %v1128_v15  ;;  %v7551_v29 = vadd.f32 %v1296_v24, %v7541_v16 }
 0x871   :  { %v7547_v7 = vadd.f32 %v1297_v18, %v7543_v19  ;;  %1137 = vrot.lane.b32.xlu0 %v1132_v20, %s7182_s1 }
 0x873   :  { %v1388_v53 = vrot.slane %v7547_v7, 7 }
 0x875   :  { %1135 = vrot.lane.b32.xlu0 %v1131_v28, %s7182_s1  ;;  %v1389_v30 = vsel %vm586_vm6, %v1388_v53, %v7551_v29 }
 0x876   :  { %1390 = vrot.lane.b32.xlu1 %v1389_v30, %s7185_s5 }
 0x879   :  { %1277 = vperm.xlu0 %6659, %v1269_v21  }
 0x87a   :  { %1231 = vperm.xlu1 %6658, %v943_v27  }
 0x87d   :  { %1272 = vperm.xlu0 %6659, %v1268_v32  }
 0x87e   :  { %1226 = vperm.xlu1 %6658, %v942_v60  }
 0x8e3   :  { %v1138_v33 = vpop.permute.xlu0 %1137 }
 0x8e4   :  { %v1142_v14 = vadd.f32 %v1138_v33, %v939_v36 }
 0x8e6   :  { %6732 = vtanh.f32 %v1142_v14 }
 0x8e7   :  { %v1136_v34 = vpop.permute.xlu0 %1135 }
 0x8e8   :  { %v1141_v37 = vadd.f32 %v1136_v34, %v938_v42  ;;  %v1391_v44 = vpop.permute.xlu1 %1390 }
 0x8e9   :  { %6366 = vmatmul.mubr.msk.f32.vlgmr.msra.gmra.mrb[8].mxu0 %vm216_vm7, %v1391_v44 }
 0x8ea   :  { %6734 = vtanh.f32 %v1141_v37  ;;  %6573 = vmatpush3.bf16.msra.mxu0 %v7344_v11  ;;  %6379 = vmatprep.mubr.msk.f32.mxu0 %vm7178_vm0, %v7176_v0 }
 0x8eb   :  { %6577 = vmatprep.subr.bf16.mxu0 %v7177_v1 }
 0x8f0   :  { %v6733_v22 = vpop.eup %6732 }
 0x8f1   :  { %1151 = vrot.lane.b32.xlu1 %v6733_v22, %s7183_s23 }
 0x8f4   :  { %v6735_v45 = vpop.eup %6734 }
 0x8f5   :  { %1149 = vrot.lane.b32.xlu0 %v6735_v45, %s7183_s23 }
 0x8f8   :  { %v1278_v46 = vpop.permute.xlu0 %1277 }
 0x8f9   :  { %v1232_v36 = vpop.permute.xlu1 %1231  ;;  %v1281_v57 = vmul.f32 %v1278_v46, %v7505_v35 }
 0x8fc   :  { %v1273_v26 = vpop.permute.xlu0 %1272 }
 0x8fd   :  { %v1227_v42 = vpop.permute.xlu1 %1226  ;;  %v1280_v2 = vmul.f32 %v1273_v26, %v7511_v41 }
 0x963   :  { %v1152_v50 = vpop.permute.xlu1 %1151 }
 0x964   :  { %v1156_v52 = vmul.f32 %v1152_v50, %v1146_v49  ;;  %v1307_v49 = vld [vmem:[#allocation4 + $0xc] sm:$0x1] }
 0x966   :  { %v1160_v54 = vadd.f32 %v1158_v51, %v1156_v52  ;;  %v1647_v52 = vsub.f32 1.0, %v1307_v49 }
 0x967   :  { %v1150_v59 = vpop.permute.xlu0 %1149 }
 0x968   :  { %v7567_v61 = vmul.f32 %v1232_v36, %v1160_v54  ;;  %v1155_v43 = vmul.f32 %v1150_v59, %v1145_v58  ;;  %v1306_v54 = vld [vmem:[#allocation4 + $0x4] sm:$0x1] }
 0x969   :  { %v1646_v58 = vsub.f32 1.0, %v1306_v54 }
 0x96a   :  { %v7571_v63 = vadd.f32 %v1281_v57, %v7567_v61  ;;  %v1159_v48 = vadd.f32 %v1157_v62, %v1155_v43 }
 0x96c   :  { %v7574_v4 = vmul.f32 %v1227_v42, %v1159_v48  ;;  %v1310_v8 = vrot.slane %v7571_v63, 7 }
 0x96e   :  { %v7577_v6 = vadd.f32 %v1280_v2, %v7574_v4 }
 0x970   :  { %v1311_v35 = vsel %vm586_vm6, %v1310_v8, %v7577_v6 }
 0x971   :  { %1312 = vrot.lane.b32.xlu1 %v1311_v35, %s7183_s23  ;;  %v1300_v35 = vld [vmem:[#allocation2 + $0x3] sm:$0x1] }
 0x9bc   :  { %v1460_v9 = vpop.f32.mrb[8].mxu0 }
 0x9bd   :  { %v1524_v10 = vrot.slane %v1460_v9, 1  ;;  %v1547_v15 = vadd.f32 %v7366_v13, %v1460_v9  ;;  %v6367_v18 = vpop.f32.mrb[9].mxu0  ;;  %1525 = vrot.lane.b32.xlu1 %v1460_v9, %s7179_s30  ;;  %v1302_v13 = vld [vmem:[#allocation2 + $0x4] sm:$0x1] }
 0x9bf   :  { %1527 = vrot.lane.b32.xlu0 %v1524_v10, %s7179_s30  ;;  %v1549_v41 = vrot.slane %v1547_v15, 1  ;;  %v1301_v10 = vld [vmem:[#allocation2 + $0xb] sm:$0x1] }
 0x9c1   :  { %1550 = vrot.lane.b32.xlu1 %v1547_v15, %s7180_s16 }
 0x9c3   :  { %1552 = vrot.lane.b32.xlu0 %v1549_v41, %s7180_s16 }
 0x9e3   :  { %v1313_v20 = vpop.permute.xlu1 %1312 }
 0x9e4   :  { %6359 = vmatmul.mubr.msk.f32.vlgmr.msra.gmra.mrb[8].mxu1 %vm216_vm7, %v1313_v20 }
 0x9e5   :  { %6570 = vmatpush3.bf16.msra.mxu1 %v7331_v5  ;;  %6372 = vmatprep.mubr.msk.f32.mxu1 %vm7178_vm0, %v7176_v0 }
 0x9e6   :  { %6574 = vmatprep.subr.bf16.mxu1 %v7177_v1 }
 0xa2f   :  { %v1526_v23 = vpop.permute.xlu1 %1525 }
 0xa30   :  { %v1531_v24 = vadd.f32 %v1526_v23, %v1302_v13 }
 0xa31   :  { %v1528_v27 = vpop.permute.xlu0 %1527 }
 0xa32   :  { %v1533_v28 = vadd.f32 %v1531_v24, %v7387_v39  ;;  %v1532_v53 = vadd.f32 %v1528_v27, %v1303_v12 }
 0xa33   :  { %v1551_v44 = vpop.permute.xlu1 %1550 }
 0xa34   :  { %v6124_v30 = vmul.f32 -1.442695, %v1533_v28  ;;  %v1534_v21 = vadd.f32 %v1532_v53, %v7387_v39 }
 0xa35   :  { %v1553_v36 = vpop.permute.xlu0 %1552 }
 0xa36   :  { %6736 = vpow2.f32 %v6124_v30  ;;  %v6125_v60 = vmul.f32 -1.442695, %v1534_v21 }
 0xa38   :  { %6738 = vpow2.f32 %v6125_v60 }
 0xa40   :  { %v6737_v32 = vpop.eup %6736 }
 0xa41   :  { %v1541_v33 = vadd.f32 1.0, %v6737_v32 }
 0xa42   :  { %v6739_v14 = vpop.eup %6738 }
 0xa43   :  { %6740 = vrcp.f32 %v1541_v33  ;;  %v1542_v34 = vadd.f32 1.0, %v6739_v14  ;;  %v1304_v33 = vld [vmem:[#allocation4 + $0x3] sm:$0x1] }
 0xa45   :  { %6742 = vrcp.f32 %v1542_v34 }
 0xa4d   :  { %v7595_v37 = vpop.eup %6740 }
 0xa4e   :  { %v1556_v22 = vmul.f32 %v7595_v37, %v1551_v44 }
 0xa4f   :  { %v7598_v45 = vpop.eup %6742 }
 0xa50   :  { %v1557_v46 = vmul.f32 %v7598_v45, %v1553_v36  ;;  %1560 = vrot.lane.b32.xlu1 %v1556_v22, %s7182_s1  ;;  %v1570_v36 = vsub.f32 1.0, %v7595_v37 }
 0xa52   :  { %1562 = vrot.lane.b32.xlu0 %v1557_v46, %s7182_s1 }
 0xab7   :  { %v1382_v42 = vpop.f32.mrb[8].mxu1 }
 0xab8   :  { %v1484_v26 = vadd.f32 %v7396_v3, %v1382_v42  ;;  %v6360_v50 = vpop.f32.mrb[9].mxu1  ;;  %v1465_v8 = vrot.slane %v1382_v42, 1  ;;  %v1468_v9 = vadd.f32 %v1382_v42, %v1300_v35  ;;  %v1582_v42 = vmul.f32 %v7595_v37, %v7551_v29 }
 0xaba   :  { %1487 = vrot.lane.b32.xlu1 %v1484_v26, %s7184_s24  ;;  %v1486_v51 = vrot.slane %v1484_v26, 1  ;;  %v1469_v15 = vadd.f32 %v1465_v8, %v1301_v10  ;;  %v1470_v18 = vadd.f32 %v7396_v3, %v1468_v9  ;;  %v1571_v26 = vsub.f32 1.0, %v7598_v45 }
 0xabc   :  { %1489 = vrot.lane.b32.xlu0 %v1486_v51, %s7184_s24  ;;  %v1471_v41 = vadd.f32 %v7396_v3, %v1469_v15  ;;  %v6122_v20 = vmul.f32 -1.442695, %v1470_v18  ;;  %v1305_v3 = vld [vmem:[#allocation4 + $0xb] sm:$0x1] }
 0xabd   :  { %v1631_v8 = vsub.f32 1.0, %v1305_v3 }
 0xabe   :  { %1655 = vperm.xlu1 %6658, %v1647_v52   ;;  %v1583_v52 = vmul.f32 %v7598_v45, %v7547_v7 }
 0xac0   :  { %1605 = vperm.xlu0 %6659, %v1307_v49  }
 0xac2   :  { %1650 = vperm.xlu1 %6658, %v1646_v58   ;;  %v1561_v59 = vpop.permute.xlu1 %1560 }
 0xac3   :  { %v1566_v57 = vadd.f32 %v1561_v59, %v1302_v13  ;;  %v6123_v13 = vmul.f32 -1.442695, %v1471_v41 }
 0xac4   :  { %1600 = vperm.xlu0 %6659, %v1306_v54   ;;  %v1563_v62 = vpop.permute.xlu0 %1562 }
 0xac5   :  { %6744 = vtanh.f32 %v1566_v57  ;;  %v1567_v43 = vadd.f32 %v1563_v62, %v1303_v12 }
 0xac7   :  { %6746 = vtanh.f32 %v1567_v43 }
 0xac8   :  { %6748 = vpow2.f32 %v6122_v20 }
 0xac9   :  { %6750 = vpow2.f32 %v6123_v13 }
 0xacf   :  { %v6745_v48 = vpop.eup %6744 }
 0xad0   :  { %1574 = vrot.lane.b32.xlu1 %v6745_v48, %s7183_s23 }
 0xad1   :  { %v6747_v2 = vpop.eup %6746 }
 0xad2   :  { %1576 = vrot.lane.b32.xlu0 %v6747_v2, %s7183_s23  ;;  %v6749_v23 = vpop.eup %6748 }
 0xad3   :  { %v6751_v24 = vpop.eup %6750  ;;  %v1478_v12 = vadd.f32 1.0, %v6749_v23 }
 0xad4   :  { %v1479_v27 = vadd.f32 1.0, %v6751_v24 }
 0xad5   :  { %6752 = vrcp.f32 %v1478_v12 }
 0xad6   :  { %6754 = vrcp.f32 %v1479_v27 }
 0xadf   :  { %v6753_v28 = vpop.eup %6752 }
 0xae0   :  { %v7610_v21 = vpop.eup %6754  ;;  %v1507_v12 = vsub.f32 1.0, %v6753_v28 }
 0xb2c   :  { %v1488_v53 = vpop.permute.xlu1 %1487 }
 0xb2d   :  { %v1493_v30 = vmul.f32 %v6753_v28, %v1488_v53  ;;  %v1519_v53 = vmul.f32 %v6753_v28, %v7577_v6 }
 0xb2e   :  { %v1490_v60 = vpop.permute.xlu0 %1489 }
 0xb2f   :  { %v1494_v32 = vmul.f32 %v7610_v21, %v1490_v60  ;;  %1497 = vrot.lane.b32.xlu1 %v1493_v30, %s7182_s1  ;;  %v1508_v60 = vsub.f32 1.0, %v7610_v21 }
 0xb31   :  { %1499 = vrot.lane.b32.xlu0 %v1494_v32, %s7182_s1 }
 0xb33   :  { %1593 = vperm.xlu1 %6658, %v1305_v3  }
 0xb37   :  { %1588 = vperm.xlu1 %6658, %v1304_v33  }
 0xb3d   :  { %v1656_v14 = vpop.permute.xlu1 %1655 }
 0xb3e   :  { %v1659_v59 = vmul.f32 %v1656_v14, %v7547_v7  ;;  %v1630_v7 = vsub.f32 1.0, %v1304_v33  ;;  %v1520_v33 = vmul.f32 %v7610_v21, %v7571_v63 }
 0xb3f   :  { %v1606_v34 = vpop.permute.xlu0 %1605 }
 0xb41   :  { %v1651_v44 = vpop.permute.xlu1 %1650 }
 0xb42   :  { %v1658_v43 = vmul.f32 %v1651_v44, %v7551_v29 }
 0xb43   :  { %v1601_v22 = vpop.permute.xlu0 %1600 }
 0xb45   :  { %v1575_v46 = vpop.permute.xlu1 %1574 }
 0xb46   :  { %v1580_v49 = vmul.f32 %v1575_v46, %v1570_v36 }
 0xb47   :  { %v1577_v50 = vpop.permute.xlu0 %1576 }
 0xb48   :  { %v1584_v51 = vadd.f32 %v1582_v42, %v1580_v49  ;;  %v1581_v54 = vmul.f32 %v1577_v50, %v1571_v26  ;;  %v7667_v50 = vld [vmem:[%s8848_s7] ss:$0 sm:$0xff] }
 0xb4a   :  { %v1585_v58 = vadd.f32 %v1583_v52, %v1581_v54  ;;  %v7622_v57 = vmul.f32 %v1601_v22, %v1584_v51 }
 0xb4c   :  { %v7624_v62 = vmul.f32 %v1606_v34, %v1585_v58  ;;  %v7631_v48 = vadd.f32 %v1658_v43, %v7622_v57  ;;  %v1664_v58 = vld [vmem:[#allocation2 + $0x3] sm:$0x1] }
 0xb4e   :  { %v7628_v37 = vadd.f32 %v1659_v59, %v7624_v62 }
 0xb50   :  { %v1750_v2 = vrot.slane %v7628_v37, 7 }
 0xb52   :  { %v1751_v45 = vsel %vm586_vm6, %v1750_v2, %v7631_v48  ;;  %v1665_v2 = vld [vmem:[#allocation2 + $0xb] sm:$0x1] }
 0xb53   :  { %1752 = vrot.lane.b32.xlu0 %v1751_v45, %s7185_s5 }
 0xb57   :  { %1639 = vperm.xlu0 %6659, %v1631_v8  }
 0xb5b   :  { %1634 = vperm.xlu0 %6659, %v1630_v7  }
 0xba1   :  { %v1498_v9 = vpop.permute.xlu1 %1497 }
 0xba2   :  { %v1503_v15 = vadd.f32 %v1498_v9, %v1300_v35 }
 0xba3   :  { %v1500_v29 = vpop.permute.xlu0 %1499 }
 0xba4   :  { %6756 = vtanh.f32 %v1503_v15  ;;  %v1504_v18 = vadd.f32 %v1500_v29, %v1301_v10 }
 0xba6   :  { %6758 = vtanh.f32 %v1504_v18 }
 0xbae   :  { %v6757_v41 = vpop.eup %6756 }
 0xbaf   :  { %1511 = vrot.lane.b32.xlu0 %v6757_v41, %s7183_s23 }
 0xbb0   :  { %v6759_v20 = vpop.eup %6758 }
 0xbb1   :  { %1513 = vrot.lane.b32.xlu1 %v6759_v20, %s7183_s23 }
 0xbb2   :  { %v1594_v23 = vpop.permute.xlu1 %1593 }
 0xbb6   :  { %v1589_v24 = vpop.permute.xlu1 %1588 }
 0xbc5   :  { %v1753_v13 = vpop.permute.xlu0 %1752 }
 0xbc6   :  { %6380 = vmatmul.mubr.msk.f32.vlgmr.msra.gmra.mrb[10].mxu0 %vm216_vm7, %v1753_v13 }
 0xbc7   :  { %6579 = vmatpush3.bf16.msra.mxu0 %v7344_v11  ;;  %6393 = vmatprep.mubr.msk.f32.mxu0 %vm7178_vm0, %v7176_v0 }
 0xbc8   :  { %6583 = vmatprep.subr.bf16.mxu0 %v7177_v1 }
 0xbd6   :  { %v1640_v35 = vpop.permute.xlu0 %1639 }
 0xbd7   :  { %v1643_v44 = vmul.f32 %v1640_v35, %v7571_v63 }
 0xbda   :  { %v1635_v10 = vpop.permute.xlu0 %1634 }
 0xbdb   :  { %v1642_v46 = vmul.f32 %v1635_v10, %v7577_v6 }
 0xc21   :  { %v1512_v27 = vpop.permute.xlu0 %1511 }
 0xc22   :  { %v1517_v30 = vmul.f32 %v1512_v27, %v1507_v12 }
 0xc23   :  { %v1514_v32 = vpop.permute.xlu1 %1513 }
 0xc24   :  { %v1521_v3 = vadd.f32 %v1519_v53, %v1517_v30  ;;  %v1518_v14 = vmul.f32 %v1514_v32, %v1508_v60  ;;  %v1669_v30 = vld [vmem:[#allocation4 + $0xb] sm:$0x1]  ;;  %v7689_v60 = vld [vmem:[#allocation10] ss:$0 sm:$0xff] }
 0xc26   :  { %v1522_v34 = vadd.f32 %v1520_v33, %v1518_v14  ;;  %v7649_v22 = vmul.f32 %v1589_v24, %v1521_v3  ;;  %v2009_v14 = vsub.f32 1.0, %v1669_v30 }
 0xc28   :  { %v7651_v36 = vmul.f32 %v1594_v23, %v1522_v34  ;;  %v7658_v42 = vadd.f32 %v1642_v46, %v7649_v22  ;;  %v1668_v34 = vld [vmem:[#allocation4 + $0x3] sm:$0x1] }
 0xc2a   :  { %v7655_v28 = vadd.f32 %v1643_v44, %v7651_v36  ;;  %v2008_v44 = vsub.f32 1.0, %v1668_v34 }
 0xc2c   :  { %v1672_v49 = vrot.slane %v7655_v28, 7 }
 0xc2e   :  { %v1673_v21 = vsel %vm586_vm6, %v1672_v49, %v7658_v42 }
 0xc2f   :  { %1674 = vrot.lane.b32.xlu1 %v1673_v21, %s7183_s23 }
 0xc99   :  { %v1822_v63 = vpop.f32.mrb[10].mxu0 }
 0xc9a   :  { %v1886_v26 = vrot.slane %v1822_v63, 1  ;;  %v1909_v6 = vadd.f32 %v7667_v50, %v1822_v63  ;;  %v6381_v51 = vpop.f32.mrb[11].mxu0  ;;  %1887 = vrot.lane.b32.xlu1 %v1822_v63, %s7179_s30 }
 0xc9c   :  { %1889 = vrot.lane.b32.xlu0 %v1886_v26, %s7179_s30  ;;  %v1911_v52 = vrot.slane %v1909_v6, 1 }
 0xc9e   :  { %1912 = vrot.lane.b32.xlu1 %v1909_v6, %s7180_s16 }
 0xca0   :  { %1914 = vrot.lane.b32.xlu0 %v1911_v52, %s7180_s16  ;;  %v1662_v52 = vld [vmem:[#allocation2 + $0x4] sm:$0x1] }
 0xca1   :  { %v1675_v54 = vpop.permute.xlu1 %1674 }
 0xca2   :  { %6373 = vmatmul.mubr.msk.f32.vlgmr.msra.gmra.mrb[10].mxu1 %vm216_vm7, %v1675_v54 }
 0xca3   :  { %6576 = vmatpush3.bf16.msra.mxu1 %v7331_v5  ;;  %6386 = vmatprep.mubr.msk.f32.mxu1 %vm7178_vm0, %v7176_v0 }
 0xca4   :  { %6580 = vmatprep.subr.bf16.mxu1 %v7177_v1 }
 0xd0c   :  { %v1888_v59 = vpop.permute.xlu1 %1887 }
 0xd0d   :  { %v1893_v43 = vadd.f32 %v1888_v59, %v1664_v58  ;;  %v1663_v59 = vld [vmem:[#allocation2 + $0xc] sm:$0x1] }
 0xd0e   :  { %v1890_v45 = vpop.permute.xlu0 %1889 }
 0xd0f   :  { %v1895_v8 = vadd.f32 %v1893_v43, %v7387_v39  ;;  %v1894_v7 = vadd.f32 %v1890_v45, %v1665_v2 }
 0xd10   :  { %v1913_v23 = vpop.permute.xlu1 %1912 }
 0xd11   :  { %v6130_v9 = vmul.f32 -1.442695, %v1895_v8  ;;  %v1896_v15 = vadd.f32 %v1894_v7, %v7387_v39 }
 0xd12   :  { %v1915_v12 = vpop.permute.xlu0 %1914 }
 0xd13   :  { %6760 = vpow2.f32 %v6130_v9  ;;  %v6131_v29 = vmul.f32 -1.442695, %v1896_v15 }
 0xd15   :  { %6762 = vpow2.f32 %v6131_v29 }
 0xd1d   :  { %v6761_v18 = vpop.eup %6760 }
 0xd1e   :  { %v1903_v41 = vadd.f32 1.0, %v6761_v18 }
 0xd1f   :  { %v6763_v20 = vpop.eup %6762 }
 0xd20   :  { %6764 = vrcp.f32 %v1903_v41  ;;  %v1904_v13 = vadd.f32 1.0, %v6763_v20 }
 0xd22   :  { %6766 = vrcp.f32 %v1904_v13 }
 0xd2a   :  { %v7681_v35 = vpop.eup %6764 }
 0xd2b   :  { %v1918_v10 = vmul.f32 %v7681_v35, %v1913_v23 }
 0xd2c   :  { %v7684_v24 = vpop.eup %6766 }
 0xd2d   :  { %v1919_v27 = vmul.f32 %v7684_v24, %v1915_v12  ;;  %1922 = vrot.lane.b32.xlu1 %v1918_v10, %s7182_s1  ;;  %v1667_v12 = vld [vmem:[#allocation4 + $0xc] sm:$0x1] }
 0xd2f   :  { %1924 = vrot.lane.b32.xlu0 %v1919_v27, %s7182_s1  ;;  %v1666_v27 = vld [vmem:[#allocation4 + $0x4] sm:$0x1] }
 0xd75   :  { %v1744_v53 = vpop.f32.mrb[10].mxu1 }
 0xd76   :  { %v1846_v32 = vadd.f32 %v7689_v60, %v1744_v53  ;;  %v6374_v3 = vpop.f32.mrb[11].mxu1  ;;  %v1827_v51 = vrot.slane %v1744_v53, 1  ;;  %v1830_v54 = vadd.f32 %v1744_v53, %v1662_v52 }
 0xd78   :  { %v1848_v33 = vrot.slane %v1846_v32, 1  ;;  %1849 = vrot.lane.b32.xlu1 %v1846_v32, %s7184_s24  ;;  %v1831_v43 = vadd.f32 %v1827_v51, %v1663_v59  ;;  %v1832_v45 = vadd.f32 %v7689_v60, %v1830_v54 }
 0xd7a   :  { %1851 = vrot.lane.b32.xlu0 %v1848_v33, %s7184_s24  ;;  %v1833_v8 = vadd.f32 %v7689_v60, %v1831_v43  ;;  %v1932_v33 = vsub.f32 1.0, %v7681_v35 }
 0xd7c   :  { %2017 = vperm.xlu1 %6658, %v2009_v14   ;;  %v6129_v7 = vmul.f32 -1.442695, %v1833_v8 }
 0xd7e   :  { %1967 = vperm.xlu0 %6659, %v1669_v30  }
 0xd80   :  { %2012 = vperm.xlu1 %6658, %v2008_v44  }
 0xd82   :  { %1962 = vperm.xlu0 %6659, %v1668_v34   ;;  %v1944_v34 = vmul.f32 %v7681_v35, %v7631_v48 }
 0xd9f   :  { %v1923_v46 = vpop.permute.xlu1 %1922 }
 0xda0   :  { %v1928_v49 = vadd.f32 %v1923_v46, %v1664_v58  ;;  %v6128_v58 = vmul.f32 -1.442695, %v1832_v45  ;;  %v1933_v46 = vsub.f32 1.0, %v7684_v24 }
 0xda1   :  { %v1925_v21 = vpop.permute.xlu0 %1924 }
 0xda2   :  { %6768 = vtanh.f32 %v1928_v49  ;;  %v1929_v63 = vadd.f32 %v1925_v21, %v1665_v2 }
 0xda4   :  { %6770 = vtanh.f32 %v1929_v63  ;;  %v1945_v63 = vmul.f32 %v7684_v24, %v7628_v37 }
 0xda5   :  { %6772 = vpow2.f32 %v6128_v58 }
 0xda6   :  { %6774 = vpow2.f32 %v6129_v7  ;;  %v1993_v7 = vsub.f32 1.0, %v1667_v12 }
 0xdac   :  { %v6769_v26 = vpop.eup %6768 }
 0xdad   :  { %1936 = vrot.lane.b32.xlu1 %v6769_v26, %s7183_s23 }
 0xdae   :  { %v6771_v6 = vpop.eup %6770 }
 0xdaf   :  { %1938 = vrot.lane.b32.xlu0 %v6771_v6, %s7183_s23  ;;  %v6773_v2 = vpop.eup %6772 }
 0xdb0   :  { %v6775_v9 = vpop.eup %6774  ;;  %v1840_v15 = vadd.f32 1.0, %v6773_v2 }
 0xdb1   :  { %v1841_v29 = vadd.f32 1.0, %v6775_v9 }
 0xdb2   :  { %6776 = vrcp.f32 %v1840_v15 }
 0xdb3   :  { %6778 = vrcp.f32 %v1841_v29 }
 0xdbc   :  { %v6777_v18 = vpop.eup %6776 }
 0xdbd   :  { %v7698_v13 = vpop.eup %6778 }
 0xdea   :  { %v1850_v41 = vpop.permute.xlu1 %1849 }
 0xdeb   :  { %v1855_v20 = vmul.f32 %v6777_v18, %v1850_v41 }
 0xdec   :  { %v1852_v23 = vpop.permute.xlu0 %1851 }
 0xded   :  { %v1856_v10 = vmul.f32 %v7698_v13, %v1852_v23  ;;  %1859 = vrot.lane.b32.xlu1 %v1855_v20, %s7182_s1 }
 0xdef   :  { %1861 = vrot.lane.b32.xlu0 %v1856_v10, %s7182_s1 }
 0xdf1   :  { %1955 = vperm.xlu1 %6658, %v1667_v12   ;;  %v1869_v12 = vsub.f32 1.0, %v6777_v18 }
 0xdf5   :  { %1950 = vperm.xlu1 %6658, %v1666_v27  }
 0xdfb   :  { %v2018_v53 = vpop.permute.xlu1 %2017 }
 0xdfc   :  { %v2021_v51 = vmul.f32 %v2018_v53, %v7628_v37  ;;  %v1992_v37 = vsub.f32 1.0, %v1666_v27  ;;  %v1881_v53 = vmul.f32 %v6777_v18, %v7658_v42 }
 0xdfd   :  { %v1968_v30 = vpop.permute.xlu0 %1967 }
 0xdff   :  { %v2013_v32 = vpop.permute.xlu1 %2012 }
 0xe00   :  { %v2020_v45 = vmul.f32 %v2013_v32, %v7631_v48  ;;  %v1870_v32 = vsub.f32 1.0, %v7698_v13 }
 0xe01   :  { %v1963_v3 = vpop.permute.xlu0 %1962 }
 0xe1f   :  { %v1937_v14 = vpop.permute.xlu1 %1936 }
 0xe20   :  { %v1942_v44 = vmul.f32 %v1937_v14, %v1932_v33  ;;  %v1882_v14 = vmul.f32 %v7698_v13, %v7655_v28 }
 0xe21   :  { %v1939_v49 = vpop.permute.xlu0 %1938 }
 0xe22   :  { %v1946_v21 = vadd.f32 %v1944_v34, %v1942_v44  ;;  %v1943_v26 = vmul.f32 %v1939_v49, %v1933_v46 }
 0xe24   :  { %v1947_v6 = vadd.f32 %v1945_v63, %v1943_v26  ;;  %v7710_v54 = vmul.f32 %v1963_v3, %v1946_v21 }
 0xe26   :  { %v7712_v43 = vmul.f32 %v1968_v30, %v1947_v6  ;;  %v7719_v8 = vadd.f32 %v2020_v45, %v7710_v54 }
 0xe28   :  { %v7716_v35 = vadd.f32 %v2021_v51, %v7712_v43 }
 0xe2a   :  { %v2112_v58 = vrot.slane %v7716_v35, 7 }
 0xe2c   :  { %v2113_v24 = vsel %vm586_vm6, %v2112_v58, %v7719_v8 }
 0xe2d   :  { %2114 = vrot.lane.b32.xlu0 %v2113_v24, %s7185_s5 }
 0xe31   :  { %2001 = vperm.xlu0 %6659, %v1993_v7  }
 0xe35   :  { %1996 = vperm.xlu0 %6659, %v1992_v37   ;;  %v2026_v37 = vld [vmem:[#allocation2 + $0x2] sm:$0x1] }
 0xe5f   :  { %v1860_v2 = vpop.permute.xlu1 %1859 }
 0xe60   :  { %v1865_v9 = vadd.f32 %v1860_v2, %v1662_v52 }
 0xe61   :  { %v1862_v48 = vpop.permute.xlu0 %1861 }
 0xe62   :  { %6780 = vtanh.f32 %v1865_v9  ;;  %v1866_v15 = vadd.f32 %v1862_v48, %v1663_v59  ;;  %v2027_v48 = vld [vmem:[#allocation2 + $0xa] sm:$0x1] }
 0xe64   :  { %6782 = vtanh.f32 %v1866_v15 }
 0xe6c   :  { %v6781_v29 = vpop.eup %6780 }
 0xe6d   :  { %1873 = vrot.lane.b32.xlu0 %v6781_v29, %s7183_s23 }
 0xe6e   :  { %v6783_v41 = vpop.eup %6782 }
 0xe6f   :  { %1875 = vrot.lane.b32.xlu1 %v6783_v41, %s7183_s23 }
 0xe70   :  { %v1956_v23 = vpop.permute.xlu1 %1955 }
 0xe74   :  { %v1951_v10 = vpop.permute.xlu1 %1950 }
 0xe9f   :  { %v2115_v20 = vpop.permute.xlu0 %2114 }
 0xea0   :  { %6394 = vmatmul.mubr.msk.f32.vlgmr.msra.gmra.mrb[12].mxu0 %vm216_vm7, %v2115_v20 }
 0xea1   :  { %6585 = vmatpush3.bf16.msra.mxu0 %v7344_v11  ;;  %6407 = vmatprep.mubr.msk.f32.mxu0 %vm7178_vm0, %v7176_v0 }
 0xea2   :  { %6589 = vmatprep.subr.bf16.mxu0 %v7177_v1 }
 0xeb0   :  { %v2002_v52 = vpop.permute.xlu0 %2001 }
 0xeb1   :  { %v2005_v46 = vmul.f32 %v2002_v52, %v7655_v28 }
 0xeb4   :  { %v1997_v59 = vpop.permute.xlu0 %1996 }
 0xeb5   :  { %v2004_v63 = vmul.f32 %v1997_v59, %v7658_v42 }
 0xedf   :  { %v1874_v27 = vpop.permute.xlu0 %1873 }
 0xee0   :  { %v1879_v30 = vmul.f32 %v1874_v27, %v1869_v12 }
 0xee1   :  { %v1876_v3 = vpop.permute.xlu1 %1875 }
 0xee2   :  { %v1883_v33 = vadd.f32 %v1881_v53, %v1879_v30  ;;  %v1880_v34 = vmul.f32 %v1876_v3, %v1870_v32 }
 0xee4   :  { %v1884_v44 = vadd.f32 %v1882_v14, %v1880_v34  ;;  %v7737_v49 = vmul.f32 %v1951_v10, %v1883_v33 }
 0xee6   :  { %v7739_v21 = vmul.f32 %v1956_v23, %v1884_v44  ;;  %v7746_v26 = vadd.f32 %v2004_v63, %v7737_v49 }
 0xee8   :  { %v7743_v18 = vadd.f32 %v2005_v46, %v7739_v21 }
 0xeea   :  { %v2034_v6 = vrot.slane %v7743_v18, 7 }
 0xeec   :  { %v2035_v13 = vsel %vm586_vm6, %v2034_v6, %v7746_v26  ;;  %v2024_v6 = vld [vmem:[#allocation2 + $0x5] sm:$0x1] }
 0xeed   :  { %2036 = vrot.lane.b32.xlu1 %v2035_v13, %s7183_s23 }
 0xf5f   :  { %v2037_v28 = vpop.permute.xlu1 %2036 }
 0xf60   :  { %6387 = vmatmul.mubr.msk.f32.vlgmr.msra.gmra.mrb[12].mxu1 %vm216_vm7, %v2037_v28  ;;  %v2025_v28 = vld [vmem:[#allocation2 + $0xd] sm:$0x1] }
 0xf61   :  { %6582 = vmatpush3.bf16.msra.mxu1 %v7331_v5  ;;  %6400 = vmatprep.mubr.msk.f32.mxu1 %vm7178_vm0, %v7176_v0 }
 0xf62   :  { %6586 = vmatprep.subr.bf16.mxu1 %v7177_v1 }
 0xf73   :  { %v2184_v42 = vpop.f32.mrb[12].mxu0 }
 0xf74   :  { %v2248_v51 = vrot.slane %v2184_v42, 1  ;;  %v2271_v45 = vadd.f32 %v7667_v50, %v2184_v42  ;;  %v6395_v58 = vpop.f32.mrb[13].mxu0  ;;  %2249 = vrot.lane.b32.xlu1 %v2184_v42, %s7179_s30 }
 0xf76   :  { %2251 = vrot.lane.b32.xlu0 %v2248_v51, %s7179_s30  ;;  %v2273_v24 = vrot.slane %v2271_v45, 1 }
 0xf78   :  { %2274 = vrot.lane.b32.xlu1 %v2271_v45, %s7180_s16 }
 0xf7a   :  { %2276 = vrot.lane.b32.xlu0 %v2273_v24, %s7180_s16 }
 0xfe6   :  { %v2250_v7 = vpop.permute.xlu1 %2249 }
 0xfe7   :  { %v2255_v9 = vadd.f32 %v2250_v7, %v2026_v37 }
 0xfe8   :  { %v2252_v2 = vpop.permute.xlu0 %2251 }
 0xfe9   :  { %v2256_v15 = vadd.f32 %v2252_v2, %v2027_v48  ;;  %v2257_v29 = vadd.f32 %v2255_v9, %v7387_v39 }
 0xfea   :  { %v2275_v14 = vpop.permute.xlu1 %2274 }
 0xfeb   :  { %v2258_v41 = vadd.f32 %v2256_v15, %v7387_v39  ;;  %v6136_v20 = vmul.f32 -1.442695, %v2257_v29 }
 0xfec   :  { %v2277_v44 = vpop.permute.xlu0 %2276 }
 0xfed   :  { %v6137_v52 = vmul.f32 -1.442695, %v2258_v41  ;;  %6784 = vpow2.f32 %v6136_v20  ;;  %v2031_v20 = vld [vmem:[#allocation4 + $0xa] sm:$0x1] }
 0xfef   :  { %6786 = vpow2.f32 %v6137_v52 }
 0xff7   :  { %v6785_v23 = vpop.eup %6784 }
 0xff8   :  { %v2265_v10 = vadd.f32 1.0, %v6785_v23 }
 0xff9   :  { %v6787_v59 = vpop.eup %6786 }
 0xffa   :  { %v2266_v12 = vadd.f32 1.0, %v6787_v59  ;;  %6788 = vrcp.f32 %v2265_v10 }
 0xffc   :  { %6790 = vrcp.f32 %v2266_v12  ;;  %v2371_v12 = vsub.f32 1.0, %v2031_v20 }
0x1004   :  { %v7765_v32 = vpop.eup %6788 }
0x1005   :  { %v2280_v34 = vmul.f32 %v7765_v32, %v2275_v14 }
0x1006   :  { %v7768_v33 = vpop.eup %6790 }
0x1007   :  { %v2281_v46 = vmul.f32 %v7768_v33, %v2277_v44  ;;  %v2029_v44 = vld [vmem:[#allocation4 + $0xd] sm:$0x1] }
0x1033   :  { %v2106_v27 = vpop.f32.mrb[12].mxu1 }
0x1034   :  { %v2208_v53 = vadd.f32 %v7689_v60, %v2106_v27  ;;  %v6388_v30 = vpop.f32.mrb[13].mxu1  ;;  %v2189_v63 = vrot.slane %v2106_v27, 1  ;;  %v2192_v13 = vadd.f32 %v2106_v27, %v2024_v6 }
0x1036   :  { %v2210_v3 = vrot.slane %v2208_v53, 1  ;;  %2211 = vrot.lane.b32.xlu1 %v2208_v53, %s7184_s24  ;;  %v2193_v42 = vadd.f32 %v2189_v63, %v2025_v28  ;;  %v2194_v51 = vadd.f32 %v7689_v60, %v2192_v13  ;;  %v2030_v53 = vld [vmem:[#allocation4 + $0x2] sm:$0x1]  ;;  %v2355_v63 = vsub.f32 1.0, %v2029_v44 }
0x1038   :  { %2213 = vrot.lane.b32.xlu0 %v2210_v3, %s7184_s24  ;;  %v2195_v45 = vadd.f32 %v7689_v60, %v2193_v42  ;;  %v6134_v58 = vmul.f32 -1.442695, %v2194_v51  ;;  %v2028_v42 = vld [vmem:[#allocation4 + $0x5] sm:$0x1] }
0x103a   :  { %2284 = vrot.lane.b32.xlu1 %v2280_v34, %s7182_s1  ;;  %v6135_v24 = vmul.f32 -1.442695, %v2195_v45  ;;  %6792 = vpow2.f32 %v6134_v58  ;;  %v2370_v34 = vsub.f32 1.0, %v2030_v53 }
0x103c   :  { %2286 = vrot.lane.b32.xlu0 %v2281_v46, %s7182_s1  ;;  %6794 = vpow2.f32 %v6135_v24 }
0x1044   :  { %v6793_v7 = vpop.eup %6792 }
0x1045   :  { %v2202_v9 = vadd.f32 1.0, %v6793_v7 }
0x1046   :  { %v6795_v2 = vpop.eup %6794 }
0x1047   :  { %v2203_v15 = vadd.f32 1.0, %v6795_v2  ;;  %6796 = vrcp.f32 %v2202_v9 }
0x1049   :  { %6798 = vrcp.f32 %v2203_v15 }
0x1051   :  { %v7777_v29 = vpop.eup %6796 }
0x1053   :  { %v7780_v23 = vpop.eup %6798 }
0x10a8   :  { %v2212_v41 = vpop.permute.xlu1 %2211 }
0x10a9   :  { %v2217_v52 = vmul.f32 %v7777_v29, %v2212_v41 }
0x10aa   :  { %v2214_v59 = vpop.permute.xlu0 %2213 }
0x10ab   :  { %v2218_v10 = vmul.f32 %v7780_v23, %v2214_v59  ;;  %2221 = vrot.lane.b32.xlu1 %v2217_v52, %s7182_s1 }
0x10ac   :  { %v2285_v27 = vpop.permute.xlu1 %2284 }
0x10ad   :  { %v2290_v30 = vadd.f32 %v2285_v27, %v2026_v37  ;;  %2223 = vrot.lane.b32.xlu0 %v2218_v10, %s7182_s1  ;;  %v2354_v37 = vsub.f32 1.0, %v2028_v42  ;;  %v2307_v27 = vmul.f32 %v7768_v33, %v7716_v35 }
0x10ae   :  { %v2287_v3 = vpop.permute.xlu0 %2286 }
0x10af   :  { %6800 = vtanh.f32 %v2290_v30  ;;  %v2291_v14 = vadd.f32 %v2287_v3, %v2027_v48  ;;  %2379 = vperm.xlu1 %6658, %v2371_v12  }
0x10b1   :  { %6802 = vtanh.f32 %v2291_v14  ;;  %2329 = vperm.xlu0 %6659, %v2031_v20   ;;  %v2294_v20 = vsub.f32 1.0, %v7765_v32 }
0x10b3   :  { %2374 = vperm.xlu1 %6658, %v2370_v34  }
0x10b5   :  { %2324 = vperm.xlu0 %6659, %v2030_v53  }
0x10b9   :  { %v6801_v46 = vpop.eup %6800 }
0x10ba   :  { %2298 = vrot.lane.b32.xlu1 %v6801_v46, %s7183_s23 }
0x10bb   :  { %v6803_v13 = vpop.eup %6802 }
0x10bc   :  { %2300 = vrot.lane.b32.xlu0 %v6803_v13, %s7183_s23 }
0x10be   :  { %2363 = vperm.xlu1 %6658, %v2355_v63  }
0x10c0   :  { %2317 = vperm.xlu0 %6659, %v2029_v44  }
0x10c2   :  { %2358 = vperm.xlu1 %6658, %v2354_v37  }
0x10c4   :  { %2312 = vperm.xlu0 %6659, %v2028_v42  }
0x111d   :  { %v2222_v48 = vpop.permute.xlu1 %2221 }
0x111e   :  { %v2227_v51 = vadd.f32 %v2222_v48, %v2024_v6  ;;  %v2306_v6 = vmul.f32 %v7765_v32, %v7719_v8  ;;  %v2231_v48 = vsub.f32 1.0, %v7777_v29 }
0x111f   :  { %v2224_v45 = vpop.permute.xlu0 %2223 }
0x1120   :  { %6804 = vtanh.f32 %v2227_v51  ;;  %v2228_v58 = vadd.f32 %v2224_v45, %v2025_v28  ;;  %v2295_v28 = vsub.f32 1.0, %v7768_v33  ;;  %v2243_v51 = vmul.f32 %v7777_v29, %v7746_v26 }
0x1122   :  { %6806 = vtanh.f32 %v2228_v58  ;;  %v2232_v58 = vsub.f32 1.0, %v7780_v23 }
0x112a   :  { %v6805_v24 = vpop.eup %6804 }
0x112b   :  { %2235 = vrot.lane.b32.xlu1 %v6805_v24, %s7183_s23 }
0x112c   :  { %v6807_v7 = vpop.eup %6806 }
0x112d   :  { %2237 = vrot.lane.b32.xlu0 %v6807_v7, %s7183_s23 }
0x112e   :  { %v2380_v2 = vpop.permute.xlu1 %2379 }
0x112f   :  { %v2383_v3 = vmul.f32 %v2380_v2, %v7716_v35  ;;  %v2244_v2 = vmul.f32 %v7780_v23, %v7743_v18 }
0x1130   :  { %v2330_v9 = vpop.permute.xlu0 %2329 }
0x1132   :  { %v2375_v15 = vpop.permute.xlu1 %2374 }
0x1133   :  { %v2382_v44 = vmul.f32 %v2375_v15, %v7719_v8 }
0x1134   :  { %v2325_v41 = vpop.permute.xlu0 %2324 }
0x1136   :  { %v2299_v52 = vpop.permute.xlu1 %2298 }
0x1137   :  { %v2304_v59 = vmul.f32 %v2299_v52, %v2294_v20 }
0x1138   :  { %v2301_v10 = vpop.permute.xlu0 %2300 }
0x1139   :  { %v2308_v12 = vadd.f32 %v2306_v6, %v2304_v59  ;;  %v2305_v53 = vmul.f32 %v2301_v10, %v2295_v28 }
0x113b   :  { %v2309_v30 = vadd.f32 %v2307_v27, %v2305_v53  ;;  %v7796_v14 = vmul.f32 %v2325_v41, %v2308_v12 }
0x113d   :  { %v7798_v34 = vmul.f32 %v2330_v9, %v2309_v30  ;;  %v7805_v46 = vadd.f32 %v2382_v44, %v7796_v14  ;;  %v2364_v35 = vpop.permute.xlu1 %2363 }
0x113e   :  { %v2367_v41 = vmul.f32 %v2364_v35, %v7743_v18 }
0x113f   :  { %v7802_v32 = vadd.f32 %v2383_v3, %v7798_v34  ;;  %v2318_v13 = vpop.permute.xlu0 %2317 }
0x1141   :  { %v2474_v63 = vrot.slane %v7802_v32, 7  ;;  %v2359_v42 = vpop.permute.xlu1 %2358 }
0x1142   :  { %v2366_v6 = vmul.f32 %v2359_v42, %v7746_v26 }
0x1143   :  { %v2475_v33 = vsel %vm586_vm6, %v2474_v63, %v7805_v46  ;;  %v2313_v37 = vpop.permute.xlu0 %2312  ;;  %v2388_v63 = vld [vmem:[#allocation2 + $0x1] sm:$0x1] }
0x1144   :  { %2476 = vrot.lane.b32.xlu0 %v2475_v33, %s7185_s5 }
0x119d   :  { %v2236_v8 = vpop.permute.xlu1 %2235 }
0x119e   :  { %v2241_v45 = vmul.f32 %v2236_v8, %v2231_v48 }
0x119f   :  { %v2238_v24 = vpop.permute.xlu0 %2237 }
0x11a0   :  { %v2245_v7 = vadd.f32 %v2243_v51, %v2241_v45  ;;  %v2242_v9 = vmul.f32 %v2238_v24, %v2232_v58 }
0x11a2   :  { %v2246_v15 = vadd.f32 %v2244_v2, %v2242_v9  ;;  %v7818_v20 = vmul.f32 %v2313_v37, %v2245_v7 }
0x11a4   :  { %v7820_v52 = vmul.f32 %v2318_v13, %v2246_v15  ;;  %v7827_v59 = vadd.f32 %v2366_v6, %v7818_v20  ;;  %v2389_v13 = vld [vmem:[#allocation2 + $0x9] sm:$0x1] }
0x11a6   :  { %v7824_v29 = vadd.f32 %v2367_v41, %v7820_v52 }
0x11a8   :  { %v2396_v28 = vrot.slane %v7824_v29, 7 }
0x11aa   :  { %v2397_v23 = vsel %vm586_vm6, %v2396_v28, %v7827_v59 }
0x11ab   :  { %2398 = vrot.lane.b32.xlu1 %v2397_v23, %s7183_s23 }
0x11b6   :  { %v2477_v18 = vpop.permute.xlu0 %2476 }
0x11b7   :  { %6408 = vmatmul.mubr.msk.f32.vlgmr.msra.gmra.mrb[14].mxu0 %vm216_vm7, %v2477_v18 }
0x11b8   :  { %6591 = vmatpush3.bf16.msra.mxu0 %v7344_v11  ;;  %6421 = vmatprep.mubr.msk.f32.mxu0 %vm7178_vm0, %v7176_v0 }
0x11b9   :  { %6592 = vmatprep.subr.bf16.mxu0 %v7177_v1 }
0x121d   :  { %v2399_v26 = vpop.permute.xlu1 %2398 }
0x121e   :  { %6401 = vmatmul.mubr.msk.f32.vlgmr.msra.gmra.mrb[14].mxu1 %vm216_vm7, %v2399_v26  ;;  %v2386_v26 = vld [vmem:[#allocation2 + $0x6] sm:$0x1] }
0x121f   :  { %6588 = vmatpush3.bf16.msra.mxu1 %v7331_v5  ;;  %6414 = vmatprep.mubr.msk.f32.mxu1 %vm7178_vm0, %v7176_v0 }
0x1220   :  { %6424 = vmatprep.subr.bf16.mxu1 %v7176_v0 }
0x128a   :  { %v2546_v10 = vpop.f32.mrb[14].mxu0 }
0x128b   :  { %v2610_v12 = vrot.slane %v2546_v10, 1  ;;  %v2633_v27 = vadd.f32 %v7667_v50, %v2546_v10  ;;  %2611 = vrot.lane.b32.xlu1 %v2546_v10, %s7179_s30  ;;  %v6409_v11 = vpop.f32.mrb[15].mxu0 }
0x128d   :  { %2613 = vrot.lane.b32.xlu0 %v2610_v12, %s7179_s30  ;;  %v2635_v53 = vrot.slane %v2633_v27, 1  ;;  %v2387_v12 = vld [vmem:[#allocation2 + $0xe] sm:$0x1] }
0x128f   :  { %2636 = vrot.lane.b32.xlu1 %v2633_v27, %s7180_s16 }
0x1291   :  { %2638 = vrot.lane.b32.xlu0 %v2635_v53, %s7180_s16 }
0x12f1   :  { %v2468_v5 = vpop.f32.mrb[14].mxu1 }
0x12f2   :  { %v2570_v30 = vadd.f32 %v7689_v60, %v2468_v5  ;;  %v6402_v3 = vpop.f32.mrb[15].mxu1  ;;  %v2551_v18 = vrot.slane %v2468_v5, 1  ;;  %v2554_v10 = vadd.f32 %v2468_v5, %v2386_v26  ;;  %v2393_v5 = vld [vmem:[#allocation4 + $0x9] sm:$0x1] }
0x12f4   :  { %v2572_v44 = vrot.slane %v2570_v30, 1  ;;  %2573 = vrot.lane.b32.xlu1 %v2570_v30, %s7184_s24  ;;  %v2555_v27 = vadd.f32 %v2551_v18, %v2387_v12  ;;  %v2556_v11 = vadd.f32 %v7689_v60, %v2554_v10  ;;  %v2391_v18 = vld [vmem:[#allocation4 + $0xe] sm:$0x1] }
0x12f6   :  { %2575 = vrot.lane.b32.xlu0 %v2572_v44, %s7184_s24  ;;  %v2557_v53 = vadd.f32 %v7689_v60, %v2555_v27  ;;  %v6140_v30 = vmul.f32 -1.442695, %v2556_v11  ;;  %v2717_v27 = vsub.f32 1.0, %v2391_v18 }
0x12f8   :  { %v6141_v3 = vmul.f32 -1.442695, %v2557_v53  ;;  %v2390_v53 = vld [vmem:[#allocation4 + $0x6] sm:$0x1] }
0x12fd   :  { %v2612_v33 = vpop.permute.xlu1 %2611 }
0x12fe   :  { %v2617_v35 = vadd.f32 %v2612_v33, %v2388_v63 }
0x12ff   :  { %v2614_v42 = vpop.permute.xlu0 %2613 }
0x1300   :  { %v2619_v37 = vadd.f32 %v2617_v35, %v7387_v39  ;;  %v2618_v48 = vadd.f32 %v2614_v42, %v2389_v13 }
0x1301   :  { %v2637_v15 = vpop.permute.xlu1 %2636 }
0x1302   :  { %v6142_v8 = vmul.f32 -1.442695, %v2619_v37  ;;  %v2620_v51 = vadd.f32 %v2618_v48, %v7387_v39 }
0x1303   :  { %v2639_v28 = vpop.permute.xlu0 %2638 }
0x1304   :  { %6808 = vpow2.f32 %v6142_v8  ;;  %v6143_v45 = vmul.f32 -1.442695, %v2620_v51 }
0x1306   :  { %6810 = vpow2.f32 %v6143_v45 }
0x130e   :  { %v6809_v58 = vpop.eup %6808 }
0x130f   :  { %v2627_v24 = vadd.f32 1.0, %v6809_v58 }
0x1310   :  { %v6811_v7 = vpop.eup %6810 }
0x1311   :  { %6812 = vrcp.f32 %v2627_v24  ;;  %v2628_v2 = vadd.f32 1.0, %v6811_v7  ;;  %v2733_v24 = vsub.f32 1.0, %v2393_v5  ;;  %v2392_v7 = vld [vmem:[#allocation4 + $0x1] sm:$0x1] }
0x1313   :  { %6814 = vrcp.f32 %v2628_v2  ;;  %v2732_v2 = vsub.f32 1.0, %v2392_v7 }
0x1314   :  { %6816 = vpow2.f32 %v6140_v30  ;;  %v2716_v30 = vsub.f32 1.0, %v2390_v53 }
0x1315   :  { %6818 = vpow2.f32 %v6141_v3 }
0x131b   :  { %v7853_v9 = vpop.eup %6812 }
0x131c   :  { %v2642_v41 = vmul.f32 %v7853_v9, %v2637_v15 }
0x131d   :  { %v7856_v6 = vpop.eup %6814 }
0x131e   :  { %v2643_v23 = vmul.f32 %v7856_v6, %v2639_v28  ;;  %2646 = vrot.lane.b32.xlu1 %v2642_v41, %s7182_s1  ;;  %v6817_v44 = vpop.eup %6816 }
0x131f   :  { %v6819_v33 = vpop.eup %6818  ;;  %v2564_v35 = vadd.f32 1.0, %v6817_v44 }
0x1320   :  { %2648 = vrot.lane.b32.xlu0 %v2643_v23, %s7182_s1  ;;  %v2565_v42 = vadd.f32 1.0, %v6819_v33 }
0x1321   :  { %6820 = vrcp.f32 %v2564_v35 }
0x1322   :  { %6822 = vrcp.f32 %v2565_v42 }
0x132b   :  { %v7863_v37 = vpop.eup %6820 }
0x132c   :  { %v7866_v51 = vpop.eup %6822 }
0x1366   :  { %v2574_v48 = vpop.permute.xlu1 %2573 }
0x1367   :  { %v2579_v8 = vmul.f32 %v7863_v37, %v2574_v48 }
0x1368   :  { %v2576_v45 = vpop.permute.xlu0 %2575 }
0x1369   :  { %v2580_v58 = vmul.f32 %v7866_v51, %v2576_v45  ;;  %2583 = vrot.lane.b32.xlu1 %v2579_v8, %s7182_s1  ;;  %v2656_v45 = vsub.f32 1.0, %v7853_v9 }
0x136b   :  { %2585 = vrot.lane.b32.xlu0 %v2580_v58, %s7182_s1 }
0x136d   :  { %2741 = vperm.xlu1 %6658, %v2733_v24  }
0x136f   :  { %2691 = vperm.xlu0 %6659, %v2393_v5  }
0x1371   :  { %2736 = vperm.xlu1 %6658, %v2732_v2  }
0x1373   :  { %2686 = vperm.xlu0 %6659, %v2392_v7  }
0x1390   :  { %v2647_v15 = vpop.permute.xlu1 %2646 }
0x1391   :  { %v2652_v41 = vadd.f32 %v2647_v15, %v2388_v63  ;;  %v2669_v15 = vmul.f32 %v7856_v6, %v7802_v32 }
0x1392   :  { %v2649_v28 = vpop.permute.xlu0 %2648 }
0x1393   :  { %6824 = vtanh.f32 %v2652_v41  ;;  %v2653_v23 = vadd.f32 %v2649_v28, %v2389_v13 }
0x1395   :  { %6826 = vtanh.f32 %v2653_v23 }
0x139d   :  { %v6825_v10 = vpop.eup %6824 }
0x139e   :  { %2660 = vrot.lane.b32.xlu1 %v6825_v10, %s7183_s23 }
0x139f   :  { %v6827_v11 = vpop.eup %6826 }
0x13a0   :  { %2662 = vrot.lane.b32.xlu0 %v6827_v11, %s7183_s23 }
0x13a2   :  { %2725 = vperm.xlu1 %6658, %v2717_v27  }
0x13a4   :  { %2679 = vperm.xlu0 %6659, %v2391_v18  }
0x13a6   :  { %2720 = vperm.xlu1 %6658, %v2716_v30  }
0x13a8   :  { %2674 = vperm.xlu0 %6659, %v2390_v53  }
0x13db   :  { %v2584_v3 = vpop.permute.xlu1 %2583 }
0x13dc   :  { %v2589_v63 = vadd.f32 %v2584_v3, %v2386_v26  ;;  %v2668_v26 = vmul.f32 %v7853_v9, %v7805_v46 }
0x13dd   :  { %v2586_v44 = vpop.permute.xlu0 %2585 }
0x13de   :  { %6828 = vtanh.f32 %v2589_v63  ;;  %v2590_v13 = vadd.f32 %v2586_v44, %v2387_v12  ;;  %v2657_v12 = vsub.f32 1.0, %v7856_v6  ;;  %v2593_v44 = vsub.f32 1.0, %v7863_v37 }
0x13e0   :  { %6830 = vtanh.f32 %v2590_v13  ;;  %v2605_v13 = vmul.f32 %v7863_v37, %v7827_v59 }
0x13e8   :  { %v6829_v33 = vpop.eup %6828 }
0x13e9   :  { %2597 = vrot.lane.b32.xlu1 %v6829_v33, %s7183_s23 }
0x13ea   :  { %v6831_v35 = vpop.eup %6830 }
0x13eb   :  { %2599 = vrot.lane.b32.xlu0 %v6831_v35, %s7183_s23  ;;  %v2594_v35 = vsub.f32 1.0, %v7866_v51 }
0x13ec   :  { %v2742_v42 = vpop.permute.xlu1 %2741 }
0x13ed   :  { %v2745_v23 = vmul.f32 %v2742_v42, %v7802_v32 }
0x13ee   :  { %v2692_v48 = vpop.permute.xlu0 %2691 }
0x13f0   :  { %v2737_v5 = vpop.permute.xlu1 %2736 }
0x13f1   :  { %v2744_v27 = vmul.f32 %v2737_v5, %v7805_v46  ;;  %v2606_v5 = vmul.f32 %v7866_v51, %v7824_v29 }
0x13f2   :  { %v2687_v8 = vpop.permute.xlu0 %2686 }
0x1410   :  { %v2661_v58 = vpop.permute.xlu1 %2660 }
0x1411   :  { %v2666_v24 = vmul.f32 %v2661_v58, %v2656_v45 }
0x1412   :  { %v2663_v7 = vpop.permute.xlu0 %2662 }
0x1413   :  { %v2670_v2 = vadd.f32 %v2668_v26, %v2666_v24  ;;  %v2667_v41 = vmul.f32 %v2663_v7, %v2657_v12 }
0x1415   :  { %v2671_v28 = vadd.f32 %v2669_v15, %v2667_v41  ;;  %v7882_v18 = vmul.f32 %v2687_v8, %v2670_v2 }
0x1417   :  { %v7884_v10 = vmul.f32 %v2692_v48, %v2671_v28  ;;  %v7891_v11 = vadd.f32 %v2744_v27, %v7882_v18 }
0x1419   :  { %v7888_v9 = vadd.f32 %v2745_v23, %v7884_v10 }
0x141b   :  { %v2836_v53 = vrot.slane %v7888_v9, 7 }
0x141d   :  { %v2837_v6 = vsel %vm586_vm6, %v2836_v53, %v7891_v11 }
0x141e   :  { %2838 = vrot.lane.b32.xlu0 %v2837_v6, %s7185_s5 }
0x1421   :  { %v2726_v32 = vpop.permute.xlu1 %2725 }
0x1422   :  { %v2729_v58 = vmul.f32 %v2726_v32, %v7824_v29 }
0x1423   :  { %v2680_v30 = vpop.permute.xlu0 %2679 }
0x1425   :  { %v2721_v3 = vpop.permute.xlu1 %2720 }
0x1426   :  { %v2728_v12 = vmul.f32 %v2721_v3, %v7827_v59 }
0x1427   :  { %v2675_v63 = vpop.permute.xlu0 %2674 }
0x145b   :  { %v2598_v46 = vpop.permute.xlu1 %2597 }
0x145c   :  { %v2603_v33 = vmul.f32 %v2598_v46, %v2593_v44  ;;  %v2749_v46 = vld [vmem:[#allocation2 + $0xf] sm:$0x1] }
0x145d   :  { %v2600_v42 = vpop.permute.xlu0 %2599 }
0x145e   :  { %v2607_v48 = vadd.f32 %v2605_v13, %v2603_v33  ;;  %v2604_v8 = vmul.f32 %v2600_v42, %v2594_v35  ;;  %v2750_v35 = vld [vmem:[#allocation2] sm:$0x1] }
0x1460   :  { %v2608_v45 = vadd.f32 %v2606_v5, %v2604_v8  ;;  %v7904_v26 = vmul.f32 %v2675_v63, %v2607_v48  ;;  %v2748_v63 = vld [vmem:[#allocation2 + $0x7] sm:$0x1]  ;;  %v2751_v5 = vld [vmem:[#allocation2 + $0x8] sm:$0x1] }
0x1462   :  { %v7906_v24 = vmul.f32 %v2680_v30, %v2608_v45  ;;  %v7913_v7 = vadd.f32 %v2728_v12, %v7904_v26 }
0x1464   :  { %v7910_v37 = vadd.f32 %v2729_v58, %v7906_v24 }
0x1466   :  { %v2758_v2 = vrot.slane %v7910_v37, 7 }
0x1468   :  { %v2759_v51 = vsel %vm586_vm6, %v2758_v2, %v7913_v7 }
0x1469   :  { %2760 = vrot.lane.b32.xlu1 %v2759_v51, %s7183_s23 }
0x1490   :  { %v2839_v29 = vpop.permute.xlu0 %2838 }
0x1491   :  { %6422 = vmatmul.mubr.msk.f32.vlgmr.msra.gmra.mrb[16].mxu0 %vm216_vm7, %v2839_v29 }
0x1492   :  { %6436 = vmatprep.mubr.msk.f32.mxu0 %vm7178_vm0, %v7176_v0 }
0x14db   :  { %v2761_v59 = vpop.permute.xlu1 %2760 }
0x14dc   :  { %6415 = vmatmul.mubr.msk.f32.vlgmr.msra.gmra.mrb[16].mxu1 %vm216_vm7, %v2761_v59 }
0x14dd   :  { %6428 = vmatprep.mubr.msk.bf16.mxu1 %vm7178_vm0, %v7176_v0 }
0x1564   :  { %v2908_v15 = vpop.f32.mrb[16].mxu0 }
0x1565   :  { %v2972_v41 = vrot.slane %v2908_v15, 1  ;;  %2973 = vrot.lane.b32.xlu0 %v2908_v15, %s7179_s30  ;;  %v6423_v28 = vpop.f32.mrb[17].mxu0  ;;  %v2995_v6 = vadd.f32 %v7667_v50, %v2908_v15 }
0x1567   :  { %2975 = vrot.lane.b32.xlu1 %v2972_v41, %s7179_s30  ;;  %v2997_v30 = vrot.slane %v2995_v6, 1 }
0x15af   :  { %v2830_v23 = vpop.f32.mrb[16].mxu1 }
0x15b0   :  { %v2932_v27 = vadd.f32 %v7689_v60, %v2830_v23  ;;  %v6416_v53 = vpop.f32.mrb[17].mxu1  ;;  %v2913_v3 = vrot.slane %v2830_v23, 1  ;;  %v2916_v44 = vadd.f32 %v2830_v23, %v2748_v63 }
0x15b2   :  { %v2934_v32 = vrot.slane %v2932_v27, 1  ;;  %2935 = vrot.lane.b32.xlu0 %v2932_v27, %s7184_s24  ;;  %v2917_v33 = vadd.f32 %v2913_v3, %v2749_v46  ;;  %v2918_v50 = vadd.f32 %v7689_v60, %v2916_v44 }
0x15b4   :  { %2937 = vrot.lane.b32.xlu1 %v2934_v32, %s7184_s24  ;;  %v2919_v8 = vadd.f32 %v7689_v60, %v2917_v33  ;;  %v6146_v58 = vmul.f32 -1.442695, %v2918_v50 }
0x15b6   :  { %2998 = vrot.lane.b32.xlu0 %v2995_v6, %s7180_s16  ;;  %v6147_v2 = vmul.f32 -1.442695, %v2919_v8  ;;  %6832 = vpow2.f32 %v6146_v58  ;;  %v2752_v58 = vld [vmem:[#allocation4 + $0x7] sm:$0x1] }
0x15b8   :  { %3000 = vrot.lane.b32.xlu1 %v2997_v30, %s7180_s16  ;;  %6834 = vpow2.f32 %v6147_v2  ;;  %v2754_v2 = vld [vmem:[#allocation4] sm:$0x1] }
0x15c0   :  { %v6833_v15 = vpop.eup %6832 }
0x15c1   :  { %v2926_v28 = vadd.f32 1.0, %v6833_v15 }
0x15c2   :  { %v6835_v41 = vpop.eup %6834 }
0x15c3   :  { %v2927_v27 = vadd.f32 1.0, %v6835_v41 }
0x15d7   :  { %v2974_v13 = vpop.permute.xlu0 %2973 }
0x15d8   :  { %v2979_v48 = vadd.f32 %v2974_v13, %v2750_v35 }
0x15d9   :  { %v2976_v42 = vpop.permute.xlu1 %2975 }
0x15da   :  { %v2980_v45 = vadd.f32 %v2976_v42, %v2751_v5  ;;  %v2981_v12 = vadd.f32 %v2979_v48, %v7387_v39 }
0x15dc   :  { %v2982_v51 = vadd.f32 %v2980_v45, %v7387_v39  ;;  %v6148_v29 = vmul.f32 -1.442695, %v2981_v12  ;;  %v2753_v12 = vld [vmem:[#allocation4 + $0xf] sm:$0x1] }
0x15de   :  { %v6149_v59 = vmul.f32 -1.442695, %v2982_v51  ;;  %6836 = vpow2.f32 %v6148_v29  ;;  %v2755_v51 = vld [vmem:[#allocation4 + $0x8] sm:$0x1] }
0x15e0   :  { %6838 = vpow2.f32 %v6149_v59 }
0x15e1   :  { %6840 = vrcp.f32 %v2926_v28 }
0x15e2   :  { %6842 = vrcp.f32 %v2927_v27 }
0x15e8   :  { %v6837_v23 = vpop.eup %6836 }
0x15e9   :  { %v2989_v60 = vadd.f32 1.0, %v6837_v23 }
0x15ea   :  { %v6839_v53 = vpop.eup %6838 }
0x15eb   :  { %v2990_v6 = vadd.f32 1.0, %v6839_v53  ;;  %6844 = vrcp.f32 %v2989_v60  ;;  %v7937_v32 = vpop.eup %6840 }
0x15ec   :  { %v7940_v3 = vpop.eup %6842 }
0x15ed   :  { %6846 = vrcp.f32 %v2990_v6  ;;  %v3150_v6 = vld [vmem:[%s8851_s10] sm:$0xff] }
0x15f5   :  { %v7944_v33 = vpop.eup %6844 }
0x15f7   :  { %v7948_v48 = vpop.eup %6846 }
0x1624   :  { %v2936_v39 = vpop.permute.xlu0 %2935 }
0x1625   :  { %v2941_v30 = vmul.f32 %v7937_v32, %v2936_v39 }
0x1626   :  { %v2938_v44 = vpop.permute.xlu1 %2937 }
0x1627   :  { %v2942_v13 = vmul.f32 %v7940_v3, %v2938_v44  ;;  %2945 = vrot.lane.b32.xlu0 %v2941_v30, %s7182_s1  ;;  %v3153_v30 = vld [vmem:[%s8853_s12 + $0x8] sm:$0xff] }
0x1628   :  { %v2999_v42 = vpop.permute.xlu0 %2998 }
0x1629   :  { %v3004_v50 = vmul.f32 %v7944_v33, %v2999_v42  ;;  %2947 = vrot.lane.b32.xlu1 %v2942_v13, %s7182_s1 }
0x162a   :  { %v3001_v8 = vpop.permute.xlu1 %3000 }
0x162b   :  { %v3005_v45 = vmul.f32 %v7948_v48, %v3001_v8  ;;  %3008 = vrot.lane.b32.xlu0 %v3004_v50, %s7182_s1 }
0x162d   :  { %3010 = vrot.lane.b32.xlu1 %v3005_v45, %s7182_s1 }
0x162f   :  { %3036 = vperm.xlu0 %6659, %v2752_v58  }
0x1631   :  { %3041 = vperm.xlu1 %6658, %v2753_v12  }
0x1633   :  { %3048 = vperm.xlu0 %6659, %v2754_v2  }
0x1635   :  { %3053 = vperm.xlu1 %6658, %v2755_v51  }
0x1699   :  { %v2946_v29 = vpop.permute.xlu0 %2945 }
0x169a   :  { %v2951_v59 = vadd.f32 %v2946_v29, %v2748_v63  ;;  %v3151_v63 = vld [vmem:[%s8851_s10 + $0x8] sm:$0xff]  ;;  %s7186_s10 = smov 80  }
0x169b   :  { %v2948_v15 = vpop.permute.xlu1 %2947 }
0x169c   :  { %6848 = vtanh.f32 %v2951_v59  ;;  %v2952_v41 = vadd.f32 %v2948_v15, %v2749_v46  ;;  %v7960_v46 = vpack.c.bf16 %v3151_v63, %v3150_v6 }
0x169d   :  { %v3009_v28 = vpop.permute.xlu0 %3008 }
0x169e   :  { %6850 = vtanh.f32 %v2952_v41  ;;  %v3014_v23 = vadd.f32 %v3009_v28, %v2750_v35  ;;  %6594 = vmatpush3.bf16.msra.mxu0 %v7960_v46 }
0x169f   :  { %v3011_v27 = vpop.permute.xlu1 %3010  ;;  %6595 = vmatprep.subr.bf16.mxu0 %v7177_v1 }
0x16a0   :  { %6852 = vtanh.f32 %v3014_v23  ;;  %v3015_v53 = vadd.f32 %v3011_v27, %v2751_v5  ;;  %v3152_v5 = vld [vmem:[%s8853_s12] sm:$0xff] }
0x16a1   :  { %v7972_v13 = vpack.c.bf16 %v3153_v30, %v3152_v5  ;;  %6437 = vmatmul.mubr.f32.vlgmr.msra.gmra.mrb[18].mxu0 %v7176_v0 }
0x16a2   :  { %6854 = vtanh.f32 %v3015_v53  ;;  %6443 = vmatprep.mubr.msk.f32.mxu0 %vm7178_vm0, %v7176_v0 }
0x16a3   :  { %6597 = vmatpush3.bf16.msra.mxu0 %v7972_v13 }
0x16a4   :  { %6598 = vmatprep.subr.bf16.mxu0 %v7177_v1 }
0x16a6   :  { %v6849_v60 = vpop.eup %6848  ;;  %6444 = vmatmul.mubr.f32.vlgmr.msra.gmra.mrb[20].mxu0 %v7176_v0 }
0x16a7   :  { %2959 = vrot.lane.b32.xlu0 %v6849_v60, %s7183_s23  ;;  %6600 = vmatpush3.bf16.msra.mxu0 %v7960_v46 }
0x16a8   :  { %v6851_v39 = vpop.eup %6850  ;;  %6450 = vmatprep.mubr.msk.f32.mxu0 %vm7178_vm0, %v7176_v0  ;;  %6604 = vmatprep.subr.bf16.mxu0 %v7177_v1 }
0x16a9   :  { %2961 = vrot.lane.b32.xlu1 %v6851_v39, %s7183_s23 }
0x16aa   :  { %v6853_v35 = vpop.eup %6852 }
0x16ab   :  { %3022 = vrot.lane.b32.xlu0 %v6853_v35, %s7183_s23 }
0x16ac   :  { %v6855_v44 = vpop.eup %6854 }
0x16ad   :  { %3024 = vrot.lane.b32.xlu1 %v6855_v44, %s7183_s23 }
0x16af   :  { %523 = vrot.lane.b32.xlu0 %v7442_v25, %s7183_s23 }
0x16b1   :  { %525 = vrot.lane.b32.xlu1 %v7437_v17, %s7183_s23 }
0x16b3   :  { %534 = vrot.lane.b32.xlu0 %v7419_v47, %s7186_s10  ;;  %v3042_v47 = vpop.permute.xlu1 %3041 }
0x16b5   :  { %536 = vrot.lane.b32.xlu1 %v7413_v40, %s7186_s10  ;;  %v3037_v40 = vpop.permute.xlu0 %3036 }
0x16b7   :  { %888 = vrot.lane.b32.xlu0 %v7508_v38, %s7183_s23  ;;  %v3054_v25 = vpop.permute.xlu1 %3053  ;;  %v2967_v38 = vmul.f32 %v7937_v32, %v7913_v7 }
0x16b9   :  { %890 = vrot.lane.b32.xlu1 %v7500_v31, %s7183_s23  ;;  %v3049_v17 = vpop.permute.xlu0 %3048  ;;  %v6662_v31 = vld [vmem:[%s8849_s8] sm:$0xff]  }
0x16ba   :  { %6425 = vmatpush3.bf16.msra.mxu1 %v6662_v31 }
0x16bb   :  { %898 = vrot.lane.b32.xlu0 %v7475_v55, %s7186_s10  ;;  %v2955_v55 = vsub.f32 1.0, %v7937_v32  ;;  %6426 = vmatprep.subr.bf16.mxu1 %v7176_v0 }
0x16bd   :  { %900 = vrot.lane.b32.xlu1 %v7477_v56, %s7186_s10 }
0x16bf   :  { %1250 = vrot.lane.b32.xlu0 %v7574_v4, %s7183_s23  ;;  %v6663_v4 = vld [vmem:[%s8849_s8 + $0x8] sm:$0xff]  }
0x16c0   :  { %6427 = vmatpush3.bf16.msra.mxu1 %v6663_v4 }
0x16c1   :  { %1252 = vrot.lane.b32.xlu1 %v7567_v61, %s7183_s23  ;;  %6601 = vmatprep.subr.bf16.mxu1 %v7177_v1 }
0x16c3   :  { %1260 = vrot.lane.b32.xlu0 %v7541_v16, %s7186_s10 }
0x16c5   :  { %1262 = vrot.lane.b32.xlu1 %v7543_v19, %s7186_s10  ;;  %v2956_v19 = vsub.f32 1.0, %v7940_v3 }
0x16c7   :  { %1612 = vrot.lane.b32.xlu0 %v7649_v22, %s7183_s23 }
0x16c9   :  { %1614 = vrot.lane.b32.xlu1 %v7651_v36, %s7183_s23  ;;  %v3018_v36 = vsub.f32 1.0, %v7944_v33 }
0x16cb   :  { %1622 = vrot.lane.b32.xlu0 %v7622_v57, %s7186_s10 }
0x16cd   :  { %1624 = vrot.lane.b32.xlu1 %v7624_v62, %s7186_s10  ;;  %v2968_v62 = vmul.f32 %v7940_v3, %v7910_v37 }
0x16cf   :  { %1974 = vrot.lane.b32.xlu0 %v7737_v49, %s7183_s23 }
0x16d1   :  { %1976 = vrot.lane.b32.xlu1 %v7739_v21, %s7183_s23 }
0x16d3   :  { %1984 = vrot.lane.b32.xlu0 %v7710_v54, %s7186_s10  ;;  %v3030_v54 = vmul.f32 %v7944_v33, %v7891_v11 }
0x16d5   :  { %1986 = vrot.lane.b32.xlu1 %v7712_v43, %s7186_s10 }
0x16d7   :  { %2336 = vrot.lane.b32.xlu0 %v7818_v20, %s7183_s23  ;;  %v3031_v20 = vmul.f32 %v7948_v48, %v7888_v9 }
0x16d9   :  { %2338 = vrot.lane.b32.xlu1 %v7820_v52, %s7183_s23 }
0x16db   :  { %2346 = vrot.lane.b32.xlu0 %v7796_v14, %s7186_s10 }
0x16dd   :  { %2348 = vrot.lane.b32.xlu1 %v7798_v34, %s7186_s10  ;;  %v3019_v34 = vsub.f32 1.0, %v7948_v48 }
0x16df   :  { %2698 = vrot.lane.b32.xlu0 %v7904_v26, %s7183_s23 }
0x16e1   :  { %2700 = vrot.lane.b32.xlu1 %v7906_v24, %s7183_s23 }
0x16e3   :  { %2708 = vrot.lane.b32.xlu0 %v7882_v18, %s7186_s10 }
0x16e5   :  { %2710 = vrot.lane.b32.xlu1 %v7884_v10, %s7186_s10 }
0x1719   :  { %v2960_v56 = vpop.permute.xlu0 %2959 }
0x171a   :  { %v2965_v16 = vmul.f32 %v2960_v56, %v2955_v55 }
0x171b   :  { %v2962_v61 = vpop.permute.xlu1 %2961 }
0x171c   :  { %v2969_v57 = vadd.f32 %v2967_v38, %v2965_v16  ;;  %v2966_v22 = vmul.f32 %v2962_v61, %v2956_v19 }
0x171d   :  { %v3023_v43 = vpop.permute.xlu0 %3022 }
0x171e   :  { %v3044_v49 = vmul.f32 %v3037_v40, %v2969_v57  ;;  %v2970_v21 = vadd.f32 %v2968_v62, %v2966_v22  ;;  %v3028_v14 = vmul.f32 %v3023_v43, %v3018_v36  ;;  %v8098_v40 = vld [vmem:[%s8854_s13] ss:$0 sm:$0xff] }
0x171f   :  { %v3025_v52 = vpop.permute.xlu1 %3024  ;;  %v6150_v62 = vld [vmem:[%s8850_s9] ss:$0 sm:$0xff] }
0x1720   :  { %v3045_v18 = vmul.f32 %v3042_v47, %v2970_v21  ;;  %v3032_v10 = vadd.f32 %v3030_v54, %v3028_v14  ;;  %v3029_v26 = vmul.f32 %v3025_v52, %v3019_v34  ;;  %3060 = vrot.lane.b32.xlu0 %v3044_v49, %s7183_s23 }
0x1721   :  { %v524_v11 = vpop.permute.xlu0 %523 }
0x1722   :  { %v3056_v24 = vmul.f32 %v3049_v17, %v3032_v10  ;;  %v3033_v37 = vadd.f32 %v3031_v20, %v3029_v26  ;;  %530 = vst.msk [vmem:[#allocation3] sm:$0x1] %vm529_vm8, %v524_v11  ;;  %3062 = vrot.lane.b32.xlu1 %v3045_v18, %s7183_s23 }
0x1723   :  { %v526_v7 = vpop.permute.xlu1 %525 }
0x1724   :  { %v3057_v9 = vmul.f32 %v3054_v25, %v3033_v37  ;;  %531 = vst.msk [vmem:[#allocation3 + $0x8] sm:$0x1] %vm529_vm8, %v526_v7  ;;  %3070 = vrot.lane.b32.xlu0 %v3056_v24, %s7186_s10 }
0x1725   :  { %v535_v32 = vpop.permute.xlu0 %534 }
0x1726   :  { %541 = vst.msk [vmem:[#allocation3 + $0x7] sm:$0x1] %vm540_vm9, %v535_v32  ;;  %3072 = vrot.lane.b32.xlu1 %v3057_v9, %s7186_s10 }
0x1727   :  { %v537_v3 = vpop.permute.xlu1 %536 }
0x1728   :  { %542 = vst.msk [vmem:[#allocation3 + $0xf] sm:$0x1] %vm540_vm9, %v537_v3 }
0x1729   :  { %v889_v33 = vpop.permute.xlu0 %888 }
0x172a   :  { %894 = vst.msk [vmem:[#allocation3 + $0x1] sm:$0x1] %vm529_vm8, %v889_v33 }
0x172b   :  { %v891_v42 = vpop.permute.xlu1 %890 }
0x172c   :  { %895 = vst.msk [vmem:[#allocation3 + $0x9] sm:$0x1] %vm529_vm8, %v891_v42 }
0x172d   :  { %v899_v50 = vpop.permute.xlu0 %898 }
0x172e   :  { %904 = vst.msk [vmem:[#allocation3 + $0x6] sm:$0x1] %vm540_vm9, %v899_v50 }
0x172f   :  { %v901_v48 = vpop.permute.xlu1 %900 }
0x1730   :  { %905 = vst.msk [vmem:[#allocation3 + $0xe] sm:$0x1] %vm540_vm9, %v901_v48  ;;  %v3163_v48 = vld [vmem:[#allocation4 + $0xf] sm:$0x1] }
0x1731   :  { %v1251_v8 = vpop.permute.xlu0 %1250 }
0x1732   :  { %1256 = vst.msk [vmem:[#allocation3 + $0x2] sm:$0x1] %vm529_vm8, %v1251_v8 }
0x1733   :  { %v1253_v45 = vpop.permute.xlu1 %1252 }
0x1734   :  { %1257 = vst.msk [vmem:[#allocation3 + $0xa] sm:$0x1] %vm529_vm8, %v1253_v45 }
0x1735   :  { %v1261_v58 = vpop.permute.xlu0 %1260 }
0x1736   :  { %1266 = vst.msk [vmem:[#allocation3 + $0x5] sm:$0x1] %vm540_vm9, %v1261_v58 }
0x1737   :  { %v1263_v12 = vpop.permute.xlu1 %1262 }
0x1738   :  { %1267 = vst.msk [vmem:[#allocation3 + $0xd] sm:$0x1] %vm540_vm9, %v1263_v12 }
0x1739   :  { %v1613_v2 = vpop.permute.xlu0 %1612 }
0x173a   :  { %1618 = vst.msk [vmem:[#allocation3 + $0x3] sm:$0x1] %vm529_vm8, %v1613_v2  ;;  %v3502_v2 = vsub.f32 1.0, %v3163_v48 }
0x173b   :  { %v1615_v51 = vpop.permute.xlu1 %1614 }
0x173c   :  { %1619 = vst.msk [vmem:[#allocation3 + $0xb] sm:$0x1] %vm529_vm8, %v1615_v51  ;;  %v3162_v51 = vld [vmem:[#allocation4 + $0x7] sm:$0x1] }
0x173d   :  { %v1623_v29 = vpop.permute.xlu0 %1622 }
0x173e   :  { %1628 = vst.msk [vmem:[#allocation3 + $0x4] sm:$0x1] %vm540_vm9, %v1623_v29  ;;  %v3501_v29 = vsub.f32 1.0, %v3162_v51 }
0x173f   :  { %v1625_v59 = vpop.permute.xlu1 %1624 }
0x1740   :  { %1629 = vst.msk [vmem:[#allocation3 + $0xc] sm:$0x1] %vm540_vm9, %v1625_v59 }
0x1741   :  { %v1975_v15 = vpop.permute.xlu0 %1974 }
0x1742   :  { %1980 = vst.msk [vmem:[#allocation3 + $0x4] sm:$0x1] %vm529_vm8, %v1975_v15 }
0x1743   :  { %v1977_v41 = vpop.permute.xlu1 %1976 }
0x1744   :  { %1981 = vst.msk [vmem:[#allocation3 + $0xc] sm:$0x1] %vm529_vm8, %v1977_v41 }
0x1745   :  { %v1985_v28 = vpop.permute.xlu0 %1984 }
0x1746   :  { %1990 = vst.msk [vmem:[#allocation3 + $0x3] sm:$0x1] %vm540_vm9, %v1985_v28 }
0x1747   :  { %v1987_v23 = vpop.permute.xlu1 %1986 }
0x1748   :  { %1991 = vst.msk [vmem:[#allocation3 + $0xb] sm:$0x1] %vm540_vm9, %v1987_v23  ;;  %v8130_v23 = vld [vmem:[%s8852_s11] ss:$0 sm:$0xff] }
0x1749   :  { %v2337_v27 = vpop.permute.xlu0 %2336 }
0x174a   :  { %2342 = vst.msk [vmem:[#allocation3 + $0x5] sm:$0x1] %vm529_vm8, %v2337_v27 }
0x174b   :  { %v2339_v53 = vpop.permute.xlu1 %2338 }
0x174c   :  { %2343 = vst.msk [vmem:[#allocation3 + $0xd] sm:$0x1] %vm529_vm8, %v2339_v53 }
0x174d   :  { %v2347_v60 = vpop.permute.xlu0 %2346 }
0x174e   :  { %2352 = vst.msk [vmem:[#allocation3 + $0x2] sm:$0x1] %vm540_vm9, %v2347_v60 }
0x174f   :  { %v2349_v6 = vpop.permute.xlu1 %2348 }
0x1750   :  { %2353 = vst.msk [vmem:[#allocation3 + $0xa] sm:$0x1] %vm540_vm9, %v2349_v6 }
0x1751   :  { %v2699_v63 = vpop.permute.xlu0 %2698 }
0x1752   :  { %2704 = vst.msk [vmem:[#allocation3 + $0x6] sm:$0x1] %vm529_vm8, %v2699_v63 }
0x1753   :  { %v2701_v39 = vpop.permute.xlu1 %2700 }
0x1754   :  { %2705 = vst.msk [vmem:[#allocation3 + $0xe] sm:$0x1] %vm529_vm8, %v2701_v39 }
0x1755   :  { %v2709_v35 = vpop.permute.xlu0 %2708 }
0x1756   :  { %2714 = vst.msk [vmem:[#allocation3 + $0x1] sm:$0x1] %vm540_vm9, %v2709_v35 }
0x1757   :  { %v2711_v5 = vpop.permute.xlu1 %2710 }
0x1758   :  { %2715 = vst.msk [vmem:[#allocation3 + $0x9] sm:$0x1] %vm540_vm9, %v2711_v5 }
0x1774   :  { %v8093_v30 = vpop.f32.mrb[18].mxu0 }
0x1775   :  { %v6438_v44 = vpop.f32.mrb[19].mxu0  ;;  %v3330_v53 = vadd.f32 %v8130_v23, %v8093_v30  ;;  %v3305_v39 = vrot.slane %v8093_v30, 1 }
0x1777   :  { %v3332_v6 = vrot.slane %v3330_v53, 1 }
0x1779   :  { %v3300_v47 = vpop.f32.mrb[20].mxu0 }
0x177a   :  { %v3370_v17 = vrot.slane %v3300_v47, 1  ;;  %v3402_v25 = vadd.f32 %v8098_v40, %v3300_v47  ;;  %v6445_v55 = vpop.f32.mrb[21].mxu0  ;;  %3371 = vrot.lane.b32.xlu1 %v3300_v47, %s7179_s30 }
0x177c   :  { %v3404_v56 = vrot.slane %v3402_v25, 1  ;;  %3373 = vrot.lane.b32.xlu0 %v3370_v17, %s7179_s30 }
0x177e   :  { %3407 = vrot.lane.b32.xlu1 %v3404_v56, %s7180_s16 }
0x1780   :  { %3384 = vrot.lane.b32.xlu0 %v8098_v40, %s7179_s30 }
0x1784   :  { %3405 = vrot.lane.b32.xlu0 %v3402_v25, %s7180_s16 }
0x1792   :  { %v3061_v31 = vpop.permute.xlu0 %3060 }
0x1793   :  { %3066 = vst.msk [vmem:[#allocation3 + $0x7] sm:$0x1] %vm529_vm8, %v3061_v31 }
0x1794   :  { %v3063_v38 = vpop.permute.xlu1 %3062 }
0x1795   :  { %3067 = vst.msk [vmem:[#allocation3 + $0xf] sm:$0x1] %vm529_vm8, %v3063_v38 }
0x1796   :  { %v3071_v16 = vpop.permute.xlu0 %3070 }
0x1797   :  { %3076 = vst.msk [vmem:[#allocation3] sm:$0x1] %vm540_vm9, %v3071_v16 }
0x1798   :  { %v3073_v19 = vpop.permute.xlu1 %3072 }
0x1799   :  { %3077 = vst.msk [vmem:[#allocation3 + $0x8] sm:$0x1] %vm540_vm9, %v3073_v19 }
0x179e   :  { %v3078_v61 = vld [vmem:[#allocation3] sm:$0xff] }
0x17a0   :  { %v3079_v4 = vld [vmem:[#allocation3 + $0x8] sm:$0xff] }
0x17a1   :  { %v3080_v57 = vpack.c.bf16 %v3079_v4, %v3078_v61 }
0x17a3   :  { %6429 = vmatmul.mubr.msk.bf16.vlgmr.msra.gmra.mrb[20].mxu1 %vm154_vm1, %v3080_v57 }
0x17a4   :  { %6603 = vmatpush3.bf16.msra.mxu1 %v7972_v13  ;;  %6457 = vmatprep.mubr.msk.f32.mxu1 %vm7178_vm0, %v7176_v0 }
0x17a5   :  { %6607 = vmatprep.subr.bf16.mxu1 %v7177_v1 }
0x17ec   :  { %v3372_v20 = vpop.permute.xlu1 %3371 }
0x17ee   :  { %v3374_v14 = vpop.permute.xlu0 %3373 }
0x17f0   :  { %v3408_v58 = vpop.permute.xlu1 %3407 }
0x17f2   :  { %v8121_v10 = vpop.permute.xlu0 %3384 }
0x17f6   :  { %v3406_v50 = vpop.permute.xlu0 %3405 }
0x1876   :  { %v3141_v22 = vpop.f32.mrb[20].mxu1 }
0x1877   :  { %v3142_v36 = vadd.f32 %v6150_v62, %v3141_v22  ;;  %v6430_v54 = vpop.f32.mrb[21].mxu1 }
0x1878   :  { %v3144_v43 = vpop.f32.mrb[22].mxu1 }
0x1879   :  { %3148 = vst.msk [vmem:[#allocation2] sm:$0xff] %vm199_vm2, %v3142_v36  ;;  %v3145_v49 = vadd.f32 %v6150_v62, %v3144_v43  ;;  %v6431_v21 = vpop.f32.mrb[23].mxu1 }
0x187b   :  { %3149 = vst.msk [vmem:[#allocation2 + $0x8] sm:$0xff] %vm199_vm2, %v3145_v49 }
0x1880   :  { %v3158_v34 = vld [vmem:[#allocation2 + $0x7] sm:$0x1]  ;;  %v3156_v44 = vld [vmem:[#allocation2] sm:$0x1] }
0x1881   :  { %v3377_v52 = vadd.f32 %v3372_v20, %v3158_v34  ;;  %v3308_v17 = vadd.f32 %v8093_v30, %v3156_v44 }
0x1882   :  { %v3159_v18 = vld [vmem:[#allocation2 + $0xf] sm:$0x1]  ;;  %v3157_v63 = vld [vmem:[#allocation2 + $0x8] sm:$0x1] }
0x1883   :  { %v3378_v26 = vadd.f32 %v3374_v14, %v3159_v18  ;;  %v3387_v11 = vadd.f32 %v8121_v10, %v3377_v52  ;;  %v3309_v35 = vadd.f32 %v3305_v39, %v3157_v63  ;;  %v3316_v25 = vadd.f32 %v8130_v23, %v3308_v17 }
0x1885   :  { %v6158_v24 = vmul.f32 -1.442695, %v3387_v11  ;;  %v3388_v37 = vadd.f32 %v8121_v10, %v3378_v26  ;;  %v3317_v5 = vadd.f32 %v8130_v23, %v3309_v35  ;;  %v6155_v55 = vmul.f32 -1.442695, %v3316_v25 }
0x1887   :  { %6856 = vpow2.f32 %v6158_v24  ;;  %v6159_v7 = vmul.f32 -1.442695, %v3388_v37  ;;  %v6156_v47 = vmul.f32 -1.442695, %v3317_v5 }
0x1889   :  { %6858 = vpow2.f32 %v6159_v7 }
0x1891   :  { %v6857_v9 = vpop.eup %6856 }
0x1892   :  { %v3395_v32 = vadd.f32 1.0, %v6857_v9  ;;  %v3161_v9 = vld [vmem:[#allocation4 + $0x8] sm:$0x1] }
0x1893   :  { %v6859_v3 = vpop.eup %6858 }
0x1894   :  { %6860 = vrcp.f32 %v3395_v32  ;;  %v3396_v33 = vadd.f32 1.0, %v6859_v3 }
0x1896   :  { %6862 = vrcp.f32 %v3396_v33 }
0x189e   :  { %v6861_v42 = vpop.eup %6860 }
0x189f   :  { %v3411_v8 = vmul.f32 %v6861_v42, %v3406_v50  ;;  %v3425_v57 = vsub.f32 1.0, %v6861_v42  ;;  %v3437_v22 = vmul.f32 0.0, %v6861_v42  ;;  %v3160_v50 = vld [vmem:[#allocation4] sm:$0x1] }
0x18a0   :  { %v6863_v45 = vpop.eup %6862 }
0x18a1   :  { %v3412_v12 = vmul.f32 %v6863_v45, %v3408_v58  ;;  %3415 = vrot.lane.b32.xlu0 %v3411_v8, %s7182_s1  ;;  %v3426_v54 = vsub.f32 1.0, %v6863_v45  ;;  %v3438_v21 = vmul.f32 0.0, %v6863_v45  ;;  %v3486_v45 = vsub.f32 1.0, %v3161_v9 }
0x18a2   :  { %v3485_v58 = vsub.f32 1.0, %v3160_v50 }
0x18a3   :  { %3417 = vrot.lane.b32.xlu1 %v3412_v12, %s7182_s1 }
0x18a5   :  { %3510 = vperm.xlu0 %6659, %v3502_v2  }
0x18a7   :  { %3460 = vperm.xlu1 %6658, %v3163_v48  }
0x18a9   :  { %3505 = vperm.xlu0 %6659, %v3501_v29  }
0x18ab   :  { %3455 = vperm.xlu1 %6658, %v3162_v51  }
0x1913   :  { %v3416_v59 = vpop.permute.xlu0 %3415 }
0x1914   :  { %v3421_v15 = vadd.f32 %v3416_v59, %v3158_v34 }
0x1915   :  { %v3418_v41 = vpop.permute.xlu1 %3417 }
0x1916   :  { %6864 = vtanh.f32 %v3421_v15  ;;  %v3422_v28 = vadd.f32 %v3418_v41, %v3159_v18 }
0x1918   :  { %6866 = vtanh.f32 %v3422_v28 }
0x1919   :  { %6868 = vpow2.f32 %v6156_v47 }
0x191a   :  { %6870 = vpow2.f32 %v6155_v55 }
0x1920   :  { %v6865_v27 = vpop.eup %6864 }
0x1921   :  { %3429 = vrot.lane.b32.xlu0 %v6865_v27, %s7183_s23 }
0x1922   :  { %v6867_v60 = vpop.eup %6866 }
0x1923   :  { %3431 = vrot.lane.b32.xlu1 %v6867_v60, %s7183_s23  ;;  %v6869_v56 = vpop.eup %6868 }
0x1924   :  { %v3511_v31 = vpop.permute.xlu0 %3510  ;;  %v3325_v16 = vadd.f32 1.0, %v6869_v56  ;;  %v6871_v61 = vpop.eup %6870 }
0x1925   :  { %3333 = vrot.lane.b32.xlu0 %v3330_v53, %s7184_s24  ;;  %v3324_v43 = vadd.f32 1.0, %v6871_v61  ;;  %v3514_v18 = vmul.f32 0.0, %v3511_v31 }
0x1926   :  { %v3461_v38 = vpop.permute.xlu1 %3460  ;;  %6872 = vrcp.f32 %v3325_v16 }
0x1927   :  { %3335 = vrot.lane.b32.xlu1 %v3332_v6, %s7184_s24  ;;  %6874 = vrcp.f32 %v3324_v43 }
0x1928   :  { %v3506_v19 = vpop.permute.xlu0 %3505 }
0x1929   :  { %v3513_v37 = vmul.f32 0.0, %v3506_v19 }
0x192a   :  { %v3456_v4 = vpop.permute.xlu1 %3455 }
0x1930   :  { %v6873_v20 = vpop.eup %6872 }
0x1931   :  { %v6875_v48 = vpop.eup %6874  ;;  %v3354_v60 = vsub.f32 1.0, %v6873_v20  ;;  %v3366_v39 = vmul.f32 0.0, %v6873_v20 }
0x1932   :  { %v3353_v17 = vsub.f32 1.0, %v6875_v48  ;;  %v3365_v55 = vmul.f32 0.0, %v6875_v48 }
0x1993   :  { %v3430_v62 = vpop.permute.xlu0 %3429 }
0x1994   :  { %v3435_v36 = vmul.f32 %v3430_v62, %v3425_v57 }
0x1995   :  { %v3432_v30 = vpop.permute.xlu1 %3431 }
0x1996   :  { %v3439_v49 = vadd.f32 %v3437_v22, %v3435_v36  ;;  %v3436_v14 = vmul.f32 %v3432_v30, %v3426_v54 }
0x1997   :  { %v3334_v33 = vpop.permute.xlu0 %3333 }
0x1998   :  { %v3440_v34 = vadd.f32 %v3438_v21, %v3436_v14  ;;  %v8142_v26 = vmul.f32 %v3456_v4, %v3439_v49  ;;  %v3339_v8 = vmul.f32 %v6875_v48, %v3334_v33  ;;  %v3519_v49 = vld [vmem:[#allocation2 + $0x6] sm:$0x1] }
0x1999   :  { %v3336_v52 = vpop.permute.xlu1 %3335 }
0x199a   :  { %v8144_v11 = vmul.f32 %v3461_v38, %v3440_v34  ;;  %v3340_v24 = vmul.f32 %v6873_v20, %v3336_v52  ;;  %v8151_v32 = vadd.f32 %v3513_v37, %v8142_v26  ;;  %v3520_v34 = vld [vmem:[#allocation2 + $0xe] sm:$0x1] }
0x199c   :  { %v8147_v7 = vadd.f32 %v3514_v18, %v8144_v11  ;;  %3345 = vrot.lane.b32.xlu0 %v3340_v24, %s7182_s1 }
0x199e   :  { %v3605_v3 = vrot.slane %v8147_v7, 7 }
0x19a0   :  { %3448 = vperm.xlu0 %6659, %v3161_v9   ;;  %v3606_v42 = vsel %vm586_vm6, %v3605_v3, %v8151_v32 }
0x19a1   :  { %3607 = vrot.lane.b32.xlu1 %v3606_v42, %s7185_s5 }
0x19a4   :  { %3443 = vperm.xlu0 %6659, %v3160_v50  }
0x19a5   :  { %3343 = vrot.lane.b32.xlu1 %v3339_v8, %s7182_s1 }
0x19a9   :  { %3494 = vperm.xlu1 %6658, %v3486_v45   ;;  %v3524_v45 = vld [vmem:[#allocation4 + $0xe] sm:$0x1] }
0x19ad   :  { %3489 = vperm.xlu1 %6658, %v3485_v58  }
0x1a0e   :  { %v3346_v12 = vpop.permute.xlu0 %3345 }
0x1a0f   :  { %v3350_v2 = vadd.f32 %v3346_v12, %v3157_v63 }
0x1a11   :  { %6876 = vtanh.f32 %v3350_v2 }
0x1a13   :  { %v3608_v51 = vpop.permute.xlu1 %3607 }
0x1a14   :  { %6458 = vmatmul.mubr.msk.f32.vlgmr.msra.gmra.mrb[18].mxu1 %vm216_vm7, %v3608_v51 }
0x1a15   :  { %6609 = vmatpush3.bf16.msra.mxu1 %v7972_v13  ;;  %6471 = vmatprep.mubr.msk.f32.mxu1 %vm7178_vm0, %v7176_v0 }
0x1a16   :  { %6613 = vmatprep.subr.bf16.mxu1 %v7177_v1 }
0x1a17   :  { %v3344_v29 = vpop.permute.xlu1 %3343 }
0x1a18   :  { %v3349_v59 = vadd.f32 %v3344_v29, %v3156_v44  ;;  %v3864_v29 = vsub.f32 1.0, %v3524_v45 }
0x1a1a   :  { %6878 = vtanh.f32 %v3349_v59  ;;  %v3523_v59 = vld [vmem:[#allocation4 + $0x6] sm:$0x1] }
0x1a1b   :  { %v6877_v15 = vpop.eup %6876 }
0x1a1c   :  { %3359 = vrot.lane.b32.xlu0 %v6877_v15, %s7183_s23  ;;  %v3863_v15 = vsub.f32 1.0, %v3523_v59 }
0x1a1f   :  { %v3449_v28 = vpop.permute.xlu0 %3448 }
0x1a23   :  { %v3444_v27 = vpop.permute.xlu0 %3443 }
0x1a24   :  { %v6879_v41 = vpop.eup %6878 }
0x1a25   :  { %3357 = vrot.lane.b32.xlu1 %v6879_v41, %s7183_s23 }
0x1a28   :  { %v3495_v53 = vpop.permute.xlu1 %3494 }
0x1a29   :  { %v3498_v25 = vmul.f32 0.0, %v3495_v53 }
0x1a2c   :  { %v3490_v5 = vpop.permute.xlu1 %3489 }
0x1a2d   :  { %v3497_v16 = vmul.f32 0.0, %v3490_v5 }
0x1a8e   :  { %v3360_v6 = vpop.permute.xlu0 %3359 }
0x1a8f   :  { %v3364_v63 = vmul.f32 %v3360_v6, %v3354_v60 }
0x1a91   :  { %v3368_v35 = vadd.f32 %v3366_v39, %v3364_v63 }
0x1a93   :  { %v8165_v47 = vmul.f32 %v3449_v28, %v3368_v35 }
0x1a95   :  { %v8168_v31 = vadd.f32 %v3498_v25, %v8165_v47 }
0x1a97   :  { %v3358_v44 = vpop.permute.xlu1 %3357  ;;  %v3527_v4 = vrot.slane %v8168_v31, 7 }
0x1a98   :  { %v3363_v56 = vmul.f32 %v3358_v44, %v3353_v17  ;;  %v3518_v44 = vld [vmem:[#allocation2 + $0x9] sm:$0x1] }
0x1a9a   :  { %v3367_v38 = vadd.f32 %v3365_v55, %v3363_v56  ;;  %v3517_v56 = vld [vmem:[#allocation2 + $0x1] sm:$0x1] }
0x1a9c   :  { %v8170_v19 = vmul.f32 %v3444_v27, %v3367_v38 }
0x1a9e   :  { %v8173_v61 = vadd.f32 %v3497_v16, %v8170_v19 }
0x1aa0   :  { %v3528_v57 = vsel %vm586_vm6, %v3527_v4, %v8173_v61 }
0x1aa1   :  { %3529 = vrot.lane.b32.xlu0 %v3528_v57, %s7183_s23 }
0x1ae7   :  { %v3677_v62 = vpop.f32.mrb[18].mxu1 }
0x1ae8   :  { %v3741_v22 = vrot.slane %v3677_v62, 1  ;;  %v3764_v36 = vadd.f32 %v8098_v40, %v3677_v62  ;;  %v6459_v54 = vpop.f32.mrb[19].mxu1  ;;  %3742 = vrot.lane.b32.xlu0 %v3677_v62, %s7179_s30 }
0x1aea   :  { %3744 = vrot.lane.b32.xlu1 %v3741_v22, %s7179_s30  ;;  %v3766_v43 = vrot.slane %v3764_v36, 1 }
0x1aec   :  { %3767 = vrot.lane.b32.xlu0 %v3764_v36, %s7180_s16 }
0x1aee   :  { %3769 = vrot.lane.b32.xlu1 %v3766_v43, %s7180_s16 }
0x1b13   :  { %v3530_v30 = vpop.permute.xlu0 %3529 }
0x1b14   :  { %6451 = vmatmul.mubr.msk.f32.vlgmr.msra.gmra.mrb[22].mxu0 %vm216_vm7, %v3530_v30 }
0x1b15   :  { %6606 = vmatpush3.bf16.msra.mxu0 %v7960_v46  ;;  %6464 = vmatprep.mubr.msk.f32.mxu0 %vm7178_vm0, %v7176_v0 }
0x1b16   :  { %6610 = vmatprep.subr.bf16.mxu0 %v7177_v1 }
0x1b5a   :  { %v3743_v21 = vpop.permute.xlu0 %3742 }
0x1b5b   :  { %v3748_v14 = vadd.f32 %v3743_v21, %v3519_v49 }
0x1b5c   :  { %v3745_v20 = vpop.permute.xlu1 %3744 }
0x1b5d   :  { %v3750_v52 = vadd.f32 %v3748_v14, %v8121_v10  ;;  %v3749_v18 = vadd.f32 %v3745_v20, %v3520_v34 }
0x1b5e   :  { %v3768_v8 = vpop.permute.xlu0 %3767 }
0x1b5f   :  { %v6164_v24 = vmul.f32 -1.442695, %v3750_v52  ;;  %v3751_v37 = vadd.f32 %v3749_v18, %v8121_v10 }
0x1b60   :  { %v3770_v2 = vpop.permute.xlu1 %3769 }
0x1b61   :  { %6880 = vpow2.f32 %v6164_v24  ;;  %v6165_v9 = vmul.f32 -1.442695, %v3751_v37 }
0x1b63   :  { %6882 = vpow2.f32 %v6165_v9 }
0x1b6b   :  { %v6881_v3 = vpop.eup %6880 }
0x1b6c   :  { %v3758_v33 = vadd.f32 1.0, %v6881_v3 }
0x1b6d   :  { %v6883_v42 = vpop.eup %6882 }
0x1b6e   :  { %6884 = vrcp.f32 %v3758_v33  ;;  %v3759_v50 = vadd.f32 1.0, %v6883_v42 }
0x1b70   :  { %6886 = vrcp.f32 %v3759_v50 }
0x1b78   :  { %v6885_v48 = vpop.eup %6884 }
0x1b79   :  { %v3773_v58 = vmul.f32 %v6885_v48, %v3768_v8  ;;  %v3787_v21 = vsub.f32 1.0, %v6885_v48  ;;  %v3799_v52 = vmul.f32 %v6885_v48, %v8151_v32 }
0x1b7a   :  { %v6887_v12 = vpop.eup %6886 }
0x1b7b   :  { %v3774_v51 = vmul.f32 %v6887_v12, %v3770_v2  ;;  %3777 = vrot.lane.b32.xlu0 %v3773_v58, %s7182_s1  ;;  %v3788_v20 = vsub.f32 1.0, %v6887_v12  ;;  %v3800_v37 = vmul.f32 %v6887_v12, %v8147_v7  ;;  %v3522_v12 = vld [vmem:[#allocation4 + $0x9] sm:$0x1] }
0x1b7d   :  { %3779 = vrot.lane.b32.xlu1 %v3774_v51, %s7182_s1 }
0x1b7f   :  { %3872 = vperm.xlu0 %6659, %v3864_v29  }
0x1b81   :  { %3822 = vperm.xlu1 %6658, %v3524_v45  }
0x1b83   :  { %3867 = vperm.xlu0 %6659, %v3863_v15  }
0x1b85   :  { %3817 = vperm.xlu1 %6658, %v3523_v59  }
0x1be7   :  { %v3599_v41 = vpop.f32.mrb[22].mxu0 }
0x1be8   :  { %v6452_v28 = vpop.f32.mrb[23].mxu0  ;;  %v3701_v39 = vadd.f32 %v8130_v23, %v3599_v41  ;;  %v3682_v17 = vrot.slane %v3599_v41, 1  ;;  %v3685_v16 = vadd.f32 %v3599_v41, %v3517_v56  ;;  %v3521_v41 = vld [vmem:[#allocation4 + $0x1] sm:$0x1] }
0x1bea   :  { %v3703_v5 = vrot.slane %v3701_v39, 1  ;;  %v3686_v25 = vadd.f32 %v3682_v17, %v3518_v44  ;;  %v3687_v4 = vadd.f32 %v8130_v23, %v3685_v16 }
0x1bec   :  { %v3688_v55 = vadd.f32 %v8130_v23, %v3686_v25  ;;  %v6162_v57 = vmul.f32 -1.442695, %v3687_v4 }
0x1bed   :  { %v3778_v27 = vpop.permute.xlu0 %3777 }
0x1bee   :  { %v3783_v53 = vadd.f32 %v3778_v27, %v3519_v49  ;;  %v6163_v38 = vmul.f32 -1.442695, %v3688_v55  ;;  %v3848_v27 = vsub.f32 1.0, %v3522_v12 }
0x1bef   :  { %v3780_v60 = vpop.permute.xlu1 %3779 }
0x1bf0   :  { %v3784_v6 = vadd.f32 %v3780_v60, %v3520_v34  ;;  %6888 = vtanh.f32 %v3783_v53  ;;  %v3847_v53 = vsub.f32 1.0, %v3521_v41 }
0x1bf2   :  { %6890 = vtanh.f32 %v3784_v6 }
0x1bf3   :  { %6892 = vpow2.f32 %v6163_v38 }
0x1bf4   :  { %6894 = vpow2.f32 %v6162_v57 }
0x1bfa   :  { %v6889_v63 = vpop.eup %6888 }
0x1bfb   :  { %3791 = vrot.lane.b32.xlu0 %v6889_v63, %s7183_s23 }
0x1bfc   :  { %v6891_v35 = vpop.eup %6890 }
0x1bfd   :  { %3793 = vrot.lane.b32.xlu1 %v6891_v35, %s7183_s23  ;;  %v6893_v62 = vpop.eup %6892 }
0x1bfe   :  { %v3873_v22 = vpop.permute.xlu0 %3872  ;;  %v3696_v36 = vadd.f32 1.0, %v6893_v62  ;;  %v6895_v30 = vpop.eup %6894 }
0x1bff   :  { %3704 = vrot.lane.b32.xlu0 %v3701_v39, %s7184_s24  ;;  %v3695_v14 = vadd.f32 1.0, %v6895_v30  ;;  %v3876_v8 = vmul.f32 %v3873_v22, %v8147_v7 }
0x1c00   :  { %v3823_v54 = vpop.permute.xlu1 %3822  ;;  %6896 = vrcp.f32 %v3696_v36 }
0x1c01   :  { %3706 = vrot.lane.b32.xlu1 %v3703_v5, %s7184_s24  ;;  %6898 = vrcp.f32 %v3695_v14 }
0x1c02   :  { %v3868_v43 = vpop.permute.xlu0 %3867 }
0x1c03   :  { %v3875_v51 = vmul.f32 %v3868_v43, %v8151_v32 }
0x1c04   :  { %v3818_v49 = vpop.permute.xlu1 %3817 }
0x1c0a   :  { %v6897_v42 = vpop.eup %6896 }
0x1c0b   :  { %v6899_v32 = vpop.eup %6898  ;;  %v3725_v38 = vsub.f32 1.0, %v6897_v42  ;;  %v3737_v57 = vmul.f32 %v6897_v42, %v8168_v31 }
0x1c0c   :  { %v3736_v30 = vmul.f32 %v6899_v32, %v8173_v61 }
0x1c6d   :  { %v3792_v34 = vpop.permute.xlu0 %3791 }
0x1c6e   :  { %v3797_v18 = vmul.f32 %v3792_v34, %v3787_v21 }
0x1c6f   :  { %v3794_v24 = vpop.permute.xlu1 %3793 }
0x1c70   :  { %v3798_v9 = vmul.f32 %v3794_v24, %v3788_v20  ;;  %v3801_v3 = vadd.f32 %v3799_v52, %v3797_v18 }
0x1c71   :  { %v3705_v15 = vpop.permute.xlu0 %3704 }
0x1c72   :  { %v3802_v33 = vadd.f32 %v3800_v37, %v3798_v9  ;;  %v8203_v45 = vmul.f32 %v3818_v49, %v3801_v3  ;;  %v3710_v28 = vmul.f32 %v6899_v32, %v3705_v15 }
0x1c73   :  { %v3707_v50 = vpop.permute.xlu1 %3706 }
0x1c74   :  { %v8205_v58 = vmul.f32 %v3823_v54, %v3802_v33  ;;  %v3711_v2 = vmul.f32 %v6897_v42, %v3707_v50  ;;  %v8213_v29 = vadd.f32 %v3875_v51, %v8203_v45  ;;  %v3881_v42 = vld [vmem:[#allocation2 + $0x5] sm:$0x1] }
0x1c76   :  { %v8209_v48 = vadd.f32 %v3876_v8, %v8205_v58  ;;  %3716 = vrot.lane.b32.xlu0 %v3711_v2, %s7182_s1  ;;  %v3882_v2 = vld [vmem:[#allocation2 + $0xd] sm:$0x1] }
0x1c78   :  { %v3967_v59 = vrot.slane %v8209_v48, 7 }
0x1c7a   :  { %3810 = vperm.xlu0 %6659, %v3522_v12   ;;  %v3968_v7 = vsel %vm586_vm6, %v3967_v59, %v8213_v29 }
0x1c7b   :  { %3969 = vrot.lane.b32.xlu1 %v3968_v7, %s7185_s5 }
0x1c7e   :  { %3805 = vperm.xlu0 %6659, %v3521_v41  }
0x1c7f   :  { %3714 = vrot.lane.b32.xlu1 %v3710_v28, %s7182_s1 }
0x1c83   :  { %3856 = vperm.xlu1 %6658, %v3848_v27  }
0x1c87   :  { %3851 = vperm.xlu1 %6658, %v3847_v53  }
0x1ce8   :  { %v3717_v60 = vpop.permute.xlu0 %3716 }
0x1ce9   :  { %v3721_v6 = vadd.f32 %v3717_v60, %v3518_v44 }
0x1ceb   :  { %6900 = vtanh.f32 %v3721_v6 }
0x1ced   :  { %v3970_v63 = vpop.permute.xlu1 %3969 }
0x1cee   :  { %6472 = vmatmul.mubr.msk.f32.vlgmr.msra.gmra.mrb[24].mxu1 %vm216_vm7, %v3970_v63  ;;  %v3886_v63 = vld [vmem:[#allocation4 + $0xd] sm:$0x1] }
0x1cef   :  { %6615 = vmatpush3.bf16.msra.mxu1 %v7972_v13  ;;  %6485 = vmatprep.mubr.msk.f32.mxu1 %vm7178_vm0, %v7176_v0 }
0x1cf0   :  { %6619 = vmatprep.subr.bf16.mxu1 %v7177_v1 }
0x1cf1   :  { %v3715_v39 = vpop.permute.xlu1 %3714 }
0x1cf2   :  { %v3720_v35 = vadd.f32 %v3715_v39, %v3517_v56  ;;  %v3724_v56 = vsub.f32 1.0, %v6899_v32 }
0x1cf4   :  { %6902 = vtanh.f32 %v3720_v35 }
0x1cf5   :  { %v6901_v5 = vpop.eup %6900 }
0x1cf6   :  { %3730 = vrot.lane.b32.xlu0 %v6901_v5, %s7183_s23 }
0x1cf9   :  { %v3811_v44 = vpop.permute.xlu0 %3810 }
0x1cfd   :  { %v3806_v25 = vpop.permute.xlu0 %3805 }
0x1cfe   :  { %v6903_v17 = vpop.eup %6902 }
0x1cff   :  { %3728 = vrot.lane.b32.xlu1 %v6903_v17, %s7183_s23 }
0x1d02   :  { %v3857_v55 = vpop.permute.xlu1 %3856 }
0x1d03   :  { %v3860_v43 = vmul.f32 %v3857_v55, %v8168_v31 }
0x1d06   :  { %v3852_v22 = vpop.permute.xlu1 %3851 }
0x1d07   :  { %v3859_v34 = vmul.f32 %v3852_v22, %v8173_v61 }
0x1d68   :  { %v3731_v16 = vpop.permute.xlu0 %3730 }
0x1d69   :  { %v3735_v4 = vmul.f32 %v3731_v16, %v3725_v38 }
0x1d6b   :  { %v3739_v62 = vadd.f32 %v3737_v57, %v3735_v4 }
0x1d6d   :  { %v8228_v36 = vmul.f32 %v3811_v44, %v3739_v62  ;;  %v4226_v44 = vsub.f32 1.0, %v3886_v63 }
0x1d6f   :  { %v8233_v21 = vadd.f32 %v3860_v43, %v8228_v36 }
0x1d71   :  { %v3729_v54 = vpop.permute.xlu1 %3728  ;;  %v3889_v18 = vrot.slane %v8233_v21, 7 }
0x1d72   :  { %v3734_v49 = vmul.f32 %v3729_v54, %v3724_v56 }
0x1d74   :  { %v3738_v14 = vadd.f32 %v3736_v30, %v3734_v49 }
0x1d76   :  { %v8236_v20 = vmul.f32 %v3806_v25, %v3738_v14  ;;  %v3885_v25 = vld [vmem:[#allocation4 + $0x5] sm:$0x1]  ;;  %v3880_v14 = vld [vmem:[#allocation2 + $0xa] sm:$0x1] }
0x1d77   :  { %v4225_v55 = vsub.f32 1.0, %v3885_v25 }
0x1d78   :  { %v8239_v52 = vadd.f32 %v3859_v34, %v8236_v20 }
0x1d7a   :  { %v3890_v24 = vsel %vm586_vm6, %v3889_v18, %v8239_v52  ;;  %v3879_v18 = vld [vmem:[#allocation2 + $0x2] sm:$0x1] }
0x1d7b   :  { %3891 = vrot.lane.b32.xlu0 %v3890_v24, %s7183_s23 }
0x1dc1   :  { %v4039_v31 = vpop.f32.mrb[24].mxu1 }
0x1dc2   :  { %v4103_v37 = vrot.slane %v4039_v31, 1  ;;  %v4126_v9 = vadd.f32 %v8098_v40, %v4039_v31  ;;  %v6473_v3 = vpop.f32.mrb[25].mxu1  ;;  %4104 = vrot.lane.b32.xlu0 %v4039_v31, %s7179_s30 }
0x1dc4   :  { %4106 = vrot.lane.b32.xlu1 %v4103_v37, %s7179_s30  ;;  %v4128_v61 = vrot.slane %v4126_v9, 1 }
0x1dc6   :  { %4129 = vrot.lane.b32.xlu0 %v4126_v9, %s7180_s16 }
0x1dc8   :  { %4131 = vrot.lane.b32.xlu1 %v4128_v61, %s7180_s16 }
0x1ded   :  { %v3892_v33 = vpop.permute.xlu0 %3891 }
0x1dee   :  { %6465 = vmatmul.mubr.msk.f32.vlgmr.msra.gmra.mrb[24].mxu0 %vm216_vm7, %v3892_v33 }
0x1def   :  { %6612 = vmatpush3.bf16.msra.mxu0 %v7960_v46  ;;  %6478 = vmatprep.mubr.msk.f32.mxu0 %vm7178_vm0, %v7176_v0 }
0x1df0   :  { %6616 = vmatprep.subr.bf16.mxu0 %v7177_v1 }
0x1e34   :  { %v4105_v50 = vpop.permute.xlu0 %4104 }
0x1e35   :  { %v4110_v8 = vadd.f32 %v4105_v50, %v3881_v42 }
0x1e36   :  { %v4107_v51 = vpop.permute.xlu1 %4106 }
0x1e37   :  { %v4112_v12 = vadd.f32 %v4110_v8, %v8121_v10  ;;  %v4111_v59 = vadd.f32 %v4107_v51, %v3882_v2 }
0x1e38   :  { %v4130_v6 = vpop.permute.xlu0 %4129 }
0x1e39   :  { %v6170_v15 = vmul.f32 -1.442695, %v4112_v12  ;;  %v4113_v7 = vadd.f32 %v4111_v59, %v8121_v10 }
0x1e3a   :  { %v4132_v5 = vpop.permute.xlu1 %4131 }
0x1e3b   :  { %6904 = vpow2.f32 %v6170_v15  ;;  %v6171_v41 = vmul.f32 -1.442695, %v4113_v7 }
0x1e3d   :  { %6906 = vpow2.f32 %v6171_v41 }
0x1e45   :  { %v6905_v32 = vpop.eup %6904 }
0x1e46   :  { %v4120_v28 = vadd.f32 1.0, %v6905_v32 }
0x1e47   :  { %v6907_v27 = vpop.eup %6906 }
0x1e48   :  { %6908 = vrcp.f32 %v4120_v28  ;;  %v4121_v53 = vadd.f32 1.0, %v6907_v27 }
0x1e4a   :  { %6910 = vrcp.f32 %v4121_v53 }
0x1e52   :  { %v6909_v60 = vpop.eup %6908 }
0x1e53   :  { %v4135_v39 = vmul.f32 %v6909_v60, %v4130_v6  ;;  %v4149_v59 = vsub.f32 1.0, %v6909_v60  ;;  %v4161_v41 = vmul.f32 %v6909_v60, %v8213_v29 }
0x1e54   :  { %v6911_v35 = vpop.eup %6910 }
0x1e55   :  { %v4136_v17 = vmul.f32 %v6911_v35, %v4132_v5  ;;  %4139 = vrot.lane.b32.xlu0 %v4135_v39, %s7182_s1  ;;  %v4150_v7 = vsub.f32 1.0, %v6911_v35  ;;  %v4162_v27 = vmul.f32 %v6911_v35, %v8209_v48 }
0x1e57   :  { %4141 = vrot.lane.b32.xlu1 %v4136_v17, %s7182_s1 }
0x1e59   :  { %4234 = vperm.xlu0 %6659, %v4226_v44  }
0x1e5b   :  { %4184 = vperm.xlu1 %6658, %v3886_v63  }
0x1e5d   :  { %4229 = vperm.xlu0 %6659, %v4225_v55  }
0x1e5f   :  { %4179 = vperm.xlu1 %6658, %v3885_v25  }
0x1ec1   :  { %v3961_v38 = vpop.f32.mrb[24].mxu0 }
0x1ec2   :  { %v6466_v16 = vpop.f32.mrb[25].mxu0  ;;  %v4063_v54 = vadd.f32 %v8130_v23, %v3961_v38  ;;  %v4044_v49 = vrot.slane %v3961_v38, 1  ;;  %v4047_v24 = vadd.f32 %v3961_v38, %v3879_v18 }
0x1ec4   :  { %v4065_v30 = vrot.slane %v4063_v54, 1  ;;  %v4048_v34 = vadd.f32 %v4044_v49, %v3880_v14  ;;  %v4049_v37 = vadd.f32 %v8130_v23, %v4047_v24 }
0x1ec6   :  { %v4050_v31 = vadd.f32 %v8130_v23, %v4048_v34  ;;  %v6168_v3 = vmul.f32 -1.442695, %v4049_v37 }
0x1ec7   :  { %v4140_v4 = vpop.permute.xlu0 %4139 }
0x1ec8   :  { %v4145_v57 = vadd.f32 %v4140_v4, %v3881_v42  ;;  %v6169_v9 = vmul.f32 -1.442695, %v4050_v31  ;;  %v3884_v4 = vld [vmem:[#allocation4 + $0xa] sm:$0x1] }
0x1ec9   :  { %v4142_v62 = vpop.permute.xlu1 %4141 }
0x1eca   :  { %v4146_v22 = vadd.f32 %v4142_v62, %v3882_v2  ;;  %6912 = vtanh.f32 %v4145_v57 }
0x1ecc   :  { %6914 = vtanh.f32 %v4146_v22 }
0x1ecd   :  { %6916 = vpow2.f32 %v6169_v9 }
0x1ece   :  { %6918 = vpow2.f32 %v6168_v3 }
0x1ed4   :  { %v6913_v56 = vpop.eup %6912 }
0x1ed5   :  { %4153 = vrot.lane.b32.xlu0 %v6913_v56, %s7183_s23  ;;  %v4210_v56 = vsub.f32 1.0, %v3884_v4 }
0x1ed6   :  { %v6915_v43 = vpop.eup %6914 }
0x1ed7   :  { %4155 = vrot.lane.b32.xlu1 %v6915_v43, %s7183_s23  ;;  %v6917_v61 = vpop.eup %6916 }
0x1ed8   :  { %v4235_v33 = vpop.permute.xlu0 %4234  ;;  %v4058_v42 = vadd.f32 1.0, %v6917_v61  ;;  %v6919_v8 = vpop.eup %6918 }
0x1ed9   :  { %4066 = vrot.lane.b32.xlu0 %v4063_v54, %s7184_s24  ;;  %v4057_v2 = vadd.f32 1.0, %v6919_v8  ;;  %v4238_v17 = vmul.f32 %v4235_v33, %v8209_v48 }
0x1eda   :  { %v4185_v50 = vpop.permute.xlu1 %4184  ;;  %6920 = vrcp.f32 %v4058_v42 }
0x1edb   :  { %4068 = vrot.lane.b32.xlu1 %v4065_v30, %s7184_s24  ;;  %6922 = vrcp.f32 %v4057_v2 }
0x1edc   :  { %v4230_v51 = vpop.permute.xlu0 %4229 }
0x1edd   :  { %v4237_v16 = vmul.f32 %v4230_v51, %v8213_v29  ;;  %v3883_v29 = vld [vmem:[#allocation4 + $0x2] sm:$0x1] }
0x1ede   :  { %v4180_v12 = vpop.permute.xlu1 %4179  ;;  %v4209_v54 = vsub.f32 1.0, %v3883_v29 }
0x1ee4   :  { %v6921_v39 = vpop.eup %6920 }
0x1ee5   :  { %v6923_v35 = vpop.eup %6922  ;;  %v4087_v3 = vsub.f32 1.0, %v6921_v39  ;;  %v4099_v42 = vmul.f32 %v6921_v39, %v8233_v21 }
0x1ee6   :  { %v4086_v2 = vsub.f32 1.0, %v6923_v35 }
0x1f47   :  { %v4154_v15 = vpop.permute.xlu0 %4153 }
0x1f48   :  { %v4159_v32 = vmul.f32 %v4154_v15, %v4149_v59  ;;  %v4098_v15 = vmul.f32 %v6923_v35, %v8239_v52 }
0x1f49   :  { %v4156_v28 = vpop.permute.xlu1 %4155 }
0x1f4a   :  { %v4160_v53 = vmul.f32 %v4156_v28, %v4150_v7  ;;  %v4163_v6 = vadd.f32 %v4161_v41, %v4159_v32 }
0x1f4b   :  { %v4067_v38 = vpop.permute.xlu0 %4066 }
0x1f4c   :  { %v4164_v63 = vadd.f32 %v4162_v27, %v4160_v53  ;;  %v8269_v44 = vmul.f32 %v4180_v12, %v4163_v6  ;;  %v4072_v62 = vmul.f32 %v6923_v35, %v4067_v38  ;;  %v4244_v35 = vld [vmem:[#allocation2 + $0xc] sm:$0x1] }
0x1f4d   :  { %v4069_v5 = vpop.permute.xlu1 %4068 }
0x1f4e   :  { %v8271_v25 = vmul.f32 %v4185_v50, %v4164_v63  ;;  %v4073_v55 = vmul.f32 %v6921_v39, %v4069_v5  ;;  %v8279_v57 = vadd.f32 %v4237_v16, %v8269_v44 }
0x1f50   :  { %v8275_v60 = vadd.f32 %v4238_v17, %v8271_v25  ;;  %4078 = vrot.lane.b32.xlu1 %v4073_v55, %s7182_s1 }
0x1f52   :  { %v4329_v48 = vrot.slane %v8275_v60, 7 }
0x1f54   :  { %4076 = vrot.lane.b32.xlu1 %v4072_v62, %s7182_s1  ;;  %v4330_v22 = vsel %vm586_vm6, %v4329_v48, %v8279_v57 }
0x1f55   :  { %4331 = vrot.lane.b32.xlu0 %v4330_v22, %s7185_s5 }
0x1f58   :  { %4218 = vperm.xlu1 %6658, %v4210_v56  }
0x1f59   :  { %4172 = vperm.xlu0 %6659, %v3884_v4  }
0x1f5c   :  { %4213 = vperm.xlu1 %6658, %v4209_v54  }
0x1f5d   :  { %4167 = vperm.xlu0 %6659, %v3883_v29  }
0x1fc2   :  { %v4079_v43 = vpop.permute.xlu1 %4078 }
0x1fc3   :  { %v4083_v30 = vadd.f32 %v4079_v43, %v3880_v14 }
0x1fc5   :  { %6924 = vtanh.f32 %v4083_v30 }
0x1fc6   :  { %v4077_v49 = vpop.permute.xlu1 %4076 }
0x1fc7   :  { %v4082_v34 = vadd.f32 %v4077_v49, %v3879_v18  ;;  %v4332_v24 = vpop.permute.xlu0 %4331 }
0x1fc8   :  { %6486 = vmatmul.mubr.msk.f32.vlgmr.msra.gmra.mrb[26].mxu1 %vm216_vm7, %v4332_v24 }
0x1fc9   :  { %6926 = vtanh.f32 %v4082_v34  ;;  %6621 = vmatpush3.bf16.msra.mxu1 %v7972_v13  ;;  %6499 = vmatprep.mubr.msk.f32.mxu1 %vm7178_vm0, %v7176_v0 }
0x1fca   :  { %6625 = vmatprep.subr.bf16.mxu1 %v7177_v1 }
0x1fcf   :  { %v6925_v31 = vpop.eup %6924 }
0x1fd0   :  { %4092 = vrot.lane.b32.xlu0 %v6925_v31, %s7183_s23 }
0x1fd3   :  { %v6927_v37 = vpop.eup %6926 }
0x1fd4   :  { %4090 = vrot.lane.b32.xlu1 %v6927_v37, %s7183_s23 }
0x1fd7   :  { %v4219_v9 = vpop.permute.xlu1 %4218 }
0x1fd8   :  { %v4173_v14 = vpop.permute.xlu0 %4172  ;;  %v4222_v12 = vmul.f32 %v4219_v9, %v8233_v21 }
0x1fdb   :  { %v4214_v61 = vpop.permute.xlu1 %4213 }
0x1fdc   :  { %v4168_v18 = vpop.permute.xlu0 %4167  ;;  %v4221_v28 = vmul.f32 %v4214_v61, %v8239_v52 }
0x2042   :  { %v4093_v33 = vpop.permute.xlu0 %4092 }
0x2043   :  { %v4097_v50 = vmul.f32 %v4093_v33, %v4087_v3  ;;  %v4248_v3 = vld [vmem:[#allocation4 + $0xc] sm:$0x1] }
0x2045   :  { %v4101_v8 = vadd.f32 %v4099_v42, %v4097_v50  ;;  %v4588_v50 = vsub.f32 1.0, %v4248_v3 }
0x2046   :  { %v4091_v51 = vpop.permute.xlu1 %4090 }
0x2047   :  { %v8295_v59 = vmul.f32 %v4173_v14, %v4101_v8  ;;  %v4096_v7 = vmul.f32 %v4091_v51, %v4086_v2  ;;  %v4247_v8 = vld [vmem:[#allocation4 + $0x4] sm:$0x1] }
0x2048   :  { %v4587_v2 = vsub.f32 1.0, %v4247_v8 }
0x2049   :  { %v8299_v41 = vadd.f32 %v4222_v12, %v8295_v59  ;;  %v4100_v32 = vadd.f32 %v4098_v15, %v4096_v7 }
0x204b   :  { %v8302_v27 = vmul.f32 %v4168_v18, %v4100_v32  ;;  %v4251_v6 = vrot.slane %v8299_v41, 7 }
0x204d   :  { %v8305_v53 = vadd.f32 %v4221_v28, %v8302_v27 }
0x204f   :  { %v4252_v21 = vsel %vm586_vm6, %v4251_v6, %v8305_v53 }
0x2050   :  { %4253 = vrot.lane.b32.xlu0 %v4252_v21, %s7183_s23  ;;  %v4241_v21 = vld [vmem:[#allocation2 + $0x3] sm:$0x1] }
0x209b   :  { %v4401_v63 = vpop.f32.mrb[26].mxu1 }
0x209c   :  { %v4465_v39 = vrot.slane %v4401_v63, 1  ;;  %v4488_v5 = vadd.f32 %v8098_v40, %v4401_v63  ;;  %v6487_v17 = vpop.f32.mrb[27].mxu1  ;;  %4466 = vrot.lane.b32.xlu0 %v4401_v63, %s7179_s30  ;;  %v4243_v40 = vld [vmem:[#allocation2 + $0x4] sm:$0x1] }
0x209e   :  { %4468 = vrot.lane.b32.xlu1 %v4465_v39, %s7179_s30  ;;  %v4490_v52 = vrot.slane %v4488_v5, 1  ;;  %v4242_v39 = vld [vmem:[#allocation2 + $0xb] sm:$0x1] }
0x20a0   :  { %4491 = vrot.lane.b32.xlu0 %v4488_v5, %s7180_s16 }
0x20a2   :  { %4493 = vrot.lane.b32.xlu1 %v4490_v52, %s7180_s16 }
0x20c2   :  { %v4254_v55 = vpop.permute.xlu0 %4253 }
0x20c3   :  { %6479 = vmatmul.mubr.msk.f32.vlgmr.msra.gmra.mrb[26].mxu0 %vm216_vm7, %v4254_v55 }
0x20c4   :  { %6618 = vmatpush3.bf16.msra.mxu0 %v7960_v46  ;;  %6492 = vmatprep.mubr.msk.f32.mxu0 %vm7178_vm0, %v7176_v0 }
0x20c5   :  { %6622 = vmatprep.subr.bf16.mxu0 %v7177_v1 }
0x210e   :  { %v4467_v38 = vpop.permute.xlu0 %4466 }
0x210f   :  { %v4472_v16 = vadd.f32 %v4467_v38, %v4243_v40 }
0x2110   :  { %v4469_v4 = vpop.permute.xlu1 %4468 }
0x2111   :  { %v4474_v62 = vadd.f32 %v4472_v16, %v8121_v10  ;;  %v4473_v48 = vadd.f32 %v4469_v4, %v4244_v35 }
0x2112   :  { %v4492_v24 = vpop.permute.xlu0 %4491 }
0x2113   :  { %v6176_v22 = vmul.f32 -1.442695, %v4474_v62  ;;  %v4475_v56 = vadd.f32 %v4473_v48, %v8121_v10 }
0x2114   :  { %v4494_v14 = vpop.permute.xlu1 %4493 }
0x2115   :  { %6928 = vpow2.f32 %v6176_v22  ;;  %v6177_v29 = vmul.f32 -1.442695, %v4475_v56 }
0x2117   :  { %6930 = vpow2.f32 %v6177_v29 }
0x211f   :  { %v6929_v54 = vpop.eup %6928 }
0x2120   :  { %v4482_v43 = vadd.f32 1.0, %v6929_v54 }
0x2121   :  { %v6931_v30 = vpop.eup %6930 }
0x2122   :  { %6932 = vrcp.f32 %v4482_v43  ;;  %v4483_v49 = vadd.f32 1.0, %v6931_v30  ;;  %v4245_v43 = vld [vmem:[#allocation4 + $0x3] sm:$0x1] }
0x2124   :  { %6934 = vrcp.f32 %v4483_v49 }
0x212c   :  { %v8323_v34 = vpop.eup %6932 }
0x212d   :  { %v4497_v31 = vmul.f32 %v8323_v34, %v4492_v24 }
0x212e   :  { %v8326_v37 = vpop.eup %6934 }
0x212f   :  { %v4498_v9 = vmul.f32 %v8326_v37, %v4494_v14  ;;  %4501 = vrot.lane.b32.xlu0 %v4497_v31, %s7182_s1  ;;  %v4511_v14 = vsub.f32 1.0, %v8323_v34 }
0x2131   :  { %4503 = vrot.lane.b32.xlu1 %v4498_v9, %s7182_s1 }
0x2196   :  { %v4323_v18 = vpop.f32.mrb[26].mxu0 }
0x2197   :  { %v4425_v61 = vadd.f32 %v8130_v23, %v4323_v18  ;;  %v6480_v33 = vpop.f32.mrb[27].mxu0  ;;  %v4406_v6 = vrot.slane %v4323_v18, 1  ;;  %v4409_v63 = vadd.f32 %v4323_v18, %v4241_v21  ;;  %v4523_v18 = vmul.f32 %v8323_v34, %v8279_v57 }
0x2199   :  { %v4427_v42 = vrot.slane %v4425_v61, 1  ;;  %4428 = vrot.lane.b32.xlu0 %v4425_v61, %s7184_s24  ;;  %v4410_v5 = vadd.f32 %v4406_v6, %v4242_v39  ;;  %v4411_v17 = vadd.f32 %v8130_v23, %v4409_v63  ;;  %v4512_v61 = vsub.f32 1.0, %v8326_v37 }
0x219b   :  { %4430 = vrot.lane.b32.xlu1 %v4427_v42, %s7184_s24  ;;  %v4412_v52 = vadd.f32 %v8130_v23, %v4410_v5  ;;  %v6174_v55 = vmul.f32 -1.442695, %v4411_v17  ;;  %v4246_v23 = vld [vmem:[#allocation4 + $0xb] sm:$0x1] }
0x219c   :  { %v4572_v6 = vsub.f32 1.0, %v4246_v23 }
0x219d   :  { %4596 = vperm.xlu0 %6659, %v4588_v50   ;;  %v4524_v50 = vmul.f32 %v8326_v37, %v8275_v60 }
0x219f   :  { %4546 = vperm.xlu1 %6658, %v4248_v3  }
0x21a1   :  { %v4502_v51 = vpop.permute.xlu0 %4501  ;;  %4591 = vperm.xlu0 %6659, %v4587_v2  }
0x21a2   :  { %v4507_v12 = vadd.f32 %v4502_v51, %v4243_v40  ;;  %v6175_v40 = vmul.f32 -1.442695, %v4412_v52 }
0x21a3   :  { %v4504_v15 = vpop.permute.xlu1 %4503  ;;  %4541 = vperm.xlu1 %6658, %v4247_v8  }
0x21a4   :  { %6936 = vtanh.f32 %v4507_v12  ;;  %v4508_v7 = vadd.f32 %v4504_v15, %v4244_v35 }
0x21a6   :  { %6938 = vtanh.f32 %v4508_v7 }
0x21a7   :  { %6940 = vpow2.f32 %v6174_v55 }
0x21a8   :  { %6942 = vpow2.f32 %v6175_v40 }
0x21ae   :  { %v6937_v32 = vpop.eup %6936 }
0x21af   :  { %4515 = vrot.lane.b32.xlu0 %v6937_v32, %s7183_s23 }
0x21b0   :  { %v6939_v28 = vpop.eup %6938 }
0x21b1   :  { %4517 = vrot.lane.b32.xlu1 %v6939_v28, %s7183_s23  ;;  %v6941_v38 = vpop.eup %6940 }
0x21b2   :  { %v6943_v16 = vpop.eup %6942  ;;  %v4419_v35 = vadd.f32 1.0, %v6941_v38 }
0x21b3   :  { %v4420_v4 = vadd.f32 1.0, %v6943_v16 }
0x21b4   :  { %6944 = vrcp.f32 %v4419_v35 }
0x21b5   :  { %6946 = vrcp.f32 %v4420_v4 }
0x21be   :  { %v6945_v62 = vpop.eup %6944 }
0x21bf   :  { %v8338_v56 = vpop.eup %6946  ;;  %v4448_v35 = vsub.f32 1.0, %v6945_v62 }
0x220b   :  { %v4429_v48 = vpop.permute.xlu0 %4428 }
0x220c   :  { %v4434_v22 = vmul.f32 %v6945_v62, %v4429_v48  ;;  %v4460_v48 = vmul.f32 %v6945_v62, %v8305_v53 }
0x220d   :  { %v4431_v29 = vpop.permute.xlu1 %4430 }
0x220e   :  { %v4435_v54 = vmul.f32 %v8338_v56, %v4431_v29  ;;  %4438 = vrot.lane.b32.xlu0 %v4434_v22, %s7182_s1  ;;  %v4449_v29 = vsub.f32 1.0, %v8338_v56 }
0x2210   :  { %4440 = vrot.lane.b32.xlu1 %v4435_v54, %s7182_s1 }
0x2212   :  { %4534 = vperm.xlu0 %6659, %v4246_v23  }
0x2216   :  { %4529 = vperm.xlu0 %6659, %v4245_v43  }
0x221c   :  { %v4597_v30 = vpop.permute.xlu0 %4596 }
0x221d   :  { %v4600_v51 = vmul.f32 %v4597_v30, %v8275_v60  ;;  %v4571_v60 = vsub.f32 1.0, %v4245_v43  ;;  %v4461_v43 = vmul.f32 %v8338_v56, %v8299_v41 }
0x221e   :  { %v4547_v49 = vpop.permute.xlu1 %4546 }
0x2220   :  { %v4592_v24 = vpop.permute.xlu0 %4591 }
0x2221   :  { %v4599_v7 = vmul.f32 %v4592_v24, %v8279_v57 }
0x2222   :  { %v4542_v31 = vpop.permute.xlu1 %4541 }
0x2224   :  { %v4516_v9 = vpop.permute.xlu0 %4515 }
0x2225   :  { %v4521_v3 = vmul.f32 %v4516_v9, %v4511_v14 }
0x2226   :  { %v4518_v33 = vpop.permute.xlu1 %4517 }
0x2227   :  { %v4525_v42 = vadd.f32 %v4523_v18, %v4521_v3  ;;  %v4522_v8 = vmul.f32 %v4518_v33, %v4512_v61  ;;  %v8395_v33 = vld [vmem:[%s8854_s13] ss:$0 sm:$0xff] }
0x2229   :  { %v4526_v2 = vadd.f32 %v4524_v50, %v4522_v8  ;;  %v8350_v12 = vmul.f32 %v4542_v31, %v4525_v42 }
0x222b   :  { %v8352_v15 = vmul.f32 %v4547_v49, %v4526_v2  ;;  %v8359_v32 = vadd.f32 %v4599_v7, %v8350_v12  ;;  %v4605_v2 = vld [vmem:[#allocation2 + $0x3] sm:$0x1] }
0x222d   :  { %v8356_v34 = vadd.f32 %v4600_v51, %v8352_v15 }
0x222f   :  { %v4691_v28 = vrot.slane %v8356_v34, 7 }
0x2231   :  { %v4692_v37 = vsel %vm586_vm6, %v4691_v28, %v8359_v32  ;;  %v4606_v28 = vld [vmem:[#allocation2 + $0xb] sm:$0x1] }
0x2232   :  { %4693 = vrot.lane.b32.xlu1 %v4692_v37, %s7185_s5 }
0x2236   :  { %4580 = vperm.xlu1 %6658, %v4572_v6  }
0x223a   :  { %4575 = vperm.xlu1 %6658, %v4571_v60  }
0x2280   :  { %v4439_v63 = vpop.permute.xlu0 %4438 }
0x2281   :  { %v4444_v5 = vadd.f32 %v4439_v63, %v4241_v21 }
0x2282   :  { %v4441_v57 = vpop.permute.xlu1 %4440 }
0x2283   :  { %6948 = vtanh.f32 %v4444_v5  ;;  %v4445_v17 = vadd.f32 %v4441_v57, %v4242_v39 }
0x2285   :  { %6950 = vtanh.f32 %v4445_v17 }
0x228d   :  { %v6949_v52 = vpop.eup %6948 }
0x228e   :  { %4452 = vrot.lane.b32.xlu1 %v6949_v52, %s7183_s23 }
0x228f   :  { %v6951_v55 = vpop.eup %6950 }
0x2290   :  { %4454 = vrot.lane.b32.xlu0 %v6951_v55, %s7183_s23 }
0x2291   :  { %v4535_v38 = vpop.permute.xlu0 %4534 }
0x2295   :  { %v4530_v16 = vpop.permute.xlu0 %4529 }
0x22a4   :  { %v4694_v40 = vpop.permute.xlu1 %4693 }
0x22a5   :  { %6500 = vmatmul.mubr.msk.f32.vlgmr.msra.gmra.mrb[28].mxu1 %vm216_vm7, %v4694_v40 }
0x22a6   :  { %6627 = vmatpush3.bf16.msra.mxu1 %v7972_v13  ;;  %6513 = vmatprep.mubr.msk.f32.mxu1 %vm7178_vm0, %v7176_v0 }
0x22a7   :  { %6631 = vmatprep.subr.bf16.mxu1 %v7177_v1 }
0x22b5   :  { %v4581_v21 = vpop.permute.xlu1 %4580 }
0x22b6   :  { %v4584_v24 = vmul.f32 %v4581_v21, %v8299_v41 }
0x22b9   :  { %v4576_v39 = vpop.permute.xlu1 %4575 }
0x22ba   :  { %v4583_v9 = vmul.f32 %v4576_v39, %v8305_v53 }
0x2300   :  { %v4453_v4 = vpop.permute.xlu1 %4452 }
0x2301   :  { %v4458_v22 = vmul.f32 %v4453_v4, %v4448_v35 }
0x2302   :  { %v4455_v54 = vpop.permute.xlu0 %4454 }
0x2303   :  { %v4462_v23 = vadd.f32 %v4460_v48, %v4458_v22  ;;  %v4459_v30 = vmul.f32 %v4455_v54, %v4449_v29  ;;  %v4610_v22 = vld [vmem:[#allocation4 + $0xb] sm:$0x1]  ;;  %v8420_v29 = vld [vmem:[%s8852_s11] ss:$0 sm:$0xff] }
0x2305   :  { %v4463_v49 = vadd.f32 %v4461_v43, %v4459_v30  ;;  %v8377_v31 = vmul.f32 %v4530_v16, %v4462_v23  ;;  %v4950_v30 = vsub.f32 1.0, %v4610_v22 }
0x2307   :  { %v8379_v14 = vmul.f32 %v4535_v38, %v4463_v49  ;;  %v8386_v18 = vadd.f32 %v4583_v9, %v8377_v31  ;;  %v4609_v49 = vld [vmem:[#allocation4 + $0x3] sm:$0x1] }
0x2309   :  { %v8383_v62 = vadd.f32 %v4584_v24, %v8379_v14  ;;  %v4949_v24 = vsub.f32 1.0, %v4609_v49 }
0x230b   :  { %v4613_v3 = vrot.slane %v8383_v62, 7 }
0x230d   :  { %v4614_v56 = vsel %vm586_vm6, %v4613_v3, %v8386_v18 }
0x230e   :  { %4615 = vrot.lane.b32.xlu0 %v4614_v56, %s7183_s23 }
0x2378   :  { %v4763_v41 = vpop.f32.mrb[28].mxu1 }
0x2379   :  { %v4827_v61 = vrot.slane %v4763_v41, 1  ;;  %v4850_v53 = vadd.f32 %v8395_v33, %v4763_v41  ;;  %v6501_v42 = vpop.f32.mrb[29].mxu1  ;;  %4828 = vrot.lane.b32.xlu0 %v4763_v41, %s7179_s30 }
0x237b   :  { %4830 = vrot.lane.b32.xlu1 %v4827_v61, %s7179_s30  ;;  %v4852_v50 = vrot.slane %v4850_v53, 1 }
0x237d   :  { %4853 = vrot.lane.b32.xlu0 %v4850_v53, %s7180_s16 }
0x237f   :  { %4855 = vrot.lane.b32.xlu1 %v4852_v50, %s7180_s16  ;;  %v4603_v50 = vld [vmem:[#allocation2 + $0x4] sm:$0x1] }
0x2380   :  { %v4616_v8 = vpop.permute.xlu0 %4615 }
0x2381   :  { %6493 = vmatmul.mubr.msk.f32.vlgmr.msra.gmra.mrb[28].mxu0 %vm216_vm7, %v4616_v8 }
0x2382   :  { %6624 = vmatpush3.bf16.msra.mxu0 %v7960_v46  ;;  %6506 = vmatprep.mubr.msk.f32.mxu0 %vm7178_vm0, %v7176_v0 }
0x2383   :  { %6628 = vmatprep.subr.bf16.mxu0 %v7177_v1 }
0x23eb   :  { %v4829_v51 = vpop.permute.xlu0 %4828 }
0x23ec   :  { %v4834_v7 = vadd.f32 %v4829_v51, %v4605_v2  ;;  %v4604_v51 = vld [vmem:[#allocation2 + $0xc] sm:$0x1] }
0x23ed   :  { %v4831_v37 = vpop.permute.xlu1 %4830 }
0x23ee   :  { %v4836_v6 = vadd.f32 %v4834_v7, %v8121_v10  ;;  %v4835_v60 = vadd.f32 %v4831_v37, %v4606_v28 }
0x23ef   :  { %v4854_v38 = vpop.permute.xlu0 %4853 }
0x23f0   :  { %v6182_v63 = vmul.f32 -1.442695, %v4836_v6  ;;  %v4837_v5 = vadd.f32 %v4835_v60, %v8121_v10 }
0x23f1   :  { %v4856_v35 = vpop.permute.xlu1 %4855 }
0x23f2   :  { %6952 = vpow2.f32 %v6182_v63  ;;  %v6183_v57 = vmul.f32 -1.442695, %v4837_v5 }
0x23f4   :  { %6954 = vpow2.f32 %v6183_v57 }
0x23fc   :  { %v6953_v17 = vpop.eup %6952 }
0x23fd   :  { %v4844_v52 = vadd.f32 1.0, %v6953_v17 }
0x23fe   :  { %v6955_v55 = vpop.eup %6954 }
0x23ff   :  { %6956 = vrcp.f32 %v4844_v52  ;;  %v4845_v40 = vadd.f32 1.0, %v6955_v55 }
0x2401   :  { %6958 = vrcp.f32 %v4845_v40 }
0x2409   :  { %v8409_v21 = vpop.eup %6956 }
0x240a   :  { %v4859_v39 = vmul.f32 %v8409_v21, %v4854_v38 }
0x240b   :  { %v8412_v16 = vpop.eup %6958 }
0x240c   :  { %v4860_v4 = vmul.f32 %v8412_v16, %v4856_v35  ;;  %4863 = vrot.lane.b32.xlu0 %v4859_v39, %s7182_s1  ;;  %v4608_v35 = vld [vmem:[#allocation4 + $0xc] sm:$0x1] }
0x240e   :  { %4865 = vrot.lane.b32.xlu1 %v4860_v4, %s7182_s1  ;;  %v4607_v4 = vld [vmem:[#allocation4 + $0x4] sm:$0x1] }
0x2454   :  { %v4685_v48 = vpop.f32.mrb[28].mxu0 }
0x2455   :  { %v4787_v54 = vadd.f32 %v8420_v29, %v4685_v48  ;;  %v6494_v23 = vpop.f32.mrb[29].mxu0  ;;  %v4768_v42 = vrot.slane %v4685_v48, 1  ;;  %v4771_v8 = vadd.f32 %v4685_v48, %v4603_v50 }
0x2457   :  { %v4789_v43 = vrot.slane %v4787_v54, 1  ;;  %4790 = vrot.lane.b32.xlu0 %v4787_v54, %s7184_s24  ;;  %v4772_v7 = vadd.f32 %v4768_v42, %v4604_v51  ;;  %v4773_v37 = vadd.f32 %v8420_v29, %v4771_v8 }
0x2459   :  { %4792 = vrot.lane.b32.xlu1 %v4789_v43, %s7184_s24  ;;  %v4774_v6 = vadd.f32 %v8420_v29, %v4772_v7  ;;  %v4873_v43 = vsub.f32 1.0, %v8409_v21 }
0x245b   :  { %4958 = vperm.xlu0 %6659, %v4950_v30   ;;  %v6181_v60 = vmul.f32 -1.442695, %v4774_v6 }
0x245d   :  { %4908 = vperm.xlu1 %6658, %v4610_v22  }
0x245f   :  { %4953 = vperm.xlu0 %6659, %v4949_v24  }
0x2461   :  { %4903 = vperm.xlu1 %6658, %v4609_v49   ;;  %v4885_v49 = vmul.f32 %v8409_v21, %v8359_v32 }
0x247e   :  { %v4864_v9 = vpop.permute.xlu0 %4863 }
0x247f   :  { %v4869_v3 = vadd.f32 %v4864_v9, %v4605_v2  ;;  %v6180_v2 = vmul.f32 -1.442695, %v4773_v37  ;;  %v4874_v9 = vsub.f32 1.0, %v8412_v16 }
0x2480   :  { %v4866_v56 = vpop.permute.xlu1 %4865 }
0x2481   :  { %6960 = vtanh.f32 %v4869_v3  ;;  %v4870_v41 = vadd.f32 %v4866_v56, %v4606_v28 }
0x2483   :  { %6962 = vtanh.f32 %v4870_v41  ;;  %v4886_v41 = vmul.f32 %v8412_v16, %v8356_v34 }
0x2484   :  { %6964 = vpow2.f32 %v6180_v2 }
0x2485   :  { %6966 = vpow2.f32 %v6181_v60  ;;  %v4934_v60 = vsub.f32 1.0, %v4608_v35 }
0x248b   :  { %v6961_v61 = vpop.eup %6960 }
0x248c   :  { %4877 = vrot.lane.b32.xlu0 %v6961_v61, %s7183_s23 }
0x248d   :  { %v6963_v53 = vpop.eup %6962 }
0x248e   :  { %4879 = vrot.lane.b32.xlu1 %v6963_v53, %s7183_s23  ;;  %v6965_v28 = vpop.eup %6964 }
0x248f   :  { %v6967_v63 = vpop.eup %6966  ;;  %v4781_v5 = vadd.f32 1.0, %v6965_v28 }
0x2490   :  { %v4782_v57 = vadd.f32 1.0, %v6967_v63 }
0x2491   :  { %6968 = vrcp.f32 %v4781_v5 }
0x2492   :  { %6970 = vrcp.f32 %v4782_v57 }
0x249b   :  { %v6969_v17 = vpop.eup %6968 }
0x249c   :  { %v8429_v40 = vpop.eup %6970 }
0x24c9   :  { %v4791_v52 = vpop.permute.xlu0 %4790 }
0x24ca   :  { %v4796_v55 = vmul.f32 %v6969_v17, %v4791_v52 }
0x24cb   :  { %v4793_v38 = vpop.permute.xlu1 %4792 }
0x24cc   :  { %v4797_v39 = vmul.f32 %v8429_v40, %v4793_v38  ;;  %4800 = vrot.lane.b32.xlu0 %v4796_v55, %s7182_s1 }
0x24ce   :  { %4802 = vrot.lane.b32.xlu1 %v4797_v39, %s7182_s1 }
0x24d0   :  { %4896 = vperm.xlu0 %6659, %v4608_v35   ;;  %v4810_v35 = vsub.f32 1.0, %v6969_v17 }
0x24d4   :  { %4891 = vperm.xlu0 %6659, %v4607_v4  }
0x24da   :  { %v4959_v48 = vpop.permute.xlu0 %4958 }
0x24db   :  { %v4962_v42 = vmul.f32 %v4959_v48, %v8356_v34  ;;  %v4933_v34 = vsub.f32 1.0, %v4607_v4  ;;  %v4822_v48 = vmul.f32 %v6969_v17, %v8386_v18 }
0x24dc   :  { %v4909_v22 = vpop.permute.xlu1 %4908 }
0x24de   :  { %v4954_v54 = vpop.permute.xlu0 %4953 }
0x24df   :  { %v4961_v37 = vmul.f32 %v4954_v54, %v8359_v32  ;;  %v4811_v54 = vsub.f32 1.0, %v8429_v40 }
0x24e0   :  { %v4904_v23 = vpop.permute.xlu1 %4903 }
0x24fe   :  { %v4878_v30 = vpop.permute.xlu0 %4877 }
0x24ff   :  { %v4883_v24 = vmul.f32 %v4878_v30, %v4873_v43  ;;  %v4823_v30 = vmul.f32 %v8429_v40, %v8383_v62 }
0x2500   :  { %v4880_v3 = vpop.permute.xlu1 %4879 }
0x2501   :  { %v4887_v56 = vadd.f32 %v4885_v49, %v4883_v24  ;;  %v4884_v61 = vmul.f32 %v4880_v3, %v4874_v9 }
0x2503   :  { %v4888_v53 = vadd.f32 %v4886_v41, %v4884_v61  ;;  %v8441_v8 = vmul.f32 %v4904_v23, %v4887_v56 }
0x2505   :  { %v8443_v7 = vmul.f32 %v4909_v22, %v4888_v53  ;;  %v8450_v6 = vadd.f32 %v4961_v37, %v8441_v8 }
0x2507   :  { %v8447_v21 = vadd.f32 %v4962_v42, %v8443_v7 }
0x2509   :  { %v5053_v2 = vrot.slane %v8447_v21, 7 }
0x250b   :  { %v5054_v16 = vsel %vm586_vm6, %v5053_v2, %v8450_v6 }
0x250c   :  { %5055 = vrot.lane.b32.xlu1 %v5054_v16, %s7185_s5 }
0x2510   :  { %4942 = vperm.xlu1 %6658, %v4934_v60  }
0x2514   :  { %4937 = vperm.xlu1 %6658, %v4933_v34   ;;  %v4967_v34 = vld [vmem:[#allocation2 + $0x2] sm:$0x1] }
0x253e   :  { %v4801_v28 = vpop.permute.xlu0 %4800 }
0x253f   :  { %v4806_v63 = vadd.f32 %v4801_v28, %v4603_v50 }
0x2540   :  { %v4803_v32 = vpop.permute.xlu1 %4802 }
0x2541   :  { %6972 = vtanh.f32 %v4806_v63  ;;  %v4807_v5 = vadd.f32 %v4803_v32, %v4604_v51  ;;  %v4968_v32 = vld [vmem:[#allocation2 + $0xa] sm:$0x1] }
0x2543   :  { %6974 = vtanh.f32 %v4807_v5 }
0x254b   :  { %v6973_v57 = vpop.eup %6972 }
0x254c   :  { %4814 = vrot.lane.b32.xlu1 %v6973_v57, %s7183_s23 }
0x254d   :  { %v6975_v52 = vpop.eup %6974 }
0x254e   :  { %4816 = vrot.lane.b32.xlu0 %v6975_v52, %s7183_s23 }
0x254f   :  { %v4897_v38 = vpop.permute.xlu0 %4896 }
0x2553   :  { %v4892_v39 = vpop.permute.xlu0 %4891 }
0x257e   :  { %v5056_v55 = vpop.permute.xlu1 %5055 }
0x257f   :  { %6514 = vmatmul.mubr.msk.f32.vlgmr.msra.gmra.mrb[30].mxu1 %vm216_vm7, %v5056_v55 }
0x2580   :  { %6633 = vmatpush3.bf16.msra.mxu1 %v7972_v13  ;;  %6527 = vmatprep.mubr.msk.f32.mxu1 %vm7178_vm0, %v7176_v0 }
0x2581   :  { %6637 = vmatprep.subr.bf16.mxu1 %v7177_v1 }
0x258f   :  { %v4943_v50 = vpop.permute.xlu1 %4942 }
0x2590   :  { %v4946_v9 = vmul.f32 %v4943_v50, %v8383_v62 }
0x2593   :  { %v4938_v51 = vpop.permute.xlu1 %4937 }
0x2594   :  { %v4945_v41 = vmul.f32 %v4938_v51, %v8386_v18 }
0x25be   :  { %v4815_v4 = vpop.permute.xlu1 %4814 }
0x25bf   :  { %v4820_v22 = vmul.f32 %v4815_v4, %v4810_v35 }
0x25c0   :  { %v4817_v23 = vpop.permute.xlu0 %4816 }
0x25c1   :  { %v4824_v43 = vadd.f32 %v4822_v48, %v4820_v22  ;;  %v4821_v49 = vmul.f32 %v4817_v23, %v4811_v54 }
0x25c3   :  { %v4825_v24 = vadd.f32 %v4823_v30, %v4821_v49  ;;  %v8468_v3 = vmul.f32 %v4892_v39, %v4824_v43 }
0x25c5   :  { %v8470_v56 = vmul.f32 %v4897_v38, %v4825_v24  ;;  %v8477_v61 = vadd.f32 %v4945_v41, %v8468_v3  ;;  %v4965_v41 = vld [vmem:[#allocation2 + $0x5] sm:$0x1] }
0x25c7   :  { %v8474_v17 = vadd.f32 %v4946_v9, %v8470_v56 }
0x25c9   :  { %v4975_v53 = vrot.slane %v8474_v17, 7 }
0x25cb   :  { %v4976_v40 = vsel %vm586_vm6, %v4975_v53, %v8477_v61 }
0x25cc   :  { %4977 = vrot.lane.b32.xlu0 %v4976_v40, %s7183_s23  ;;  %v4966_v40 = vld [vmem:[#allocation2 + $0xd] sm:$0x1] }
0x263e   :  { %v4978_v62 = vpop.permute.xlu0 %4977 }
0x263f   :  { %6507 = vmatmul.mubr.msk.f32.vlgmr.msra.gmra.mrb[30].mxu0 %vm216_vm7, %v4978_v62 }
0x2640   :  { %6630 = vmatpush3.bf16.msra.mxu0 %v7960_v46  ;;  %6520 = vmatprep.mubr.msk.f32.mxu0 %vm7178_vm0, %v7176_v0 }
0x2641   :  { %6634 = vmatprep.subr.bf16.mxu0 %v7177_v1 }
0x2652   :  { %v5125_v18 = vpop.f32.mrb[30].mxu1 }
0x2653   :  { %v5189_v42 = vrot.slane %v5125_v18, 1  ;;  %v5212_v37 = vadd.f32 %v8395_v33, %v5125_v18  ;;  %v6515_v2 = vpop.f32.mrb[31].mxu1  ;;  %5190 = vrot.lane.b32.xlu0 %v5125_v18, %s7179_s30 }
0x2655   :  { %5192 = vrot.lane.b32.xlu1 %v5189_v42, %s7179_s30  ;;  %v5214_v16 = vrot.slane %v5212_v37, 1 }
0x2657   :  { %5215 = vrot.lane.b32.xlu0 %v5212_v37, %s7180_s16 }
0x2659   :  { %5217 = vrot.lane.b32.xlu1 %v5214_v16, %s7180_s16 }
0x26c5   :  { %v5191_v60 = vpop.permute.xlu0 %5190 }
0x26c6   :  { %v5196_v63 = vadd.f32 %v5191_v60, %v4967_v34 }
0x26c7   :  { %v5193_v28 = vpop.permute.xlu1 %5192 }
0x26c8   :  { %v5197_v1 = vadd.f32 %v5193_v28, %v4968_v32  ;;  %v5198_v5 = vadd.f32 %v5196_v63, %v8121_v10 }
0x26c9   :  { %v5216_v43 = vpop.permute.xlu0 %5215 }
0x26ca   :  { %v5199_v57 = vadd.f32 %v5197_v1, %v8121_v10  ;;  %v6188_v52 = vmul.f32 -1.442695, %v5198_v5 }
0x26cb   :  { %v5218_v49 = vpop.permute.xlu1 %5217 }
0x26cc   :  { %v6189_v55 = vmul.f32 -1.442695, %v5199_v57  ;;  %6976 = vpow2.f32 %v6188_v52  ;;  %v4972_v57 = vld [vmem:[#allocation4 + $0xa] sm:$0x1] }
0x26ce   :  { %6978 = vpow2.f32 %v6189_v55 }
0x26d6   :  { %v6977_v50 = vpop.eup %6976 }
0x26d7   :  { %v5206_v51 = vadd.f32 1.0, %v6977_v50 }
0x26d8   :  { %v6979_v38 = vpop.eup %6978 }
0x26d9   :  { %v5207_v39 = vadd.f32 1.0, %v6979_v38  ;;  %6980 = vrcp.f32 %v5206_v51  ;;  %v5312_v51 = vsub.f32 1.0, %v4972_v57 }
0x26db   :  { %6982 = vrcp.f32 %v5207_v39 }
0x26e3   :  { %v8496_v22 = vpop.eup %6980 }
0x26e4   :  { %v5221_v30 = vmul.f32 %v8496_v22, %v5216_v43 }
0x26e5   :  { %v8499_v23 = vpop.eup %6982 }
0x26e6   :  { %v5222_v24 = vmul.f32 %v8499_v23, %v5218_v49 }
0x2712   :  { %v5047_v35 = vpop.f32.mrb[30].mxu0 }
0x2713   :  { %v5149_v4 = vadd.f32 %v8420_v29, %v5047_v35  ;;  %v6508_v48 = vpop.f32.mrb[31].mxu0  ;;  %v5130_v9 = vrot.slane %v5047_v35, 1  ;;  %v5133_v53 = vadd.f32 %v5047_v35, %v4965_v41  ;;  %v4971_v35 = vld [vmem:[#allocation4 + $0x2] sm:$0x1] }
0x2714   :  { %v5311_v43 = vsub.f32 1.0, %v4971_v35 }
0x2715   :  { %v5151_v54 = vrot.slane %v5149_v4, 1  ;;  %5152 = vrot.lane.b32.xlu0 %v5149_v4, %s7184_s24  ;;  %v5134_v62 = vadd.f32 %v5130_v9, %v4966_v40  ;;  %v5135_v18 = vadd.f32 %v8420_v29, %v5133_v53  ;;  %v4969_v53 = vld [vmem:[#allocation4 + $0x5] sm:$0x1] }
0x2717   :  { %5154 = vrot.lane.b32.xlu1 %v5151_v54, %s7184_s24  ;;  %v5136_v42 = vadd.f32 %v8420_v29, %v5134_v62  ;;  %v6186_v37 = vmul.f32 -1.442695, %v5135_v18 }
0x2719   :  { %5225 = vrot.lane.b32.xlu0 %v5221_v30, %s7182_s1  ;;  %v6187_v2 = vmul.f32 -1.442695, %v5136_v42  ;;  %6984 = vpow2.f32 %v6186_v37  ;;  %v4970_v30 = vld [vmem:[#allocation4 + $0xd] sm:$0x1] }
0x271b   :  { %5227 = vrot.lane.b32.xlu1 %v5222_v24, %s7182_s1  ;;  %6986 = vpow2.f32 %v6187_v2  ;;  %v5296_v24 = vsub.f32 1.0, %v4970_v30 }
0x2723   :  { %v6985_v16 = vpop.eup %6984 }
0x2724   :  { %v5143_v28 = vadd.f32 1.0, %v6985_v16 }
0x2725   :  { %v6987_v60 = vpop.eup %6986 }
0x2726   :  { %v5144_v63 = vadd.f32 1.0, %v6987_v60  ;;  %6988 = vrcp.f32 %v5143_v28 }
0x2728   :  { %6990 = vrcp.f32 %v5144_v63 }
0x2730   :  { %v8508_v1 = vpop.eup %6988 }
0x2732   :  { %v8511_v55 = vpop.eup %6990 }
0x2787   :  { %v5153_v5 = vpop.permute.xlu0 %5152 }
0x2788   :  { %v5158_v52 = vmul.f32 %v8508_v1, %v5153_v5  ;;  %v5235_v5 = vsub.f32 1.0, %v8496_v22 }
0x2789   :  { %v5155_v50 = vpop.permute.xlu1 %5154 }
0x278a   :  { %v5159_v38 = vmul.f32 %v8511_v55, %v5155_v50  ;;  %5162 = vrot.lane.b32.xlu0 %v5158_v52, %s7182_s1 }
0x278b   :  { %v5226_v39 = vpop.permute.xlu0 %5225 }
0x278c   :  { %v5231_v4 = vadd.f32 %v5226_v39, %v4967_v34  ;;  %5164 = vrot.lane.b32.xlu1 %v5159_v38, %s7182_s1  ;;  %v5295_v34 = vsub.f32 1.0, %v4969_v53 }
0x278d   :  { %v5228_v48 = vpop.permute.xlu1 %5227 }
0x278e   :  { %6992 = vtanh.f32 %v5231_v4  ;;  %v5232_v54 = vadd.f32 %v5228_v48, %v4968_v32  ;;  %5320 = vperm.xlu0 %6659, %v5312_v51   ;;  %v5248_v51 = vmul.f32 %v8499_v23, %v8447_v21 }
0x2790   :  { %6994 = vtanh.f32 %v5232_v54  ;;  %5270 = vperm.xlu1 %6658, %v4972_v57  }
0x2792   :  { %5315 = vperm.xlu0 %6659, %v5311_v43  }
0x2794   :  { %5265 = vperm.xlu1 %6658, %v4971_v35  }
0x2798   :  { %v6993_v49 = vpop.eup %6992 }
0x2799   :  { %5239 = vrot.lane.b32.xlu0 %v6993_v49, %s7183_s23 }
0x279a   :  { %v6995_v9 = vpop.eup %6994 }
0x279b   :  { %5241 = vrot.lane.b32.xlu1 %v6995_v9, %s7183_s23 }
0x279d   :  { %5304 = vperm.xlu0 %6659, %v5296_v24  }
0x279f   :  { %5258 = vperm.xlu1 %6658, %v4970_v30  }
0x27a1   :  { %5299 = vperm.xlu0 %6659, %v5295_v34   ;;  %v5172_v34 = vsub.f32 1.0, %v8508_v1 }
0x27a3   :  { %5253 = vperm.xlu1 %6658, %v4969_v53  }
0x27fc   :  { %v5163_v32 = vpop.permute.xlu0 %5162 }
0x27fd   :  { %v5168_v62 = vadd.f32 %v5163_v32, %v4965_v41  ;;  %v5247_v41 = vmul.f32 %v8496_v22, %v8450_v6  ;;  %v5184_v32 = vmul.f32 %v8508_v1, %v8477_v61 }
0x27fe   :  { %v5165_v18 = vpop.permute.xlu1 %5164 }
0x27ff   :  { %6996 = vtanh.f32 %v5168_v62  ;;  %v5169_v42 = vadd.f32 %v5165_v18, %v4966_v40  ;;  %v5236_v40 = vsub.f32 1.0, %v8499_v23  ;;  %v5173_v18 = vsub.f32 1.0, %v8511_v55 }
0x2801   :  { %6998 = vtanh.f32 %v5169_v42 }
0x2809   :  { %v6997_v37 = vpop.eup %6996 }
0x280a   :  { %5176 = vrot.lane.b32.xlu0 %v6997_v37, %s7183_s23 }
0x280b   :  { %v6999_v2 = vpop.eup %6998 }
0x280c   :  { %5178 = vrot.lane.b32.xlu1 %v6999_v2, %s7183_s23  ;;  %v5185_v2 = vmul.f32 %v8511_v55, %v8474_v17 }
0x280d   :  { %v5321_v16 = vpop.permute.xlu0 %5320 }
0x280e   :  { %v5324_v4 = vmul.f32 %v5321_v16, %v8447_v21 }
0x280f   :  { %v5271_v60 = vpop.permute.xlu1 %5270 }
0x2811   :  { %v5316_v28 = vpop.permute.xlu0 %5315 }
0x2812   :  { %v5323_v43 = vmul.f32 %v5316_v28, %v8450_v6 }
0x2813   :  { %v5266_v63 = vpop.permute.xlu1 %5265 }
0x2815   :  { %v5240_v57 = vpop.permute.xlu0 %5239 }
0x2816   :  { %v5245_v52 = vmul.f32 %v5240_v57, %v5235_v5 }
0x2817   :  { %v5242_v50 = vpop.permute.xlu1 %5241 }
0x2818   :  { %v5249_v38 = vadd.f32 %v5247_v41, %v5245_v52  ;;  %v5246_v39 = vmul.f32 %v5242_v50, %v5236_v40 }
0x281a   :  { %v5250_v35 = vadd.f32 %v5248_v51, %v5246_v39  ;;  %v8527_v48 = vmul.f32 %v5266_v63, %v5249_v38 }
0x281c   :  { %v8529_v54 = vmul.f32 %v5271_v60, %v5250_v35  ;;  %v8536_v30 = vadd.f32 %v5323_v43, %v8527_v48  ;;  %v5305_v21 = vpop.permute.xlu0 %5304 }
0x281d   :  { %v5308_v28 = vmul.f32 %v5305_v21, %v8474_v17 }
0x281e   :  { %v8533_v22 = vadd.f32 %v5324_v4, %v8529_v54  ;;  %v5259_v24 = vpop.permute.xlu1 %5258 }
0x2820   :  { %v5415_v49 = vrot.slane %v8533_v22, 7  ;;  %v5300_v9 = vpop.permute.xlu0 %5299 }
0x2821   :  { %v5307_v57 = vmul.f32 %v5300_v9, %v8477_v61 }
0x2822   :  { %v5416_v23 = vsel %vm586_vm6, %v5415_v49, %v8536_v30  ;;  %v5254_v53 = vpop.permute.xlu1 %5253 }
0x2823   :  { %5417 = vrot.lane.b32.xlu1 %v5416_v23, %s7185_s5  ;;  %v5330_v23 = vld [vmem:[#allocation2 + $0x9] sm:$0x1] }
0x287c   :  { %v5177_v6 = vpop.permute.xlu0 %5176 }
0x287d   :  { %v5182_v62 = vmul.f32 %v5177_v6, %v5172_v34 }
0x287e   :  { %v5179_v42 = vpop.permute.xlu1 %5178 }
0x287f   :  { %v5186_v37 = vadd.f32 %v5184_v32, %v5182_v62  ;;  %v5183_v16 = vmul.f32 %v5179_v42, %v5173_v18 }
0x2881   :  { %v5187_v60 = vadd.f32 %v5185_v2, %v5183_v16  ;;  %v8549_v63 = vmul.f32 %v5254_v53, %v5186_v37 }
0x2883   :  { %v8551_v5 = vmul.f32 %v5259_v24, %v5187_v60  ;;  %v8558_v41 = vadd.f32 %v5307_v57, %v8549_v63 }
0x2885   :  { %v8555_v1 = vadd.f32 %v5308_v28, %v8551_v5 }
0x2887   :  { %v5337_v52 = vrot.slane %v8555_v1, 7 }
0x2889   :  { %v5338_v55 = vsel %vm586_vm6, %v5337_v52, %v8558_v41 }
0x288a   :  { %5339 = vrot.lane.b32.xlu0 %v5338_v55, %s7183_s23  ;;  %v5327_v55 = vld [vmem:[#allocation2 + $0x6] sm:$0x1] }
0x2895   :  { %v5418_v17 = vpop.permute.xlu1 %5417 }
0x2896   :  { %6528 = vmatmul.mubr.msk.f32.vlgmr.msra.gmra.mrb[32].mxu1 %vm216_vm7, %v5418_v17 }
0x2897   :  { %6639 = vmatpush3.bf16.msra.mxu1 %v7972_v13  ;;  %6541 = vmatprep.mubr.msk.f32.mxu1 %vm7178_vm0, %v7176_v0 }
0x28fc   :  { %v5340_v61 = vpop.permute.xlu0 %5339 }
0x28fd   :  { %6521 = vmatmul.mubr.msk.f32.vlgmr.msra.gmra.mrb[32].mxu0 %vm216_vm7, %v5340_v61  ;;  %v5328_v61 = vld [vmem:[#allocation2 + $0xe] sm:$0x1] }
0x28fe   :  { %6636 = vmatpush3.bf16.msra.mxu0 %v7960_v46  ;;  %6534 = vmatprep.mubr.msk.f32.mxu0 %vm7178_vm0, %v7176_v0  ;;  %v5329_v0 = vld [vmem:[#allocation2 + $0x1] sm:$0x1] }
0x2969   :  { %v5487_v40 = vpop.f32.mrb[32].mxu1 }
0x296a   :  { %v5551_v50 = vrot.slane %v5487_v40, 1  ;;  %v5574_v38 = vadd.f32 %v8395_v33, %v5487_v40  ;;  %5552 = vrot.lane.b32.xlu0 %v5487_v40, %s7179_s30  ;;  %v6529_v51 = vpop.f32.mrb[33].mxu1 }
0x296c   :  { %5554 = vrot.lane.b32.xlu1 %v5551_v50, %s7179_s30  ;;  %v5576_v13 = vrot.slane %v5574_v38, 1 }
0x296e   :  { %5577 = vrot.lane.b32.xlu0 %v5574_v38, %s7180_s16 }
0x2970   :  { %5579 = vrot.lane.b32.xlu1 %v5576_v13, %s7180_s16 }
0x29d0   :  { %v5409_v39 = vpop.f32.mrb[32].mxu0 }
0x29d1   :  { %v5511_v46 = vadd.f32 %v8420_v29, %v5409_v39  ;;  %v6522_v35 = vpop.f32.mrb[33].mxu0  ;;  %v5492_v52 = vrot.slane %v5409_v39, 1  ;;  %v5495_v17 = vadd.f32 %v5409_v39, %v5327_v55  ;;  %v5334_v39 = vld [vmem:[#allocation4 + $0x9] sm:$0x1] }
0x29d3   :  { %v5513_v4 = vrot.slane %v5511_v46, 1  ;;  %5514 = vrot.lane.b32.xlu0 %v5511_v46, %s7184_s24  ;;  %v5496_v40 = vadd.f32 %v5492_v52, %v5328_v61  ;;  %v5497_v50 = vadd.f32 %v8420_v29, %v5495_v17 }
0x29d5   :  { %5516 = vrot.lane.b32.xlu1 %v5513_v4, %s7184_s24  ;;  %v5498_v38 = vadd.f32 %v8420_v29, %v5496_v40  ;;  %v6192_v51 = vmul.f32 -1.442695, %v5497_v50  ;;  %v5331_v40 = vld [vmem:[#allocation4 + $0x6] sm:$0x1] }
0x29d6   :  { %v5657_v50 = vsub.f32 1.0, %v5331_v40 }
0x29d7   :  { %v6193_v13 = vmul.f32 -1.442695, %v5498_v38 }
0x29dc   :  { %v5553_v43 = vpop.permute.xlu0 %5552 }
0x29dd   :  { %v5558_v49 = vadd.f32 %v5553_v43, %v5329_v0 }
0x29de   :  { %v5555_v21 = vpop.permute.xlu1 %5554 }
0x29df   :  { %v5560_v24 = vadd.f32 %v5558_v49, %v8121_v10  ;;  %v5559_v9 = vadd.f32 %v5555_v21, %v5330_v23 }
0x29e0   :  { %v5578_v2 = vpop.permute.xlu0 %5577 }
0x29e1   :  { %v6194_v53 = vmul.f32 -1.442695, %v5560_v24  ;;  %v5561_v34 = vadd.f32 %v5559_v9, %v8121_v10 }
0x29e2   :  { %v5580_v28 = vpop.permute.xlu1 %5579 }
0x29e3   :  { %7000 = vpow2.f32 %v6194_v53  ;;  %v6195_v6 = vmul.f32 -1.442695, %v5561_v34 }
0x29e5   :  { %7002 = vpow2.f32 %v6195_v6  ;;  %v5674_v6 = vsub.f32 1.0, %v5334_v39 }
0x29ed   :  { %v7001_v32 = vpop.eup %7000 }
0x29ee   :  { %v5568_v62 = vadd.f32 1.0, %v7001_v32  ;;  %v5333_v32 = vld [vmem:[#allocation4 + $0x1] sm:$0x1] }
0x29ef   :  { %v7003_v18 = vpop.eup %7002 }
0x29f0   :  { %7004 = vrcp.f32 %v5568_v62  ;;  %v5569_v42 = vadd.f32 1.0, %v7003_v18  ;;  %v5673_v62 = vsub.f32 1.0, %v5333_v32 }
0x29f2   :  { %7006 = vrcp.f32 %v5569_v42 }
0x29f3   :  { %7008 = vpow2.f32 %v6192_v51 }
0x29f4   :  { %7010 = vpow2.f32 %v6193_v13 }
0x29fa   :  { %v8582_v37 = vpop.eup %7004 }
0x29fb   :  { %v5583_v16 = vmul.f32 %v8582_v37, %v5578_v2 }
0x29fc   :  { %v8585_v60 = vpop.eup %7006 }
0x29fd   :  { %v5584_v57 = vmul.f32 %v8585_v60, %v5580_v28  ;;  %5587 = vrot.lane.b32.xlu0 %v5583_v16, %s7182_s1  ;;  %v7009_v46 = vpop.eup %7008  ;;  %v5332_v28 = vld [vmem:[#allocation4 + $0xe] sm:$0x1] }
0x29fe   :  { %v7011_v35 = vpop.eup %7010  ;;  %v5505_v4 = vadd.f32 1.0, %v7009_v46  ;;  %v5658_v52 = vsub.f32 1.0, %v5332_v28 }
0x29ff   :  { %5589 = vrot.lane.b32.xlu1 %v5584_v57, %s7182_s1  ;;  %v5506_v43 = vadd.f32 1.0, %v7011_v35 }
0x2a00   :  { %7012 = vrcp.f32 %v5505_v4 }
0x2a01   :  { %7014 = vrcp.f32 %v5506_v43 }
0x2a0a   :  { %v8592_v49 = vpop.eup %7012 }
0x2a0b   :  { %v8595_v9 = vpop.eup %7014 }
0x2a45   :  { %v5515_v21 = vpop.permute.xlu0 %5514 }
0x2a46   :  { %v5520_v24 = vmul.f32 %v8592_v49, %v5515_v21 }
0x2a47   :  { %v5517_v53 = vpop.permute.xlu1 %5516 }
0x2a48   :  { %v5521_v34 = vmul.f32 %v8595_v9, %v5517_v53  ;;  %5524 = vrot.lane.b32.xlu0 %v5520_v24, %s7182_s1 }
0x2a4a   :  { %5526 = vrot.lane.b32.xlu1 %v5521_v34, %s7182_s1 }
0x2a4c   :  { %5682 = vperm.xlu0 %6659, %v5674_v6  }
0x2a4e   :  { %5632 = vperm.xlu1 %6658, %v5334_v39   ;;  %v5597_v39 = vsub.f32 1.0, %v8582_v37 }
0x2a50   :  { %5677 = vperm.xlu0 %6659, %v5673_v62  }
0x2a52   :  { %5627 = vperm.xlu1 %6658, %v5333_v32   ;;  %v5610_v32 = vmul.f32 %v8585_v60, %v8533_v22 }
0x2a6f   :  { %v5588_v18 = vpop.permute.xlu0 %5587 }
0x2a70   :  { %v5593_v42 = vadd.f32 %v5588_v18, %v5329_v0 }
0x2a71   :  { %v5590_v2 = vpop.permute.xlu1 %5589 }
0x2a72   :  { %7016 = vtanh.f32 %v5593_v42  ;;  %v5594_v16 = vadd.f32 %v5590_v2, %v5330_v23 }
0x2a74   :  { %7018 = vtanh.f32 %v5594_v16 }
0x2a7c   :  { %v7017_v57 = vpop.eup %7016 }
0x2a7d   :  { %5601 = vrot.lane.b32.xlu0 %v7017_v57, %s7183_s23 }
0x2a7e   :  { %v7019_v17 = vpop.eup %7018 }
0x2a7f   :  { %5603 = vrot.lane.b32.xlu1 %v7019_v17, %s7183_s23 }
0x2a81   :  { %5666 = vperm.xlu0 %6659, %v5658_v52  }
0x2a83   :  { %5620 = vperm.xlu1 %6658, %v5332_v28  }
0x2a85   :  { %5661 = vperm.xlu0 %6659, %v5657_v50  }
0x2a87   :  { %5615 = vperm.xlu1 %6658, %v5331_v40  }
0x2aba   :  { %v5525_v38 = vpop.permute.xlu0 %5524 }
0x2abb   :  { %v5530_v0 = vadd.f32 %v5525_v38, %v5327_v55  ;;  %v5609_v55 = vmul.f32 %v8582_v37, %v8536_v30  ;;  %v5534_v38 = vsub.f32 1.0, %v8592_v49 }
0x2abc   :  { %v5527_v51 = vpop.permute.xlu1 %5526 }
0x2abd   :  { %7020 = vtanh.f32 %v5530_v0  ;;  %v5531_v23 = vadd.f32 %v5527_v51, %v5328_v61  ;;  %v5598_v61 = vsub.f32 1.0, %v8585_v60  ;;  %v5546_v0 = vmul.f32 %v8592_v49, %v8558_v41 }
0x2abf   :  { %7022 = vtanh.f32 %v5531_v23  ;;  %v5535_v23 = vsub.f32 1.0, %v8595_v9 }
0x2ac7   :  { %v7021_v13 = vpop.eup %7020 }
0x2ac8   :  { %5538 = vrot.lane.b32.xlu0 %v7021_v13, %s7183_s23 }
0x2ac9   :  { %v7023_v46 = vpop.eup %7022 }
0x2aca   :  { %5540 = vrot.lane.b32.xlu1 %v7023_v46, %s7183_s23 }
0x2acb   :  { %v5683_v35 = vpop.permute.xlu0 %5682 }
0x2acc   :  { %v5686_v42 = vmul.f32 %v5683_v35, %v8533_v22  ;;  %v5547_v35 = vmul.f32 %v8595_v9, %v8555_v1 }
0x2acd   :  { %v5633_v4 = vpop.permute.xlu1 %5632 }
0x2acf   :  { %v5678_v43 = vpop.permute.xlu0 %5677 }
0x2ad0   :  { %v5685_v28 = vmul.f32 %v5678_v43, %v8536_v30 }
0x2ad1   :  { %v5628_v21 = vpop.permute.xlu1 %5627 }
0x2aef   :  { %v5602_v24 = vpop.permute.xlu0 %5601 }
0x2af0   :  { %v5607_v53 = vmul.f32 %v5602_v24, %v5597_v39 }
0x2af1   :  { %v5604_v34 = vpop.permute.xlu1 %5603 }
0x2af2   :  { %v5611_v6 = vadd.f32 %v5609_v55, %v5607_v53  ;;  %v5608_v62 = vmul.f32 %v5604_v34, %v5598_v61 }
0x2af4   :  { %v5612_v18 = vadd.f32 %v5610_v32, %v5608_v62  ;;  %v8611_v2 = vmul.f32 %v5628_v21, %v5611_v6 }
0x2af6   :  { %v8613_v16 = vmul.f32 %v5633_v4, %v5612_v18  ;;  %v8620_v57 = vadd.f32 %v5685_v28, %v8611_v2 }
0x2af8   :  { %v8617_v37 = vadd.f32 %v5686_v42, %v8613_v16 }
0x2afa   :  { %v5777_v52 = vrot.slane %v8617_v37, 7 }
0x2afc   :  { %v5778_v60 = vsel %vm586_vm6, %v5777_v52, %v8620_v57 }
0x2afd   :  { %5779 = vrot.lane.b32.xlu1 %v5778_v60, %s7185_s5 }
0x2b00   :  { %v5667_v22 = vpop.permute.xlu0 %5666 }
0x2b01   :  { %v5670_v21 = vmul.f32 %v5667_v22, %v8555_v1 }
0x2b02   :  { %v5621_v17 = vpop.permute.xlu1 %5620 }
0x2b04   :  { %v5662_v40 = vpop.permute.xlu0 %5661 }
0x2b05   :  { %v5669_v55 = vmul.f32 %v5662_v40, %v8558_v41 }
0x2b06   :  { %v5616_v50 = vpop.permute.xlu1 %5615 }
0x2b3a   :  { %v5539_v30 = vpop.permute.xlu0 %5538 }
0x2b3b   :  { %v5544_v51 = vmul.f32 %v5539_v30, %v5534_v38  ;;  %v8664_v30 = vld [vmem:[#allocation2] sm:$0x1] }
0x2b3c   :  { %v5541_v13 = vpop.permute.xlu1 %5540 }
0x2b3d   :  { %v5548_v46 = vadd.f32 %v5546_v0, %v5544_v51  ;;  %v5545_v4 = vmul.f32 %v5541_v13, %v5535_v23  ;;  %v8668_v13 = vld [vmem:[#allocation2 + $0x8] sm:$0x1] }
0x2b3f   :  { %v5549_v43 = vadd.f32 %v5547_v35, %v5545_v4  ;;  %v8633_v39 = vmul.f32 %v5616_v50, %v5548_v46  ;;  %v8661_v50 = vld [vmem:[#allocation2 + $0xf] sm:$0x1] }
0x2b41   :  { %v8635_v24 = vmul.f32 %v5621_v17, %v5549_v43  ;;  %v8642_v53 = vadd.f32 %v5669_v55, %v8633_v39  ;;  %v8658_v17 = vld [vmem:[#allocation2 + $0x7] sm:$0x1] }
0x2b43   :  { %v8639_v49 = vadd.f32 %v5670_v21, %v8635_v24 }
0x2b45   :  { %v5699_v61 = vrot.slane %v8639_v49, 7 }
0x2b47   :  { %v5700_v9 = vsel %vm586_vm6, %v5699_v61, %v8642_v53 }
0x2b48   :  { %5701 = vrot.lane.b32.xlu0 %v5700_v9, %s7183_s23 }
0x2b6f   :  { %v5780_v1 = vpop.permute.xlu1 %5779 }
0x2b70   :  { %6542 = vmatmul.mubr.msk.f32.vlgmr.msra.gmra.mrb[34].mxu1 %vm216_vm7, %v5780_v1 }
0x2bba   :  { %v5702_v34 = vpop.permute.xlu0 %5701 }
0x2bbb   :  { %6535 = vmatmul.mubr.msk.f32.vlgmr.msra.gmra.mrb[34].mxu0 %vm216_vm7, %v5702_v34 }
0x2c43   :  { %v5849_v41 = vpop.f32.mrb[34].mxu1 }
0x2c44   :  { %v5913_v6 = vrot.slane %v5849_v41, 1  ;;  %5914 = vrot.lane.b32.xlu1 %v5849_v41, %s7179_s30  ;;  %v6543_v32 = vpop.f32.mrb[35].mxu1  ;;  %v5936_v28 = vadd.f32 %v8395_v33, %v5849_v41 }
0x2c46   :  { %5916 = vrot.lane.b32.xlu0 %v5913_v6, %s7179_s30  ;;  %v5938_v60 = vrot.slane %v5936_v28, 1 }
0x2c8e   :  { %v5771_v62 = vpop.f32.mrb[34].mxu0 }
0x2c8f   :  { %v5873_v18 = vadd.f32 %v8420_v29, %v5771_v62  ;;  %v6536_v42 = vpop.f32.mrb[35].mxu0  ;;  %v5854_v22 = vrot.slane %v5771_v62, 1  ;;  %v5857_v40 = vadd.f32 %v5771_v62, %v8658_v17 }
0x2c91   :  { %v5875_v52 = vrot.slane %v5873_v18, 1  ;;  %5876 = vrot.lane.b32.xlu1 %v5873_v18, %s7184_s24  ;;  %v5858_v33 = vadd.f32 %v5854_v22, %v8661_v50  ;;  %v5859_v51 = vadd.f32 %v8420_v29, %v5857_v40 }
0x2c93   :  { %5878 = vrot.lane.b32.xlu0 %v5875_v52, %s7184_s24  ;;  %v5860_v46 = vadd.f32 %v8420_v29, %v5858_v33  ;;  %v6198_v4 = vmul.f32 -1.442695, %v5859_v51 }
0x2c95   :  { %5939 = vrot.lane.b32.xlu1 %v5936_v28, %s7180_s16  ;;  %v6199_v21 = vmul.f32 -1.442695, %v5860_v46  ;;  %7024 = vpow2.f32 %v6198_v4  ;;  %v5693_v46 = vld [vmem:[#allocation4 + $0x7] sm:$0x1] }
0x2c96   :  { %v6019_v4 = vsub.f32 1.0, %v5693_v46 }
0x2c97   :  { %5941 = vrot.lane.b32.xlu0 %v5938_v60, %s7180_s16  ;;  %7026 = vpow2.f32 %v6199_v21  ;;  %v5695_v21 = vld [vmem:[#allocation4] sm:$0x1]  ;;  %s7187_s16 = smov [#allocation13]  }
0x2c9f   :  { %v7025_v1 = vpop.eup %7024 }
0x2ca0   :  { %v5867_v41 = vadd.f32 1.0, %v7025_v1 }
0x2ca1   :  { %v7027_v34 = vpop.eup %7026 }
0x2ca2   :  { %v5868_v32 = vadd.f32 1.0, %v7027_v34 }
0x2cb6   :  { %v5915_v38 = vpop.permute.xlu1 %5914 }
0x2cb7   :  { %v5920_v23 = vadd.f32 %v5915_v38, %v8664_v30 }
0x2cb8   :  { %v5917_v0 = vpop.permute.xlu0 %5916 }
0x2cb9   :  { %v5921_v35 = vadd.f32 %v5917_v0, %v8668_v13  ;;  %v5922_v43 = vadd.f32 %v5920_v23, %v8121_v10 }
0x2cbb   :  { %v5923_v55 = vadd.f32 %v5921_v35, %v8121_v10  ;;  %v6200_v61 = vmul.f32 -1.442695, %v5922_v43  ;;  %v5694_v35 = vld [vmem:[#allocation4 + $0xf] sm:$0x1] }
0x2cbc   :  { %v6020_v43 = vsub.f32 1.0, %v5694_v35 }
0x2cbd   :  { %v6201_v9 = vmul.f32 -1.442695, %v5923_v55  ;;  %7028 = vpow2.f32 %v6200_v61  ;;  %v5696_v55 = vld [vmem:[#allocation4 + $0x8] sm:$0x1]  ;;  %v6035_v61 = vsub.f32 1.0, %v5695_v21 }
0x2cbf   :  { %7030 = vpow2.f32 %v6201_v9  ;;  %v6036_v9 = vsub.f32 1.0, %v5696_v55 }
0x2cc0   :  { %7032 = vrcp.f32 %v5867_v41 }
0x2cc1   :  { %7034 = vrcp.f32 %v5868_v32 }
0x2cc7   :  { %v7029_v6 = vpop.eup %7028 }
0x2cc8   :  { %v5930_v62 = vadd.f32 1.0, %v7029_v6 }
0x2cc9   :  { %v7031_v29 = vpop.eup %7030 }
0x2cca   :  { %v5931_v18 = vadd.f32 1.0, %v7031_v29  ;;  %7036 = vrcp.f32 %v5930_v62  ;;  %v8674_v42 = vpop.eup %7032 }
0x2ccb   :  { %v8677_v52 = vpop.eup %7034 }
0x2ccc   :  { %7038 = vrcp.f32 %v5931_v18 }
0x2cd4   :  { %v8681_v40 = vpop.eup %7036 }
0x2cd6   :  { %v8685_v0 = vpop.eup %7038 }
0x2d03   :  { %v5877_v10 = vpop.permute.xlu1 %5876 }
0x2d04   :  { %v5882_v28 = vmul.f32 %v8674_v42, %v5877_v10 }
0x2d05   :  { %v5879_v60 = vpop.permute.xlu0 %5878 }
0x2d06   :  { %v5883_v22 = vmul.f32 %v8677_v52, %v5879_v60  ;;  %5886 = vrot.lane.b32.xlu1 %v5882_v28, %s7182_s1  ;;  %v5972_v60 = vmul.f32 %v8685_v0, %v8617_v37 }
0x2d07   :  { %v5940_v38 = vpop.permute.xlu1 %5939 }
0x2d08   :  { %v5945_v33 = vmul.f32 %v8681_v40, %v5940_v38  ;;  %5888 = vrot.lane.b32.xlu0 %v5883_v22, %s7182_s1 }
0x2d09   :  { %v5942_v51 = vpop.permute.xlu0 %5941 }
0x2d0a   :  { %v5946_v23 = vmul.f32 %v8685_v0, %v5942_v51  ;;  %5949 = vrot.lane.b32.xlu1 %v5945_v33, %s7182_s1 }
0x2d0c   :  { %5951 = vrot.lane.b32.xlu0 %v5946_v23, %s7182_s1  ;;  %s6076_s1 = sshll.u32 %s7187_s16, 4  ;;  %s6077_s1 = int_to_ptr.vmem [resolvable:$true] %s6076_s1 }
0x2d0d   :  { %s7140_s5 = scalar_lea.vmem %s6077_s1, 256  ;;  %p7145_p5 = scmp.lt.s32.totalorder %s6077_s1, %s6077_s1 }
0x2d0e   :  { %5977 = vperm.xlu1 %6658, %v5693_v46   ;;  %p7141_p4 = scmp.ne.s32.totalorder %s6077_s1, %s7140_s5  ;;  %p7146_p6 = scmp.lt.s32.totalorder %s7140_s5, %s7140_s5 }
0x2d10   :  { %5982 = vperm.xlu0 %6659, %v5694_v35   ;;  %p7147_p7 = por %p7146_p6, %p7145_p5 }
0x2d12   :  { %6023 = vperm.xlu1 %6658, %v6019_v4   ;;  %p7148_p8 = pnand %p7147_p7, %p7141_p4 }
0x2d14   :  { %6028 = vperm.xlu0 %6659, %v6020_v43  }
0x2d16   :  { %5989 = vperm.xlu1 %6658, %v5695_v21  }
0x2d18   :  { %5994 = vperm.xlu0 %6659, %v5696_v55  }
0x2d1a   :  { %6039 = vperm.xlu1 %6658, %v6035_v61  }
0x2d1c   :  { %6044 = vperm.xlu0 %6659, %v6036_v9  }
0x2d78   :  { %v5887_v1 = vpop.permute.xlu1 %5886 }
0x2d79   :  { %v5892_v34 = vadd.f32 %v5887_v1, %v8658_v17 }
0x2d7a   :  { %v5889_v41 = vpop.permute.xlu0 %5888 }
0x2d7b   :  { %7040 = vtanh.f32 %v5892_v34  ;;  %v5893_v6 = vadd.f32 %v5889_v41, %v8661_v50 }
0x2d7c   :  { %v5950_v32 = vpop.permute.xlu1 %5949 }
0x2d7d   :  { %7042 = vtanh.f32 %v5893_v6  ;;  %v5955_v62 = vadd.f32 %v5950_v32, %v8664_v30 }
0x2d7e   :  { %v5952_v29 = vpop.permute.xlu0 %5951 }
0x2d7f   :  { %v5956_v18 = vadd.f32 %v5952_v29, %v8668_v13  ;;  %7044 = vtanh.f32 %v5955_v62  ;;  %v5960_v13 = vsub.f32 1.0, %v8685_v0 }
0x2d81   :  { %7046 = vtanh.f32 %v5956_v18 }
0x2d85   :  { %v7041_v10 = vpop.eup %7040 }
0x2d86   :  { %5900 = vrot.lane.b32.xlu1 %v7041_v10, %s7183_s23 }
0x2d87   :  { %v7043_v28 = vpop.eup %7042 }
0x2d88   :  { %5902 = vrot.lane.b32.xlu0 %v7043_v28, %s7183_s23 }
0x2d89   :  { %v7045_v17 = vpop.eup %7044 }
0x2d8a   :  { %3467 = vrot.lane.b32.xlu1 %v8170_v19, %s7183_s23 }
0x2d8b   :  { %v7047_v50 = vpop.eup %7046 }
0x2d8c   :  { %3469 = vrot.lane.b32.xlu0 %v8165_v47, %s7183_s23 }
0x2d8e   :  { %5963 = vrot.lane.b32.xlu1 %v7045_v17, %s7183_s23 }
0x2d90   :  { %5965 = vrot.lane.b32.xlu0 %v7047_v50, %s7183_s23 }
0x2d92   :  { %3477 = vrot.lane.b32.xlu1 %v8142_v26, %s7186_s10  ;;  %v5978_v26 = vpop.permute.xlu1 %5977 }
0x2d94   :  { %3479 = vrot.lane.b32.xlu0 %v8144_v11, %s7186_s10  ;;  %v5983_v11 = vpop.permute.xlu0 %5982 }
0x2d96   :  { %3829 = vrot.lane.b32.xlu1 %v8236_v20, %s7183_s23  ;;  %v6024_v47 = vpop.permute.xlu1 %6023 }
0x2d98   :  { %3831 = vrot.lane.b32.xlu0 %v8228_v36, %s7183_s23  ;;  %v6029_v19 = vpop.permute.xlu0 %6028 }
0x2d9a   :  { %3839 = vrot.lane.b32.xlu1 %v8203_v45, %s7186_s10  ;;  %v5990_v45 = vpop.permute.xlu1 %5989 }
0x2d9c   :  { %3841 = vrot.lane.b32.xlu0 %v8205_v58, %s7186_s10  ;;  %v5995_v58 = vpop.permute.xlu0 %5994 }
0x2d9e   :  { %4191 = vrot.lane.b32.xlu1 %v8302_v27, %s7183_s23  ;;  %v6040_v36 = vpop.permute.xlu1 %6039 }
0x2d9f   :  { %v6047_v51 = vmul.f32 %v6040_v36, %v8620_v57 }
0x2da0   :  { %4193 = vrot.lane.b32.xlu0 %v8295_v59, %s7183_s23  ;;  %v6045_v20 = vpop.permute.xlu0 %6044  ;;  %v5908_v59 = vmul.f32 %v8674_v42, %v8642_v53 }
0x2da1   :  { %v6048_v0 = vmul.f32 %v6045_v20, %v8617_v37 }
0x2da2   :  { %4201 = vrot.lane.b32.xlu1 %v8269_v44, %s7186_s10  ;;  %v5896_v44 = vsub.f32 1.0, %v8674_v42 }
0x2da4   :  { %4203 = vrot.lane.b32.xlu0 %v8271_v25, %s7186_s10 }
0x2da6   :  { %4553 = vrot.lane.b32.xlu1 %v8377_v31, %s7183_s23 }
0x2da8   :  { %4555 = vrot.lane.b32.xlu0 %v8379_v14, %s7183_s23  ;;  %v5909_v14 = vmul.f32 %v8677_v52, %v8639_v49 }
0x2daa   :  { %4563 = vrot.lane.b32.xlu1 %v8350_v12, %s7186_s10  ;;  %v5897_v12 = vsub.f32 1.0, %v8677_v52 }
0x2dac   :  { %4565 = vrot.lane.b32.xlu0 %v8352_v15, %s7186_s10 }
0x2dae   :  { %4915 = vrot.lane.b32.xlu1 %v8468_v3, %s7183_s23 }
0x2db0   :  { %4917 = vrot.lane.b32.xlu0 %v8470_v56, %s7183_s23 }
0x2db2   :  { %4925 = vrot.lane.b32.xlu1 %v8441_v8, %s7186_s10 }
0x2db4   :  { %4927 = vrot.lane.b32.xlu0 %v8443_v7, %s7186_s10 }
0x2db6   :  { %5277 = vrot.lane.b32.xlu1 %v8549_v63, %s7183_s23 }
0x2db8   :  { %5279 = vrot.lane.b32.xlu0 %v8551_v5, %s7183_s23  ;;  %v5959_v5 = vsub.f32 1.0, %v8681_v40 }
0x2dba   :  { %5287 = vrot.lane.b32.xlu1 %v8527_v48, %s7186_s10 }
0x2dbc   :  { %5289 = vrot.lane.b32.xlu0 %v8529_v54, %s7186_s10  ;;  %v6031_v54 = vmul.f32 %v6024_v47, %v8642_v53 }
0x2dbe   :  { %5639 = vrot.lane.b32.xlu1 %v8633_v39, %s7183_s23  ;;  %v6032_v39 = vmul.f32 %v6029_v19, %v8639_v49 }
0x2dc0   :  { %5641 = vrot.lane.b32.xlu0 %v8635_v24, %s7183_s23 }
0x2dc2   :  { %5649 = vrot.lane.b32.xlu1 %v8611_v2, %s7186_s10  ;;  %v5971_v2 = vmul.f32 %v8681_v40, %v8620_v57 }
0x2dc4   :  { %5651 = vrot.lane.b32.xlu0 %v8613_v16, %s7186_s10 }
0x2df8   :  { %v5901_v25 = vpop.permute.xlu1 %5900 }
0x2df9   :  { %v5906_v27 = vmul.f32 %v5901_v25, %v5896_v44 }
0x2dfa   :  { %v5903_v15 = vpop.permute.xlu0 %5902 }
0x2dfb   :  { %v5910_v31 = vadd.f32 %v5908_v59, %v5906_v27  ;;  %v5907_v8 = vmul.f32 %v5903_v15, %v5897_v12 }
0x2dfc   :  { %v3468_v7 = vpop.permute.xlu1 %3467 }
0x2dfd   :  { %v5985_v3 = vmul.f32 %v5978_v26, %v5910_v31  ;;  %v5911_v56 = vadd.f32 %v5909_v14, %v5907_v8  ;;  %3473 = vst.msk [vmem:[#allocation13] sm:$0x1] %vm529_vm8, %v3468_v7 }
0x2dfe   :  { %v3470_v48 = vpop.permute.xlu0 %3469 }
0x2dff   :  { %v5986_v63 = vmul.f32 %v5983_v11, %v5911_v56  ;;  %3474 = vst.msk [vmem:[#allocation13 + $0x8] sm:$0x1] %vm529_vm8, %v3470_v48  ;;  %6001 = vrot.lane.b32.xlu1 %v5985_v3, %s7183_s23  ;;  %v6033_v24 = vadd.f32 %v6031_v54, %v5985_v3 }
0x2e00   :  { %v5964_v16 = vpop.permute.xlu1 %5963 }
0x2e01   :  { %v5969_v30 = vmul.f32 %v5964_v16, %v5959_v5  ;;  %6003 = vrot.lane.b32.xlu0 %v5986_v63, %s7183_s23  ;;  %v6034_v42 = vadd.f32 %v6032_v39, %v5986_v63 }
0x2e02   :  { %v5966_v53 = vpop.permute.xlu0 %5965 }
0x2e03   :  { %v5973_v52 = vadd.f32 %v5971_v2, %v5969_v30  ;;  %v5970_v22 = vmul.f32 %v5966_v53, %v5960_v13  ;;  %6053 = vrot.lane.b32.xlu1 %v6033_v24, %s7183_s23 }
0x2e04   :  { %v3478_v38 = vpop.permute.xlu1 %3477 }
0x2e05   :  { %v5997_v40 = vmul.f32 %v5990_v45, %v5973_v52  ;;  %v5974_v33 = vadd.f32 %v5972_v60, %v5970_v22  ;;  %3483 = vst.msk [vmem:[#allocation13 + $0x7] sm:$0x1] %vm540_vm9, %v3478_v38  ;;  %6055 = vrot.lane.b32.xlu0 %v6034_v42, %s7183_s23 }
0x2e06   :  { %v3480_v49 = vpop.permute.xlu0 %3479 }
0x2e07   :  { %v5998_v23 = vmul.f32 %v5995_v58, %v5974_v33  ;;  %3484 = vst.msk [vmem:[#allocation13 + $0xf] sm:$0x1] %vm540_vm9, %v3480_v49  ;;  %6011 = vrot.lane.b32.xlu1 %v5997_v40, %s7186_s10  ;;  %v6049_v35 = vadd.f32 %v6047_v51, %v5997_v40 }
0x2e08   :  { %v3830_v46 = vpop.permute.xlu1 %3829 }
0x2e09   :  { %3835 = vst.msk [vmem:[#allocation13 + $0x1] sm:$0x1] %vm529_vm8, %v3830_v46  ;;  %6013 = vrot.lane.b32.xlu0 %v5998_v23, %s7186_s10  ;;  %v6050_v43 = vadd.f32 %v6048_v0, %v5998_v23 }
0x2e0a   :  { %v3832_v4 = vpop.permute.xlu0 %3831 }
0x2e0b   :  { %3836 = vst.msk [vmem:[#allocation13 + $0x9] sm:$0x1] %vm529_vm8, %v3832_v4  ;;  %6063 = vrot.lane.b32.xlu1 %v6049_v35, %s7186_s10 }
0x2e0c   :  { %v3840_v57 = vpop.permute.xlu1 %3839 }
0x2e0d   :  { %3845 = vst.msk [vmem:[#allocation13 + $0x6] sm:$0x1] %vm540_vm9, %v3840_v57  ;;  %6065 = vrot.lane.b32.xlu0 %v6050_v43, %s7186_s10 }
0x2e0e   :  { %v3842_v21 = vpop.permute.xlu0 %3841 }
0x2e0f   :  { %3846 = vst.msk [vmem:[#allocation13 + $0xe] sm:$0x1] %vm540_vm9, %v3842_v21 }
0x2e10   :  { %v4192_v37 = vpop.permute.xlu1 %4191 }
0x2e11   :  { %4197 = vst.msk [vmem:[#allocation13 + $0x2] sm:$0x1] %vm529_vm8, %v4192_v37 }
0x2e12   :  { %v4194_v55 = vpop.permute.xlu0 %4193 }
0x2e13   :  { %4198 = vst.msk [vmem:[#allocation13 + $0xa] sm:$0x1] %vm529_vm8, %v4194_v55 }
0x2e14   :  { %v4202_v61 = vpop.permute.xlu1 %4201 }
0x2e15   :  { %4207 = vst.msk [vmem:[#allocation13 + $0x5] sm:$0x1] %vm540_vm9, %v4202_v61 }
0x2e16   :  { %v4204_v9 = vpop.permute.xlu0 %4203 }
0x2e17   :  { %4208 = vst.msk [vmem:[#allocation13 + $0xd] sm:$0x1] %vm540_vm9, %v4204_v9 }
0x2e18   :  { %v4554_v1 = vpop.permute.xlu1 %4553 }
0x2e19   :  { %4559 = vst.msk [vmem:[#allocation13 + $0x3] sm:$0x1] %vm529_vm8, %v4554_v1 }
0x2e1a   :  { %v4556_v34 = vpop.permute.xlu0 %4555 }
0x2e1b   :  { %4560 = vst.msk [vmem:[#allocation13 + $0xb] sm:$0x1] %vm529_vm8, %v4556_v34 }
0x2e1c   :  { %v4564_v41 = vpop.permute.xlu1 %4563 }
0x2e1d   :  { %4569 = vst.msk [vmem:[#allocation13 + $0x4] sm:$0x1] %vm540_vm9, %v4564_v41 }
0x2e1e   :  { %v4566_v6 = vpop.permute.xlu0 %4565 }
0x2e1f   :  { %4570 = vst.msk [vmem:[#allocation13 + $0xc] sm:$0x1] %vm540_vm9, %v4566_v6 }
0x2e20   :  { %v4916_v32 = vpop.permute.xlu1 %4915 }
0x2e21   :  { %4921 = vst.msk [vmem:[#allocation13 + $0x4] sm:$0x1] %vm529_vm8, %v4916_v32 }
0x2e22   :  { %v4918_v29 = vpop.permute.xlu0 %4917 }
0x2e23   :  { %4922 = vst.msk [vmem:[#allocation13 + $0xc] sm:$0x1] %vm529_vm8, %v4918_v29 }
0x2e24   :  { %v4926_v62 = vpop.permute.xlu1 %4925 }
0x2e25   :  { %4931 = vst.msk [vmem:[#allocation13 + $0x3] sm:$0x1] %vm540_vm9, %v4926_v62 }
0x2e26   :  { %v4928_v18 = vpop.permute.xlu0 %4927 }
0x2e27   :  { %4932 = vst.msk [vmem:[#allocation13 + $0xb] sm:$0x1] %vm540_vm9, %v4928_v18 }
0x2e28   :  { %v5278_v10 = vpop.permute.xlu1 %5277 }
0x2e29   :  { %5283 = vst.msk [vmem:[#allocation13 + $0x5] sm:$0x1] %vm529_vm8, %v5278_v10 }
0x2e2a   :  { %v5280_v28 = vpop.permute.xlu0 %5279 }
0x2e2b   :  { %5284 = vst.msk [vmem:[#allocation13 + $0xd] sm:$0x1] %vm529_vm8, %v5280_v28 }
0x2e2c   :  { %v5288_v17 = vpop.permute.xlu1 %5287 }
0x2e2d   :  { %5293 = vst.msk [vmem:[#allocation13 + $0x2] sm:$0x1] %vm540_vm9, %v5288_v17 }
0x2e2e   :  { %v5290_v50 = vpop.permute.xlu0 %5289 }
0x2e2f   :  { %5294 = vst.msk [vmem:[#allocation13 + $0xa] sm:$0x1] %vm540_vm9, %v5290_v50 }
0x2e30   :  { %v5640_v26 = vpop.permute.xlu1 %5639 }
0x2e31   :  { %5645 = vst.msk [vmem:[#allocation13 + $0x6] sm:$0x1] %vm529_vm8, %v5640_v26 }
0x2e32   :  { %v5642_v11 = vpop.permute.xlu0 %5641 }
0x2e33   :  { %5646 = vst.msk [vmem:[#allocation13 + $0xe] sm:$0x1] %vm529_vm8, %v5642_v11 }
0x2e34   :  { %v5650_v47 = vpop.permute.xlu1 %5649 }
0x2e35   :  { %5655 = vst.msk [vmem:[#allocation13 + $0x1] sm:$0x1] %vm540_vm9, %v5650_v47 }
0x2e36   :  { %v5652_v19 = vpop.permute.xlu0 %5651 }
0x2e37   :  { %5656 = vst.msk [vmem:[#allocation13 + $0x9] sm:$0x1] %vm540_vm9, %v5652_v19 }
0x2e71   :  { %v6002_v45 = vpop.permute.xlu1 %6001 }
0x2e72   :  { %6007 = vst.msk [vmem:[#allocation13 + $0x7] sm:$0x1] %vm529_vm8, %v6002_v45 }
0x2e73   :  { %v6004_v58 = vpop.permute.xlu0 %6003 }
0x2e74   :  { %6008 = vst.msk [vmem:[#allocation13 + $0xf] sm:$0x1] %vm529_vm8, %v6004_v58 }
0x2e75   :  { %v6054_v36 = vpop.permute.xlu1 %6053 }
0x2e76   :  { %6059 = vst.msk [vmem:[%s8856_s15] sm:$0x1] %vm529_vm8, %v6054_v36 }
0x2e77   :  { %v6056_v20 = vpop.permute.xlu0 %6055 }
0x2e78   :  { %6060 = vst.msk [vmem:[%s8856_s15 + $0x1] sm:$0x1] %vm529_vm8, %v6056_v20 }
0x2e79   :  { %v6012_v44 = vpop.permute.xlu1 %6011 }
0x2e7a   :  { %6017 = vst.msk [vmem:[#allocation13] sm:$0x1] %vm540_vm9, %v6012_v44 }
0x2e7b   :  { %v6014_v25 = vpop.permute.xlu0 %6013 }
0x2e7c   :  { %6018 = vst.msk [vmem:[#allocation13 + $0x8] sm:$0x1] %vm540_vm9, %v6014_v25 }
0x2e7d   :  { %v6064_v59 = vpop.permute.xlu1 %6063 }
0x2e7e   :  { %7151 = shalt.err (!%p7148_p8)
}
0x2e7f   :  { %s8859_s3 = sld [smem:[#allocation18_spill]] }
0x2e85   :  { %s7152_s18 = scalar_lea.hbm %s8859_s3, 256 }
0x2e86   :  { %p7153_p9 = scmp.ne.s32.totalorder %s8859_s3, %s7152_s18  ;;  %p7156_p10 = scmp.lt.u32.totalorder %s7152_s18, %s8859_s3 }
0x2e88   :  { %p7158_p11 = pnand %p7156_p10, %p7153_p9 }
0x2e8a   :  { %7161 = shalt.err (!%p7158_p11)
}
0x2e8b   :  { %6082 = dma.vmem_to_hbm [thread:$0]  %s6077_s1, 256, %s8859_s3, [#allocation7], %s7171_s28, %s7171_s28, %s7172_s29   ;;  %v6066_v27 = vpop.permute.xlu0 %6065 }
0x2e8c   :  { %6069 = vst.msk [vmem:[%s8856_s15] sm:$0x1] %vm540_vm9, %v6064_v59  ;;  %6070 = vst.msk [vmem:[%s8856_s15 + $0x1] sm:$0x1] %vm540_vm9, %v6066_v27 }
0x2e8d   :  { %7168 = dma.done.wait [#allocation7], 256  }
0x2e8e   :  { %7169 = vsyncadd [#allocation7], 4294967040 }
0x2e8f   :  { %6090 = vsyncpa [#allocation6], 1 }
0x2e90   :  { %6091 = vsyncpa [#allocation9], 1 }
0x2e91   :  { %6092 = vsyncpa [#allocation12], 1 }
0x2e92   :  { %6093 = vsyncpa [#allocation7], 1 }

</bundles_post_ra>
